<compile_context>
chip_gen: v7x
topology: tpu7x:2x2x1
jax: 0.10.0
libtpu: 0.0.40
codegen_flags: <defaults>
</compile_context>

<pallas_src>
import math

import jax
import jax.numpy as jnp
from jax import lax
from jax.experimental import pallas as pl
from jax.experimental.pallas import tpu as pltpu

NUM_ROUND_KEYS = 11      # AES-128 key schedule -> 11 round keys
N_GROUPS = 16            # ArgMax16: 16 independent 256-way argmax groups
GROUP_SIZE = 256
FEATURES = 128
SBOX_DIM = N_GROUPS * GROUP_SIZE          # 4096
VMEM_LIMIT = 32 * 1024 * 1024
MAX_BATCH_TILE = 128                      # rows per grid step once B grows


# ---------------------------------------------------------------------------
# Fused whole-model kernel
# ---------------------------------------------------------------------------
def _aes_kernel(x_ref, oh_w, oh_b, sb_w, sb_b, sr_w, sr_b, xor_w, xor_b, *rest):
    """All 10 AES rounds for one batch tile; every weight is VMEM-resident."""
    *mix_refs, out_ref, oh_scratch = rest          # 12 mix refs, output, one-hot scratch
    n_mix = len(mix_refs) // 2
    f32 = jnp.float32
    bf16 = jnp.bfloat16
    bt = x_ref.shape[0]

    def dense(h, w, b, sig=False):
        # bf16 x bf16 MXU dot with f32 accumulation; bias (+sigmoid) in f32.
        y = jnp.dot(h.astype(bf16), w, preferred_element_type=f32) + b
        return jax.nn.sigmoid(y) if sig else y

    lane = lax.broadcasted_iota(jnp.int32, (bt, GROUP_SIZE), 1)
    lane_f = lane.astype(f32)

    def sub_bytes(h):
        # OneHot16 scores -> ArgMax16 strict one-hot per 256-group (first-index
        # tie-break, matching torch.argmax) -> folded SboxOneHot16 @ ReverseOneHot16.
        s = dense(h, oh_w[...], oh_b[...])                       # (bt, 4096) f32
        for g in range(N_GROUPS):
            lo = g * GROUP_SIZE
            sg = s[:, lo:lo + GROUP_SIZE]
            m = jnp.max(sg, axis=-1, keepdims=True)
            first = jnp.min(jnp.where(sg == m, lane_f, float(GROUP_SIZE)),
                            axis=-1, keepdims=True).astype(jnp.int32)
            oh_scratch[:, lo:lo + GROUP_SIZE] = (lane == first).astype(f32)
        return dense(oh_scratch[...], sb_w[...], sb_b[...])      # (bt, 128) f32

    # Round 0: AddRoundKey + Sigmoid.
    h = dense(x_ref[...].astype(f32), xor_w[0], xor_b[0], sig=True)

    # Rounds 1..9: SubBytes -> ShiftRows -> 6x MixColumns(+Sigmoid)
    #              -> AddRoundKey(+Sigmoid), round key selected dynamically.
    def mid_round(r, h):
        h = sub_bytes(h)
        h = dense(h, sr_w[...], sr_b[...])
        for li in range(n_mix):
            h = dense(h, mix_refs[2 * li][...], mix_refs[2 * li + 1][...], sig=True)
        return dense(h, xor_w[r], xor_b[r], sig=True)

    h = lax.fori_loop(1, NUM_ROUND_KEYS - 1, mid_round, h)

    # Final round: SubBytes -> ShiftRows -> AddRoundKey (no sigmoid).
    h = sub_bytes(h)
    h = dense(h, sr_w[...], sr_b[...])
    h = dense(h, xor_w[NUM_ROUND_KEYS - 1], xor_b[NUM_ROUND_KEYS - 1])
    out_ref[...] = h.astype(out_ref.dtype)


def _resident_spec(arr):
    """Full-array block whose index never changes -> DMA'd once, kept in VMEM."""
    zeros = (0,) * arr.ndim
    return pl.BlockSpec(arr.shape, lambda i: zeros)


def _batch_tiling(B):
    bp8 = max(8, ((B + 7) // 8) * 8)
    if bp8 <= MAX_BATCH_TILE:
        return bp8, bp8
    bt = MAX_BATCH_TILE
    return bt, ((B + bt - 1) // bt) * bt


# ---------------------------------------------------------------------------
# Forward pass (matches AES_O.forward)
# ---------------------------------------------------------------------------
def aes_o_forward(x, params):
    B = x.shape[0]
    bt, bp = _batch_tiling(B)
    grid = (bp // bt,)

    # x.reshape(-1,4,4,8).transpose(1,2).reshape(-1,128)
    h = x.reshape(B, 4, 4, 8).transpose(0, 2, 1, 3).reshape(B, FEATURES)
    h = jnp.pad(h, ((0, bp - B), (0, 0)))

    w_oh, b_oh = params["onehot"]
    w_sb, b_sb = params["sbox_rev"]
    w_sr, b_sr = params["shiftrows"]
    xor_w = jnp.stack([w for (w, _) in params["xor"]])     # (11,128,128) bf16
    xor_b = jnp.stack([b for (_, b) in params["xor"]])     # (11,  1,128) f32
    mix_flat = []
    for (w, b) in params["mix"]:
        mix_flat += [w, b]

    weights = [w_oh, b_oh, w_sb, b_sb, w_sr, b_sr, xor_w, xor_b] + mix_flat
    in_specs = ([pl.BlockSpec((bt, FEATURES), lambda i: (i, 0))]
                + [_resident_spec(a) for a in weights])

    out = pl.pallas_call(
        _aes_kernel,
        out_shape=jax.ShapeDtypeStruct((bp, FEATURES), jnp.float32),
        grid_spec=pltpu.PrefetchScalarGridSpec(
            num_scalar_prefetch=0,
            grid=grid,
            in_specs=in_specs,
            out_specs=pl.BlockSpec((bt, FEATURES), lambda i: (i, 0)),
            scratch_shapes=[pltpu.VMEM((bt, SBOX_DIM), jnp.float32)],
        ),
        compiler_params=pltpu.CompilerParams(
            dimension_semantics=("parallel",),        # batch tiles -> megacore on v7x
            vmem_limit_bytes=VMEM_LIMIT),
    )(h, *weights)

    out = out[:B]
    return out.reshape(B, 4, 4, 8).transpose(0, 2, 1, 3).reshape(B, FEATURES)


# ---------------------------------------------------------------------------
# Parameter construction (deterministic, synthetic)
# ---------------------------------------------------------------------------
def build_aes_o_params(key):
    """Deterministic synthetic parameters with the module's functional shapes.

    Weights are pre-transposed to [in, out] (y = x @ Wt + b == torch's x @ W.T + b)
    and stored bfloat16; biases are float32 (1, out).  SboxOneHot16 and
    ReverseOneHot16 are folded offline into a single (4096, 128) matrix — an exact
    composition of the two linear layers — so the 64 MiB Sbox matrix never enters
    the data path.
    """
    keys = jax.random.split(key, 21)
    it = iter(keys)
    f32 = jnp.float32

    def lin(in_dim, out_dim, dtype=jnp.bfloat16):
        k1, k2 = jax.random.split(next(it))
        bound = 1.0 / math.sqrt(in_dim)
        w = jax.random.uniform(k1, (out_dim, in_dim), f32, -bound, bound)
        b = jax.random.uniform(k2, (out_dim,), f32, -bound, bound)
        return w.T.astype(dtype), b.reshape(1, out_dim)

    # TODO(synk): the real module derives the AddRoundKey weights from the AES key
    # schedule (aeskeyschedule) and loads pretrained sbox/shiftrows/mixcolumns
    # weights from .pt files; deterministic random weights with identical
    # functional shapes are used here instead.
    onehot = lin(FEATURES, SBOX_DIM)                         # Sbox16.OneHot16
    sb_wt, sb_b = lin(SBOX_DIM, SBOX_DIM, dtype=f32)         # SboxOneHot16 (transient)
    rv_wt, rv_b = lin(SBOX_DIM, FEATURES, dtype=f32)         # ReverseOneHot16 (transient)
    hp = jax.lax.Precision.HIGHEST
    fused_wt = jnp.dot(sb_wt, rv_wt, precision=hp).astype(jnp.bfloat16)  # (4096,128)
    fused_b = jnp.dot(sb_b, rv_wt, precision=hp) + rv_b                  # (1,128) f32

    return {
        "onehot": onehot,
        "sbox_rev": (fused_wt, fused_b),                     # Sbox ∘ Reverse, folded
        "shiftrows": lin(FEATURES, FEATURES),
        "mix": [lin(a, b) for a, b in
                [(128, 384), (384, 384), (384, 512),
                 (512, 512), (512, 512), (512, 128)]],
        "xor": [lin(FEATURES, FEATURES) for _ in range(NUM_ROUND_KEYS)],
    }


# ---------------------------------------------------------------------------
# Pure-JAX reference (one-hot matmul form, mirrors the torch layer sequence)
# ---------------------------------------------------------------------------
def aes_o_reference(x, params):
    """Reference in the module's explicit one-hot matmul form.

    Uses the same (bf16) parameters and casts activations to the weight dtype
    before each dot, mirroring the kernel's MXU numerics so the discrete
    ArgMax16 decisions are comparable.
    """
    f32 = jnp.float32
    B = x.shape[0]

    def lin(h, layer, sig=False):
        wt, b = layer
        y = jnp.dot(h.astype(wt.dtype), wt, preferred_element_type=f32) + b
        return jax.nn.sigmoid(y) if sig else y

    def sub_bytes(h):
        s = lin(h, params["onehot"])                                   # OneHot16
        idx = jnp.argmax(s.reshape(B, N_GROUPS, GROUP_SIZE), axis=-1)  # ArgMax16
        oh = jax.nn.one_hot(idx, GROUP_SIZE, dtype=f32).reshape(B, SBOX_DIM)
        return lin(oh, params["sbox_rev"])      # folded Sbox∘Reverse, one-hot matmul

    h = x.reshape(B, 4, 4, 8).transpose(0, 2, 1, 3).reshape(B, FEATURES)
    h = lin(h, params["xor"][0], sig=True)
    for r in range(1, NUM_ROUND_KEYS - 1):
        h = sub_bytes(h)
        h = lin(h, params["shiftrows"])
        for m in params["mix"]:
            h = lin(h, m, sig=True)
        h = lin(h, params["xor"][r], sig=True)
    h = sub_bytes(h)
    h = lin(h, params["shiftrows"])
    h = lin(h, params["xor"][-1])
    return h.reshape(B, 4, 4, 8).transpose(0, 2, 1, 3).reshape(B, FEATURES)


if __name__ == "__main__":
    root = jax.random.PRNGKey(0)
    k_params, k_x = jax.random.split(root)

    params = build_aes_o_params(k_params)

    B = 2
    # AES_O consumes 128 "bit" features per sample.
    x = jax.random.bernoulli(k_x, 0.5, (B, FEATURES)).astype(jnp.float32)

    y = jax.jit(aes_o_forward)(x, params)
    jax.block_until_ready(y)

    assert y.shape == (B, FEATURES)
    assert bool(jnp.all(jnp.isfinite(y)))

    # Consistency check vs the explicit one-hot matmul reference.
    y_ref = jax.jit(aes_o_reference)(x, params)
    jax.block_until_ready(y_ref)
    err = float(jnp.max(jnp.abs(y - y_ref)))
    assert err < 3e-3, f"mismatch vs reference: max abs err {err}"

    print("KERNEL_OK")
</pallas_src>

<mosaic_0001>
module attributes {stable_mosaic.version = 11 : i64} {
  func.func @_aes_kernel(%arg0: i32, %arg1: memref<8x128xf32, #tpu.memory_space<vmem>>, %arg2: memref<128x4096xbf16, #tpu.memory_space<vmem>>, %arg3: memref<1x4096xf32, #tpu.memory_space<vmem>>, %arg4: memref<4096x128xbf16, #tpu.memory_space<vmem>>, %arg5: memref<1x128xf32, #tpu.memory_space<vmem>>, %arg6: memref<128x128xbf16, #tpu.memory_space<vmem>>, %arg7: memref<1x128xf32, #tpu.memory_space<vmem>>, %arg8: memref<11x128x128xbf16, #tpu.memory_space<vmem>>, %arg9: memref<11x1x128xf32, #tpu.memory_space<vmem>>, %arg10: memref<128x384xbf16, #tpu.memory_space<vmem>>, %arg11: memref<1x384xf32, #tpu.memory_space<vmem>>, %arg12: memref<384x384xbf16, #tpu.memory_space<vmem>>, %arg13: memref<1x384xf32, #tpu.memory_space<vmem>>, %arg14: memref<384x512xbf16, #tpu.memory_space<vmem>>, %arg15: memref<1x512xf32, #tpu.memory_space<vmem>>, %arg16: memref<512x512xbf16, #tpu.memory_space<vmem>>, %arg17: memref<1x512xf32, #tpu.memory_space<vmem>>, %arg18: memref<512x512xbf16, #tpu.memory_space<vmem>>, %arg19: memref<1x512xf32, #tpu.memory_space<vmem>>, %arg20: memref<512x128xbf16, #tpu.memory_space<vmem>>, %arg21: memref<1x128xf32, #tpu.memory_space<vmem>>, %arg22: memref<8x128xf32, #tpu.memory_space<vmem>>, %arg23: memref<8x4096xf32, #tpu.memory_space<vmem>>) attributes {dimension_semantics = [#tpu.dimension_semantics<parallel>], iteration_bounds = array<i64: 1>, scalar_prefetch = 0 : i64, scratch_operands = 1 : i64, tpu.core_type = #tpu.core_type<tc>, window_params = [{transform_indices = @transform_0, window_bounds = array<i64: 8, 128>}, {pipeline_mode = #tpu.pipeline_mode<synchronous>, transform_indices = @transform_1, window_bounds = array<i64: 128, 4096>}, {pipeline_mode = #tpu.pipeline_mode<synchronous>, transform_indices = @transform_2, window_bounds = array<i64: 1, 4096>}, {pipeline_mode = #tpu.pipeline_mode<synchronous>, transform_indices = @transform_3, window_bounds = array<i64: 4096, 128>}, {pipeline_mode = #tpu.pipeline_mode<synchronous>, transform_indices = @transform_4, window_bounds = array<i64: 1, 128>}, {pipeline_mode = #tpu.pipeline_mode<synchronous>, transform_indices = @transform_5, window_bounds = array<i64: 128, 128>}, {pipeline_mode = #tpu.pipeline_mode<synchronous>, transform_indices = @transform_6, window_bounds = array<i64: 1, 128>}, {pipeline_mode = #tpu.pipeline_mode<synchronous>, transform_indices = @transform_7, window_bounds = array<i64: 11, 128, 128>}, {pipeline_mode = #tpu.pipeline_mode<synchronous>, transform_indices = @transform_8, window_bounds = array<i64: 11, 1, 128>}, {pipeline_mode = #tpu.pipeline_mode<synchronous>, transform_indices = @transform_9, window_bounds = array<i64: 128, 384>}, {pipeline_mode = #tpu.pipeline_mode<synchronous>, transform_indices = @transform_10, window_bounds = array<i64: 1, 384>}, {pipeline_mode = #tpu.pipeline_mode<synchronous>, transform_indices = @transform_11, window_bounds = array<i64: 384, 384>}, {pipeline_mode = #tpu.pipeline_mode<synchronous>, transform_indices = @transform_12, window_bounds = array<i64: 1, 384>}, {pipeline_mode = #tpu.pipeline_mode<synchronous>, transform_indices = @transform_13, window_bounds = array<i64: 384, 512>}, {pipeline_mode = #tpu.pipeline_mode<synchronous>, transform_indices = @transform_14, window_bounds = array<i64: 1, 512>}, {pipeline_mode = #tpu.pipeline_mode<synchronous>, transform_indices = @transform_15, window_bounds = array<i64: 512, 512>}, {pipeline_mode = #tpu.pipeline_mode<synchronous>, transform_indices = @transform_16, window_bounds = array<i64: 1, 512>}, {pipeline_mode = #tpu.pipeline_mode<synchronous>, transform_indices = @transform_17, window_bounds = array<i64: 512, 512>}, {pipeline_mode = #tpu.pipeline_mode<synchronous>, transform_indices = @transform_18, window_bounds = array<i64: 1, 512>}, {pipeline_mode = #tpu.pipeline_mode<synchronous>, transform_indices = @transform_19, window_bounds = array<i64: 512, 128>}, {pipeline_mode = #tpu.pipeline_mode<synchronous>, transform_indices = @transform_20, window_bounds = array<i64: 1, 128>}, {transform_indices = @transform_21, window_bounds = array<i64: 8, 128>}]} {
    %0 = tpu.iota {dimensions = array<i32: 1>} : vector<8x256xi32>
    %1 = arith.sitofp %0 : vector<8x256xi32> to vector<8x256xf32>
    %c0 = arith.constant 0 : index
    %c0_0 = arith.constant 0 : index
    %2 = vector.load %arg1[%c0, %c0_0] : memref<8x128xf32, #tpu.memory_space<vmem>>, vector<8x128xf32>
    %c0_1 = arith.constant 0 : index
    %c0_2 = arith.constant 0 : index
    %c0_3 = arith.constant 0 : index
    %3 = vector.load %arg8[%c0_1, %c0_2, %c0_3] : memref<11x128x128xbf16, #tpu.memory_space<vmem>>, vector<1x128x128xbf16>
    %4 = vector.shape_cast %3 : vector<1x128x128xbf16> to vector<128x128xbf16>
    %c0_4 = arith.constant 0 : index
    %c0_5 = arith.constant 0 : index
    %c0_6 = arith.constant 0 : index
    %5 = vector.load %arg9[%c0_4, %c0_5, %c0_6] : memref<11x1x128xf32, #tpu.memory_space<vmem>>, vector<1x1x128xf32>
    %6 = vector.shape_cast %5 : vector<1x1x128xf32> to vector<1x128xf32>
    %7 = arith.truncf %2 : vector<8x128xf32> to vector<8x128xbf16>
    %cst = arith.constant dense<0.000000e+00> : vector<8x128xf32>
    %8 = tpu.matmul %7, %4, %cst {dimension_numbers = #tpu.dot_dimension_numbers<[1], [0], [0], [1], [0, 0, 1, 1], [], []>} : vector<8x128xbf16>, vector<128x128xbf16>, vector<8x128xf32> -> vector<8x128xf32>
    %9 = vector.broadcast %6 : vector<1x128xf32> to vector<8x128xf32>
    %10 = arith.addf %8, %9 : vector<8x128xf32>
    %11 = arith.negf %10 : vector<8x128xf32>
    %12 = math.exp %11 : vector<8x128xf32>
    %cst_7 = arith.constant 1.000000e+00 : f32
    %13 = vector.broadcast %cst_7 : f32 to vector<8x128xf32>
    %14 = arith.addf %13, %12 : vector<8x128xf32>
    %15 = arith.divf %13, %14 : vector<8x128xf32>
    %c1_i32 = arith.constant 1 : i32
    %c9_i32 = arith.constant 9 : i32
    %16 = arith.addi %c1_i32, %c9_i32 : i32
    %c1_i32_8 = arith.constant 1 : i32
    %17 = scf.for %arg24 = %c1_i32 to %16 step %c1_i32_8 iter_args(%arg25 = %15) -> (vector<8x128xf32>)  : i32 {
      %c0_100 = arith.constant 0 : index
      %c0_101 = arith.constant 0 : index
      %286 = vector.load %arg2[%c0_100, %c0_101] : memref<128x4096xbf16, #tpu.memory_space<vmem>>, vector<128x4096xbf16>
      %c0_102 = arith.constant 0 : index
      %c0_103 = arith.constant 0 : index
      %287 = vector.load %arg3[%c0_102, %c0_103] : memref<1x4096xf32, #tpu.memory_space<vmem>>, vector<1x4096xf32>
      %288 = arith.truncf %arg25 : vector<8x128xf32> to vector<8x128xbf16>
      %cst_104 = arith.constant dense<0.000000e+00> : vector<8x4096xf32>
      %289 = tpu.matmul %288, %286, %cst_104 {dimension_numbers = #tpu.dot_dimension_numbers<[1], [0], [0], [1], [0, 0, 1, 1], [], []>} : vector<8x128xbf16>, vector<128x4096xbf16>, vector<8x4096xf32> -> vector<8x4096xf32>
      %290 = vector.broadcast %287 : vector<1x4096xf32> to vector<8x4096xf32>
      %291 = arith.addf %289, %290 : vector<8x4096xf32>
      %292 = vector.extract_strided_slice %291 {offsets = [0, 0], sizes = [8, 256], strides = [1, 1]} : vector<8x4096xf32> to vector<8x256xf32>
      %cst_105 = arith.constant dense<0xFF800000> : vector<8xf32>
      %293 = vector.multi_reduction <maximumf>, %292, %cst_105 [1] : vector<8x256xf32> to vector<8xf32>
      %294 = vector.shape_cast %293 : vector<8xf32> to vector<8x1xf32>
      %295 = vector.broadcast %294 : vector<8x1xf32> to vector<8x256xf32>
      %296 = arith.cmpf oeq, %292, %295 : vector<8x256xf32>
      %cst_106 = arith.constant 2.560000e+02 : f32
      %297 = vector.broadcast %cst_106 : f32 to vector<8x256xf32>
      %298 = arith.select %296, %1, %297 : vector<8x256xi1>, vector<8x256xf32>
      %cst_107 = arith.constant dense<0x7F800000> : vector<8xf32>
      %299 = vector.multi_reduction <minimumf>, %298, %cst_107 [1] : vector<8x256xf32> to vector<8xf32>
      %300 = vector.shape_cast %299 : vector<8xf32> to vector<8x1xf32>
      %301 = arith.fptosi %300 : vector<8x1xf32> to vector<8x1xi32>
      %302 = vector.broadcast %301 : vector<8x1xi32> to vector<8x256xi32>
      %303 = arith.cmpi eq, %0, %302 : vector<8x256xi32>
      %304 = arith.extui %303 : vector<8x256xi1> to vector<8x256xi32>
      %305 = arith.sitofp %304 : vector<8x256xi32> to vector<8x256xf32>
      %c0_108 = arith.constant 0 : index
      %c0_109 = arith.constant 0 : index
      %306 = vector.load %arg23[%c0_108, %c0_109] : memref<8x4096xf32, #tpu.memory_space<vmem>>, vector<8x256xf32>
      tpu.vector_store %arg23[%c0_108, %c0_109], %305 {strides = array<i32>} : memref<8x4096xf32, #tpu.memory_space<vmem>>, vector<8x256xf32>,
      %307 = vector.extract_strided_slice %291 {offsets = [0, 256], sizes = [8, 256], strides = [1, 1]} : vector<8x4096xf32> to vector<8x256xf32>
      %cst_110 = arith.constant dense<0xFF800000> : vector<8xf32>
      %308 = vector.multi_reduction <maximumf>, %307, %cst_110 [1] : vector<8x256xf32> to vector<8xf32>
      %309 = vector.shape_cast %308 : vector<8xf32> to vector<8x1xf32>
      %310 = vector.broadcast %309 : vector<8x1xf32> to vector<8x256xf32>
      %311 = arith.cmpf oeq, %307, %310 : vector<8x256xf32>
      %cst_111 = arith.constant 2.560000e+02 : f32
      %312 = vector.broadcast %cst_111 : f32 to vector<8x256xf32>
      %313 = arith.select %311, %1, %312 : vector<8x256xi1>, vector<8x256xf32>
      %cst_112 = arith.constant dense<0x7F800000> : vector<8xf32>
      %314 = vector.multi_reduction <minimumf>, %313, %cst_112 [1] : vector<8x256xf32> to vector<8xf32>
      %315 = vector.shape_cast %314 : vector<8xf32> to vector<8x1xf32>
      %316 = arith.fptosi %315 : vector<8x1xf32> to vector<8x1xi32>
      %317 = vector.broadcast %316 : vector<8x1xi32> to vector<8x256xi32>
      %318 = arith.cmpi eq, %0, %317 : vector<8x256xi32>
      %319 = arith.extui %318 : vector<8x256xi1> to vector<8x256xi32>
      %320 = arith.sitofp %319 : vector<8x256xi32> to vector<8x256xf32>
      %c0_113 = arith.constant 0 : index
      %c256_114 = arith.constant 256 : index
      %321 = vector.load %arg23[%c0_113, %c256_114] : memref<8x4096xf32, #tpu.memory_space<vmem>>, vector<8x256xf32>
      tpu.vector_store %arg23[%c0_113, %c256_114], %320 {strides = array<i32>} : memref<8x4096xf32, #tpu.memory_space<vmem>>, vector<8x256xf32>,
      %322 = vector.extract_strided_slice %291 {offsets = [0, 512], sizes = [8, 256], strides = [1, 1]} : vector<8x4096xf32> to vector<8x256xf32>
      %cst_115 = arith.constant dense<0xFF800000> : vector<8xf32>
      %323 = vector.multi_reduction <maximumf>, %322, %cst_115 [1] : vector<8x256xf32> to vector<8xf32>
      %324 = vector.shape_cast %323 : vector<8xf32> to vector<8x1xf32>
      %325 = vector.broadcast %324 : vector<8x1xf32> to vector<8x256xf32>
      %326 = arith.cmpf oeq, %322, %325 : vector<8x256xf32>
      %cst_116 = arith.constant 2.560000e+02 : f32
      %327 = vector.broadcast %cst_116 : f32 to vector<8x256xf32>
      %328 = arith.select %326, %1, %327 : vector<8x256xi1>, vector<8x256xf32>
      %cst_117 = arith.constant dense<0x7F800000> : vector<8xf32>
      %329 = vector.multi_reduction <minimumf>, %328, %cst_117 [1] : vector<8x256xf32> to vector<8xf32>
      %330 = vector.shape_cast %329 : vector<8xf32> to vector<8x1xf32>
      %331 = arith.fptosi %330 : vector<8x1xf32> to vector<8x1xi32>
      %332 = vector.broadcast %331 : vector<8x1xi32> to vector<8x256xi32>
      %333 = arith.cmpi eq, %0, %332 : vector<8x256xi32>
      %334 = arith.extui %333 : vector<8x256xi1> to vector<8x256xi32>
      %335 = arith.sitofp %334 : vector<8x256xi32> to vector<8x256xf32>
      %c0_118 = arith.constant 0 : index
      %c512_119 = arith.constant 512 : index
      %336 = vector.load %arg23[%c0_118, %c512_119] : memref<8x4096xf32, #tpu.memory_space<vmem>>, vector<8x256xf32>
      tpu.vector_store %arg23[%c0_118, %c512_119], %335 {strides = array<i32>} : memref<8x4096xf32, #tpu.memory_space<vmem>>, vector<8x256xf32>,
      %337 = vector.extract_strided_slice %291 {offsets = [0, 768], sizes = [8, 256], strides = [1, 1]} : vector<8x4096xf32> to vector<8x256xf32>
      %cst_120 = arith.constant dense<0xFF800000> : vector<8xf32>
      %338 = vector.multi_reduction <maximumf>, %337, %cst_120 [1] : vector<8x256xf32> to vector<8xf32>
      %339 = vector.shape_cast %338 : vector<8xf32> to vector<8x1xf32>
      %340 = vector.broadcast %339 : vector<8x1xf32> to vector<8x256xf32>
      %341 = arith.cmpf oeq, %337, %340 : vector<8x256xf32>
      %cst_121 = arith.constant 2.560000e+02 : f32
      %342 = vector.broadcast %cst_121 : f32 to vector<8x256xf32>
      %343 = arith.select %341, %1, %342 : vector<8x256xi1>, vector<8x256xf32>
      %cst_122 = arith.constant dense<0x7F800000> : vector<8xf32>
      %344 = vector.multi_reduction <minimumf>, %343, %cst_122 [1] : vector<8x256xf32> to vector<8xf32>
      %345 = vector.shape_cast %344 : vector<8xf32> to vector<8x1xf32>
      %346 = arith.fptosi %345 : vector<8x1xf32> to vector<8x1xi32>
      %347 = vector.broadcast %346 : vector<8x1xi32> to vector<8x256xi32>
      %348 = arith.cmpi eq, %0, %347 : vector<8x256xi32>
      %349 = arith.extui %348 : vector<8x256xi1> to vector<8x256xi32>
      %350 = arith.sitofp %349 : vector<8x256xi32> to vector<8x256xf32>
      %c0_123 = arith.constant 0 : index
      %c768_124 = arith.constant 768 : index
      %351 = vector.load %arg23[%c0_123, %c768_124] : memref<8x4096xf32, #tpu.memory_space<vmem>>, vector<8x256xf32>
      tpu.vector_store %arg23[%c0_123, %c768_124], %350 {strides = array<i32>} : memref<8x4096xf32, #tpu.memory_space<vmem>>, vector<8x256xf32>,
      %352 = vector.extract_strided_slice %291 {offsets = [0, 1024], sizes = [8, 256], strides = [1, 1]} : vector<8x4096xf32> to vector<8x256xf32>
      %cst_125 = arith.constant dense<0xFF800000> : vector<8xf32>
      %353 = vector.multi_reduction <maximumf>, %352, %cst_125 [1] : vector<8x256xf32> to vector<8xf32>
      %354 = vector.shape_cast %353 : vector<8xf32> to vector<8x1xf32>
      %355 = vector.broadcast %354 : vector<8x1xf32> to vector<8x256xf32>
      %356 = arith.cmpf oeq, %352, %355 : vector<8x256xf32>
      %cst_126 = arith.constant 2.560000e+02 : f32
      %357 = vector.broadcast %cst_126 : f32 to vector<8x256xf32>
      %358 = arith.select %356, %1, %357 : vector<8x256xi1>, vector<8x256xf32>
      %cst_127 = arith.constant dense<0x7F800000> : vector<8xf32>
      %359 = vector.multi_reduction <minimumf>, %358, %cst_127 [1] : vector<8x256xf32> to vector<8xf32>
      %360 = vector.shape_cast %359 : vector<8xf32> to vector<8x1xf32>
      %361 = arith.fptosi %360 : vector<8x1xf32> to vector<8x1xi32>
      %362 = vector.broadcast %361 : vector<8x1xi32> to vector<8x256xi32>
      %363 = arith.cmpi eq, %0, %362 : vector<8x256xi32>
      %364 = arith.extui %363 : vector<8x256xi1> to vector<8x256xi32>
      %365 = arith.sitofp %364 : vector<8x256xi32> to vector<8x256xf32>
      %c0_128 = arith.constant 0 : index
      %c1024_129 = arith.constant 1024 : index
      %366 = vector.load %arg23[%c0_128, %c1024_129] : memref<8x4096xf32, #tpu.memory_space<vmem>>, vector<8x256xf32>
      tpu.vector_store %arg23[%c0_128, %c1024_129], %365 {strides = array<i32>} : memref<8x4096xf32, #tpu.memory_space<vmem>>, vector<8x256xf32>,
      %367 = vector.extract_strided_slice %291 {offsets = [0, 1280], sizes = [8, 256], strides = [1, 1]} : vector<8x4096xf32> to vector<8x256xf32>
      %cst_130 = arith.constant dense<0xFF800000> : vector<8xf32>
      %368 = vector.multi_reduction <maximumf>, %367, %cst_130 [1] : vector<8x256xf32> to vector<8xf32>
      %369 = vector.shape_cast %368 : vector<8xf32> to vector<8x1xf32>
      %370 = vector.broadcast %369 : vector<8x1xf32> to vector<8x256xf32>
      %371 = arith.cmpf oeq, %367, %370 : vector<8x256xf32>
      %cst_131 = arith.constant 2.560000e+02 : f32
      %372 = vector.broadcast %cst_131 : f32 to vector<8x256xf32>
      %373 = arith.select %371, %1, %372 : vector<8x256xi1>, vector<8x256xf32>
      %cst_132 = arith.constant dense<0x7F800000> : vector<8xf32>
      %374 = vector.multi_reduction <minimumf>, %373, %cst_132 [1] : vector<8x256xf32> to vector<8xf32>
      %375 = vector.shape_cast %374 : vector<8xf32> to vector<8x1xf32>
      %376 = arith.fptosi %375 : vector<8x1xf32> to vector<8x1xi32>
      %377 = vector.broadcast %376 : vector<8x1xi32> to vector<8x256xi32>
      %378 = arith.cmpi eq, %0, %377 : vector<8x256xi32>
      %379 = arith.extui %378 : vector<8x256xi1> to vector<8x256xi32>
      %380 = arith.sitofp %379 : vector<8x256xi32> to vector<8x256xf32>
      %c0_133 = arith.constant 0 : index
      %c1280_134 = arith.constant 1280 : index
      %381 = vector.load %arg23[%c0_133, %c1280_134] : memref<8x4096xf32, #tpu.memory_space<vmem>>, vector<8x256xf32>
      tpu.vector_store %arg23[%c0_133, %c1280_134], %380 {strides = array<i32>} : memref<8x4096xf32, #tpu.memory_space<vmem>>, vector<8x256xf32>,
      %382 = vector.extract_strided_slice %291 {offsets = [0, 1536], sizes = [8, 256], strides = [1, 1]} : vector<8x4096xf32> to vector<8x256xf32>
      %cst_135 = arith.constant dense<0xFF800000> : vector<8xf32>
      %383 = vector.multi_reduction <maximumf>, %382, %cst_135 [1] : vector<8x256xf32> to vector<8xf32>
      %384 = vector.shape_cast %383 : vector<8xf32> to vector<8x1xf32>
      %385 = vector.broadcast %384 : vector<8x1xf32> to vector<8x256xf32>
      %386 = arith.cmpf oeq, %382, %385 : vector<8x256xf32>
      %cst_136 = arith.constant 2.560000e+02 : f32
      %387 = vector.broadcast %cst_136 : f32 to vector<8x256xf32>
      %388 = arith.select %386, %1, %387 : vector<8x256xi1>, vector<8x256xf32>
      %cst_137 = arith.constant dense<0x7F800000> : vector<8xf32>
      %389 = vector.multi_reduction <minimumf>, %388, %cst_137 [1] : vector<8x256xf32> to vector<8xf32>
      %390 = vector.shape_cast %389 : vector<8xf32> to vector<8x1xf32>
      %391 = arith.fptosi %390 : vector<8x1xf32> to vector<8x1xi32>
      %392 = vector.broadcast %391 : vector<8x1xi32> to vector<8x256xi32>
      %393 = arith.cmpi eq, %0, %392 : vector<8x256xi32>
      %394 = arith.extui %393 : vector<8x256xi1> to vector<8x256xi32>
      %395 = arith.sitofp %394 : vector<8x256xi32> to vector<8x256xf32>
      %c0_138 = arith.constant 0 : index
      %c1536_139 = arith.constant 1536 : index
      %396 = vector.load %arg23[%c0_138, %c1536_139] : memref<8x4096xf32, #tpu.memory_space<vmem>>, vector<8x256xf32>
      tpu.vector_store %arg23[%c0_138, %c1536_139], %395 {strides = array<i32>} : memref<8x4096xf32, #tpu.memory_space<vmem>>, vector<8x256xf32>,
      %397 = vector.extract_strided_slice %291 {offsets = [0, 1792], sizes = [8, 256], strides = [1, 1]} : vector<8x4096xf32> to vector<8x256xf32>
      %cst_140 = arith.constant dense<0xFF800000> : vector<8xf32>
      %398 = vector.multi_reduction <maximumf>, %397, %cst_140 [1] : vector<8x256xf32> to vector<8xf32>
      %399 = vector.shape_cast %398 : vector<8xf32> to vector<8x1xf32>
      %400 = vector.broadcast %399 : vector<8x1xf32> to vector<8x256xf32>
      %401 = arith.cmpf oeq, %397, %400 : vector<8x256xf32>
      %cst_141 = arith.constant 2.560000e+02 : f32
      %402 = vector.broadcast %cst_141 : f32 to vector<8x256xf32>
      %403 = arith.select %401, %1, %402 : vector<8x256xi1>, vector<8x256xf32>
      %cst_142 = arith.constant dense<0x7F800000> : vector<8xf32>
      %404 = vector.multi_reduction <minimumf>, %403, %cst_142 [1] : vector<8x256xf32> to vector<8xf32>
      %405 = vector.shape_cast %404 : vector<8xf32> to vector<8x1xf32>
      %406 = arith.fptosi %405 : vector<8x1xf32> to vector<8x1xi32>
      %407 = vector.broadcast %406 : vector<8x1xi32> to vector<8x256xi32>
      %408 = arith.cmpi eq, %0, %407 : vector<8x256xi32>
      %409 = arith.extui %408 : vector<8x256xi1> to vector<8x256xi32>
      %410 = arith.sitofp %409 : vector<8x256xi32> to vector<8x256xf32>
      %c0_143 = arith.constant 0 : index
      %c1792_144 = arith.constant 1792 : index
      %411 = vector.load %arg23[%c0_143, %c1792_144] : memref<8x4096xf32, #tpu.memory_space<vmem>>, vector<8x256xf32>
      tpu.vector_store %arg23[%c0_143, %c1792_144], %410 {strides = array<i32>} : memref<8x4096xf32, #tpu.memory_space<vmem>>, vector<8x256xf32>,
      %412 = vector.extract_strided_slice %291 {offsets = [0, 2048], sizes = [8, 256], strides = [1, 1]} : vector<8x4096xf32> to vector<8x256xf32>
      %cst_145 = arith.constant dense<0xFF800000> : vector<8xf32>
      %413 = vector.multi_reduction <maximumf>, %412, %cst_145 [1] : vector<8x256xf32> to vector<8xf32>
      %414 = vector.shape_cast %413 : vector<8xf32> to vector<8x1xf32>
      %415 = vector.broadcast %414 : vector<8x1xf32> to vector<8x256xf32>
      %416 = arith.cmpf oeq, %412, %415 : vector<8x256xf32>
      %cst_146 = arith.constant 2.560000e+02 : f32
      %417 = vector.broadcast %cst_146 : f32 to vector<8x256xf32>
      %418 = arith.select %416, %1, %417 : vector<8x256xi1>, vector<8x256xf32>
      %cst_147 = arith.constant dense<0x7F800000> : vector<8xf32>
      %419 = vector.multi_reduction <minimumf>, %418, %cst_147 [1] : vector<8x256xf32> to vector<8xf32>
      %420 = vector.shape_cast %419 : vector<8xf32> to vector<8x1xf32>
      %421 = arith.fptosi %420 : vector<8x1xf32> to vector<8x1xi32>
      %422 = vector.broadcast %421 : vector<8x1xi32> to vector<8x256xi32>
      %423 = arith.cmpi eq, %0, %422 : vector<8x256xi32>
      %424 = arith.extui %423 : vector<8x256xi1> to vector<8x256xi32>
      %425 = arith.sitofp %424 : vector<8x256xi32> to vector<8x256xf32>
      %c0_148 = arith.constant 0 : index
      %c2048_149 = arith.constant 2048 : index
      %426 = vector.load %arg23[%c0_148, %c2048_149] : memref<8x4096xf32, #tpu.memory_space<vmem>>, vector<8x256xf32>
      tpu.vector_store %arg23[%c0_148, %c2048_149], %425 {strides = array<i32>} : memref<8x4096xf32, #tpu.memory_space<vmem>>, vector<8x256xf32>,
      %427 = vector.extract_strided_slice %291 {offsets = [0, 2304], sizes = [8, 256], strides = [1, 1]} : vector<8x4096xf32> to vector<8x256xf32>
      %cst_150 = arith.constant dense<0xFF800000> : vector<8xf32>
      %428 = vector.multi_reduction <maximumf>, %427, %cst_150 [1] : vector<8x256xf32> to vector<8xf32>
      %429 = vector.shape_cast %428 : vector<8xf32> to vector<8x1xf32>
      %430 = vector.broadcast %429 : vector<8x1xf32> to vector<8x256xf32>
      %431 = arith.cmpf oeq, %427, %430 : vector<8x256xf32>
      %cst_151 = arith.constant 2.560000e+02 : f32
      %432 = vector.broadcast %cst_151 : f32 to vector<8x256xf32>
      %433 = arith.select %431, %1, %432 : vector<8x256xi1>, vector<8x256xf32>
      %cst_152 = arith.constant dense<0x7F800000> : vector<8xf32>
      %434 = vector.multi_reduction <minimumf>, %433, %cst_152 [1] : vector<8x256xf32> to vector<8xf32>
      %435 = vector.shape_cast %434 : vector<8xf32> to vector<8x1xf32>
      %436 = arith.fptosi %435 : vector<8x1xf32> to vector<8x1xi32>
      %437 = vector.broadcast %436 : vector<8x1xi32> to vector<8x256xi32>
      %438 = arith.cmpi eq, %0, %437 : vector<8x256xi32>
      %439 = arith.extui %438 : vector<8x256xi1> to vector<8x256xi32>
      %440 = arith.sitofp %439 : vector<8x256xi32> to vector<8x256xf32>
      %c0_153 = arith.constant 0 : index
      %c2304_154 = arith.constant 2304 : index
      %441 = vector.load %arg23[%c0_153, %c2304_154] : memref<8x4096xf32, #tpu.memory_space<vmem>>, vector<8x256xf32>
      tpu.vector_store %arg23[%c0_153, %c2304_154], %440 {strides = array<i32>} : memref<8x4096xf32, #tpu.memory_space<vmem>>, vector<8x256xf32>,
      %442 = vector.extract_strided_slice %291 {offsets = [0, 2560], sizes = [8, 256], strides = [1, 1]} : vector<8x4096xf32> to vector<8x256xf32>
      %cst_155 = arith.constant dense<0xFF800000> : vector<8xf32>
      %443 = vector.multi_reduction <maximumf>, %442, %cst_155 [1] : vector<8x256xf32> to vector<8xf32>
      %444 = vector.shape_cast %443 : vector<8xf32> to vector<8x1xf32>
      %445 = vector.broadcast %444 : vector<8x1xf32> to vector<8x256xf32>
      %446 = arith.cmpf oeq, %442, %445 : vector<8x256xf32>
      %cst_156 = arith.constant 2.560000e+02 : f32
      %447 = vector.broadcast %cst_156 : f32 to vector<8x256xf32>
      %448 = arith.select %446, %1, %447 : vector<8x256xi1>, vector<8x256xf32>
      %cst_157 = arith.constant dense<0x7F800000> : vector<8xf32>
      %449 = vector.multi_reduction <minimumf>, %448, %cst_157 [1] : vector<8x256xf32> to vector<8xf32>
      %450 = vector.shape_cast %449 : vector<8xf32> to vector<8x1xf32>
      %451 = arith.fptosi %450 : vector<8x1xf32> to vector<8x1xi32>
      %452 = vector.broadcast %451 : vector<8x1xi32> to vector<8x256xi32>
      %453 = arith.cmpi eq, %0, %452 : vector<8x256xi32>
      %454 = arith.extui %453 : vector<8x256xi1> to vector<8x256xi32>
      %455 = arith.sitofp %454 : vector<8x256xi32> to vector<8x256xf32>
      %c0_158 = arith.constant 0 : index
      %c2560_159 = arith.constant 2560 : index
      %456 = vector.load %arg23[%c0_158, %c2560_159] : memref<8x4096xf32, #tpu.memory_space<vmem>>, vector<8x256xf32>
      tpu.vector_store %arg23[%c0_158, %c2560_159], %455 {strides = array<i32>} : memref<8x4096xf32, #tpu.memory_space<vmem>>, vector<8x256xf32>,
      %457 = vector.extract_strided_slice %291 {offsets = [0, 2816], sizes = [8, 256], strides = [1, 1]} : vector<8x4096xf32> to vector<8x256xf32>
      %cst_160 = arith.constant dense<0xFF800000> : vector<8xf32>
      %458 = vector.multi_reduction <maximumf>, %457, %cst_160 [1] : vector<8x256xf32> to vector<8xf32>
      %459 = vector.shape_cast %458 : vector<8xf32> to vector<8x1xf32>
      %460 = vector.broadcast %459 : vector<8x1xf32> to vector<8x256xf32>
      %461 = arith.cmpf oeq, %457, %460 : vector<8x256xf32>
      %cst_161 = arith.constant 2.560000e+02 : f32
      %462 = vector.broadcast %cst_161 : f32 to vector<8x256xf32>
      %463 = arith.select %461, %1, %462 : vector<8x256xi1>, vector<8x256xf32>
      %cst_162 = arith.constant dense<0x7F800000> : vector<8xf32>
      %464 = vector.multi_reduction <minimumf>, %463, %cst_162 [1] : vector<8x256xf32> to vector<8xf32>
      %465 = vector.shape_cast %464 : vector<8xf32> to vector<8x1xf32>
      %466 = arith.fptosi %465 : vector<8x1xf32> to vector<8x1xi32>
      %467 = vector.broadcast %466 : vector<8x1xi32> to vector<8x256xi32>
      %468 = arith.cmpi eq, %0, %467 : vector<8x256xi32>
      %469 = arith.extui %468 : vector<8x256xi1> to vector<8x256xi32>
      %470 = arith.sitofp %469 : vector<8x256xi32> to vector<8x256xf32>
      %c0_163 = arith.constant 0 : index
      %c2816_164 = arith.constant 2816 : index
      %471 = vector.load %arg23[%c0_163, %c2816_164] : memref<8x4096xf32, #tpu.memory_space<vmem>>, vector<8x256xf32>
      tpu.vector_store %arg23[%c0_163, %c2816_164], %470 {strides = array<i32>} : memref<8x4096xf32, #tpu.memory_space<vmem>>, vector<8x256xf32>,
      %472 = vector.extract_strided_slice %291 {offsets = [0, 3072], sizes = [8, 256], strides = [1, 1]} : vector<8x4096xf32> to vector<8x256xf32>
      %cst_165 = arith.constant dense<0xFF800000> : vector<8xf32>
      %473 = vector.multi_reduction <maximumf>, %472, %cst_165 [1] : vector<8x256xf32> to vector<8xf32>
      %474 = vector.shape_cast %473 : vector<8xf32> to vector<8x1xf32>
      %475 = vector.broadcast %474 : vector<8x1xf32> to vector<8x256xf32>
      %476 = arith.cmpf oeq, %472, %475 : vector<8x256xf32>
      %cst_166 = arith.constant 2.560000e+02 : f32
      %477 = vector.broadcast %cst_166 : f32 to vector<8x256xf32>
      %478 = arith.select %476, %1, %477 : vector<8x256xi1>, vector<8x256xf32>
      %cst_167 = arith.constant dense<0x7F800000> : vector<8xf32>
      %479 = vector.multi_reduction <minimumf>, %478, %cst_167 [1] : vector<8x256xf32> to vector<8xf32>
      %480 = vector.shape_cast %479 : vector<8xf32> to vector<8x1xf32>
      %481 = arith.fptosi %480 : vector<8x1xf32> to vector<8x1xi32>
      %482 = vector.broadcast %481 : vector<8x1xi32> to vector<8x256xi32>
      %483 = arith.cmpi eq, %0, %482 : vector<8x256xi32>
      %484 = arith.extui %483 : vector<8x256xi1> to vector<8x256xi32>
      %485 = arith.sitofp %484 : vector<8x256xi32> to vector<8x256xf32>
      %c0_168 = arith.constant 0 : index
      %c3072_169 = arith.constant 3072 : index
      %486 = vector.load %arg23[%c0_168, %c3072_169] : memref<8x4096xf32, #tpu.memory_space<vmem>>, vector<8x256xf32>
      tpu.vector_store %arg23[%c0_168, %c3072_169], %485 {strides = array<i32>} : memref<8x4096xf32, #tpu.memory_space<vmem>>, vector<8x256xf32>,
      %487 = vector.extract_strided_slice %291 {offsets = [0, 3328], sizes = [8, 256], strides = [1, 1]} : vector<8x4096xf32> to vector<8x256xf32>
      %cst_170 = arith.constant dense<0xFF800000> : vector<8xf32>
      %488 = vector.multi_reduction <maximumf>, %487, %cst_170 [1] : vector<8x256xf32> to vector<8xf32>
      %489 = vector.shape_cast %488 : vector<8xf32> to vector<8x1xf32>
      %490 = vector.broadcast %489 : vector<8x1xf32> to vector<8x256xf32>
      %491 = arith.cmpf oeq, %487, %490 : vector<8x256xf32>
      %cst_171 = arith.constant 2.560000e+02 : f32
      %492 = vector.broadcast %cst_171 : f32 to vector<8x256xf32>
      %493 = arith.select %491, %1, %492 : vector<8x256xi1>, vector<8x256xf32>
      %cst_172 = arith.constant dense<0x7F800000> : vector<8xf32>
      %494 = vector.multi_reduction <minimumf>, %493, %cst_172 [1] : vector<8x256xf32> to vector<8xf32>
      %495 = vector.shape_cast %494 : vector<8xf32> to vector<8x1xf32>
      %496 = arith.fptosi %495 : vector<8x1xf32> to vector<8x1xi32>
      %497 = vector.broadcast %496 : vector<8x1xi32> to vector<8x256xi32>
      %498 = arith.cmpi eq, %0, %497 : vector<8x256xi32>
      %499 = arith.extui %498 : vector<8x256xi1> to vector<8x256xi32>
      %500 = arith.sitofp %499 : vector<8x256xi32> to vector<8x256xf32>
      %c0_173 = arith.constant 0 : index
      %c3328_174 = arith.constant 3328 : index
      %501 = vector.load %arg23[%c0_173, %c3328_174] : memref<8x4096xf32, #tpu.memory_space<vmem>>, vector<8x256xf32>
      tpu.vector_store %arg23[%c0_173, %c3328_174], %500 {strides = array<i32>} : memref<8x4096xf32, #tpu.memory_space<vmem>>, vector<8x256xf32>,
      %502 = vector.extract_strided_slice %291 {offsets = [0, 3584], sizes = [8, 256], strides = [1, 1]} : vector<8x4096xf32> to vector<8x256xf32>
      %cst_175 = arith.constant dense<0xFF800000> : vector<8xf32>
      %503 = vector.multi_reduction <maximumf>, %502, %cst_175 [1] : vector<8x256xf32> to vector<8xf32>
      %504 = vector.shape_cast %503 : vector<8xf32> to vector<8x1xf32>
      %505 = vector.broadcast %504 : vector<8x1xf32> to vector<8x256xf32>
      %506 = arith.cmpf oeq, %502, %505 : vector<8x256xf32>
      %cst_176 = arith.constant 2.560000e+02 : f32
      %507 = vector.broadcast %cst_176 : f32 to vector<8x256xf32>
      %508 = arith.select %506, %1, %507 : vector<8x256xi1>, vector<8x256xf32>
      %cst_177 = arith.constant dense<0x7F800000> : vector<8xf32>
      %509 = vector.multi_reduction <minimumf>, %508, %cst_177 [1] : vector<8x256xf32> to vector<8xf32>
      %510 = vector.shape_cast %509 : vector<8xf32> to vector<8x1xf32>
      %511 = arith.fptosi %510 : vector<8x1xf32> to vector<8x1xi32>
      %512 = vector.broadcast %511 : vector<8x1xi32> to vector<8x256xi32>
      %513 = arith.cmpi eq, %0, %512 : vector<8x256xi32>
      %514 = arith.extui %513 : vector<8x256xi1> to vector<8x256xi32>
      %515 = arith.sitofp %514 : vector<8x256xi32> to vector<8x256xf32>
      %c0_178 = arith.constant 0 : index
      %c3584_179 = arith.constant 3584 : index
      %516 = vector.load %arg23[%c0_178, %c3584_179] : memref<8x4096xf32, #tpu.memory_space<vmem>>, vector<8x256xf32>
      tpu.vector_store %arg23[%c0_178, %c3584_179], %515 {strides = array<i32>} : memref<8x4096xf32, #tpu.memory_space<vmem>>, vector<8x256xf32>,
      %517 = vector.extract_strided_slice %291 {offsets = [0, 3840], sizes = [8, 256], strides = [1, 1]} : vector<8x4096xf32> to vector<8x256xf32>
      %cst_180 = arith.constant dense<0xFF800000> : vector<8xf32>
      %518 = vector.multi_reduction <maximumf>, %517, %cst_180 [1] : vector<8x256xf32> to vector<8xf32>
      %519 = vector.shape_cast %518 : vector<8xf32> to vector<8x1xf32>
      %520 = vector.broadcast %519 : vector<8x1xf32> to vector<8x256xf32>
      %521 = arith.cmpf oeq, %517, %520 : vector<8x256xf32>
      %cst_181 = arith.constant 2.560000e+02 : f32
      %522 = vector.broadcast %cst_181 : f32 to vector<8x256xf32>
      %523 = arith.select %521, %1, %522 : vector<8x256xi1>, vector<8x256xf32>
      %cst_182 = arith.constant dense<0x7F800000> : vector<8xf32>
      %524 = vector.multi_reduction <minimumf>, %523, %cst_182 [1] : vector<8x256xf32> to vector<8xf32>
      %525 = vector.shape_cast %524 : vector<8xf32> to vector<8x1xf32>
      %526 = arith.fptosi %525 : vector<8x1xf32> to vector<8x1xi32>
      %527 = vector.broadcast %526 : vector<8x1xi32> to vector<8x256xi32>
      %528 = arith.cmpi eq, %0, %527 : vector<8x256xi32>
      %529 = arith.extui %528 : vector<8x256xi1> to vector<8x256xi32>
      %530 = arith.sitofp %529 : vector<8x256xi32> to vector<8x256xf32>
      %c0_183 = arith.constant 0 : index
      %c3840_184 = arith.constant 3840 : index
      %531 = vector.load %arg23[%c0_183, %c3840_184] : memref<8x4096xf32, #tpu.memory_space<vmem>>, vector<8x256xf32>
      tpu.vector_store %arg23[%c0_183, %c3840_184], %530 {strides = array<i32>} : memref<8x4096xf32, #tpu.memory_space<vmem>>, vector<8x256xf32>,
      %c0_185 = arith.constant 0 : index
      %c0_186 = arith.constant 0 : index
      %532 = vector.load %arg23[%c0_185, %c0_186] : memref<8x4096xf32, #tpu.memory_space<vmem>>, vector<8x4096xf32>
      %c0_187 = arith.constant 0 : index
      %c0_188 = arith.constant 0 : index
      %533 = vector.load %arg4[%c0_187, %c0_188] : memref<4096x128xbf16, #tpu.memory_space<vmem>>, vector<4096x128xbf16>
      %c0_189 = arith.constant 0 : index
      %c0_190 = arith.constant 0 : index
      %534 = vector.load %arg5[%c0_189, %c0_190] : memref<1x128xf32, #tpu.memory_space<vmem>>, vector<1x128xf32>
      %535 = arith.truncf %532 : vector<8x4096xf32> to vector<8x4096xbf16>
      %cst_191 = arith.constant dense<0.000000e+00> : vector<8x128xf32>
      %536 = tpu.matmul %535, %533, %cst_191 {dimension_numbers = #tpu.dot_dimension_numbers<[1], [0], [0], [1], [0, 0, 1, 1], [], []>} : vector<8x4096xbf16>, vector<4096x128xbf16>, vector<8x128xf32> -> vector<8x128xf32>
      %537 = vector.broadcast %534 : vector<1x128xf32> to vector<8x128xf32>
      %538 = arith.addf %536, %537 : vector<8x128xf32>
      %c0_192 = arith.constant 0 : index
      %c0_193 = arith.constant 0 : index
      %539 = vector.load %arg6[%c0_192, %c0_193] : memref<128x128xbf16, #tpu.memory_space<vmem>>, vector<128x128xbf16>
      %c0_194 = arith.constant 0 : index
      %c0_195 = arith.constant 0 : index
      %540 = vector.load %arg7[%c0_194, %c0_195] : memref<1x128xf32, #tpu.memory_space<vmem>>, vector<1x128xf32>
      %541 = arith.truncf %538 : vector<8x128xf32> to vector<8x128xbf16>
      %cst_196 = arith.constant dense<0.000000e+00> : vector<8x128xf32>
      %542 = tpu.matmul %541, %539, %cst_196 {dimension_numbers = #tpu.dot_dimension_numbers<[1], [0], [0], [1], [0, 0, 1, 1], [], []>} : vector<8x128xbf16>, vector<128x128xbf16>, vector<8x128xf32> -> vector<8x128xf32>
      %543 = vector.broadcast %540 : vector<1x128xf32> to vector<8x128xf32>
      %544 = arith.addf %542, %543 : vector<8x128xf32>
      %c0_197 = arith.constant 0 : index
      %c0_198 = arith.constant 0 : index
      %545 = vector.load %arg10[%c0_197, %c0_198] : memref<128x384xbf16, #tpu.memory_space<vmem>>, vector<128x384xbf16>
      %c0_199 = arith.constant 0 : index
      %c0_200 = arith.constant 0 : index
      %546 = vector.load %arg11[%c0_199, %c0_200] : memref<1x384xf32, #tpu.memory_space<vmem>>, vector<1x384xf32>
      %547 = arith.truncf %544 : vector<8x128xf32> to vector<8x128xbf16>
      %cst_201 = arith.constant dense<0.000000e+00> : vector<8x384xf32>
      %548 = tpu.matmul %547, %545, %cst_201 {dimension_numbers = #tpu.dot_dimension_numbers<[1], [0], [0], [1], [0, 0, 1, 1], [], []>} : vector<8x128xbf16>, vector<128x384xbf16>, vector<8x384xf32> -> vector<8x384xf32>
      %549 = vector.broadcast %546 : vector<1x384xf32> to vector<8x384xf32>
      %550 = arith.addf %548, %549 : vector<8x384xf32>
      %551 = arith.negf %550 : vector<8x384xf32>
      %552 = math.exp %551 : vector<8x384xf32>
      %cst_202 = arith.constant 1.000000e+00 : f32
      %553 = vector.broadcast %cst_202 : f32 to vector<8x384xf32>
      %554 = arith.addf %553, %552 : vector<8x384xf32>
      %555 = arith.divf %553, %554 : vector<8x384xf32>
      %c0_203 = arith.constant 0 : index
      %c0_204 = arith.constant 0 : index
      %556 = vector.load %arg12[%c0_203, %c0_204] : memref<384x384xbf16, #tpu.memory_space<vmem>>, vector<384x384xbf16>
      %c0_205 = arith.constant 0 : index
      %c0_206 = arith.constant 0 : index
      %557 = vector.load %arg13[%c0_205, %c0_206] : memref<1x384xf32, #tpu.memory_space<vmem>>, vector<1x384xf32>
      %558 = arith.truncf %555 : vector<8x384xf32> to vector<8x384xbf16>
      %cst_207 = arith.constant dense<0.000000e+00> : vector<8x384xf32>
      %559 = tpu.matmul %558, %556, %cst_207 {dimension_numbers = #tpu.dot_dimension_numbers<[1], [0], [0], [1], [0, 0, 1, 1], [], []>} : vector<8x384xbf16>, vector<384x384xbf16>, vector<8x384xf32> -> vector<8x384xf32>
      %560 = vector.broadcast %557 : vector<1x384xf32> to vector<8x384xf32>
      %561 = arith.addf %559, %560 : vector<8x384xf32>
      %562 = arith.negf %561 : vector<8x384xf32>
      %563 = math.exp %562 : vector<8x384xf32>
      %cst_208 = arith.constant 1.000000e+00 : f32
      %564 = vector.broadcast %cst_208 : f32 to vector<8x384xf32>
      %565 = arith.addf %564, %563 : vector<8x384xf32>
      %566 = arith.divf %564, %565 : vector<8x384xf32>
      %c0_209 = arith.constant 0 : index
      %c0_210 = arith.constant 0 : index
      %567 = vector.load %arg14[%c0_209, %c0_210] : memref<384x512xbf16, #tpu.memory_space<vmem>>, vector<384x512xbf16>
      %c0_211 = arith.constant 0 : index
      %c0_212 = arith.constant 0 : index
      %568 = vector.load %arg15[%c0_211, %c0_212] : memref<1x512xf32, #tpu.memory_space<vmem>>, vector<1x512xf32>
      %569 = arith.truncf %566 : vector<8x384xf32> to vector<8x384xbf16>
      %cst_213 = arith.constant dense<0.000000e+00> : vector<8x512xf32>
      %570 = tpu.matmul %569, %567, %cst_213 {dimension_numbers = #tpu.dot_dimension_numbers<[1], [0], [0], [1], [0, 0, 1, 1], [], []>} : vector<8x384xbf16>, vector<384x512xbf16>, vector<8x512xf32> -> vector<8x512xf32>
      %571 = vector.broadcast %568 : vector<1x512xf32> to vector<8x512xf32>
      %572 = arith.addf %570, %571 : vector<8x512xf32>
      %573 = arith.negf %572 : vector<8x512xf32>
      %574 = math.exp %573 : vector<8x512xf32>
      %cst_214 = arith.constant 1.000000e+00 : f32
      %575 = vector.broadcast %cst_214 : f32 to vector<8x512xf32>
      %576 = arith.addf %575, %574 : vector<8x512xf32>
      %577 = arith.divf %575, %576 : vector<8x512xf32>
      %c0_215 = arith.constant 0 : index
      %c0_216 = arith.constant 0 : index
      %578 = vector.load %arg16[%c0_215, %c0_216] : memref<512x512xbf16, #tpu.memory_space<vmem>>, vector<512x512xbf16>
      %c0_217 = arith.constant 0 : index
      %c0_218 = arith.constant 0 : index
      %579 = vector.load %arg17[%c0_217, %c0_218] : memref<1x512xf32, #tpu.memory_space<vmem>>, vector<1x512xf32>
      %580 = arith.truncf %577 : vector<8x512xf32> to vector<8x512xbf16>
      %cst_219 = arith.constant dense<0.000000e+00> : vector<8x512xf32>
      %581 = tpu.matmul %580, %578, %cst_219 {dimension_numbers = #tpu.dot_dimension_numbers<[1], [0], [0], [1], [0, 0, 1, 1], [], []>} : vector<8x512xbf16>, vector<512x512xbf16>, vector<8x512xf32> -> vector<8x512xf32>
      %582 = vector.broadcast %579 : vector<1x512xf32> to vector<8x512xf32>
      %583 = arith.addf %581, %582 : vector<8x512xf32>
      %584 = arith.negf %583 : vector<8x512xf32>
      %585 = math.exp %584 : vector<8x512xf32>
      %cst_220 = arith.constant 1.000000e+00 : f32
      %586 = vector.broadcast %cst_220 : f32 to vector<8x512xf32>
      %587 = arith.addf %586, %585 : vector<8x512xf32>
      %588 = arith.divf %586, %587 : vector<8x512xf32>
      %c0_221 = arith.constant 0 : index
      %c0_222 = arith.constant 0 : index
      %589 = vector.load %arg18[%c0_221, %c0_222] : memref<512x512xbf16, #tpu.memory_space<vmem>>, vector<512x512xbf16>
      %c0_223 = arith.constant 0 : index
      %c0_224 = arith.constant 0 : index
      %590 = vector.load %arg19[%c0_223, %c0_224] : memref<1x512xf32, #tpu.memory_space<vmem>>, vector<1x512xf32>
      %591 = arith.truncf %588 : vector<8x512xf32> to vector<8x512xbf16>
      %cst_225 = arith.constant dense<0.000000e+00> : vector<8x512xf32>
      %592 = tpu.matmul %591, %589, %cst_225 {dimension_numbers = #tpu.dot_dimension_numbers<[1], [0], [0], [1], [0, 0, 1, 1], [], []>} : vector<8x512xbf16>, vector<512x512xbf16>, vector<8x512xf32> -> vector<8x512xf32>
      %593 = vector.broadcast %590 : vector<1x512xf32> to vector<8x512xf32>
      %594 = arith.addf %592, %593 : vector<8x512xf32>
      %595 = arith.negf %594 : vector<8x512xf32>
      %596 = math.exp %595 : vector<8x512xf32>
      %cst_226 = arith.constant 1.000000e+00 : f32
      %597 = vector.broadcast %cst_226 : f32 to vector<8x512xf32>
      %598 = arith.addf %597, %596 : vector<8x512xf32>
      %599 = arith.divf %597, %598 : vector<8x512xf32>
      %c0_227 = arith.constant 0 : index
      %c0_228 = arith.constant 0 : index
      %600 = vector.load %arg20[%c0_227, %c0_228] : memref<512x128xbf16, #tpu.memory_space<vmem>>, vector<512x128xbf16>
      %c0_229 = arith.constant 0 : index
      %c0_230 = arith.constant 0 : index
      %601 = vector.load %arg21[%c0_229, %c0_230] : memref<1x128xf32, #tpu.memory_space<vmem>>, vector<1x128xf32>
      %602 = arith.truncf %599 : vector<8x512xf32> to vector<8x512xbf16>
      %cst_231 = arith.constant dense<0.000000e+00> : vector<8x128xf32>
      %603 = tpu.matmul %602, %600, %cst_231 {dimension_numbers = #tpu.dot_dimension_numbers<[1], [0], [0], [1], [0, 0, 1, 1], [], []>} : vector<8x512xbf16>, vector<512x128xbf16>, vector<8x128xf32> -> vector<8x128xf32>
      %604 = vector.broadcast %601 : vector<1x128xf32> to vector<8x128xf32>
      %605 = arith.addf %603, %604 : vector<8x128xf32>
      %606 = arith.negf %605 : vector<8x128xf32>
      %607 = math.exp %606 : vector<8x128xf32>
      %cst_232 = arith.constant 1.000000e+00 : f32
      %608 = vector.broadcast %cst_232 : f32 to vector<8x128xf32>
      %609 = arith.addf %608, %607 : vector<8x128xf32>
      %610 = arith.divf %608, %609 : vector<8x128xf32>
      %611 = arith.index_cast %arg24 : i32 to index
      %c0_233 = arith.constant 0 : index
      %c0_234 = arith.constant 0 : index
      %612 = vector.load %arg8[%611, %c0_233, %c0_234] : memref<11x128x128xbf16, #tpu.memory_space<vmem>>, vector<1x128x128xbf16>
      %613 = vector.shape_cast %612 : vector<1x128x128xbf16> to vector<128x128xbf16>
      %614 = arith.index_cast %arg24 : i32 to index
      %c0_235 = arith.constant 0 : index
      %c0_236 = arith.constant 0 : index
      %615 = vector.load %arg9[%614, %c0_235, %c0_236] : memref<11x1x128xf32, #tpu.memory_space<vmem>>, vector<1x1x128xf32>
      %616 = vector.shape_cast %615 : vector<1x1x128xf32> to vector<1x128xf32>
      %617 = arith.truncf %610 : vector<8x128xf32> to vector<8x128xbf16>
      %cst_237 = arith.constant dense<0.000000e+00> : vector<8x128xf32>
      %618 = tpu.matmul %617, %613, %cst_237 {dimension_numbers = #tpu.dot_dimension_numbers<[1], [0], [0], [1], [0, 0, 1, 1], [], []>} : vector<8x128xbf16>, vector<128x128xbf16>, vector<8x128xf32> -> vector<8x128xf32>
      %619 = vector.broadcast %616 : vector<1x128xf32> to vector<8x128xf32>
      %620 = arith.addf %618, %619 : vector<8x128xf32>
      %621 = arith.negf %620 : vector<8x128xf32>
      %622 = math.exp %621 : vector<8x128xf32>
      %cst_238 = arith.constant 1.000000e+00 : f32
      %623 = vector.broadcast %cst_238 : f32 to vector<8x128xf32>
      %624 = arith.addf %623, %622 : vector<8x128xf32>
      %625 = arith.divf %623, %624 : vector<8x128xf32>
      scf.yield %625 : vector<8x128xf32>
    }
    %c9_i32_9 = arith.constant 9 : i32
    %c0_10 = arith.constant 0 : index
    %c0_11 = arith.constant 0 : index
    %18 = vector.load %arg2[%c0_10, %c0_11] : memref<128x4096xbf16, #tpu.memory_space<vmem>>, vector<128x4096xbf16>
    %c0_12 = arith.constant 0 : index
    %c0_13 = arith.constant 0 : index
    %19 = vector.load %arg3[%c0_12, %c0_13] : memref<1x4096xf32, #tpu.memory_space<vmem>>, vector<1x4096xf32>
    %20 = arith.truncf %17 : vector<8x128xf32> to vector<8x128xbf16>
    %cst_14 = arith.constant dense<0.000000e+00> : vector<8x4096xf32>
    %21 = tpu.matmul %20, %18, %cst_14 {dimension_numbers = #tpu.dot_dimension_numbers<[1], [0], [0], [1], [0, 0, 1, 1], [], []>} : vector<8x128xbf16>, vector<128x4096xbf16>, vector<8x4096xf32> -> vector<8x4096xf32>
    %22 = vector.broadcast %19 : vector<1x4096xf32> to vector<8x4096xf32>
    %23 = arith.addf %21, %22 : vector<8x4096xf32>
    %24 = vector.extract_strided_slice %23 {offsets = [0, 0], sizes = [8, 256], strides = [1, 1]} : vector<8x4096xf32> to vector<8x256xf32>
    %cst_15 = arith.constant dense<0xFF800000> : vector<8xf32>
    %25 = vector.multi_reduction <maximumf>, %24, %cst_15 [1] : vector<8x256xf32> to vector<8xf32>
    %26 = vector.shape_cast %25 : vector<8xf32> to vector<8x1xf32>
    %27 = vector.broadcast %26 : vector<8x1xf32> to vector<8x256xf32>
    %28 = arith.cmpf oeq, %24, %27 : vector<8x256xf32>
    %cst_16 = arith.constant 2.560000e+02 : f32
    %29 = vector.broadcast %cst_16 : f32 to vector<8x256xf32>
    %30 = arith.select %28, %1, %29 : vector<8x256xi1>, vector<8x256xf32>
    %cst_17 = arith.constant dense<0x7F800000> : vector<8xf32>
    %31 = vector.multi_reduction <minimumf>, %30, %cst_17 [1] : vector<8x256xf32> to vector<8xf32>
    %32 = vector.shape_cast %31 : vector<8xf32> to vector<8x1xf32>
    %33 = arith.fptosi %32 : vector<8x1xf32> to vector<8x1xi32>
    %34 = vector.broadcast %33 : vector<8x1xi32> to vector<8x256xi32>
    %35 = arith.cmpi eq, %0, %34 : vector<8x256xi32>
    %36 = arith.extui %35 : vector<8x256xi1> to vector<8x256xi32>
    %37 = arith.sitofp %36 : vector<8x256xi32> to vector<8x256xf32>
    %c0_18 = arith.constant 0 : index
    %c0_19 = arith.constant 0 : index
    %38 = vector.load %arg23[%c0_18, %c0_19] : memref<8x4096xf32, #tpu.memory_space<vmem>>, vector<8x256xf32>
    tpu.vector_store %arg23[%c0_18, %c0_19], %37 {strides = array<i32>} : memref<8x4096xf32, #tpu.memory_space<vmem>>, vector<8x256xf32>,
    %39 = vector.extract_strided_slice %23 {offsets = [0, 256], sizes = [8, 256], strides = [1, 1]} : vector<8x4096xf32> to vector<8x256xf32>
    %cst_20 = arith.constant dense<0xFF800000> : vector<8xf32>
    %40 = vector.multi_reduction <maximumf>, %39, %cst_20 [1] : vector<8x256xf32> to vector<8xf32>
    %41 = vector.shape_cast %40 : vector<8xf32> to vector<8x1xf32>
    %42 = vector.broadcast %41 : vector<8x1xf32> to vector<8x256xf32>
    %43 = arith.cmpf oeq, %39, %42 : vector<8x256xf32>
    %cst_21 = arith.constant 2.560000e+02 : f32
    %44 = vector.broadcast %cst_21 : f32 to vector<8x256xf32>
    %45 = arith.select %43, %1, %44 : vector<8x256xi1>, vector<8x256xf32>
    %cst_22 = arith.constant dense<0x7F800000> : vector<8xf32>
    %46 = vector.multi_reduction <minimumf>, %45, %cst_22 [1] : vector<8x256xf32> to vector<8xf32>
    %47 = vector.shape_cast %46 : vector<8xf32> to vector<8x1xf32>
    %48 = arith.fptosi %47 : vector<8x1xf32> to vector<8x1xi32>
    %49 = vector.broadcast %48 : vector<8x1xi32> to vector<8x256xi32>
    %50 = arith.cmpi eq, %0, %49 : vector<8x256xi32>
    %51 = arith.extui %50 : vector<8x256xi1> to vector<8x256xi32>
    %52 = arith.sitofp %51 : vector<8x256xi32> to vector<8x256xf32>
    %c0_23 = arith.constant 0 : index
    %c256 = arith.constant 256 : index
    %53 = vector.load %arg23[%c0_23, %c256] : memref<8x4096xf32, #tpu.memory_space<vmem>>, vector<8x256xf32>
    tpu.vector_store %arg23[%c0_23, %c256], %52 {strides = array<i32>} : memref<8x4096xf32, #tpu.memory_space<vmem>>, vector<8x256xf32>,
    %54 = vector.extract_strided_slice %23 {offsets = [0, 512], sizes = [8, 256], strides = [1, 1]} : vector<8x4096xf32> to vector<8x256xf32>
    %cst_24 = arith.constant dense<0xFF800000> : vector<8xf32>
    %55 = vector.multi_reduction <maximumf>, %54, %cst_24 [1] : vector<8x256xf32> to vector<8xf32>
    %56 = vector.shape_cast %55 : vector<8xf32> to vector<8x1xf32>
    %57 = vector.broadcast %56 : vector<8x1xf32> to vector<8x256xf32>
    %58 = arith.cmpf oeq, %54, %57 : vector<8x256xf32>
    %cst_25 = arith.constant 2.560000e+02 : f32
    %59 = vector.broadcast %cst_25 : f32 to vector<8x256xf32>
    %60 = arith.select %58, %1, %59 : vector<8x256xi1>, vector<8x256xf32>
    %cst_26 = arith.constant dense<0x7F800000> : vector<8xf32>
    %61 = vector.multi_reduction <minimumf>, %60, %cst_26 [1] : vector<8x256xf32> to vector<8xf32>
    %62 = vector.shape_cast %61 : vector<8xf32> to vector<8x1xf32>
    %63 = arith.fptosi %62 : vector<8x1xf32> to vector<8x1xi32>
    %64 = vector.broadcast %63 : vector<8x1xi32> to vector<8x256xi32>
    %65 = arith.cmpi eq, %0, %64 : vector<8x256xi32>
    %66 = arith.extui %65 : vector<8x256xi1> to vector<8x256xi32>
    %67 = arith.sitofp %66 : vector<8x256xi32> to vector<8x256xf32>
    %c0_27 = arith.constant 0 : index
    %c512 = arith.constant 512 : index
    %68 = vector.load %arg23[%c0_27, %c512] : memref<8x4096xf32, #tpu.memory_space<vmem>>, vector<8x256xf32>
    tpu.vector_store %arg23[%c0_27, %c512], %67 {strides = array<i32>} : memref<8x4096xf32, #tpu.memory_space<vmem>>, vector<8x256xf32>,
    %69 = vector.extract_strided_slice %23 {offsets = [0, 768], sizes = [8, 256], strides = [1, 1]} : vector<8x4096xf32> to vector<8x256xf32>
    %cst_28 = arith.constant dense<0xFF800000> : vector<8xf32>
    %70 = vector.multi_reduction <maximumf>, %69, %cst_28 [1] : vector<8x256xf32> to vector<8xf32>
    %71 = vector.shape_cast %70 : vector<8xf32> to vector<8x1xf32>
    %72 = vector.broadcast %71 : vector<8x1xf32> to vector<8x256xf32>
    %73 = arith.cmpf oeq, %69, %72 : vector<8x256xf32>
    %cst_29 = arith.constant 2.560000e+02 : f32
    %74 = vector.broadcast %cst_29 : f32 to vector<8x256xf32>
    %75 = arith.select %73, %1, %74 : vector<8x256xi1>, vector<8x256xf32>
    %cst_30 = arith.constant dense<0x7F800000> : vector<8xf32>
    %76 = vector.multi_reduction <minimumf>, %75, %cst_30 [1] : vector<8x256xf32> to vector<8xf32>
    %77 = vector.shape_cast %76 : vector<8xf32> to vector<8x1xf32>
    %78 = arith.fptosi %77 : vector<8x1xf32> to vector<8x1xi32>
    %79 = vector.broadcast %78 : vector<8x1xi32> to vector<8x256xi32>
    %80 = arith.cmpi eq, %0, %79 : vector<8x256xi32>
    %81 = arith.extui %80 : vector<8x256xi1> to vector<8x256xi32>
    %82 = arith.sitofp %81 : vector<8x256xi32> to vector<8x256xf32>
    %c0_31 = arith.constant 0 : index
    %c768 = arith.constant 768 : index
    %83 = vector.load %arg23[%c0_31, %c768] : memref<8x4096xf32, #tpu.memory_space<vmem>>, vector<8x256xf32>
    tpu.vector_store %arg23[%c0_31, %c768], %82 {strides = array<i32>} : memref<8x4096xf32, #tpu.memory_space<vmem>>, vector<8x256xf32>,
    %84 = vector.extract_strided_slice %23 {offsets = [0, 1024], sizes = [8, 256], strides = [1, 1]} : vector<8x4096xf32> to vector<8x256xf32>
    %cst_32 = arith.constant dense<0xFF800000> : vector<8xf32>
    %85 = vector.multi_reduction <maximumf>, %84, %cst_32 [1] : vector<8x256xf32> to vector<8xf32>
    %86 = vector.shape_cast %85 : vector<8xf32> to vector<8x1xf32>
    %87 = vector.broadcast %86 : vector<8x1xf32> to vector<8x256xf32>
    %88 = arith.cmpf oeq, %84, %87 : vector<8x256xf32>
    %cst_33 = arith.constant 2.560000e+02 : f32
    %89 = vector.broadcast %cst_33 : f32 to vector<8x256xf32>
    %90 = arith.select %88, %1, %89 : vector<8x256xi1>, vector<8x256xf32>
    %cst_34 = arith.constant dense<0x7F800000> : vector<8xf32>
    %91 = vector.multi_reduction <minimumf>, %90, %cst_34 [1] : vector<8x256xf32> to vector<8xf32>
    %92 = vector.shape_cast %91 : vector<8xf32> to vector<8x1xf32>
    %93 = arith.fptosi %92 : vector<8x1xf32> to vector<8x1xi32>
    %94 = vector.broadcast %93 : vector<8x1xi32> to vector<8x256xi32>
    %95 = arith.cmpi eq, %0, %94 : vector<8x256xi32>
    %96 = arith.extui %95 : vector<8x256xi1> to vector<8x256xi32>
    %97 = arith.sitofp %96 : vector<8x256xi32> to vector<8x256xf32>
    %c0_35 = arith.constant 0 : index
    %c1024 = arith.constant 1024 : index
    %98 = vector.load %arg23[%c0_35, %c1024] : memref<8x4096xf32, #tpu.memory_space<vmem>>, vector<8x256xf32>
    tpu.vector_store %arg23[%c0_35, %c1024], %97 {strides = array<i32>} : memref<8x4096xf32, #tpu.memory_space<vmem>>, vector<8x256xf32>,
    %99 = vector.extract_strided_slice %23 {offsets = [0, 1280], sizes = [8, 256], strides = [1, 1]} : vector<8x4096xf32> to vector<8x256xf32>
    %cst_36 = arith.constant dense<0xFF800000> : vector<8xf32>
    %100 = vector.multi_reduction <maximumf>, %99, %cst_36 [1] : vector<8x256xf32> to vector<8xf32>
    %101 = vector.shape_cast %100 : vector<8xf32> to vector<8x1xf32>
    %102 = vector.broadcast %101 : vector<8x1xf32> to vector<8x256xf32>
    %103 = arith.cmpf oeq, %99, %102 : vector<8x256xf32>
    %cst_37 = arith.constant 2.560000e+02 : f32
    %104 = vector.broadcast %cst_37 : f32 to vector<8x256xf32>
    %105 = arith.select %103, %1, %104 : vector<8x256xi1>, vector<8x256xf32>
    %cst_38 = arith.constant dense<0x7F800000> : vector<8xf32>
    %106 = vector.multi_reduction <minimumf>, %105, %cst_38 [1] : vector<8x256xf32> to vector<8xf32>
    %107 = vector.shape_cast %106 : vector<8xf32> to vector<8x1xf32>
    %108 = arith.fptosi %107 : vector<8x1xf32> to vector<8x1xi32>
    %109 = vector.broadcast %108 : vector<8x1xi32> to vector<8x256xi32>
    %110 = arith.cmpi eq, %0, %109 : vector<8x256xi32>
    %111 = arith.extui %110 : vector<8x256xi1> to vector<8x256xi32>
    %112 = arith.sitofp %111 : vector<8x256xi32> to vector<8x256xf32>
    %c0_39 = arith.constant 0 : index
    %c1280 = arith.constant 1280 : index
    %113 = vector.load %arg23[%c0_39, %c1280] : memref<8x4096xf32, #tpu.memory_space<vmem>>, vector<8x256xf32>
    tpu.vector_store %arg23[%c0_39, %c1280], %112 {strides = array<i32>} : memref<8x4096xf32, #tpu.memory_space<vmem>>, vector<8x256xf32>,
    %114 = vector.extract_strided_slice %23 {offsets = [0, 1536], sizes = [8, 256], strides = [1, 1]} : vector<8x4096xf32> to vector<8x256xf32>
    %cst_40 = arith.constant dense<0xFF800000> : vector<8xf32>
    %115 = vector.multi_reduction <maximumf>, %114, %cst_40 [1] : vector<8x256xf32> to vector<8xf32>
    %116 = vector.shape_cast %115 : vector<8xf32> to vector<8x1xf32>
    %117 = vector.broadcast %116 : vector<8x1xf32> to vector<8x256xf32>
    %118 = arith.cmpf oeq, %114, %117 : vector<8x256xf32>
    %cst_41 = arith.constant 2.560000e+02 : f32
    %119 = vector.broadcast %cst_41 : f32 to vector<8x256xf32>
    %120 = arith.select %118, %1, %119 : vector<8x256xi1>, vector<8x256xf32>
    %cst_42 = arith.constant dense<0x7F800000> : vector<8xf32>
    %121 = vector.multi_reduction <minimumf>, %120, %cst_42 [1] : vector<8x256xf32> to vector<8xf32>
    %122 = vector.shape_cast %121 : vector<8xf32> to vector<8x1xf32>
    %123 = arith.fptosi %122 : vector<8x1xf32> to vector<8x1xi32>
    %124 = vector.broadcast %123 : vector<8x1xi32> to vector<8x256xi32>
    %125 = arith.cmpi eq, %0, %124 : vector<8x256xi32>
    %126 = arith.extui %125 : vector<8x256xi1> to vector<8x256xi32>
    %127 = arith.sitofp %126 : vector<8x256xi32> to vector<8x256xf32>
    %c0_43 = arith.constant 0 : index
    %c1536 = arith.constant 1536 : index
    %128 = vector.load %arg23[%c0_43, %c1536] : memref<8x4096xf32, #tpu.memory_space<vmem>>, vector<8x256xf32>
    tpu.vector_store %arg23[%c0_43, %c1536], %127 {strides = array<i32>} : memref<8x4096xf32, #tpu.memory_space<vmem>>, vector<8x256xf32>,
    %129 = vector.extract_strided_slice %23 {offsets = [0, 1792], sizes = [8, 256], strides = [1, 1]} : vector<8x4096xf32> to vector<8x256xf32>
    %cst_44 = arith.constant dense<0xFF800000> : vector<8xf32>
    %130 = vector.multi_reduction <maximumf>, %129, %cst_44 [1] : vector<8x256xf32> to vector<8xf32>
    %131 = vector.shape_cast %130 : vector<8xf32> to vector<8x1xf32>
    %132 = vector.broadcast %131 : vector<8x1xf32> to vector<8x256xf32>
    %133 = arith.cmpf oeq, %129, %132 : vector<8x256xf32>
    %cst_45 = arith.constant 2.560000e+02 : f32
    %134 = vector.broadcast %cst_45 : f32 to vector<8x256xf32>
    %135 = arith.select %133, %1, %134 : vector<8x256xi1>, vector<8x256xf32>
    %cst_46 = arith.constant dense<0x7F800000> : vector<8xf32>
    %136 = vector.multi_reduction <minimumf>, %135, %cst_46 [1] : vector<8x256xf32> to vector<8xf32>
    %137 = vector.shape_cast %136 : vector<8xf32> to vector<8x1xf32>
    %138 = arith.fptosi %137 : vector<8x1xf32> to vector<8x1xi32>
    %139 = vector.broadcast %138 : vector<8x1xi32> to vector<8x256xi32>
    %140 = arith.cmpi eq, %0, %139 : vector<8x256xi32>
    %141 = arith.extui %140 : vector<8x256xi1> to vector<8x256xi32>
    %142 = arith.sitofp %141 : vector<8x256xi32> to vector<8x256xf32>
    %c0_47 = arith.constant 0 : index
    %c1792 = arith.constant 1792 : index
    %143 = vector.load %arg23[%c0_47, %c1792] : memref<8x4096xf32, #tpu.memory_space<vmem>>, vector<8x256xf32>
    tpu.vector_store %arg23[%c0_47, %c1792], %142 {strides = array<i32>} : memref<8x4096xf32, #tpu.memory_space<vmem>>, vector<8x256xf32>,
    %144 = vector.extract_strided_slice %23 {offsets = [0, 2048], sizes = [8, 256], strides = [1, 1]} : vector<8x4096xf32> to vector<8x256xf32>
    %cst_48 = arith.constant dense<0xFF800000> : vector<8xf32>
    %145 = vector.multi_reduction <maximumf>, %144, %cst_48 [1] : vector<8x256xf32> to vector<8xf32>
    %146 = vector.shape_cast %145 : vector<8xf32> to vector<8x1xf32>
    %147 = vector.broadcast %146 : vector<8x1xf32> to vector<8x256xf32>
    %148 = arith.cmpf oeq, %144, %147 : vector<8x256xf32>
    %cst_49 = arith.constant 2.560000e+02 : f32
    %149 = vector.broadcast %cst_49 : f32 to vector<8x256xf32>
    %150 = arith.select %148, %1, %149 : vector<8x256xi1>, vector<8x256xf32>
    %cst_50 = arith.constant dense<0x7F800000> : vector<8xf32>
    %151 = vector.multi_reduction <minimumf>, %150, %cst_50 [1] : vector<8x256xf32> to vector<8xf32>
    %152 = vector.shape_cast %151 : vector<8xf32> to vector<8x1xf32>
    %153 = arith.fptosi %152 : vector<8x1xf32> to vector<8x1xi32>
    %154 = vector.broadcast %153 : vector<8x1xi32> to vector<8x256xi32>
    %155 = arith.cmpi eq, %0, %154 : vector<8x256xi32>
    %156 = arith.extui %155 : vector<8x256xi1> to vector<8x256xi32>
    %157 = arith.sitofp %156 : vector<8x256xi32> to vector<8x256xf32>
    %c0_51 = arith.constant 0 : index
    %c2048 = arith.constant 2048 : index
    %158 = vector.load %arg23[%c0_51, %c2048] : memref<8x4096xf32, #tpu.memory_space<vmem>>, vector<8x256xf32>
    tpu.vector_store %arg23[%c0_51, %c2048], %157 {strides = array<i32>} : memref<8x4096xf32, #tpu.memory_space<vmem>>, vector<8x256xf32>,
    %159 = vector.extract_strided_slice %23 {offsets = [0, 2304], sizes = [8, 256], strides = [1, 1]} : vector<8x4096xf32> to vector<8x256xf32>
    %cst_52 = arith.constant dense<0xFF800000> : vector<8xf32>
    %160 = vector.multi_reduction <maximumf>, %159, %cst_52 [1] : vector<8x256xf32> to vector<8xf32>
    %161 = vector.shape_cast %160 : vector<8xf32> to vector<8x1xf32>
    %162 = vector.broadcast %161 : vector<8x1xf32> to vector<8x256xf32>
    %163 = arith.cmpf oeq, %159, %162 : vector<8x256xf32>
    %cst_53 = arith.constant 2.560000e+02 : f32
    %164 = vector.broadcast %cst_53 : f32 to vector<8x256xf32>
    %165 = arith.select %163, %1, %164 : vector<8x256xi1>, vector<8x256xf32>
    %cst_54 = arith.constant dense<0x7F800000> : vector<8xf32>
    %166 = vector.multi_reduction <minimumf>, %165, %cst_54 [1] : vector<8x256xf32> to vector<8xf32>
    %167 = vector.shape_cast %166 : vector<8xf32> to vector<8x1xf32>
    %168 = arith.fptosi %167 : vector<8x1xf32> to vector<8x1xi32>
    %169 = vector.broadcast %168 : vector<8x1xi32> to vector<8x256xi32>
    %170 = arith.cmpi eq, %0, %169 : vector<8x256xi32>
    %171 = arith.extui %170 : vector<8x256xi1> to vector<8x256xi32>
    %172 = arith.sitofp %171 : vector<8x256xi32> to vector<8x256xf32>
    %c0_55 = arith.constant 0 : index
    %c2304 = arith.constant 2304 : index
    %173 = vector.load %arg23[%c0_55, %c2304] : memref<8x4096xf32, #tpu.memory_space<vmem>>, vector<8x256xf32>
    tpu.vector_store %arg23[%c0_55, %c2304], %172 {strides = array<i32>} : memref<8x4096xf32, #tpu.memory_space<vmem>>, vector<8x256xf32>,
    %174 = vector.extract_strided_slice %23 {offsets = [0, 2560], sizes = [8, 256], strides = [1, 1]} : vector<8x4096xf32> to vector<8x256xf32>
    %cst_56 = arith.constant dense<0xFF800000> : vector<8xf32>
    %175 = vector.multi_reduction <maximumf>, %174, %cst_56 [1] : vector<8x256xf32> to vector<8xf32>
    %176 = vector.shape_cast %175 : vector<8xf32> to vector<8x1xf32>
    %177 = vector.broadcast %176 : vector<8x1xf32> to vector<8x256xf32>
    %178 = arith.cmpf oeq, %174, %177 : vector<8x256xf32>
    %cst_57 = arith.constant 2.560000e+02 : f32
    %179 = vector.broadcast %cst_57 : f32 to vector<8x256xf32>
    %180 = arith.select %178, %1, %179 : vector<8x256xi1>, vector<8x256xf32>
    %cst_58 = arith.constant dense<0x7F800000> : vector<8xf32>
    %181 = vector.multi_reduction <minimumf>, %180, %cst_58 [1] : vector<8x256xf32> to vector<8xf32>
    %182 = vector.shape_cast %181 : vector<8xf32> to vector<8x1xf32>
    %183 = arith.fptosi %182 : vector<8x1xf32> to vector<8x1xi32>
    %184 = vector.broadcast %183 : vector<8x1xi32> to vector<8x256xi32>
    %185 = arith.cmpi eq, %0, %184 : vector<8x256xi32>
    %186 = arith.extui %185 : vector<8x256xi1> to vector<8x256xi32>
    %187 = arith.sitofp %186 : vector<8x256xi32> to vector<8x256xf32>
    %c0_59 = arith.constant 0 : index
    %c2560 = arith.constant 2560 : index
    %188 = vector.load %arg23[%c0_59, %c2560] : memref<8x4096xf32, #tpu.memory_space<vmem>>, vector<8x256xf32>
    tpu.vector_store %arg23[%c0_59, %c2560], %187 {strides = array<i32>} : memref<8x4096xf32, #tpu.memory_space<vmem>>, vector<8x256xf32>,
    %189 = vector.extract_strided_slice %23 {offsets = [0, 2816], sizes = [8, 256], strides = [1, 1]} : vector<8x4096xf32> to vector<8x256xf32>
    %cst_60 = arith.constant dense<0xFF800000> : vector<8xf32>
    %190 = vector.multi_reduction <maximumf>, %189, %cst_60 [1] : vector<8x256xf32> to vector<8xf32>
    %191 = vector.shape_cast %190 : vector<8xf32> to vector<8x1xf32>
    %192 = vector.broadcast %191 : vector<8x1xf32> to vector<8x256xf32>
    %193 = arith.cmpf oeq, %189, %192 : vector<8x256xf32>
    %cst_61 = arith.constant 2.560000e+02 : f32
    %194 = vector.broadcast %cst_61 : f32 to vector<8x256xf32>
    %195 = arith.select %193, %1, %194 : vector<8x256xi1>, vector<8x256xf32>
    %cst_62 = arith.constant dense<0x7F800000> : vector<8xf32>
    %196 = vector.multi_reduction <minimumf>, %195, %cst_62 [1] : vector<8x256xf32> to vector<8xf32>
    %197 = vector.shape_cast %196 : vector<8xf32> to vector<8x1xf32>
    %198 = arith.fptosi %197 : vector<8x1xf32> to vector<8x1xi32>
    %199 = vector.broadcast %198 : vector<8x1xi32> to vector<8x256xi32>
    %200 = arith.cmpi eq, %0, %199 : vector<8x256xi32>
    %201 = arith.extui %200 : vector<8x256xi1> to vector<8x256xi32>
    %202 = arith.sitofp %201 : vector<8x256xi32> to vector<8x256xf32>
    %c0_63 = arith.constant 0 : index
    %c2816 = arith.constant 2816 : index
    %203 = vector.load %arg23[%c0_63, %c2816] : memref<8x4096xf32, #tpu.memory_space<vmem>>, vector<8x256xf32>
    tpu.vector_store %arg23[%c0_63, %c2816], %202 {strides = array<i32>} : memref<8x4096xf32, #tpu.memory_space<vmem>>, vector<8x256xf32>,
    %204 = vector.extract_strided_slice %23 {offsets = [0, 3072], sizes = [8, 256], strides = [1, 1]} : vector<8x4096xf32> to vector<8x256xf32>
    %cst_64 = arith.constant dense<0xFF800000> : vector<8xf32>
    %205 = vector.multi_reduction <maximumf>, %204, %cst_64 [1] : vector<8x256xf32> to vector<8xf32>
    %206 = vector.shape_cast %205 : vector<8xf32> to vector<8x1xf32>
    %207 = vector.broadcast %206 : vector<8x1xf32> to vector<8x256xf32>
    %208 = arith.cmpf oeq, %204, %207 : vector<8x256xf32>
    %cst_65 = arith.constant 2.560000e+02 : f32
    %209 = vector.broadcast %cst_65 : f32 to vector<8x256xf32>
    %210 = arith.select %208, %1, %209 : vector<8x256xi1>, vector<8x256xf32>
    %cst_66 = arith.constant dense<0x7F800000> : vector<8xf32>
    %211 = vector.multi_reduction <minimumf>, %210, %cst_66 [1] : vector<8x256xf32> to vector<8xf32>
    %212 = vector.shape_cast %211 : vector<8xf32> to vector<8x1xf32>
    %213 = arith.fptosi %212 : vector<8x1xf32> to vector<8x1xi32>
    %214 = vector.broadcast %213 : vector<8x1xi32> to vector<8x256xi32>
    %215 = arith.cmpi eq, %0, %214 : vector<8x256xi32>
    %216 = arith.extui %215 : vector<8x256xi1> to vector<8x256xi32>
    %217 = arith.sitofp %216 : vector<8x256xi32> to vector<8x256xf32>
    %c0_67 = arith.constant 0 : index
    %c3072 = arith.constant 3072 : index
    %218 = vector.load %arg23[%c0_67, %c3072] : memref<8x4096xf32, #tpu.memory_space<vmem>>, vector<8x256xf32>
    tpu.vector_store %arg23[%c0_67, %c3072], %217 {strides = array<i32>} : memref<8x4096xf32, #tpu.memory_space<vmem>>, vector<8x256xf32>,
    %219 = vector.extract_strided_slice %23 {offsets = [0, 3328], sizes = [8, 256], strides = [1, 1]} : vector<8x4096xf32> to vector<8x256xf32>
    %cst_68 = arith.constant dense<0xFF800000> : vector<8xf32>
    %220 = vector.multi_reduction <maximumf>, %219, %cst_68 [1] : vector<8x256xf32> to vector<8xf32>
    %221 = vector.shape_cast %220 : vector<8xf32> to vector<8x1xf32>
    %222 = vector.broadcast %221 : vector<8x1xf32> to vector<8x256xf32>
    %223 = arith.cmpf oeq, %219, %222 : vector<8x256xf32>
    %cst_69 = arith.constant 2.560000e+02 : f32
    %224 = vector.broadcast %cst_69 : f32 to vector<8x256xf32>
    %225 = arith.select %223, %1, %224 : vector<8x256xi1>, vector<8x256xf32>
    %cst_70 = arith.constant dense<0x7F800000> : vector<8xf32>
    %226 = vector.multi_reduction <minimumf>, %225, %cst_70 [1] : vector<8x256xf32> to vector<8xf32>
    %227 = vector.shape_cast %226 : vector<8xf32> to vector<8x1xf32>
    %228 = arith.fptosi %227 : vector<8x1xf32> to vector<8x1xi32>
    %229 = vector.broadcast %228 : vector<8x1xi32> to vector<8x256xi32>
    %230 = arith.cmpi eq, %0, %229 : vector<8x256xi32>
    %231 = arith.extui %230 : vector<8x256xi1> to vector<8x256xi32>
    %232 = arith.sitofp %231 : vector<8x256xi32> to vector<8x256xf32>
    %c0_71 = arith.constant 0 : index
    %c3328 = arith.constant 3328 : index
    %233 = vector.load %arg23[%c0_71, %c3328] : memref<8x4096xf32, #tpu.memory_space<vmem>>, vector<8x256xf32>
    tpu.vector_store %arg23[%c0_71, %c3328], %232 {strides = array<i32>} : memref<8x4096xf32, #tpu.memory_space<vmem>>, vector<8x256xf32>,
    %234 = vector.extract_strided_slice %23 {offsets = [0, 3584], sizes = [8, 256], strides = [1, 1]} : vector<8x4096xf32> to vector<8x256xf32>
    %cst_72 = arith.constant dense<0xFF800000> : vector<8xf32>
    %235 = vector.multi_reduction <maximumf>, %234, %cst_72 [1] : vector<8x256xf32> to vector<8xf32>
    %236 = vector.shape_cast %235 : vector<8xf32> to vector<8x1xf32>
    %237 = vector.broadcast %236 : vector<8x1xf32> to vector<8x256xf32>
    %238 = arith.cmpf oeq, %234, %237 : vector<8x256xf32>
    %cst_73 = arith.constant 2.560000e+02 : f32
    %239 = vector.broadcast %cst_73 : f32 to vector<8x256xf32>
    %240 = arith.select %238, %1, %239 : vector<8x256xi1>, vector<8x256xf32>
    %cst_74 = arith.constant dense<0x7F800000> : vector<8xf32>
    %241 = vector.multi_reduction <minimumf>, %240, %cst_74 [1] : vector<8x256xf32> to vector<8xf32>
    %242 = vector.shape_cast %241 : vector<8xf32> to vector<8x1xf32>
    %243 = arith.fptosi %242 : vector<8x1xf32> to vector<8x1xi32>
    %244 = vector.broadcast %243 : vector<8x1xi32> to vector<8x256xi32>
    %245 = arith.cmpi eq, %0, %244 : vector<8x256xi32>
    %246 = arith.extui %245 : vector<8x256xi1> to vector<8x256xi32>
    %247 = arith.sitofp %246 : vector<8x256xi32> to vector<8x256xf32>
    %c0_75 = arith.constant 0 : index
    %c3584 = arith.constant 3584 : index
    %248 = vector.load %arg23[%c0_75, %c3584] : memref<8x4096xf32, #tpu.memory_space<vmem>>, vector<8x256xf32>
    tpu.vector_store %arg23[%c0_75, %c3584], %247 {strides = array<i32>} : memref<8x4096xf32, #tpu.memory_space<vmem>>, vector<8x256xf32>,
    %249 = vector.extract_strided_slice %23 {offsets = [0, 3840], sizes = [8, 256], strides = [1, 1]} : vector<8x4096xf32> to vector<8x256xf32>
    %cst_76 = arith.constant dense<0xFF800000> : vector<8xf32>
    %250 = vector.multi_reduction <maximumf>, %249, %cst_76 [1] : vector<8x256xf32> to vector<8xf32>
    %251 = vector.shape_cast %250 : vector<8xf32> to vector<8x1xf32>
    %252 = vector.broadcast %251 : vector<8x1xf32> to vector<8x256xf32>
    %253 = arith.cmpf oeq, %249, %252 : vector<8x256xf32>
    %cst_77 = arith.constant 2.560000e+02 : f32
    %254 = vector.broadcast %cst_77 : f32 to vector<8x256xf32>
    %255 = arith.select %253, %1, %254 : vector<8x256xi1>, vector<8x256xf32>
    %cst_78 = arith.constant dense<0x7F800000> : vector<8xf32>
    %256 = vector.multi_reduction <minimumf>, %255, %cst_78 [1] : vector<8x256xf32> to vector<8xf32>
    %257 = vector.shape_cast %256 : vector<8xf32> to vector<8x1xf32>
    %258 = arith.fptosi %257 : vector<8x1xf32> to vector<8x1xi32>
    %259 = vector.broadcast %258 : vector<8x1xi32> to vector<8x256xi32>
    %260 = arith.cmpi eq, %0, %259 : vector<8x256xi32>
    %261 = arith.extui %260 : vector<8x256xi1> to vector<8x256xi32>
    %262 = arith.sitofp %261 : vector<8x256xi32> to vector<8x256xf32>
    %c0_79 = arith.constant 0 : index
    %c3840 = arith.constant 3840 : index
    %263 = vector.load %arg23[%c0_79, %c3840] : memref<8x4096xf32, #tpu.memory_space<vmem>>, vector<8x256xf32>
    tpu.vector_store %arg23[%c0_79, %c3840], %262 {strides = array<i32>} : memref<8x4096xf32, #tpu.memory_space<vmem>>, vector<8x256xf32>,
    %c0_80 = arith.constant 0 : index
    %c0_81 = arith.constant 0 : index
    %264 = vector.load %arg23[%c0_80, %c0_81] : memref<8x4096xf32, #tpu.memory_space<vmem>>, vector<8x4096xf32>
    %c0_82 = arith.constant 0 : index
    %c0_83 = arith.constant 0 : index
    %265 = vector.load %arg4[%c0_82, %c0_83] : memref<4096x128xbf16, #tpu.memory_space<vmem>>, vector<4096x128xbf16>
    %c0_84 = arith.constant 0 : index
    %c0_85 = arith.constant 0 : index
    %266 = vector.load %arg5[%c0_84, %c0_85] : memref<1x128xf32, #tpu.memory_space<vmem>>, vector<1x128xf32>
    %267 = arith.truncf %264 : vector<8x4096xf32> to vector<8x4096xbf16>
    %cst_86 = arith.constant dense<0.000000e+00> : vector<8x128xf32>
    %268 = tpu.matmul %267, %265, %cst_86 {dimension_numbers = #tpu.dot_dimension_numbers<[1], [0], [0], [1], [0, 0, 1, 1], [], []>} : vector<8x4096xbf16>, vector<4096x128xbf16>, vector<8x128xf32> -> vector<8x128xf32>
    %269 = vector.broadcast %266 : vector<1x128xf32> to vector<8x128xf32>
    %270 = arith.addf %268, %269 : vector<8x128xf32>
    %c0_87 = arith.constant 0 : index
    %c0_88 = arith.constant 0 : index
    %271 = vector.load %arg6[%c0_87, %c0_88] : memref<128x128xbf16, #tpu.memory_space<vmem>>, vector<128x128xbf16>
    %c0_89 = arith.constant 0 : index
    %c0_90 = arith.constant 0 : index
    %272 = vector.load %arg7[%c0_89, %c0_90] : memref<1x128xf32, #tpu.memory_space<vmem>>, vector<1x128xf32>
    %273 = arith.truncf %270 : vector<8x128xf32> to vector<8x128xbf16>
    %cst_91 = arith.constant dense<0.000000e+00> : vector<8x128xf32>
    %274 = tpu.matmul %273, %271, %cst_91 {dimension_numbers = #tpu.dot_dimension_numbers<[1], [0], [0], [1], [0, 0, 1, 1], [], []>} : vector<8x128xbf16>, vector<128x128xbf16>, vector<8x128xf32> -> vector<8x128xf32>
    %275 = vector.broadcast %272 : vector<1x128xf32> to vector<8x128xf32>
    %276 = arith.addf %274, %275 : vector<8x128xf32>
    %c10 = arith.constant 10 : index
    %c0_92 = arith.constant 0 : index
    %c0_93 = arith.constant 0 : index
    %277 = vector.load %arg8[%c10, %c0_92, %c0_93] : memref<11x128x128xbf16, #tpu.memory_space<vmem>>, vector<1x128x128xbf16>
    %278 = vector.shape_cast %277 : vector<1x128x128xbf16> to vector<128x128xbf16>
    %c10_94 = arith.constant 10 : index
    %c0_95 = arith.constant 0 : index
    %c0_96 = arith.constant 0 : index
    %279 = vector.load %arg9[%c10_94, %c0_95, %c0_96] : memref<11x1x128xf32, #tpu.memory_space<vmem>>, vector<1x1x128xf32>
    %280 = vector.shape_cast %279 : vector<1x1x128xf32> to vector<1x128xf32>
    %281 = arith.truncf %276 : vector<8x128xf32> to vector<8x128xbf16>
    %cst_97 = arith.constant dense<0.000000e+00> : vector<8x128xf32>
    %282 = tpu.matmul %281, %278, %cst_97 {dimension_numbers = #tpu.dot_dimension_numbers<[1], [0], [0], [1], [0, 0, 1, 1], [], []>} : vector<8x128xbf16>, vector<128x128xbf16>, vector<8x128xf32> -> vector<8x128xf32>
    %283 = vector.broadcast %280 : vector<1x128xf32> to vector<8x128xf32>
    %284 = arith.addf %282, %283 : vector<8x128xf32>
    %c0_98 = arith.constant 0 : index
    %c0_99 = arith.constant 0 : index
    %285 = vector.load %arg22[%c0_98, %c0_99] : memref<8x128xf32, #tpu.memory_space<vmem>>, vector<8x128xf32>
    tpu.vector_store %arg22[%c0_98, %c0_99], %284 {strides = array<i32>} : memref<8x128xf32, #tpu.memory_space<vmem>>, vector<8x128xf32>,
    return
  }
  func.func @transform_0(%arg0: i32) -> (i32, i32) {
    %c0_i32 = arith.constant 0 : i32
    %c0_i32_0 = arith.constant 0 : i32
    return %arg0, %c0_i32 : i32, i32
  }
  func.func @transform_1(%arg0: i32) -> (i32, i32) {
    %c0_i32 = arith.constant 0 : i32
    %c0_i32_0 = arith.constant 0 : i32
    %c0_i32_1 = arith.constant 0 : i32
    return %c0_i32, %c0_i32_0 : i32, i32
  }
  func.func @transform_2(%arg0: i32) -> (i32, i32) {
    %c0_i32 = arith.constant 0 : i32
    %c0_i32_0 = arith.constant 0 : i32
    %c0_i32_1 = arith.constant 0 : i32
    return %c0_i32, %c0_i32_0 : i32, i32
  }
  func.func @transform_3(%arg0: i32) -> (i32, i32) {
    %c0_i32 = arith.constant 0 : i32
    %c0_i32_0 = arith.constant 0 : i32
    %c0_i32_1 = arith.constant 0 : i32
    return %c0_i32, %c0_i32_0 : i32, i32
  }
  func.func @transform_4(%arg0: i32) -> (i32, i32) {
    %c0_i32 = arith.constant 0 : i32
    %c0_i32_0 = arith.constant 0 : i32
    %c0_i32_1 = arith.constant 0 : i32
    return %c0_i32, %c0_i32_0 : i32, i32
  }
  func.func @transform_5(%arg0: i32) -> (i32, i32) {
    %c0_i32 = arith.constant 0 : i32
    %c0_i32_0 = arith.constant 0 : i32
    %c0_i32_1 = arith.constant 0 : i32
    return %c0_i32, %c0_i32_0 : i32, i32
  }
  func.func @transform_6(%arg0: i32) -> (i32, i32) {
    %c0_i32 = arith.constant 0 : i32
    %c0_i32_0 = arith.constant 0 : i32
    %c0_i32_1 = arith.constant 0 : i32
    return %c0_i32, %c0_i32_0 : i32, i32
  }
  func.func @transform_7(%arg0: i32) -> (i32, i32, i32) {
    %c0_i32 = arith.constant 0 : i32
    %c0_i32_0 = arith.constant 0 : i32
    %c0_i32_1 = arith.constant 0 : i32
    %c0_i32_2 = arith.constant 0 : i32
    return %c0_i32, %c0_i32_0, %c0_i32_1 : i32, i32, i32
  }
  func.func @transform_8(%arg0: i32) -> (i32, i32, i32) {
    %c0_i32 = arith.constant 0 : i32
    %c0_i32_0 = arith.constant 0 : i32
    %c0_i32_1 = arith.constant 0 : i32
    %c0_i32_2 = arith.constant 0 : i32
    return %c0_i32, %c0_i32_0, %c0_i32_1 : i32, i32, i32
  }
  func.func @transform_9(%arg0: i32) -> (i32, i32) {
    %c0_i32 = arith.constant 0 : i32
    %c0_i32_0 = arith.constant 0 : i32
    %c0_i32_1 = arith.constant 0 : i32
    return %c0_i32, %c0_i32_0 : i32, i32
  }
  func.func @transform_10(%arg0: i32) -> (i32, i32) {
    %c0_i32 = arith.constant 0 : i32
    %c0_i32_0 = arith.constant 0 : i32
    %c0_i32_1 = arith.constant 0 : i32
    return %c0_i32, %c0_i32_0 : i32, i32
  }
  func.func @transform_11(%arg0: i32) -> (i32, i32) {
    %c0_i32 = arith.constant 0 : i32
    %c0_i32_0 = arith.constant 0 : i32
    %c0_i32_1 = arith.constant 0 : i32
    return %c0_i32, %c0_i32_0 : i32, i32
  }
  func.func @transform_12(%arg0: i32) -> (i32, i32) {
    %c0_i32 = arith.constant 0 : i32
    %c0_i32_0 = arith.constant 0 : i32
    %c0_i32_1 = arith.constant 0 : i32
    return %c0_i32, %c0_i32_0 : i32, i32
  }
  func.func @transform_13(%arg0: i32) -> (i32, i32) {
    %c0_i32 = arith.constant 0 : i32
    %c0_i32_0 = arith.constant 0 : i32
    %c0_i32_1 = arith.constant 0 : i32
    return %c0_i32, %c0_i32_0 : i32, i32
  }
  func.func @transform_14(%arg0: i32) -> (i32, i32) {
    %c0_i32 = arith.constant 0 : i32
    %c0_i32_0 = arith.constant 0 : i32
    %c0_i32_1 = arith.constant 0 : i32
    return %c0_i32, %c0_i32_0 : i32, i32
  }
  func.func @transform_15(%arg0: i32) -> (i32, i32) {
    %c0_i32 = arith.constant 0 : i32
    %c0_i32_0 = arith.constant 0 : i32
    %c0_i32_1 = arith.constant 0 : i32
    return %c0_i32, %c0_i32_0 : i32, i32
  }
  func.func @transform_16(%arg0: i32) -> (i32, i32) {
    %c0_i32 = arith.constant 0 : i32
    %c0_i32_0 = arith.constant 0 : i32
    %c0_i32_1 = arith.constant 0 : i32
    return %c0_i32, %c0_i32_0 : i32, i32
  }
  func.func @transform_17(%arg0: i32) -> (i32, i32) {
    %c0_i32 = arith.constant 0 : i32
    %c0_i32_0 = arith.constant 0 : i32
    %c0_i32_1 = arith.constant 0 : i32
    return %c0_i32, %c0_i32_0 : i32, i32
  }
  func.func @transform_18(%arg0: i32) -> (i32, i32) {
    %c0_i32 = arith.constant 0 : i32
    %c0_i32_0 = arith.constant 0 : i32
    %c0_i32_1 = arith.constant 0 : i32
    return %c0_i32, %c0_i32_0 : i32, i32
  }
  func.func @transform_19(%arg0: i32) -> (i32, i32) {
    %c0_i32 = arith.constant 0 : i32
    %c0_i32_0 = arith.constant 0 : i32
    %c0_i32_1 = arith.constant 0 : i32
    return %c0_i32, %c0_i32_0 : i32, i32
  }
  func.func @transform_20(%arg0: i32) -> (i32, i32) {
    %c0_i32 = arith.constant 0 : i32
    %c0_i32_0 = arith.constant 0 : i32
    %c0_i32_1 = arith.constant 0 : i32
    return %c0_i32, %c0_i32_0 : i32, i32
  }
  func.func @transform_21(%arg0: i32) -> (i32, i32) {
    %c0_i32 = arith.constant 0 : i32
    %c0_i32_0 = arith.constant 0 : i32
    return %arg0, %c0_i32 : i32, i32
  }
}

</mosaic_0001>

<bundles_post_ra>
// kernel: aes_o_forward.1
= control target key start
LH: loop header
LB: loop body
LE: loop exit
PB: predicated region body
PF: predicated region fallthrough
CT: control target
= control target key end

     0   :  { %s22453_s0 = inlined_call_operand.vmem [shape: f32[8,128], index: 0, kind: input, shape index: {}]   ;;  %s22454_s1 = inlined_call_operand.hbm [shape: bf16[128,4096], index: 1, kind: input, shape index: {}]   ;;  %s22455_s2 = inlined_call_operand.hbm [shape: f32[1,4096], index: 2, kind: input, shape index: {}]   ;;  %s22456_s3 = inlined_call_operand.hbm [shape: bf16[4096,128], index: 3, kind: input, shape index: {}]   ;;  %s22457_s4 = inlined_call_operand.hbm [shape: f32[1,128], index: 4, kind: input, shape index: {}]   ;;  %s22458_s5 = inlined_call_operand.hbm [shape: bf16[128,128], index: 5, kind: input, shape index: {}]   ;;  %s22459_s6 = inlined_call_operand.hbm [shape: f32[1,128], index: 6, kind: input, shape index: {}]   ;;  %s22460_s7 = inlined_call_operand.vmem [shape: bf16[11,128,128], index: 7, kind: input, shape index: {}]   ;;  %s22461_s8 = inlined_call_operand.vmem [shape: f32[11,1,128], index: 8, kind: input, shape index: {}]   ;;  %s22462_s9 = inlined_call_operand.hbm [shape: bf16[128,384], index: 9, kind: input, shape index: {}]   ;;  %s22463_s10 = inlined_call_operand.hbm [shape: f32[1,384], index: 10, kind: input, shape index: {}]   ;;  %s22464_s11 = inlined_call_operand.vmem [shape: bf16[384,384], index: 11, kind: input, shape index: {}]   ;;  %s22465_s12 = inlined_call_operand.hbm [shape: f32[1,384], index: 12, kind: input, shape index: {}]   ;;  %s22466_s13 = inlined_call_operand.hbm [shape: bf16[384,512], index: 13, kind: input, shape index: {}]   ;;  %s22467_s14 = inlined_call_operand.hbm [shape: f32[1,512], index: 14, kind: input, shape index: {}]   ;;  %s22468_s15 = inlined_call_operand.vmem [shape: bf16[512,512], index: 15, kind: input, shape index: {}]   ;;  %s22469_s16 = inlined_call_operand.hbm [shape: f32[1,512], index: 16, kind: input, shape index: {}]   ;;  %s22470_s17 = inlined_call_operand.hbm [shape: bf16[512,512], index: 17, kind: input, shape index: {}]   ;;  %s22471_s18 = inlined_call_operand.hbm [shape: f32[1,512], index: 18, kind: input, shape index: {}]   ;;  %s22472_s19 = inlined_call_operand.hbm [shape: bf16[512,128], index: 19, kind: input, shape index: {}]   ;;  %s22473_s20 = inlined_call_operand.hbm [shape: f32[1,128], index: 20, kind: input, shape index: {}]   ;;  %s22474_s21 = inlined_call_operand.vmem [shape: f32[8,128], index: 21, kind: output, shape index: {}]  }
   0x1   :  { %22480 = sst [smem:[#allocation37_spill]] %s22453_s0 }
   0x2   :  { %22481 = sst [smem:[#allocation38_spill]] %s22454_s1 }
   0x3   :  { %22482 = sst [smem:[#allocation39_spill]] %s22455_s2 }
   0x4   :  { %22483 = sst [smem:[#allocation40_spill]] %s22456_s3 }
   0x5   :  { %22484 = sst [smem:[#allocation41_spill]] %s22457_s4 }
   0x6   :  { %22485 = sst [smem:[#allocation42_spill]] %s22458_s5 }
   0x7   :  { %26 = vsyncpa [#allocation4], 0 }
   0x8   :  { %27 = vsyncpa [#allocation6], 0 }
   0x9   :  { %28 = vsyncpa [#allocation9], 0 }
   0xa   :  { %29 = vsyncpa [#allocation12], 0 }
   0xb   :  { %30 = vsyncpa [#allocation15], 0 }
   0xc   :  { %31 = vsyncpa [#allocation18], 0 }
   0xd   :  { %32 = vsyncpa [#allocation21], 0 }
   0xe   :  { %33 = vsyncpa [#allocation24], 0 }
   0xf   :  { %34 = vsyncpa [#allocation27], 0  ;;  %s20415_s2 = smov [#allocation5]   ;;  %s20416_s26 = smov [#allocation8]  }
  0x10   :  { %s55_s25 = sshll.u32 %s20415_s2, 4  ;;  %s77_s27 = sshll.u32 %s20416_s26, 4  ;;  %s56_s25 = int_to_ptr.vmem [resolvable:$true] %s55_s25  ;;  %s78_s27 = int_to_ptr.vmem [resolvable:$true] %s77_s27 }
  0x11   :  { %s22486_s29 = sld [smem:[#allocation39_spill]] }
  0x17   :  { %s20029_s0 = scalar_lea.hbm %s22486_s29, 512 }
  0x18   :  { %p20030_p0 = scmp.ne.s32.totalorder %s22486_s29, %s20029_s0  ;;  %p20033_p1 = scmp.lt.u32.totalorder %s20029_s0, %s22486_s29 }
  0x1a   :  { %p20035_p2 = pnand %p20033_p1, %p20030_p0 }
  0x1c   :  { %20038 = shalt.err (!%p20035_p2)
}
  0x1d   :  { %s20039_s23 = scalar_lea.vmem %s56_s25, 512  ;;  %p20044_p4 = scmp.lt.s32.totalorder %s56_s25, %s56_s25 }
  0x1e   :  { %p20040_p3 = scmp.ne.s32.totalorder %s56_s25, %s20039_s23  ;;  %p20045_p5 = scmp.lt.s32.totalorder %s20039_s23, %s20039_s23 }
  0x20   :  { %p20046_p6 = por %p20045_p5, %p20044_p4 }
  0x22   :  { %p20047_p7 = pnand %p20046_p6, %p20040_p3 }
  0x24   :  { %20050 = shalt.err (!%p20047_p7)
}
  0x25   :  { %58 = dma.hbm_to_vmem [thread:$0]  %s22486_s29, 512, %s56_s25, [#allocation6]  }
  0x26   :  { %s22487_s3 = sld [smem:[#allocation41_spill]] }
  0x2c   :  { %s20051_s28 = scalar_lea.hbm %s22487_s3, 16 }
  0x2d   :  { %p20052_p8 = scmp.ne.s32.totalorder %s22487_s3, %s20051_s28  ;;  %p20055_p9 = scmp.lt.u32.totalorder %s20051_s28, %s22487_s3 }
  0x2f   :  { %p20057_p10 = pnand %p20055_p9, %p20052_p8 }
  0x31   :  { %20060 = shalt.err (!%p20057_p10)
}
  0x32   :  { %s20061_s22 = scalar_lea.vmem %s78_s27, 16  ;;  %s20065_s23 = scalar_lea.vmem %s78_s27, 32 }
  0x33   :  { %p20062_p11 = scmp.ne.s32.totalorder %s78_s27, %s20061_s22  ;;  %p20066_p12 = scmp.lt.s32.totalorder %s78_s27, %s78_s27 }
  0x34   :  { %p20067_p13 = scmp.lt.s32.totalorder %s20065_s23, %s20061_s22 }
  0x36   :  { %p20068_p0 = por %p20067_p13, %p20066_p12 }
  0x38   :  { %p20069_p1 = pnand %p20068_p0, %p20062_p11 }
  0x3a   :  { %20072 = shalt.err (!%p20069_p1)
}
  0x3b   :  { %80 = dma.hbm_to_vmem [thread:$0]  %s22487_s3, 16, %s78_s27, [#allocation9]  }
  0x3c   :  { %s20417_s1 = smov [#allocation11]   ;;  %s20418_s2 = smov [#allocation14]  }
  0x3d   :  { %s99_s24 = sshll.u32 %s20417_s1, 4  ;;  %s125_s26 = sshll.u32 %s20418_s2, 4  ;;  %s100_s24 = int_to_ptr.vmem [resolvable:$true] %s99_s24  ;;  %s126_s26 = int_to_ptr.vmem [resolvable:$true] %s125_s26 }
  0x3e   :  { %s20073_s30 = scalar_lea.hbm %s22459_s6, 16 }
  0x3f   :  { %p20074_p2 = scmp.ne.s32.totalorder %s22459_s6, %s20073_s30  ;;  %p20077_p3 = scmp.lt.u32.totalorder %s20073_s30, %s22459_s6 }
  0x41   :  { %p20079_p4 = pnand %p20077_p3, %p20074_p2 }
  0x43   :  { %20082 = shalt.err (!%p20079_p4)
}
  0x44   :  { %s20083_s27 = scalar_lea.vmem %s100_s24, 16  ;;  %s20087_s3 = scalar_lea.vmem %s100_s24, 32 }
  0x45   :  { %p20084_p5 = scmp.ne.s32.totalorder %s100_s24, %s20083_s27  ;;  %p20088_p6 = scmp.lt.s32.totalorder %s100_s24, %s100_s24 }
  0x46   :  { %p20089_p7 = scmp.lt.s32.totalorder %s20087_s3, %s20083_s27 }
  0x48   :  { %p20090_p8 = por %p20089_p7, %p20088_p6 }
  0x4a   :  { %p20091_p9 = pnand %p20090_p8, %p20084_p5 }
  0x4c   :  { %20094 = shalt.err (!%p20091_p9)
}
  0x4d   :  { %102 = dma.hbm_to_vmem [thread:$0]  %s22459_s6, 16, %s100_s24, [#allocation12]  }
  0x4e   :  { %s20095_s28 = scalar_lea.hbm %s22463_s10, 48 }
  0x4f   :  { %p20096_p10 = scmp.ne.s32.totalorder %s22463_s10, %s20095_s28  ;;  %p20099_p11 = scmp.lt.u32.totalorder %s20095_s28, %s22463_s10 }
  0x51   :  { %p20101_p12 = pnand %p20099_p11, %p20096_p10 }
  0x53   :  { %20104 = shalt.err (!%p20101_p12)
}
  0x54   :  { %s20105_s22 = scalar_lea.vmem %s126_s26, 48  ;;  %s20109_s23 = scalar_lea.vmem %s126_s26, 64 }
  0x55   :  { %p20106_p13 = scmp.ne.s32.totalorder %s126_s26, %s20105_s22  ;;  %p20110_p0 = scmp.lt.s32.totalorder %s126_s26, %s126_s26 }
  0x56   :  { %p20111_p1 = scmp.lt.s32.totalorder %s20109_s23, %s20105_s22 }
  0x58   :  { %p20112_p2 = por %p20111_p1, %p20110_p0 }
  0x5a   :  { %p20113_p3 = pnand %p20112_p2, %p20106_p13 }
  0x5c   :  { %20116 = shalt.err (!%p20113_p3)
}
  0x5d   :  { %128 = dma.hbm_to_vmem [thread:$0]  %s22463_s10, 48, %s126_s26, [#allocation15]  }
  0x5e   :  { %s20419_s27 = smov [#allocation17]   ;;  %s20117_s1 = scalar_lea.hbm %s22466_s13, 12288 }
  0x5f   :  { %s146_s3 = sshll.u32 %s20419_s27, 4  ;;  %p20118_p4 = scmp.ne.s32.totalorder %s22466_s13, %s20117_s1  ;;  %s147_s3 = int_to_ptr.vmem [resolvable:$true] %s146_s3 }
  0x60   :  { %p20121_p5 = scmp.lt.u32.totalorder %s20117_s1, %s22466_s13 }
  0x62   :  { %p20123_p6 = pnand %p20121_p5, %p20118_p4 }
  0x64   :  { %20126 = shalt.err (!%p20123_p6)
}
  0x65   :  { %s20127_s0 = scalar_lea.vmem %s147_s3, 12288  ;;  %p20132_p8 = scmp.lt.s32.totalorder %s147_s3, %s147_s3 }
  0x66   :  { %p20128_p7 = scmp.ne.s32.totalorder %s147_s3, %s20127_s0  ;;  %p20133_p9 = scmp.lt.s32.totalorder %s20127_s0, %s20127_s0 }
  0x68   :  { %p20134_p10 = por %p20133_p9, %p20132_p8 }
  0x6a   :  { %p20135_p11 = pnand %p20134_p10, %p20128_p7 }
  0x6c   :  { %20138 = shalt.err (!%p20135_p11)
}
  0x6d   :  { %s20420_s10 = smov 256   ;;  %s20421_s26 = smov 16  }
  0x6e   :  { %152 = dma.hbm_to_vmem [thread:$0]  %s22466_s13, 12288, %s147_s3, [#allocation18], %s20420_s10, %s20420_s10, %s20421_s26  }
  0x6f   :  { %s20422_s23 = smov [#allocation20]   ;;  %s20423_s24 = smov [#allocation23]  }
  0x70   :  { %s171_s6 = sshll.u32 %s20422_s23, 4  ;;  %s193_s27 = sshll.u32 %s20423_s24, 4  ;;  %s172_s6 = int_to_ptr.vmem [resolvable:$true] %s171_s6  ;;  %s194_s27 = int_to_ptr.vmem [resolvable:$true] %s193_s27 }
  0x71   :  { %s20139_s1 = scalar_lea.hbm %s22469_s16, 64 }
  0x72   :  { %p20140_p12 = scmp.ne.s32.totalorder %s22469_s16, %s20139_s1  ;;  %p20143_p13 = scmp.lt.u32.totalorder %s20139_s1, %s22469_s16 }
  0x74   :  { %p20145_p0 = pnand %p20143_p13, %p20140_p12 }
  0x76   :  { %20148 = shalt.err (!%p20145_p0)
}
  0x77   :  { %s20149_s13 = scalar_lea.vmem %s172_s6, 64  ;;  %p20154_p2 = scmp.lt.s32.totalorder %s172_s6, %s172_s6 }
  0x78   :  { %p20150_p1 = scmp.ne.s32.totalorder %s172_s6, %s20149_s13  ;;  %p20155_p3 = scmp.lt.s32.totalorder %s20149_s13, %s20149_s13 }
  0x7a   :  { %p20156_p4 = por %p20155_p3, %p20154_p2 }
  0x7c   :  { %p20157_p5 = pnand %p20156_p4, %p20150_p1 }
  0x7e   :  { %20160 = shalt.err (!%p20157_p5)
}
  0x7f   :  { %174 = dma.hbm_to_vmem [thread:$0]  %s22469_s16, 64, %s172_s6, [#allocation21]  }
  0x80   :  { %s20161_s23 = scalar_lea.hbm %s22471_s18, 64 }
  0x81   :  { %p20162_p6 = scmp.ne.s32.totalorder %s22471_s18, %s20161_s23  ;;  %p20165_p7 = scmp.lt.u32.totalorder %s20161_s23, %s22471_s18 }
  0x83   :  { %p20167_p8 = pnand %p20165_p7, %p20162_p6 }
  0x85   :  { %20170 = shalt.err (!%p20167_p8)
}
  0x86   :  { %s20171_s2 = scalar_lea.vmem %s194_s27, 64  ;;  %p20176_p10 = scmp.lt.s32.totalorder %s194_s27, %s194_s27 }
  0x87   :  { %p20172_p9 = scmp.ne.s32.totalorder %s194_s27, %s20171_s2  ;;  %p20177_p11 = scmp.lt.s32.totalorder %s20171_s2, %s20171_s2 }
  0x89   :  { %p20178_p12 = por %p20177_p11, %p20176_p10 }
  0x8b   :  { %p20179_p13 = pnand %p20178_p12, %p20172_p9 }
  0x8d   :  { %20182 = shalt.err (!%p20179_p13)
}
  0x8e   :  { %196 = dma.hbm_to_vmem [thread:$0]  %s22471_s18, 64, %s194_s27, [#allocation24]  }
  0x8f   :  { %s20424_s28 = smov [#allocation3]   ;;  %s22488_s3 = sld [smem:[#allocation38_spill]] }
  0x90   :  { %s42_s4 = sshll.u32 %s20424_s28, 4  ;;  %s43_s4 = int_to_ptr.vmem [resolvable:$true] %s42_s4 }
  0x95   :  { %s20183_s0 = scalar_lea.hbm %s22488_s3, 32768 }
  0x96   :  { %p20184_p0 = scmp.ne.s32.totalorder %s22488_s3, %s20183_s0  ;;  %p20187_p1 = scmp.lt.u32.totalorder %s20183_s0, %s22488_s3 }
  0x98   :  { %p20189_p2 = pnand %p20187_p1, %p20184_p0 }
  0x9a   :  { %20192 = shalt.err (!%p20189_p2)
}
  0x9b   :  { %s20193_s25 = scalar_lea.vmem %s43_s4, 32768  ;;  %p20198_p4 = scmp.lt.s32.totalorder %s43_s4, %s43_s4 }
  0x9c   :  { %p20194_p3 = scmp.ne.s32.totalorder %s43_s4, %s20193_s25  ;;  %p20199_p5 = scmp.lt.s32.totalorder %s20193_s25, %s20193_s25 }
  0x9e   :  { %p20200_p6 = por %p20199_p5, %p20198_p4 }
  0xa0   :  { %p20201_p7 = pnand %p20200_p6, %p20194_p3 }
  0xa2   :  { %20204 = shalt.err (!%p20201_p7)
}
  0xa3   :  { %s20425_s18 = smov 2048   ;;  %s20426_s27 = smov 128  }
  0xa4   :  { %48 = dma.hbm_to_vmem [thread:$0]  %s22488_s3, 32768, %s43_s4, [#allocation4], %s20425_s18, %s20425_s18, %s20426_s27  }
  0xa5   :  { %s20427_s2 = smov [#allocation7]   ;;  %s22489_s30 = sld [smem:[#allocation40_spill]] }
  0xa6   :  { %s64_s16 = sshll.u32 %s20427_s2, 4  ;;  %s65_s16 = int_to_ptr.vmem [resolvable:$true] %s64_s16 }
  0xab   :  { %s20205_s13 = scalar_lea.hbm %s22489_s30, 32768 }
  0xac   :  { %p20206_p8 = scmp.ne.s32.totalorder %s22489_s30, %s20205_s13  ;;  %p20209_p9 = scmp.lt.u32.totalorder %s20205_s13, %s22489_s30 }
  0xae   :  { %p20211_p10 = pnand %p20209_p9, %p20206_p8 }
  0xb0   :  { %20214 = shalt.err (!%p20211_p10)
}
  0xb1   :  { %s20215_s24 = scalar_lea.vmem %s65_s16, 32768  ;;  %p20220_p12 = scmp.lt.s32.totalorder %s65_s16, %s65_s16 }
  0xb2   :  { %p20216_p11 = scmp.ne.s32.totalorder %s65_s16, %s20215_s24  ;;  %p20221_p13 = scmp.lt.s32.totalorder %s20215_s24, %s20215_s24 }
  0xb4   :  { %p20222_p0 = por %p20221_p13, %p20220_p12 }
  0xb6   :  { %p20223_p1 = pnand %p20222_p0, %p20216_p11 }
  0xb8   :  { %20226 = shalt.err (!%p20223_p1)
}
  0xb9   :  { %s20428_s4 = smov 64   ;;  %s20429_s3 = smov 4  }
  0xba   :  { %70 = dma.hbm_to_vmem [thread:$0]  %s22489_s30, 32768, %s65_s16, [#allocation6], %s20428_s4, %s20428_s4, %s20429_s3  }
  0xbb   :  { %s20430_s27 = smov [#allocation10]   ;;  %s20431_s1 = smov [#allocation13]  }
  0xbc   :  { %s86_s29 = sshll.u32 %s20430_s27, 4  ;;  %s112_s2 = sshll.u32 %s20431_s1, 4  ;;  %s87_s29 = int_to_ptr.vmem [resolvable:$true] %s86_s29  ;;  %s113_s2 = int_to_ptr.vmem [resolvable:$true] %s112_s2 }
  0xbd   :  { %s22490_s13 = sld [smem:[#allocation42_spill]] }
  0xc3   :  { %s20227_s0 = scalar_lea.hbm %s22490_s13, 1024 }
  0xc4   :  { %p20228_p2 = scmp.ne.s32.totalorder %s22490_s13, %s20227_s0  ;;  %p20231_p3 = scmp.lt.u32.totalorder %s20227_s0, %s22490_s13 }
  0xc6   :  { %p20233_p4 = pnand %p20231_p3, %p20228_p2 }
  0xc8   :  { %20236 = shalt.err (!%p20233_p4)
}
  0xc9   :  { %s20237_s16 = scalar_lea.vmem %s87_s29, 1024  ;;  %p20242_p6 = scmp.lt.s32.totalorder %s87_s29, %s87_s29 }
  0xca   :  { %p20238_p5 = scmp.ne.s32.totalorder %s87_s29, %s20237_s16  ;;  %p20243_p7 = scmp.lt.s32.totalorder %s20237_s16, %s20237_s16 }
  0xcc   :  { %p20244_p8 = por %p20243_p7, %p20242_p6 }
  0xce   :  { %p20245_p9 = pnand %p20244_p8, %p20238_p5 }
  0xd0   :  { %20248 = shalt.err (!%p20245_p9)
}
  0xd1   :  { %92 = dma.hbm_to_vmem [thread:$0]  %s22490_s13, 1024, %s87_s29, [#allocation9], %s20428_s4, %s20428_s4, %s20429_s3  }
  0xd2   :  { %s20249_s1 = scalar_lea.hbm %s22462_s9, 3072 }
  0xd3   :  { %p20250_p10 = scmp.ne.s32.totalorder %s22462_s9, %s20249_s1  ;;  %p20253_p11 = scmp.lt.u32.totalorder %s20249_s1, %s22462_s9 }
  0xd5   :  { %p20255_p12 = pnand %p20253_p11, %p20250_p10 }
  0xd7   :  { %20258 = shalt.err (!%p20255_p12)
}
  0xd8   :  { %s20259_s22 = scalar_lea.vmem %s113_s2, 3072  ;;  %p20264_p0 = scmp.lt.s32.totalorder %s113_s2, %s113_s2 }
  0xd9   :  { %p20260_p13 = scmp.ne.s32.totalorder %s113_s2, %s20259_s22  ;;  %p20265_p1 = scmp.lt.s32.totalorder %s20259_s22, %s20259_s22 }
  0xdb   :  { %p20266_p2 = por %p20265_p1, %p20264_p0 }
  0xdd   :  { %p20267_p3 = pnand %p20266_p2, %p20260_p13 }
  0xdf   :  { %20270 = shalt.err (!%p20267_p3)
}
  0xe0   :  { %s20432_s29 = smov 192   ;;  %s20433_s13 = smov 12  }
  0xe1   :  { %118 = dma.hbm_to_vmem [thread:$0]  %s22462_s9, 3072, %s113_s2, [#allocation12], %s20432_s29, %s20432_s29, %s20433_s13  }
  0xe2   :  { %s20434_s16 = smov [#allocation16]   ;;  %s20435_s25 = smov [#allocation19]  }
  0xe3   :  { %s137_s30 = sshll.u32 %s20434_s16, 4  ;;  %s159_s18 = sshll.u32 %s20435_s25, 4  ;;  %s138_s30 = int_to_ptr.vmem [resolvable:$true] %s137_s30  ;;  %s160_s18 = int_to_ptr.vmem [resolvable:$true] %s159_s18 }
  0xe4   :  { %s20271_s6 = scalar_lea.hbm %s22465_s12, 48 }
  0xe5   :  { %p20272_p4 = scmp.ne.s32.totalorder %s22465_s12, %s20271_s6  ;;  %p20275_p5 = scmp.lt.u32.totalorder %s20271_s6, %s22465_s12 }
  0xe7   :  { %p20277_p6 = pnand %p20275_p5, %p20272_p4 }
  0xe9   :  { %20280 = shalt.err (!%p20277_p6)
}
  0xea   :  { %s20281_s9 = scalar_lea.vmem %s138_s30, 48  ;;  %s20285_s2 = scalar_lea.vmem %s138_s30, 64 }
  0xeb   :  { %p20282_p7 = scmp.ne.s32.totalorder %s138_s30, %s20281_s9  ;;  %p20286_p8 = scmp.lt.s32.totalorder %s138_s30, %s138_s30 }
  0xec   :  { %p20287_p9 = scmp.lt.s32.totalorder %s20285_s2, %s20281_s9 }
  0xee   :  { %p20288_p10 = por %p20287_p9, %p20286_p8 }
  0xf0   :  { %p20289_p11 = pnand %p20288_p10, %p20282_p7 }
  0xf2   :  { %20292 = shalt.err (!%p20289_p11)
}
  0xf3   :  { %140 = dma.hbm_to_vmem [thread:$0]  %s22465_s12, 48, %s138_s30, [#allocation15]  }
  0xf4   :  { %s20293_s16 = scalar_lea.hbm %s22467_s14, 64 }
  0xf5   :  { %p20294_p12 = scmp.ne.s32.totalorder %s22467_s14, %s20293_s16  ;;  %p20297_p13 = scmp.lt.u32.totalorder %s20293_s16, %s22467_s14 }
  0xf7   :  { %p20299_p0 = pnand %p20297_p13, %p20294_p12 }
  0xf9   :  { %20302 = shalt.err (!%p20299_p0)
}
  0xfa   :  { %s20303_s28 = scalar_lea.vmem %s160_s18, 64  ;;  %p20308_p2 = scmp.lt.s32.totalorder %s160_s18, %s160_s18 }
  0xfb   :  { %p20304_p1 = scmp.ne.s32.totalorder %s160_s18, %s20303_s28  ;;  %p20309_p3 = scmp.lt.s32.totalorder %s20303_s28, %s20303_s28 }
  0xfd   :  { %p20310_p4 = por %p20309_p3, %p20308_p2 }
  0xff   :  { %p20311_p5 = pnand %p20310_p4, %p20304_p1 }
 0x101   :  { %20314 = shalt.err (!%p20311_p5)
}
 0x102   :  { %162 = dma.hbm_to_vmem [thread:$0]  %s22467_s14, 64, %s160_s18, [#allocation18]  }
 0x103   :  { %s20436_s0 = smov [#allocation22]   ;;  %s20437_s22 = smov [#allocation25]  }
 0x104   :  { %s180_s5 = sshll.u32 %s20436_s0, 4  ;;  %s202_s9 = sshll.u32 %s20437_s22, 4  ;;  %s181_s5 = int_to_ptr.vmem [resolvable:$true] %s180_s5  ;;  %s203_s9 = int_to_ptr.vmem [resolvable:$true] %s202_s9 }
 0x105   :  { %s20315_s13 = scalar_lea.hbm %s22470_s17, 16384 }
 0x106   :  { %p20316_p6 = scmp.ne.s32.totalorder %s22470_s17, %s20315_s13  ;;  %p20319_p7 = scmp.lt.u32.totalorder %s20315_s13, %s22470_s17 }
 0x108   :  { %p20321_p8 = pnand %p20319_p7, %p20316_p6 }
 0x10a   :  { %20324 = shalt.err (!%p20321_p8)
}
 0x10b   :  { %s20325_s14 = scalar_lea.vmem %s181_s5, 16384  ;;  %p20330_p10 = scmp.lt.s32.totalorder %s181_s5, %s181_s5 }
 0x10c   :  { %p20326_p9 = scmp.ne.s32.totalorder %s181_s5, %s20325_s14  ;;  %p20331_p11 = scmp.lt.s32.totalorder %s20325_s14, %s20325_s14 }
 0x10e   :  { %p20332_p12 = por %p20331_p11, %p20330_p10 }
 0x110   :  { %p20333_p13 = pnand %p20332_p12, %p20326_p9 }
 0x112   :  { %20336 = shalt.err (!%p20333_p13)
}
 0x113   :  { %186 = dma.hbm_to_vmem [thread:$0]  %s22470_s17, 16384, %s181_s5, [#allocation21], %s20420_s10, %s20420_s10, %s20421_s26  }
 0x114   :  { %s20337_s28 = scalar_lea.hbm %s22472_s19, 4096 }
 0x115   :  { %p20338_p0 = scmp.ne.s32.totalorder %s22472_s19, %s20337_s28  ;;  %p20341_p1 = scmp.lt.u32.totalorder %s20337_s28, %s22472_s19 }
 0x117   :  { %p20343_p2 = pnand %p20341_p1, %p20338_p0 }
 0x119   :  { %20346 = shalt.err (!%p20343_p2)
}
 0x11a   :  { %s20347_s2 = scalar_lea.vmem %s203_s9, 4096  ;;  %p20352_p4 = scmp.lt.s32.totalorder %s203_s9, %s203_s9 }
 0x11b   :  { %p20348_p3 = scmp.ne.s32.totalorder %s203_s9, %s20347_s2  ;;  %p20353_p5 = scmp.lt.s32.totalorder %s20347_s2, %s20347_s2 }
 0x11d   :  { %p20354_p6 = por %p20353_p5, %p20352_p4 }
 0x11f   :  { %p20355_p7 = pnand %p20354_p6, %p20348_p3 }
 0x121   :  { %20358 = shalt.err (!%p20355_p7)
}
 0x122   :  { %208 = dma.hbm_to_vmem [thread:$0]  %s22472_s19, 4096, %s203_s9, [#allocation24], %s20428_s4, %s20428_s4, %s20429_s3  }
 0x123   :  { %s20438_s26 = smov [#allocation26]   ;;  %s20359_s23 = scalar_lea.hbm %s22473_s20, 16 }
 0x124   :  { %s215_s5 = sshll.u32 %s20438_s26, 4  ;;  %p20360_p8 = scmp.ne.s32.totalorder %s22473_s20, %s20359_s23  ;;  %s216_s5 = int_to_ptr.vmem [resolvable:$true] %s215_s5 }
 0x125   :  { %p20363_p9 = scmp.lt.u32.totalorder %s20359_s23, %s22473_s20 }
 0x127   :  { %p20365_p10 = pnand %p20363_p9, %p20360_p8 }
 0x129   :  { %20368 = shalt.err (!%p20365_p10)
}
 0x12a   :  { %s20369_s18 = scalar_lea.vmem %s216_s5, 16  ;;  %s20373_s19 = scalar_lea.vmem %s216_s5, 32 }
 0x12b   :  { %p20370_p11 = scmp.ne.s32.totalorder %s216_s5, %s20369_s18  ;;  %p20374_p12 = scmp.lt.s32.totalorder %s216_s5, %s216_s5 }
 0x12c   :  { %p20375_p13 = scmp.lt.s32.totalorder %s20373_s19, %s20369_s18 }
 0x12e   :  { %p20376_p0 = por %p20375_p13, %p20374_p12 }
 0x130   :  { %p20377_p1 = pnand %p20376_p0, %p20370_p11 }
 0x132   :  { %20380 = shalt.err (!%p20377_p1)
}
 0x133   :  { %218 = dma.hbm_to_vmem [thread:$0]  %s22473_s20, 16, %s216_s5, [#allocation27]  }
 0x134   :  { %20389 = dma.done.wait [#allocation4], 32768  }
 0x135   :  { %20390 = vsyncadd [#allocation4], 4294934528 }
 0x136   :  { %20391 = dma.done.wait [#allocation6], 33280  }
 0x137   :  { %20392 = vsyncadd [#allocation6], 4294934016 }
 0x138   :  { %20393 = dma.done.wait [#allocation9], 1040  }
 0x139   :  { %20394 = vsyncadd [#allocation9], 4294966256 }
 0x13a   :  { %20395 = dma.done.wait [#allocation12], 3088  }
 0x13b   :  { %20396 = vsyncadd [#allocation12], 4294964208 }
 0x13c   :  { %20397 = dma.done.wait [#allocation15], 96  }
 0x13d   :  { %20398 = vsyncadd [#allocation15], 4294967200 }
 0x13e   :  { %20399 = dma.done.wait [#allocation18], 12352  }
 0x13f   :  { %20400 = vsyncadd [#allocation18], 4294954944 }
 0x140   :  { %20401 = dma.done.wait [#allocation21], 16448  }
 0x141   :  { %20402 = vsyncadd [#allocation21], 4294950848 }
 0x142   :  { %20403 = dma.done.wait [#allocation24], 4160  }
 0x143   :  { %20404 = vsyncadd [#allocation24], 4294963136 }
 0x144   :  { %20405 = dma.done.wait [#allocation27], 16  }
 0x145   :  { %20406 = vsyncadd [#allocation27], 4294967280  ;;  %v268_v0 = vlaneseq  ;;  %v20439_v1 = vmov 0.0   ;;  %vm20440_vm0 = vmmov 0   ;;  %v18577_v6 = vld [vmem:[%s22460_s7] sm:$0xff]   ;;  %v18578_v7 = vld [vmem:[%s22460_s7 + $0x8] sm:$0xff]  }
 0x146   :  { %18285 = vmatprep.subr.bf16.mxu0 %v20439_v1  ;;  %18301 = vmatprep.mubr.msk.bf16.mxu0 %vm20440_vm0, %v20439_v1  ;;  %v18579_v8 = vld [vmem:[%s22460_s7 + $0x10] sm:$0xff]   ;;  %v18580_v9 = vld [vmem:[%s22460_s7 + $0x18] sm:$0xff]   ;;  %v18581_v10 = vld [vmem:[%s22460_s7 + $0x20] sm:$0xff]   ;;  %s22491_s24 = sld [smem:[#allocation37_spill]]  ;;  %s20818_s14 = smov 1  }
 0x147   :  { %v20768_v2 = vand.u32 127, %v268_v0  ;;  %18286 = vmatpush3.bf16.msra.mxu0 %v18577_v6  ;;  %v18582_v11 = vld [vmem:[%s22460_s7 + $0x28] sm:$0xff]   ;;  %v18583_v12 = vld [vmem:[%s22460_s7 + $0x30] sm:$0xff]   ;;  %v18584_v13 = vld [vmem:[%s22460_s7 + $0x38] sm:$0xff]  }
 0x148   :  { %18287 = vmatprep.subr.bf16.mxu0 %v20439_v1  ;;  %v15795_v16 = vld [vmem:[%s22461_s8] ss:$0 sm:$0xff] }
 0x149   :  { %v20771_v3 = vadd.s32 128, %v20768_v2  ;;  %v20774_v4 = vcvt.s32.f32 %v20768_v2 }
 0x14b   :  { %v20777_v5 = vcvt.s32.f32 %v20771_v3  ;;  %18288 = vmatpush3.bf16.msra.mxu0 %v18578_v7 }
 0x14c   :  { %18289 = vmatprep.subr.bf16.mxu0 %v20439_v1  ;;  %v273_v14 = vld [vmem:[%s22491_s24] sm:$0xff] }
 0x14d   :  { %v291_v15 = vpack.c.bf16 %v273_v14, %v273_v14 }
 0x14f   :  { %18290 = vmatpush3.bf16.msra.mxu0 %v18579_v8 }
 0x150   :  { %18291 = vmatprep.subr.bf16.mxu0 %v20439_v1 }
 0x153   :  { %18292 = vmatpush3.bf16.msra.mxu0 %v18580_v9 }
 0x154   :  { %18293 = vmatprep.subr.bf16.mxu0 %v20439_v1 }
 0x157   :  { %18294 = vmatpush3.bf16.msra.mxu0 %v18581_v10 }
 0x158   :  { %18295 = vmatprep.subr.bf16.mxu0 %v20439_v1 }
 0x15b   :  { %18296 = vmatpush3.bf16.msra.mxu0 %v18582_v11 }
 0x15c   :  { %18297 = vmatprep.subr.bf16.mxu0 %v20439_v1 }
 0x15f   :  { %18298 = vmatpush3.bf16.msra.mxu0 %v18583_v12 }
 0x160   :  { %18299 = vmatprep.subr.bf16.mxu0 %v20439_v1 }
 0x163   :  { %18300 = vmatpush3.bf16.msra.mxu0 %v18584_v13 }
 0x166   :  { %18302 = vmatmul.mubr.bf16.vlgmr.msra.gmra.mrb[0].mxu0 %v291_v15 }
 0x239   :  { %v380_v17 = vpop.f32.mrb[0].mxu0 }
 0x23a   :  { %v381_v18 = vadd.f32 %v15795_v16, %v380_v17  ;;  %v18303_v19 = vpop.f32.mrb[1].mxu0 }
 0x23b   :  { %v383_v20 = vpop.f32.mrb[2].mxu0 }
 0x23c   :  { %v15804_v21 = vmul.f32 -1.442695, %v381_v18  ;;  %v18304_v22 = vpop.f32.mrb[3].mxu0 }
 0x23e   :  { %18585 = vpow2.f32 %v15804_v21 }
 0x248   :  { %v18586_v23 = vpop.eup %18585 }
 0x249   :  { %v389_v24 = vadd.f32 1.0, %v18586_v23 }
 0x24b   :  { %18587 = vrcp.f32 %v389_v24 }
 0x255   :  { %v18588_v25 = vpop.eup %18587  }
 0x256 LB: > { %v399_v26 = vld [vmem:[#allocation3] sm:$0xff]  ;;  %v400_v28 = vld [vmem:[#allocation3 + $0x8] sm:$0xff]  ;;  %v20441_v34 = vmov 0   ;;  %s17451_s18 = sshll.u32 %s20413_s14, 6  ;;  %s10017_s27 = scalar_lea.vmem %s22461_s8, %s20413_s14  ;;  %s20413_s14 = sphi %s20818_s14, %s397_s14   ;;  %v20409_v25 = vphi %v18588_v25, %v22494_v25  }
 0x257   : > { %v415_v27 = vld [vmem:[#allocation3 + $0x80] sm:$0xff]  ;;  %v416_v30 = vld [vmem:[#allocation3 + $0x88] sm:$0xff]  ;;  %2136 = vmatprep.mubr.bf16.mxu0 %v20441_v34  ;;  %2177 = vmatprep.mubr.bf16.mxu1 %v20441_v34  ;;  %s10000_s3 = scalar_lea.vmem %s22460_s7, %s17451_s18  ;;  %s397_s14 = sadd.s32 1, %s20413_s14  }
 0x258   : > { %v15806_v29 = vcombine.high %v399_v26, %v415_v27  ;;  %v15805_v31 = vcombine.low %v399_v26, %v415_v27  ;;  %v431_v32 = vld [vmem:[#allocation3 + $0x100] sm:$0xff]  ;;  %v15808_v35 = vcombine.high %v400_v28, %v416_v30  ;;  %v15807_v36 = vcombine.low %v400_v28, %v416_v30  ;;  %v432_v38 = vld [vmem:[#allocation3 + $0x108] sm:$0xff]  ;;  %p394_p2 = scmp.ge.s32.totalorder %s397_s14, 10  }
 0x259   : > { %v447_v33 = vld [vmem:[#allocation3 + $0x180] sm:$0xff]  ;;  %v448_v39 = vld [vmem:[#allocation3 + $0x188] sm:$0xff] }
 0x25a   : > { %v15838_v37 = vcombine.high %v431_v32, %v447_v33  ;;  %v463_v40 = vld [vmem:[#allocation3 + $0x200] sm:$0xff]  ;;  %2104 = vmatprep.subr.bf16.mxu0 %v15806_v29  ;;  %v15840_v41 = vcombine.high %v432_v38, %v448_v39  ;;  %v464_v43 = vld [vmem:[#allocation3 + $0x208] sm:$0xff]  ;;  %2145 = vmatprep.subr.bf16.mxu1 %v15808_v35  ;;  %v15837_v45 = vcombine.low %v431_v32, %v447_v33  ;;  %v401_v32 = vld [vmem:[#allocation3 + $0x10] sm:$0xff] }
 0x25b   : > { %v479_v42 = vld [vmem:[#allocation3 + $0x280] sm:$0xff]  ;;  %v480_v44 = vld [vmem:[#allocation3 + $0x288] sm:$0xff]  ;;  %2105 = vmatpush1.bf16.msra.mxu0 %v15805_v31  ;;  %2146 = vmatpush1.bf16.msra.mxu1 %v15807_v36  ;;  %v15839_v46 = vcombine.low %v432_v38, %v448_v39  ;;  %v417_v33 = vld [vmem:[#allocation3 + $0x90] sm:$0xff] }
 0x25c   : > { %2106 = vmatprep.subr.bf16.mxu0 %v15838_v37  ;;  %v15870_v47 = vcombine.high %v463_v40, %v479_v42  ;;  %2147 = vmatprep.subr.bf16.mxu1 %v15840_v41  ;;  %v15872_v48 = vcombine.high %v464_v43, %v480_v44  ;;  %v495_v49 = vld [vmem:[#allocation3 + $0x300] sm:$0xff]  ;;  %v496_v51 = vld [vmem:[#allocation3 + $0x308] sm:$0xff]  ;;  %v15869_v53 = vcombine.low %v463_v40, %v479_v42  ;;  %v402_v35 = vld [vmem:[#allocation3 + $0x18] sm:$0xff] }
 0x25d   : > { %v511_v50 = vld [vmem:[#allocation3 + $0x380] sm:$0xff]  ;;  %v512_v52 = vld [vmem:[#allocation3 + $0x388] sm:$0xff]  ;;  %v15871_v54 = vcombine.low %v464_v43, %v480_v44  ;;  %v418_v36 = vld [vmem:[#allocation3 + $0x98] sm:$0xff]  ;;  %v15810_v39 = vcombine.high %v401_v32, %v417_v33  ;;  %v20830_v43 = vpack.c.bf16 %v20409_v25, %v20409_v25 }
 0x25e   : > { %v15902_v55 = vcombine.high %v495_v49, %v511_v50  ;;  %v15904_v56 = vcombine.high %v496_v51, %v512_v52  ;;  %v527_v57 = vld [vmem:[#allocation3 + $0x400] sm:$0xff]  ;;  %v528_v59 = vld [vmem:[#allocation3 + $0x408] sm:$0xff]  ;;  %v15901_v61 = vcombine.low %v495_v49, %v511_v50  ;;  %v15903_v62 = vcombine.low %v496_v51, %v512_v52  ;;  %v433_v41 = vld [vmem:[#allocation3 + $0x110] sm:$0xff] }
 0x25f   : > { %2107 = vmatpush1.bf16.msra.mxu0 %v15837_v45  ;;  %2148 = vmatpush1.bf16.msra.mxu1 %v15839_v46  ;;  %v543_v58 = vld [vmem:[#allocation3 + $0x480] sm:$0xff]  ;;  %v544_v60 = vld [vmem:[#allocation3 + $0x488] sm:$0xff]  ;;  %v15812_v40 = vcombine.high %v402_v35, %v418_v36  ;;  %v449_v42 = vld [vmem:[#allocation3 + $0x190] sm:$0xff]  ;;  %v15809_v46 = vcombine.low %v401_v32, %v417_v33 }
 0x260   : > { %2108 = vmatprep.subr.bf16.mxu0 %v15870_v47  ;;  %2149 = vmatprep.subr.bf16.mxu1 %v15872_v48  ;;  %v15934_v63 = vcombine.high %v527_v57, %v543_v58  ;;  %v15936_v6 = vcombine.high %v528_v59, %v544_v60  ;;  %v559_v7 = vld [vmem:[#allocation3 + $0x500] sm:$0xff]  ;;  %v560_v9 = vld [vmem:[#allocation3 + $0x508] sm:$0xff]  ;;  %v15933_v11 = vcombine.low %v527_v57, %v543_v58  ;;  %v434_v44 = vld [vmem:[#allocation3 + $0x118] sm:$0xff] }
 0x261   : > { %v575_v8 = vld [vmem:[#allocation3 + $0x580] sm:$0xff]  ;;  %v576_v10 = vld [vmem:[#allocation3 + $0x588] sm:$0xff]  ;;  %v15935_v12 = vcombine.low %v528_v59, %v544_v60  ;;  %v450_v45 = vld [vmem:[#allocation3 + $0x198] sm:$0xff]  ;;  %v15811_v47 = vcombine.low %v402_v35, %v418_v36  ;;  %v15842_v48 = vcombine.high %v433_v41, %v449_v42  ;;  %v15841_v25 = vcombine.low %v433_v41, %v449_v42 }
 0x262   : > { %v15966_v13 = vcombine.high %v559_v7, %v575_v8  ;;  %v15968_v14 = vcombine.high %v560_v9, %v576_v10  ;;  %v591_v15 = vld [vmem:[#allocation3 + $0x600] sm:$0xff]  ;;  %v592_v17 = vld [vmem:[#allocation3 + $0x608] sm:$0xff]  ;;  %v15965_v19 = vcombine.low %v559_v7, %v575_v8  ;;  %v15967_v20 = vcombine.low %v560_v9, %v576_v10  ;;  %v465_v50 = vld [vmem:[#allocation3 + $0x210] sm:$0xff] }
 0x263   : > { %2109 = vmatpush1.bf16.msra.mxu0 %v15869_v53  ;;  %2150 = vmatpush1.bf16.msra.mxu1 %v15871_v54  ;;  %v607_v16 = vld [vmem:[#allocation3 + $0x680] sm:$0xff]  ;;  %v608_v18 = vld [vmem:[#allocation3 + $0x688] sm:$0xff]  ;;  %v15844_v49 = vcombine.high %v434_v44, %v450_v45  ;;  %v481_v51 = vld [vmem:[#allocation3 + $0x290] sm:$0xff]  ;;  %v15843_v54 = vcombine.low %v434_v44, %v450_v45 }
 0x264   : > { %2110 = vmatprep.subr.bf16.mxu0 %v15902_v55  ;;  %2151 = vmatprep.subr.bf16.mxu1 %v15904_v56  ;;  %v15998_v21 = vcombine.high %v591_v15, %v607_v16  ;;  %v16000_v22 = vcombine.high %v592_v17, %v608_v18  ;;  %v623_v23 = vld [vmem:[#allocation3 + $0x700] sm:$0xff]  ;;  %v624_v26 = vld [vmem:[#allocation3 + $0x708] sm:$0xff]  ;;  %v15997_v28 = vcombine.low %v591_v15, %v607_v16  ;;  %v466_v52 = vld [vmem:[#allocation3 + $0x218] sm:$0xff] }
 0x265   : > { %v639_v24 = vld [vmem:[#allocation3 + $0x780] sm:$0xff]  ;;  %v640_v27 = vld [vmem:[#allocation3 + $0x788] sm:$0xff]  ;;  %v15999_v29 = vcombine.low %v592_v17, %v608_v18  ;;  %v482_v53 = vld [vmem:[#allocation3 + $0x298] sm:$0xff]  ;;  %v15874_v55 = vcombine.high %v465_v50, %v481_v51 }
 0x266   : > { %v16030_v30 = vcombine.high %v623_v23, %v639_v24  ;;  %v16032_v31 = vcombine.high %v624_v26, %v640_v27  ;;  %v16029_v37 = vcombine.low %v623_v23, %v639_v24  ;;  %v16031_v38 = vcombine.low %v624_v26, %v640_v27  ;;  %v497_v57 = vld [vmem:[#allocation3 + $0x310] sm:$0xff]  ;;  %v498_v59 = vld [vmem:[#allocation3 + $0x318] sm:$0xff]  ;;  %v403_v41 = vld [vmem:[#allocation3 + $0x20] sm:$0xff] }
 0x267   : > { %2111 = vmatpush1.bf16.msra.mxu0 %v15901_v61  ;;  %2152 = vmatpush1.bf16.msra.mxu1 %v15903_v62  ;;  %v15876_v56 = vcombine.high %v466_v52, %v482_v53  ;;  %v513_v58 = vld [vmem:[#allocation3 + $0x390] sm:$0xff]  ;;  %v514_v60 = vld [vmem:[#allocation3 + $0x398] sm:$0xff]  ;;  %v15873_v61 = vcombine.low %v465_v50, %v481_v51  ;;  %v15875_v62 = vcombine.low %v466_v52, %v482_v53  ;;  %v419_v42 = vld [vmem:[#allocation3 + $0xa0] sm:$0xff] }
 0x268   : > { %2112 = vmatprep.subr.bf16.mxu0 %v15934_v63  ;;  %2153 = vmatprep.subr.bf16.mxu1 %v15936_v6  ;;  %v15906_v63 = vcombine.high %v497_v57, %v513_v58  ;;  %v15908_v6 = vcombine.high %v498_v59, %v514_v60  ;;  %v529_v7 = vld [vmem:[#allocation3 + $0x410] sm:$0xff]  ;;  %v530_v9 = vld [vmem:[#allocation3 + $0x418] sm:$0xff]  ;;  %v404_v44 = vld [vmem:[#allocation3 + $0x28] sm:$0xff] }
 0x269   : > { %v545_v8 = vld [vmem:[#allocation3 + $0x490] sm:$0xff]  ;;  %v546_v10 = vld [vmem:[#allocation3 + $0x498] sm:$0xff]  ;;  %v420_v45 = vld [vmem:[#allocation3 + $0xa8] sm:$0xff] }
 0x26a   : > { %v561_v15 = vld [vmem:[#allocation3 + $0x510] sm:$0xff]  ;;  %v562_v17 = vld [vmem:[#allocation3 + $0x518] sm:$0xff]  ;;  %v435_v50 = vld [vmem:[#allocation3 + $0x120] sm:$0xff] }
 0x26b   : > { %2113 = vmatpush1.bf16.msra.mxu0 %v15933_v11  ;;  %2154 = vmatpush1.bf16.msra.mxu1 %v15935_v12  ;;  %v15905_v11 = vcombine.low %v497_v57, %v513_v58  ;;  %v15907_v12 = vcombine.low %v498_v59, %v514_v60  ;;  %v577_v16 = vld [vmem:[#allocation3 + $0x590] sm:$0xff]  ;;  %v578_v18 = vld [vmem:[#allocation3 + $0x598] sm:$0xff]  ;;  %v451_v51 = vld [vmem:[#allocation3 + $0x1a0] sm:$0xff] }
 0x26c   : > { %2114 = vmatprep.subr.bf16.mxu0 %v15966_v13  ;;  %2155 = vmatprep.subr.bf16.mxu1 %v15968_v14  ;;  %v15938_v13 = vcombine.high %v529_v7, %v545_v8  ;;  %v15940_v14 = vcombine.high %v530_v9, %v546_v10  ;;  %v593_v23 = vld [vmem:[#allocation3 + $0x610] sm:$0xff]  ;;  %v594_v26 = vld [vmem:[#allocation3 + $0x618] sm:$0xff]  ;;  %v436_v52 = vld [vmem:[#allocation3 + $0x128] sm:$0xff]  ;;  %v15846_v57 = vcombine.high %v435_v50, %v451_v51 }
 0x26d   : > { %v609_v24 = vld [vmem:[#allocation3 + $0x690] sm:$0xff]  ;;  %v610_v27 = vld [vmem:[#allocation3 + $0x698] sm:$0xff]  ;;  %v452_v53 = vld [vmem:[#allocation3 + $0x1a8] sm:$0xff] }
 0x26e   : > { %v625_v32 = vld [vmem:[#allocation3 + $0x710] sm:$0xff]  ;;  %v626_v35 = vld [vmem:[#allocation3 + $0x718] sm:$0xff]  ;;  %v468_v58 = vld [vmem:[#allocation3 + $0x228] sm:$0xff]  ;;  %v15848_v60 = vcombine.high %v436_v52, %v452_v53 }
 0x26f   : > { %2115 = vmatpush1.bf16.msra.mxu0 %v15965_v19  ;;  %2156 = vmatpush1.bf16.msra.mxu1 %v15967_v20  ;;  %v15937_v19 = vcombine.low %v529_v7, %v545_v8  ;;  %v15939_v20 = vcombine.low %v530_v9, %v546_v10  ;;  %v641_v33 = vld [vmem:[#allocation3 + $0x790] sm:$0xff]  ;;  %v642_v36 = vld [vmem:[#allocation3 + $0x798] sm:$0xff]  ;;  %v484_v59 = vld [vmem:[#allocation3 + $0x2a8] sm:$0xff] }
 0x270   : > { %2116 = vmatprep.subr.bf16.mxu0 %v15998_v21  ;;  %2157 = vmatprep.subr.bf16.mxu1 %v16000_v22  ;;  %v15970_v21 = vcombine.high %v561_v15, %v577_v16  ;;  %v15972_v22 = vcombine.high %v562_v17, %v578_v18  ;;  %v500_v8 = vld [vmem:[#allocation3 + $0x328] sm:$0xff]  ;;  %v15880_v10 = vcombine.high %v468_v58, %v484_v59 }
 0x271   : > { %v516_v9 = vld [vmem:[#allocation3 + $0x3a8] sm:$0xff] }
 0x273   : > { %2117 = vmatpush1.bf16.msra.mxu0 %v15997_v28  ;;  %2158 = vmatpush1.bf16.msra.mxu1 %v15999_v29  ;;  %v15969_v28 = vcombine.low %v561_v15, %v577_v16  ;;  %v15971_v29 = vcombine.low %v562_v17, %v578_v18  ;;  %v532_v16 = vld [vmem:[#allocation3 + $0x428] sm:$0xff]  ;;  %v15912_v18 = vcombine.high %v500_v8, %v516_v9 }
 0x274   : > { %2118 = vmatprep.subr.bf16.mxu0 %v16030_v30  ;;  %2159 = vmatprep.subr.bf16.mxu1 %v16032_v31  ;;  %v16002_v30 = vcombine.high %v593_v23, %v609_v24  ;;  %v16004_v31 = vcombine.high %v594_v26, %v610_v27  ;;  %v548_v17 = vld [vmem:[#allocation3 + $0x4a8] sm:$0xff] }
 0x277   : > { %2119 = vmatpush1.bf16.msra.mxu0 %v16029_v37  ;;  %2160 = vmatpush1.bf16.msra.mxu1 %v16031_v38  ;;  %v16001_v37 = vcombine.low %v593_v23, %v609_v24  ;;  %v16003_v38 = vcombine.low %v594_v26, %v610_v27  ;;  %v564_v24 = vld [vmem:[#allocation3 + $0x528] sm:$0xff]  ;;  %v15944_v27 = vcombine.high %v532_v16, %v548_v17 }
 0x278   : > { %2186 = vmatprep.subr.bf16.mxu0 %v15810_v39  ;;  %2227 = vmatprep.subr.bf16.mxu1 %v15812_v40  ;;  %v16034_v39 = vcombine.high %v625_v32, %v641_v33  ;;  %v16036_v40 = vcombine.high %v626_v35, %v642_v36  ;;  %v580_v26 = vld [vmem:[#allocation3 + $0x5a8] sm:$0xff] }
 0x27a   : > { %2137 = vmatmul.mubr.bf16.vlgmr.msra.gmra.mrb[0].mxu0 %v20830_v43  ;;  %2178 = vmatmul.mubr.bf16.vlgmr.msra.gmra.mrb[0].mxu1 %v20830_v43 }
 0x27b   : > { %2187 = vmatpush1.bf16.msra.mxu0 %v15809_v46  ;;  %2228 = vmatpush1.bf16.msra.mxu1 %v15811_v47  ;;  %v16033_v46 = vcombine.low %v625_v32, %v641_v33  ;;  %v16035_v47 = vcombine.low %v626_v35, %v642_v36  ;;  %v596_v33 = vld [vmem:[#allocation3 + $0x628] sm:$0xff]  ;;  %v15976_v36 = vcombine.high %v564_v24, %v580_v26 }
 0x27c   : > { %2188 = vmatprep.subr.bf16.mxu0 %v15842_v48  ;;  %2229 = vmatprep.subr.bf16.mxu1 %v15844_v49  ;;  %v15814_v48 = vcombine.high %v403_v41, %v419_v42  ;;  %v15816_v49 = vcombine.high %v404_v44, %v420_v45  ;;  %v612_v35 = vld [vmem:[#allocation3 + $0x6a8] sm:$0xff] }
 0x27d   : > { %2218 = vmatprep.mubr.bf16.mxu0 %v20441_v34  ;;  %2259 = vmatprep.mubr.bf16.mxu1 %v20441_v34 }
 0x27f   : > { %2189 = vmatpush1.bf16.msra.mxu0 %v15841_v25  ;;  %2230 = vmatpush1.bf16.msra.mxu1 %v15843_v54  ;;  %v15813_v25 = vcombine.low %v403_v41, %v419_v42  ;;  %v467_v54 = vld [vmem:[#allocation3 + $0x220] sm:$0xff]  ;;  %v628_v42 = vld [vmem:[#allocation3 + $0x728] sm:$0xff] }
 0x280   : > { %2190 = vmatprep.subr.bf16.mxu0 %v15874_v55  ;;  %2231 = vmatprep.subr.bf16.mxu1 %v15876_v56  ;;  %v483_v55 = vld [vmem:[#allocation3 + $0x2a0] sm:$0xff]  ;;  %v15815_v56 = vcombine.low %v404_v44, %v420_v45  ;;  %v644_v44 = vld [vmem:[#allocation3 + $0x7a8] sm:$0xff]  ;;  %v16008_v45 = vcombine.high %v596_v33, %v612_v35 }
 0x281   : > { %v15878_v7 = vcombine.high %v467_v54, %v483_v55 }
 0x283   : > { %2191 = vmatpush1.bf16.msra.mxu0 %v15873_v61  ;;  %2232 = vmatpush1.bf16.msra.mxu1 %v15875_v62  ;;  %v15845_v61 = vcombine.low %v435_v50, %v451_v51  ;;  %v499_v62 = vld [vmem:[#allocation3 + $0x320] sm:$0xff]  ;;  %v406_v51 = vld [vmem:[#allocation3 + $0x38] sm:$0xff] }
 0x284   : > { %2192 = vmatprep.subr.bf16.mxu0 %v15906_v63  ;;  %2233 = vmatprep.subr.bf16.mxu1 %v15908_v6  ;;  %v515_v63 = vld [vmem:[#allocation3 + $0x3a0] sm:$0xff]  ;;  %v15847_v6 = vcombine.low %v436_v52, %v452_v53  ;;  %v422_v52 = vld [vmem:[#allocation3 + $0xb8] sm:$0xff]  ;;  %v16040_v53 = vcombine.high %v628_v42, %v644_v44 }
 0x285   : > { %v15910_v15 = vcombine.high %v499_v62, %v515_v63 }
 0x287   : > { %2193 = vmatpush1.bf16.msra.mxu0 %v15905_v11  ;;  %2234 = vmatpush1.bf16.msra.mxu1 %v15907_v12  ;;  %v15877_v11 = vcombine.low %v467_v54, %v483_v55  ;;  %v531_v12 = vld [vmem:[#allocation3 + $0x420] sm:$0xff]  ;;  %v437_v54 = vld [vmem:[#allocation3 + $0x130] sm:$0xff] }
 0x288   : > { %2194 = vmatprep.subr.bf16.mxu0 %v15938_v13  ;;  %2235 = vmatprep.subr.bf16.mxu1 %v15940_v14  ;;  %v547_v13 = vld [vmem:[#allocation3 + $0x4a0] sm:$0xff]  ;;  %v15879_v14 = vcombine.low %v468_v58, %v484_v59  ;;  %v453_v55 = vld [vmem:[#allocation3 + $0x1b0] sm:$0xff]  ;;  %v438_v58 = vld [vmem:[#allocation3 + $0x138] sm:$0xff] }
 0x289   : > { %v15942_v23 = vcombine.high %v531_v12, %v547_v13  ;;  %v454_v59 = vld [vmem:[#allocation3 + $0x1b8] sm:$0xff] }
 0x28b   : > { %2195 = vmatpush1.bf16.msra.mxu0 %v15937_v19  ;;  %2236 = vmatpush1.bf16.msra.mxu1 %v15939_v20  ;;  %v15909_v19 = vcombine.low %v499_v62, %v515_v63  ;;  %v563_v20 = vld [vmem:[#allocation3 + $0x520] sm:$0xff]  ;;  %v469_v62 = vld [vmem:[#allocation3 + $0x230] sm:$0xff] }
 0x28c   : > { %2196 = vmatprep.subr.bf16.mxu0 %v15970_v21  ;;  %2237 = vmatprep.subr.bf16.mxu1 %v15972_v22  ;;  %v579_v21 = vld [vmem:[#allocation3 + $0x5a0] sm:$0xff]  ;;  %v15911_v22 = vcombine.low %v500_v8, %v516_v9  ;;  %v485_v63 = vld [vmem:[#allocation3 + $0x2b0] sm:$0xff]  ;;  %v470_v8 = vld [vmem:[#allocation3 + $0x238] sm:$0xff] }
 0x28d   : > { %v15974_v32 = vcombine.high %v563_v20, %v579_v21  ;;  %v486_v9 = vld [vmem:[#allocation3 + $0x2b8] sm:$0xff] }
 0x28f   : > { %2197 = vmatpush1.bf16.msra.mxu0 %v15969_v28  ;;  %2238 = vmatpush1.bf16.msra.mxu1 %v15971_v29  ;;  %v15941_v28 = vcombine.low %v531_v12, %v547_v13  ;;  %v595_v29 = vld [vmem:[#allocation3 + $0x620] sm:$0xff]  ;;  %v501_v12 = vld [vmem:[#allocation3 + $0x330] sm:$0xff] }
 0x290   : > { %2198 = vmatprep.subr.bf16.mxu0 %v16002_v30  ;;  %2239 = vmatprep.subr.bf16.mxu1 %v16004_v31  ;;  %v611_v30 = vld [vmem:[#allocation3 + $0x6a0] sm:$0xff]  ;;  %v15943_v31 = vcombine.low %v532_v16, %v548_v17  ;;  %v517_v13 = vld [vmem:[#allocation3 + $0x3b0] sm:$0xff]  ;;  %v502_v16 = vld [vmem:[#allocation3 + $0x338] sm:$0xff] }
 0x291   : > { %v16006_v41 = vcombine.high %v595_v29, %v611_v30  ;;  %v518_v17 = vld [vmem:[#allocation3 + $0x3b8] sm:$0xff] }
 0x293   : > { %2199 = vmatpush1.bf16.msra.mxu0 %v16001_v37  ;;  %2240 = vmatpush1.bf16.msra.mxu1 %v16003_v38  ;;  %v15973_v37 = vcombine.low %v563_v20, %v579_v21  ;;  %v627_v38 = vld [vmem:[#allocation3 + $0x720] sm:$0xff]  ;;  %v533_v20 = vld [vmem:[#allocation3 + $0x430] sm:$0xff] }
 0x294   : > { %2200 = vmatprep.subr.bf16.mxu0 %v16034_v39  ;;  %2241 = vmatprep.subr.bf16.mxu1 %v16036_v40  ;;  %v643_v39 = vld [vmem:[#allocation3 + $0x7a0] sm:$0xff]  ;;  %v15975_v40 = vcombine.low %v564_v24, %v580_v26  ;;  %v549_v21 = vld [vmem:[#allocation3 + $0x4b0] sm:$0xff]  ;;  %v534_v24 = vld [vmem:[#allocation3 + $0x438] sm:$0xff] }
 0x295   : > { %v16038_v50 = vcombine.high %v627_v38, %v643_v39  ;;  %v550_v26 = vld [vmem:[#allocation3 + $0x4b8] sm:$0xff] }
 0x297   : > { %2201 = vmatpush1.bf16.msra.mxu0 %v16033_v46  ;;  %2242 = vmatpush1.bf16.msra.mxu1 %v16035_v47  ;;  %v16005_v46 = vcombine.low %v595_v29, %v611_v30  ;;  %v405_v47 = vld [vmem:[#allocation3 + $0x30] sm:$0xff] }
 0x298   : > { %2268 = vmatprep.subr.bf16.mxu0 %v15814_v48  ;;  %2309 = vmatprep.subr.bf16.mxu1 %v15816_v49  ;;  %v421_v48 = vld [vmem:[#allocation3 + $0xb0] sm:$0xff]  ;;  %v16007_v49 = vcombine.low %v596_v33, %v612_v35  ;;  %v566_v33 = vld [vmem:[#allocation3 + $0x538] sm:$0xff] }
 0x299   : > { %v565_v29 = vld [vmem:[#allocation3 + $0x530] sm:$0xff]  ;;  %v582_v35 = vld [vmem:[#allocation3 + $0x5b8] sm:$0xff] }
 0x29a   : > { %2219 = vmatmul.mubr.bf16.vlgmr.msra.gmra.mrb[4].mxu0 %v20830_v43  ;;  %2260 = vmatmul.mubr.bf16.vlgmr.msra.gmra.mrb[4].mxu1 %v20830_v43  ;;  %v581_v30 = vld [vmem:[#allocation3 + $0x5b0] sm:$0xff] }
 0x29b   : > { %2269 = vmatpush1.bf16.msra.mxu0 %v15813_v25  ;;  %2310 = vmatpush1.bf16.msra.mxu1 %v15815_v56  ;;  %v16037_v25 = vcombine.low %v627_v38, %v643_v39  ;;  %v16039_v56 = vcombine.low %v628_v42, %v644_v44  ;;  %v597_v38 = vld [vmem:[#allocation3 + $0x630] sm:$0xff]  ;;  %v598_v42 = vld [vmem:[#allocation3 + $0x638] sm:$0xff] }
 0x29c   : > { %2270 = vmatprep.subr.bf16.mxu0 %v15846_v57  ;;  %2311 = vmatprep.subr.bf16.mxu1 %v15848_v60  ;;  %v15818_v57 = vcombine.high %v405_v47, %v421_v48  ;;  %v15820_v60 = vcombine.high %v406_v51, %v422_v52  ;;  %v613_v39 = vld [vmem:[#allocation3 + $0x6b0] sm:$0xff]  ;;  %v614_v44 = vld [vmem:[#allocation3 + $0x6b8] sm:$0xff] }
 0x29d   : > { %2300 = vmatprep.mubr.bf16.mxu0 %v20441_v34  ;;  %2341 = vmatprep.mubr.bf16.mxu1 %v20441_v34 }
 0x29f   : > { %2271 = vmatpush1.bf16.msra.mxu0 %v15845_v61  ;;  %2312 = vmatpush1.bf16.msra.mxu1 %v15847_v6  ;;  %v15817_v61 = vcombine.low %v405_v47, %v421_v48  ;;  %v15819_v6 = vcombine.low %v406_v51, %v422_v52  ;;  %v629_v47 = vld [vmem:[#allocation3 + $0x730] sm:$0xff]  ;;  %v630_v51 = vld [vmem:[#allocation3 + $0x738] sm:$0xff] }
 0x2a0   : > { %2272 = vmatprep.subr.bf16.mxu0 %v15878_v7  ;;  %2313 = vmatprep.subr.bf16.mxu1 %v15880_v10  ;;  %v15850_v7 = vcombine.high %v437_v54, %v453_v55  ;;  %v15852_v10 = vcombine.high %v438_v58, %v454_v59  ;;  %v645_v48 = vld [vmem:[#allocation3 + $0x7b0] sm:$0xff]  ;;  %v646_v52 = vld [vmem:[#allocation3 + $0x7b8] sm:$0xff] }
 0x2a3   : > { %2273 = vmatpush1.bf16.msra.mxu0 %v15877_v11  ;;  %2314 = vmatpush1.bf16.msra.mxu1 %v15879_v14  ;;  %v15849_v11 = vcombine.low %v437_v54, %v453_v55  ;;  %v15851_v14 = vcombine.low %v438_v58, %v454_v59  ;;  %v407_v54 = vld [vmem:[#allocation3 + $0x40] sm:$0xff]  ;;  %v408_v58 = vld [vmem:[#allocation3 + $0x48] sm:$0xff] }
 0x2a4   : > { %2274 = vmatprep.subr.bf16.mxu0 %v15910_v15  ;;  %2315 = vmatprep.subr.bf16.mxu1 %v15912_v18  ;;  %v15882_v15 = vcombine.high %v469_v62, %v485_v63  ;;  %v15884_v18 = vcombine.high %v470_v8, %v486_v9  ;;  %v423_v55 = vld [vmem:[#allocation3 + $0xc0] sm:$0xff]  ;;  %v424_v59 = vld [vmem:[#allocation3 + $0xc8] sm:$0xff] }
 0x2a7   : > { %2275 = vmatpush1.bf16.msra.mxu0 %v15909_v19  ;;  %2316 = vmatpush1.bf16.msra.mxu1 %v15911_v22  ;;  %v15881_v19 = vcombine.low %v469_v62, %v485_v63  ;;  %v15883_v22 = vcombine.low %v470_v8, %v486_v9  ;;  %v439_v62 = vld [vmem:[#allocation3 + $0x140] sm:$0xff]  ;;  %v440_v8 = vld [vmem:[#allocation3 + $0x148] sm:$0xff] }
 0x2a8   : > { %2276 = vmatprep.subr.bf16.mxu0 %v15942_v23  ;;  %2317 = vmatprep.subr.bf16.mxu1 %v15944_v27  ;;  %v15914_v23 = vcombine.high %v501_v12, %v517_v13  ;;  %v15916_v27 = vcombine.high %v502_v16, %v518_v17  ;;  %v455_v63 = vld [vmem:[#allocation3 + $0x1c0] sm:$0xff]  ;;  %v456_v9 = vld [vmem:[#allocation3 + $0x1c8] sm:$0xff] }
 0x2ab   : > { %2277 = vmatpush1.bf16.msra.mxu0 %v15941_v28  ;;  %2318 = vmatpush1.bf16.msra.mxu1 %v15943_v31  ;;  %v15913_v28 = vcombine.low %v501_v12, %v517_v13  ;;  %v15915_v31 = vcombine.low %v502_v16, %v518_v17  ;;  %v471_v12 = vld [vmem:[#allocation3 + $0x240] sm:$0xff]  ;;  %v472_v16 = vld [vmem:[#allocation3 + $0x248] sm:$0xff] }
 0x2ac   : > { %2278 = vmatprep.subr.bf16.mxu0 %v15974_v32  ;;  %2319 = vmatprep.subr.bf16.mxu1 %v15976_v36  ;;  %v15946_v32 = vcombine.high %v533_v20, %v549_v21  ;;  %v15948_v36 = vcombine.high %v534_v24, %v550_v26  ;;  %v487_v13 = vld [vmem:[#allocation3 + $0x2c0] sm:$0xff]  ;;  %v488_v17 = vld [vmem:[#allocation3 + $0x2c8] sm:$0xff] }
 0x2af   : > { %2279 = vmatpush1.bf16.msra.mxu0 %v15973_v37  ;;  %2320 = vmatpush1.bf16.msra.mxu1 %v15975_v40  ;;  %v15945_v37 = vcombine.low %v533_v20, %v549_v21  ;;  %v15947_v40 = vcombine.low %v534_v24, %v550_v26  ;;  %v503_v20 = vld [vmem:[#allocation3 + $0x340] sm:$0xff]  ;;  %v504_v24 = vld [vmem:[#allocation3 + $0x348] sm:$0xff] }
 0x2b0   : > { %2280 = vmatprep.subr.bf16.mxu0 %v16006_v41  ;;  %2321 = vmatprep.subr.bf16.mxu1 %v16008_v45  ;;  %v15978_v41 = vcombine.high %v565_v29, %v581_v30  ;;  %v15980_v45 = vcombine.high %v566_v33, %v582_v35  ;;  %v519_v21 = vld [vmem:[#allocation3 + $0x3c0] sm:$0xff]  ;;  %v520_v26 = vld [vmem:[#allocation3 + $0x3c8] sm:$0xff] }
 0x2b3   : > { %2281 = vmatpush1.bf16.msra.mxu0 %v16005_v46  ;;  %2322 = vmatpush1.bf16.msra.mxu1 %v16007_v49  ;;  %v15977_v46 = vcombine.low %v565_v29, %v581_v30  ;;  %v15979_v49 = vcombine.low %v566_v33, %v582_v35  ;;  %v535_v29 = vld [vmem:[#allocation3 + $0x440] sm:$0xff]  ;;  %v536_v33 = vld [vmem:[#allocation3 + $0x448] sm:$0xff] }
 0x2b4   : > { %2282 = vmatprep.subr.bf16.mxu0 %v16038_v50  ;;  %2323 = vmatprep.subr.bf16.mxu1 %v16040_v53  ;;  %v16010_v50 = vcombine.high %v597_v38, %v613_v39  ;;  %v16012_v53 = vcombine.high %v598_v42, %v614_v44  ;;  %v551_v30 = vld [vmem:[#allocation3 + $0x4c0] sm:$0xff]  ;;  %v552_v35 = vld [vmem:[#allocation3 + $0x4c8] sm:$0xff] }
 0x2b7   : > { %2283 = vmatpush1.bf16.msra.mxu0 %v16037_v25  ;;  %2324 = vmatpush1.bf16.msra.mxu1 %v16039_v56  ;;  %v16009_v25 = vcombine.low %v597_v38, %v613_v39  ;;  %v16011_v56 = vcombine.low %v598_v42, %v614_v44  ;;  %v567_v38 = vld [vmem:[#allocation3 + $0x540] sm:$0xff]  ;;  %v568_v42 = vld [vmem:[#allocation3 + $0x548] sm:$0xff] }
 0x2b8   : > { %2350 = vmatprep.subr.bf16.mxu0 %v15818_v57  ;;  %2391 = vmatprep.subr.bf16.mxu1 %v15820_v60  ;;  %v16042_v57 = vcombine.high %v629_v47, %v645_v48  ;;  %v16044_v60 = vcombine.high %v630_v51, %v646_v52  ;;  %v583_v39 = vld [vmem:[#allocation3 + $0x5c0] sm:$0xff]  ;;  %v584_v44 = vld [vmem:[#allocation3 + $0x5c8] sm:$0xff] }
 0x2ba   : > { %2301 = vmatmul.mubr.bf16.vlgmr.msra.gmra.mrb[8].mxu0 %v20830_v43  ;;  %2342 = vmatmul.mubr.bf16.vlgmr.msra.gmra.mrb[8].mxu1 %v20830_v43 }
 0x2bb   : > { %2351 = vmatpush1.bf16.msra.mxu0 %v15817_v61  ;;  %2392 = vmatpush1.bf16.msra.mxu1 %v15819_v6  ;;  %v16041_v61 = vcombine.low %v629_v47, %v645_v48  ;;  %v16043_v6 = vcombine.low %v630_v51, %v646_v52  ;;  %v599_v47 = vld [vmem:[#allocation3 + $0x640] sm:$0xff]  ;;  %v600_v51 = vld [vmem:[#allocation3 + $0x648] sm:$0xff] }
 0x2bc   : > { %2352 = vmatprep.subr.bf16.mxu0 %v15850_v7  ;;  %2393 = vmatprep.subr.bf16.mxu1 %v15852_v10  ;;  %v15822_v7 = vcombine.high %v407_v54, %v423_v55  ;;  %v15824_v10 = vcombine.high %v408_v58, %v424_v59  ;;  %v615_v48 = vld [vmem:[#allocation3 + $0x6c0] sm:$0xff]  ;;  %v616_v52 = vld [vmem:[#allocation3 + $0x6c8] sm:$0xff] }
 0x2bd   : > { %2382 = vmatprep.mubr.bf16.mxu0 %v20441_v34  ;;  %2423 = vmatprep.mubr.bf16.mxu1 %v20441_v34 }
 0x2bf   : > { %2353 = vmatpush1.bf16.msra.mxu0 %v15849_v11  ;;  %2394 = vmatpush1.bf16.msra.mxu1 %v15851_v14  ;;  %v15821_v11 = vcombine.low %v407_v54, %v423_v55  ;;  %v15823_v14 = vcombine.low %v408_v58, %v424_v59  ;;  %v631_v54 = vld [vmem:[#allocation3 + $0x740] sm:$0xff]  ;;  %v632_v58 = vld [vmem:[#allocation3 + $0x748] sm:$0xff] }
 0x2c0   : > { %2354 = vmatprep.subr.bf16.mxu0 %v15882_v15  ;;  %2395 = vmatprep.subr.bf16.mxu1 %v15884_v18  ;;  %v15854_v15 = vcombine.high %v439_v62, %v455_v63  ;;  %v15856_v18 = vcombine.high %v440_v8, %v456_v9  ;;  %v647_v55 = vld [vmem:[#allocation3 + $0x7c0] sm:$0xff]  ;;  %v648_v59 = vld [vmem:[#allocation3 + $0x7c8] sm:$0xff] }
 0x2c3   : > { %2355 = vmatpush1.bf16.msra.mxu0 %v15881_v19  ;;  %2396 = vmatpush1.bf16.msra.mxu1 %v15883_v22  ;;  %v15853_v19 = vcombine.low %v439_v62, %v455_v63  ;;  %v15855_v22 = vcombine.low %v440_v8, %v456_v9  ;;  %v409_v62 = vld [vmem:[#allocation3 + $0x50] sm:$0xff]  ;;  %v410_v8 = vld [vmem:[#allocation3 + $0x58] sm:$0xff] }
 0x2c4   : > { %2356 = vmatprep.subr.bf16.mxu0 %v15914_v23  ;;  %2397 = vmatprep.subr.bf16.mxu1 %v15916_v27  ;;  %v15886_v23 = vcombine.high %v471_v12, %v487_v13  ;;  %v15888_v27 = vcombine.high %v472_v16, %v488_v17  ;;  %v425_v63 = vld [vmem:[#allocation3 + $0xd0] sm:$0xff]  ;;  %v426_v9 = vld [vmem:[#allocation3 + $0xd8] sm:$0xff] }
 0x2c7   : > { %2357 = vmatpush1.bf16.msra.mxu0 %v15913_v28  ;;  %2398 = vmatpush1.bf16.msra.mxu1 %v15915_v31  ;;  %v15885_v28 = vcombine.low %v471_v12, %v487_v13  ;;  %v15887_v31 = vcombine.low %v472_v16, %v488_v17  ;;  %v441_v12 = vld [vmem:[#allocation3 + $0x150] sm:$0xff]  ;;  %v442_v16 = vld [vmem:[#allocation3 + $0x158] sm:$0xff] }
 0x2c8   : > { %2358 = vmatprep.subr.bf16.mxu0 %v15946_v32  ;;  %2399 = vmatprep.subr.bf16.mxu1 %v15948_v36  ;;  %v15918_v32 = vcombine.high %v503_v20, %v519_v21  ;;  %v15920_v36 = vcombine.high %v504_v24, %v520_v26  ;;  %v457_v13 = vld [vmem:[#allocation3 + $0x1d0] sm:$0xff]  ;;  %v458_v17 = vld [vmem:[#allocation3 + $0x1d8] sm:$0xff] }
 0x2cb   : > { %2359 = vmatpush1.bf16.msra.mxu0 %v15945_v37  ;;  %2400 = vmatpush1.bf16.msra.mxu1 %v15947_v40  ;;  %v15917_v37 = vcombine.low %v503_v20, %v519_v21  ;;  %v15919_v40 = vcombine.low %v504_v24, %v520_v26  ;;  %v15827_v20 = vcombine.low %v410_v8, %v426_v9  ;;  %v489_v24 = vld [vmem:[#allocation3 + $0x2d0] sm:$0xff]  ;;  %v474_v26 = vld [vmem:[#allocation3 + $0x258] sm:$0xff] }
 0x2cc   : > { %2360 = vmatprep.subr.bf16.mxu0 %v15978_v41  ;;  %2401 = vmatprep.subr.bf16.mxu1 %v15980_v45  ;;  %v15950_v41 = vcombine.high %v535_v29, %v551_v30  ;;  %v15952_v45 = vcombine.high %v536_v33, %v552_v35  ;;  %v15858_v21 = vcombine.high %v441_v12, %v457_v13 }
 0x2cf   : > { %2361 = vmatpush1.bf16.msra.mxu0 %v15977_v46  ;;  %2402 = vmatpush1.bf16.msra.mxu1 %v15979_v49  ;;  %v15949_v46 = vcombine.low %v535_v29, %v551_v30  ;;  %v15951_v49 = vcombine.low %v536_v33, %v552_v35  ;;  %v505_v29 = vld [vmem:[#allocation3 + $0x350] sm:$0xff]  ;;  %v506_v33 = vld [vmem:[#allocation3 + $0x358] sm:$0xff] }
 0x2d0   : > { %2362 = vmatprep.subr.bf16.mxu0 %v16010_v50  ;;  %2403 = vmatprep.subr.bf16.mxu1 %v16012_v53  ;;  %v15982_v50 = vcombine.high %v567_v38, %v583_v39  ;;  %v15984_v53 = vcombine.high %v568_v42, %v584_v44  ;;  %v521_v30 = vld [vmem:[#allocation3 + $0x3d0] sm:$0xff]  ;;  %v522_v35 = vld [vmem:[#allocation3 + $0x3d8] sm:$0xff] }
 0x2d3   : > { %2363 = vmatpush1.bf16.msra.mxu0 %v16009_v25  ;;  %2404 = vmatpush1.bf16.msra.mxu1 %v16011_v56  ;;  %v15981_v25 = vcombine.low %v567_v38, %v583_v39  ;;  %v15983_v56 = vcombine.low %v568_v42, %v584_v44  ;;  %v537_v38 = vld [vmem:[#allocation3 + $0x450] sm:$0xff]  ;;  %v538_v42 = vld [vmem:[#allocation3 + $0x458] sm:$0xff] }
 0x2d4   : > { %2364 = vmatprep.subr.bf16.mxu0 %v16042_v57  ;;  %2405 = vmatprep.subr.bf16.mxu1 %v16044_v60  ;;  %v16014_v57 = vcombine.high %v599_v47, %v615_v48  ;;  %v16016_v60 = vcombine.high %v600_v51, %v616_v52  ;;  %v553_v39 = vld [vmem:[#allocation3 + $0x4d0] sm:$0xff]  ;;  %v554_v44 = vld [vmem:[#allocation3 + $0x4d8] sm:$0xff] }
 0x2d7   : > { %2365 = vmatpush1.bf16.msra.mxu0 %v16041_v61  ;;  %2406 = vmatpush1.bf16.msra.mxu1 %v16043_v6  ;;  %v16013_v61 = vcombine.low %v599_v47, %v615_v48  ;;  %v16015_v6 = vcombine.low %v600_v51, %v616_v52  ;;  %v569_v47 = vld [vmem:[#allocation3 + $0x550] sm:$0xff]  ;;  %v570_v51 = vld [vmem:[#allocation3 + $0x558] sm:$0xff] }
 0x2d8   : > { %2432 = vmatprep.subr.bf16.mxu0 %v15822_v7  ;;  %2473 = vmatprep.subr.bf16.mxu1 %v15824_v10  ;;  %v16046_v7 = vcombine.high %v631_v54, %v647_v55  ;;  %v16048_v10 = vcombine.high %v632_v58, %v648_v59  ;;  %v585_v48 = vld [vmem:[#allocation3 + $0x5d0] sm:$0xff]  ;;  %v586_v52 = vld [vmem:[#allocation3 + $0x5d8] sm:$0xff] }
 0x2da   : > { %2383 = vmatmul.mubr.bf16.vlgmr.msra.gmra.mrb[12].mxu0 %v20830_v43  ;;  %2424 = vmatmul.mubr.bf16.vlgmr.msra.gmra.mrb[12].mxu1 %v20830_v43 }
 0x2db   : > { %2433 = vmatpush1.bf16.msra.mxu0 %v15821_v11  ;;  %2474 = vmatpush1.bf16.msra.mxu1 %v15823_v14  ;;  %v16045_v11 = vcombine.low %v631_v54, %v647_v55  ;;  %v16047_v14 = vcombine.low %v632_v58, %v648_v59  ;;  %v601_v54 = vld [vmem:[#allocation3 + $0x650] sm:$0xff]  ;;  %v602_v58 = vld [vmem:[#allocation3 + $0x658] sm:$0xff] }
 0x2dc   : > { %2434 = vmatprep.subr.bf16.mxu0 %v15854_v15  ;;  %2475 = vmatprep.subr.bf16.mxu1 %v15856_v18  ;;  %v15826_v15 = vcombine.high %v409_v62, %v425_v63  ;;  %v15828_v18 = vcombine.high %v410_v8, %v426_v9  ;;  %v617_v55 = vld [vmem:[#allocation3 + $0x6d0] sm:$0xff]  ;;  %v618_v59 = vld [vmem:[#allocation3 + $0x6d8] sm:$0xff] }
 0x2dd   : > { %2464 = vmatprep.mubr.bf16.mxu0 %v20441_v34  ;;  %2505 = vmatprep.mubr.bf16.mxu1 %v20441_v34  ;;  %v16020_v8 = vcombine.high %v602_v58, %v618_v59  ;;  %v634_v9 = vld [vmem:[#allocation3 + $0x758] sm:$0xff] }
 0x2df   : > { %2435 = vmatpush1.bf16.msra.mxu0 %v15853_v19  ;;  %2476 = vmatpush1.bf16.msra.mxu1 %v15855_v22  ;;  %v15825_v19 = vcombine.low %v409_v62, %v425_v63  ;;  %v473_v22 = vld [vmem:[#allocation3 + $0x250] sm:$0xff] }
 0x2e0   : > { %2436 = vmatprep.subr.bf16.mxu0 %v15886_v23  ;;  %2477 = vmatprep.subr.bf16.mxu1 %v15888_v27  ;;  %v15860_v23 = vcombine.high %v442_v16, %v458_v17  ;;  %v490_v27 = vld [vmem:[#allocation3 + $0x2d8] sm:$0xff]  ;;  %v633_v62 = vld [vmem:[#allocation3 + $0x750] sm:$0xff] }
 0x2e1   : > { %v649_v63 = vld [vmem:[#allocation3 + $0x7d0] sm:$0xff] }
 0x2e3   : > { %2437 = vmatpush1.bf16.msra.mxu0 %v15885_v28  ;;  %2478 = vmatpush1.bf16.msra.mxu1 %v15887_v31  ;;  %v15857_v28 = vcombine.low %v441_v12, %v457_v13  ;;  %v15859_v31 = vcombine.low %v442_v16, %v458_v17  ;;  %v411_v12 = vld [vmem:[#allocation3 + $0x60] sm:$0xff]  ;;  %v412_v16 = vld [vmem:[#allocation3 + $0x68] sm:$0xff] }
 0x2e4   : > { %2438 = vmatprep.subr.bf16.mxu0 %v15918_v32  ;;  %2479 = vmatprep.subr.bf16.mxu1 %v15920_v36  ;;  %v15890_v32 = vcombine.high %v473_v22, %v489_v24  ;;  %v15892_v36 = vcombine.high %v474_v26, %v490_v27  ;;  %v427_v13 = vld [vmem:[#allocation3 + $0xe0] sm:$0xff]  ;;  %v428_v17 = vld [vmem:[#allocation3 + $0xe8] sm:$0xff] }
 0x2e7   : > { %2439 = vmatpush1.bf16.msra.mxu0 %v15917_v37  ;;  %2480 = vmatpush1.bf16.msra.mxu1 %v15919_v40  ;;  %v15889_v37 = vcombine.low %v473_v22, %v489_v24  ;;  %v15891_v40 = vcombine.low %v474_v26, %v490_v27  ;;  %v15832_v22 = vcombine.high %v412_v16, %v428_v17  ;;  %v459_v24 = vld [vmem:[#allocation3 + $0x1e0] sm:$0xff]  ;;  %v444_v26 = vld [vmem:[#allocation3 + $0x168] sm:$0xff] }
 0x2e8   : > { %2440 = vmatprep.subr.bf16.mxu0 %v15950_v41  ;;  %2481 = vmatprep.subr.bf16.mxu1 %v15952_v45  ;;  %v15922_v41 = vcombine.high %v505_v29, %v521_v30  ;;  %v15924_v45 = vcombine.high %v506_v33, %v522_v35  ;;  %v460_v27 = vld [vmem:[#allocation3 + $0x1e8] sm:$0xff] }
 0x2eb   : > { %2441 = vmatpush1.bf16.msra.mxu0 %v15949_v46  ;;  %2482 = vmatpush1.bf16.msra.mxu1 %v15951_v49  ;;  %v15921_v46 = vcombine.low %v505_v29, %v521_v30  ;;  %v15923_v49 = vcombine.low %v506_v33, %v522_v35  ;;  %v15831_v29 = vcombine.low %v412_v16, %v428_v17  ;;  %v491_v33 = vld [vmem:[#allocation3 + $0x2e0] sm:$0xff]  ;;  %v476_v35 = vld [vmem:[#allocation3 + $0x268] sm:$0xff] }
 0x2ec   : > { %2442 = vmatprep.subr.bf16.mxu0 %v15982_v50  ;;  %2483 = vmatprep.subr.bf16.mxu1 %v15984_v53  ;;  %v15954_v50 = vcombine.high %v537_v38, %v553_v39  ;;  %v15956_v53 = vcombine.high %v538_v42, %v554_v44 }
 0x2ef   : > { %2443 = vmatpush1.bf16.msra.mxu0 %v15981_v25  ;;  %2484 = vmatpush1.bf16.msra.mxu1 %v15983_v56  ;;  %v15953_v25 = vcombine.low %v537_v38, %v553_v39  ;;  %v15955_v56 = vcombine.low %v538_v42, %v554_v44  ;;  %v15863_v38 = vcombine.low %v444_v26, %v460_v27  ;;  %v523_v42 = vld [vmem:[#allocation3 + $0x3e0] sm:$0xff]  ;;  %v20856_v44 = vshrl.u32 %v268_v0, 7 }
 0x2f0   : > { %2444 = vmatprep.subr.bf16.mxu0 %v16014_v57  ;;  %2485 = vmatprep.subr.bf16.mxu1 %v16016_v60  ;;  %v15986_v57 = vcombine.high %v569_v47, %v585_v48  ;;  %v15988_v60 = vcombine.high %v570_v51, %v586_v52 }
 0x2f3   : > { %2445 = vmatpush1.bf16.msra.mxu0 %v16013_v61  ;;  %2486 = vmatpush1.bf16.msra.mxu1 %v16015_v6  ;;  %v15985_v61 = vcombine.low %v569_v47, %v585_v48  ;;  %v15987_v6 = vcombine.low %v570_v51, %v586_v52  ;;  %v539_v51 = vld [vmem:[#allocation3 + $0x460] sm:$0xff] }
 0x2f4   : > { %2446 = vmatprep.subr.bf16.mxu0 %v16046_v7  ;;  %2487 = vmatprep.subr.bf16.mxu1 %v16048_v10  ;;  %v16018_v7 = vcombine.high %v601_v54, %v617_v55  ;;  %v650_v10 = vld [vmem:[#allocation3 + $0x7d8] sm:$0xff]  ;;  %v555_v52 = vld [vmem:[#allocation3 + $0x4e0] sm:$0xff] }
 0x2f7   : > { %2447 = vmatpush1.bf16.msra.mxu0 %v16045_v11  ;;  %2488 = vmatpush1.bf16.msra.mxu1 %v16047_v14  ;;  %v16017_v11 = vcombine.low %v601_v54, %v617_v55  ;;  %v16019_v14 = vcombine.low %v602_v58, %v618_v59  ;;  %v20866_v55 = vsub.s32 2, %v20856_v44  ;;  %v20869_v58 = vsub.s32 3, %v20856_v44 }
 0x2f8   : > { %2514 = vmatprep.subr.bf16.mxu0 %v15826_v15  ;;  %2555 = vmatprep.subr.bf16.mxu1 %v15828_v18  ;;  %v16050_v15 = vcombine.high %v633_v62, %v649_v63  ;;  %v16052_v18 = vcombine.high %v634_v9, %v650_v10 }
 0x2fa   : > { %2465 = vmatmul.mubr.bf16.vlgmr.msra.gmra.mrb[16].mxu0 %v20830_v43  ;;  %2506 = vmatmul.mubr.bf16.vlgmr.msra.gmra.mrb[16].mxu1 %v20830_v43 }
 0x2fb   : > { %2515 = vmatpush1.bf16.msra.mxu0 %v15825_v19  ;;  %2556 = vmatpush1.bf16.msra.mxu1 %v15827_v20  ;;  %v16049_v19 = vcombine.low %v633_v62, %v649_v63  ;;  %v16051_v20 = vcombine.low %v634_v9, %v650_v10  ;;  %v15958_v63 = vcombine.high %v539_v51, %v555_v52  ;;  %v603_v10 = vld [vmem:[#allocation3 + $0x660] sm:$0xff] }
 0x2fc   : > { %2516 = vmatprep.subr.bf16.mxu0 %v15858_v21  ;;  %2557 = vmatprep.subr.bf16.mxu1 %v15860_v23  ;;  %v15830_v21 = vcombine.high %v411_v12, %v427_v13  ;;  %v443_v23 = vld [vmem:[#allocation3 + $0x160] sm:$0xff]  ;;  %v15957_v9 = vcombine.low %v539_v51, %v555_v52  ;;  %v494_v51 = vld [vmem:[#allocation3 + $0x2f8] sm:$0xff] }
 0x2fd   : > { %2546 = vmatprep.mubr.bf16.mxu0 %v20441_v34  ;;  %2587 = vmatprep.mubr.bf16.mxu1 %v20441_v34  ;;  %v15862_v30 = vcombine.high %v443_v23, %v459_v24 }
 0x2ff   : > { %2517 = vmatpush1.bf16.msra.mxu0 %v15857_v28  ;;  %2558 = vmatpush1.bf16.msra.mxu1 %v15859_v31  ;;  %v15829_v28 = vcombine.low %v411_v12, %v427_v13  ;;  %v15864_v31 = vcombine.high %v444_v26, %v460_v27  ;;  %v413_v27 = vld [vmem:[#allocation3 + $0x70] sm:$0xff] }
 0x300   : > { %2518 = vmatprep.subr.bf16.mxu0 %v15890_v32  ;;  %2559 = vmatprep.subr.bf16.mxu1 %v15892_v36  ;;  %v475_v32 = vld [vmem:[#allocation3 + $0x260] sm:$0xff]  ;;  %v492_v36 = vld [vmem:[#allocation3 + $0x2e8] sm:$0xff] }
 0x301   : > { %v15894_v39 = vcombine.high %v475_v32, %v491_v33  ;;  %v15893_v47 = vcombine.low %v475_v32, %v491_v33  ;;  %v15895_v48 = vcombine.low %v476_v35, %v492_v36  ;;  %v430_v32 = vld [vmem:[#allocation3 + $0xf8] sm:$0xff] }
 0x303   : > { %2519 = vmatpush1.bf16.msra.mxu0 %v15889_v37  ;;  %2560 = vmatpush1.bf16.msra.mxu1 %v15891_v40  ;;  %v15861_v37 = vcombine.low %v443_v23, %v459_v24  ;;  %v15896_v40 = vcombine.high %v476_v35, %v492_v36  ;;  %v652_v23 = vld [vmem:[#allocation3 + $0x7e8] sm:$0xff]  ;;  %v445_v36 = vld [vmem:[#allocation3 + $0x170] sm:$0xff] }
 0x304   : > { %2520 = vmatprep.subr.bf16.mxu0 %v15922_v41  ;;  %2561 = vmatprep.subr.bf16.mxu1 %v15924_v45  ;;  %v507_v41 = vld [vmem:[#allocation3 + $0x360] sm:$0xff]  ;;  %v508_v45 = vld [vmem:[#allocation3 + $0x368] sm:$0xff] }
 0x305   : > { %v15925_v59 = vcombine.low %v507_v41, %v523_v42 }
 0x307   : > { %2521 = vmatpush1.bf16.msra.mxu0 %v15921_v46  ;;  %2562 = vmatpush1.bf16.msra.mxu1 %v15923_v49  ;;  %v524_v46 = vld [vmem:[#allocation3 + $0x3e8] sm:$0xff]  ;;  %v15926_v49 = vcombine.high %v507_v41, %v523_v42  ;;  %v462_v41 = vld [vmem:[#allocation3 + $0x1f8] sm:$0xff] }
 0x308   : > { %2522 = vmatprep.subr.bf16.mxu0 %v15954_v50  ;;  %2563 = vmatprep.subr.bf16.mxu1 %v15956_v53  ;;  %v15928_v50 = vcombine.high %v508_v45, %v524_v46  ;;  %v20860_v53 = vsub.s32 0, %v20856_v44  ;;  %v15927_v62 = vcombine.low %v508_v45, %v524_v46  ;;  %v477_v46 = vld [vmem:[#allocation3 + $0x270] sm:$0xff] }
 0x30b   : > { %2523 = vmatpush1.bf16.msra.mxu0 %v15953_v25  ;;  %2564 = vmatpush1.bf16.msra.mxu1 %v15955_v56  ;;  %v20863_v25 = vsub.s32 1, %v20856_v44  ;;  %v540_v56 = vld [vmem:[#allocation3 + $0x468] sm:$0xff] }
 0x30c   : > { %2524 = vmatprep.subr.bf16.mxu0 %v15986_v57  ;;  %2565 = vmatprep.subr.bf16.mxu1 %v15988_v60  ;;  %v556_v57 = vld [vmem:[#allocation3 + $0x4e8] sm:$0xff]  ;;  %v571_v60 = vld [vmem:[#allocation3 + $0x560] sm:$0xff] }
 0x30d   : > { %v22492_v54 = vmov %v20863_v25  ;;  %v15959_v12 = vcombine.low %v540_v56, %v556_v57 }
 0x30f   : > { %2525 = vmatpush1.bf16.msra.mxu0 %v15985_v61  ;;  %2566 = vmatpush1.bf16.msra.mxu1 %v15987_v6  ;;  %v587_v61 = vld [vmem:[#allocation3 + $0x5e0] sm:$0xff]  ;;  %v572_v6 = vld [vmem:[#allocation3 + $0x568] sm:$0xff] }
 0x310   : > { %2526 = vmatprep.subr.bf16.mxu0 %v16018_v7  ;;  %2567 = vmatprep.subr.bf16.mxu1 %v16020_v8  ;;  %v588_v7 = vld [vmem:[#allocation3 + $0x5e8] sm:$0xff]  ;;  %v15960_v8 = vcombine.high %v540_v56, %v556_v57  ;;  %v15990_v13 = vcombine.high %v571_v60, %v587_v61  ;;  %v15989_v17 = vcombine.low %v571_v60, %v587_v61  ;;  %v509_v56 = vld [vmem:[#allocation3 + $0x370] sm:$0xff]  ;;  %v510_v61 = vld [vmem:[#allocation3 + $0x378] sm:$0xff] }
 0x311   : > { %v15992_v16 = vcombine.high %v572_v6, %v588_v7  ;;  %v525_v57 = vld [vmem:[#allocation3 + $0x3f0] sm:$0xff] }
 0x313   : > { %2527 = vmatpush1.bf16.msra.mxu0 %v16017_v11  ;;  %2568 = vmatpush1.bf16.msra.mxu1 %v16019_v14  ;;  %v619_v11 = vld [vmem:[#allocation3 + $0x6e0] sm:$0xff]  ;;  %v604_v14 = vld [vmem:[#allocation3 + $0x668] sm:$0xff] }
 0x314   : > { %2528 = vmatprep.subr.bf16.mxu0 %v16050_v15  ;;  %2569 = vmatprep.subr.bf16.mxu1 %v16052_v18  ;;  %v620_v15 = vld [vmem:[#allocation3 + $0x6e8] sm:$0xff]  ;;  %v635_v18 = vld [vmem:[#allocation3 + $0x760] sm:$0xff]  ;;  %v16021_v26 = vcombine.low %v603_v10, %v619_v11 }
 0x315   : > { %v16024_v24 = vcombine.high %v604_v14, %v620_v15 }
 0x317   : > { %2529 = vmatpush1.bf16.msra.mxu0 %v16049_v19  ;;  %2570 = vmatpush1.bf16.msra.mxu1 %v16051_v20  ;;  %v651_v19 = vld [vmem:[#allocation3 + $0x7e0] sm:$0xff]  ;;  %v15991_v20 = vcombine.low %v572_v6, %v588_v7  ;;  %v541_v7 = vld [vmem:[#allocation3 + $0x470] sm:$0xff] }
 0x318   : > { %2596 = vmatprep.subr.bf16.mxu0 %v15830_v21  ;;  %2637 = vmatprep.subr.bf16.mxu1 %v15832_v22  ;;  %v16022_v21 = vcombine.high %v603_v10, %v619_v11  ;;  %v636_v22 = vld [vmem:[#allocation3 + $0x768] sm:$0xff]  ;;  %v16053_v35 = vcombine.low %v635_v18, %v651_v19  ;;  %v15930_v10 = vcombine.high %v509_v56, %v525_v57  ;;  %v542_v11 = vld [vmem:[#allocation3 + $0x478] sm:$0xff] }
 0x319   : > { %v16056_v33 = vcombine.high %v636_v22, %v652_v23 }
 0x31a   : > { %2547 = vmatmul.mubr.bf16.vlgmr.msra.gmra.mrb[20].mxu0 %v20830_v43  ;;  %2588 = vmatmul.mubr.bf16.vlgmr.msra.gmra.mrb[20].mxu1 %v20830_v43 }
 0x31b   : > { %2597 = vmatpush1.bf16.msra.mxu0 %v15829_v28  ;;  %2638 = vmatpush1.bf16.msra.mxu1 %v15831_v29  ;;  %v429_v28 = vld [vmem:[#allocation3 + $0xf0] sm:$0xff]  ;;  %v16023_v29 = vcombine.low %v604_v14, %v620_v15  ;;  %v15929_v14 = vcombine.low %v509_v56, %v525_v57 }
 0x31c   : > { %2598 = vmatprep.subr.bf16.mxu0 %v15862_v30  ;;  %2639 = vmatprep.subr.bf16.mxu1 %v15864_v31  ;;  %v16054_v30 = vcombine.high %v635_v18, %v651_v19  ;;  %v414_v31 = vld [vmem:[#allocation3 + $0x78] sm:$0xff]  ;;  %v15833_v45 = vcombine.low %v413_v27, %v429_v28  ;;  %v573_v15 = vld [vmem:[#allocation3 + $0x570] sm:$0xff] }
 0x31d   : > { %2628 = vmatprep.mubr.bf16.mxu0 %v20441_v34  ;;  %2669 = vmatprep.mubr.bf16.mxu1 %v20441_v34  ;;  %v15836_v42 = vcombine.high %v414_v31, %v430_v32  ;;  %v574_v19 = vld [vmem:[#allocation3 + $0x578] sm:$0xff] }
 0x31f   : > { %2599 = vmatpush1.bf16.msra.mxu0 %v15861_v37  ;;  %2640 = vmatpush1.bf16.msra.mxu1 %v15863_v38  ;;  %v461_v37 = vld [vmem:[#allocation3 + $0x1f0] sm:$0xff]  ;;  %v16055_v38 = vcombine.low %v636_v22, %v652_v23 }
 0x320   : > { %2600 = vmatprep.subr.bf16.mxu0 %v15894_v39  ;;  %2641 = vmatprep.subr.bf16.mxu1 %v15896_v40  ;;  %v15834_v39 = vcombine.high %v413_v27, %v429_v28  ;;  %v446_v40 = vld [vmem:[#allocation3 + $0x178] sm:$0xff]  ;;  %v15865_v25 = vcombine.low %v445_v36, %v461_v37 }
 0x321   : > { %v15868_v52 = vcombine.high %v446_v40, %v462_v41 }
 0x323   : > { %2601 = vmatpush1.bf16.msra.mxu0 %v15893_v47  ;;  %2642 = vmatpush1.bf16.msra.mxu1 %v15895_v48  ;;  %v493_v47 = vld [vmem:[#allocation3 + $0x2f0] sm:$0xff]  ;;  %v15835_v48 = vcombine.low %v414_v31, %v430_v32 }
 0x324   : > { %2602 = vmatprep.subr.bf16.mxu0 %v15926_v49  ;;  %2643 = vmatprep.subr.bf16.mxu1 %v15928_v50  ;;  %v15866_v49 = vcombine.high %v445_v36, %v461_v37  ;;  %v478_v50 = vld [vmem:[#allocation3 + $0x278] sm:$0xff]  ;;  %v15898_v60 = vcombine.high %v477_v46, %v493_v47  ;;  %v15897_v6 = vcombine.low %v477_v46, %v493_v47  ;;  %v637_v37 = vld [vmem:[#allocation3 + $0x770] sm:$0xff] }
 0x327   : > { %2603 = vmatpush1.bf16.msra.mxu0 %v15925_v59  ;;  %2644 = vmatpush1.bf16.msra.mxu1 %v15927_v62  ;;  %v15867_v59 = vcombine.low %v446_v40, %v462_v41  ;;  %v526_v62 = vld [vmem:[#allocation3 + $0x3f8] sm:$0xff] }
 0x328   : > { %2604 = vmatprep.subr.bf16.mxu0 %v15958_v63  ;;  %2645 = vmatprep.subr.bf16.mxu1 %v15960_v8  ;;  %v15900_v63 = vcombine.high %v478_v50, %v494_v51  ;;  %v557_v8 = vld [vmem:[#allocation3 + $0x4f0] sm:$0xff] }
 0x329   : > { %v15962_v18 = vcombine.high %v541_v7, %v557_v8  ;;  %v15961_v23 = vcombine.low %v541_v7, %v557_v8 }
 0x32b   : > { %2605 = vmatpush1.bf16.msra.mxu0 %v15957_v9  ;;  %2646 = vmatpush1.bf16.msra.mxu1 %v15959_v12  ;;  %v15899_v9 = vcombine.low %v478_v50, %v494_v51  ;;  %v558_v12 = vld [vmem:[#allocation3 + $0x4f8] sm:$0xff] }
 0x32c   : > { %2606 = vmatprep.subr.bf16.mxu0 %v15990_v13  ;;  %2647 = vmatprep.subr.bf16.mxu1 %v15992_v16  ;;  %v15932_v13 = vcombine.high %v510_v61, %v526_v62  ;;  %v589_v16 = vld [vmem:[#allocation3 + $0x5f0] sm:$0xff]  ;;  %v15964_v22 = vcombine.high %v542_v11, %v558_v12  ;;  %v15963_v27 = vcombine.low %v542_v11, %v558_v12  ;;  %v20900_v12 = vsub.s32 4, %v20856_v44 }
 0x32d   : > { %v15994_v28 = vcombine.high %v573_v15, %v589_v16  ;;  %v15993_v36 = vcombine.low %v573_v15, %v589_v16  ;;  %v20909_v15 = vsub.s32 7, %v20856_v44 }
 0x32f   : > { %2607 = vmatpush1.bf16.msra.mxu0 %v15989_v17  ;;  %2648 = vmatpush1.bf16.msra.mxu1 %v15991_v20  ;;  %v15931_v17 = vcombine.low %v510_v61, %v526_v62  ;;  %v590_v20 = vld [vmem:[#allocation3 + $0x5f8] sm:$0xff] }
 0x330   : > { %2608 = vmatprep.subr.bf16.mxu0 %v16022_v21  ;;  %2649 = vmatprep.subr.bf16.mxu1 %v16024_v24  ;;  %v20875_v21 = vld [vmem:[#allocation5] sm:$0xff]  ;;  %v605_v24 = vld [vmem:[#allocation3 + $0x670] sm:$0xff]  ;;  %v15996_v31 = vcombine.high %v574_v19, %v590_v20  ;;  %v15995_v40 = vcombine.low %v574_v19, %v590_v20 }
 0x331   : > { %v667_v32 = vrot.slane %v20875_v21, %v20860_v53  ;;  %v683_v16 = vrot.slane %v20875_v21, %v20900_v12 }
 0x333   : > { %2609 = vmatpush1.bf16.msra.mxu0 %v16021_v26  ;;  %2650 = vmatpush1.bf16.msra.mxu1 %v16023_v29  ;;  %v621_v26 = vld [vmem:[#allocation3 + $0x6f0] sm:$0xff]  ;;  %v606_v29 = vld [vmem:[#allocation3 + $0x678] sm:$0xff] }
 0x334   : > { %2610 = vmatprep.subr.bf16.mxu0 %v16054_v30  ;;  %2651 = vmatprep.subr.bf16.mxu1 %v16056_v33  ;;  %v622_v30 = vld [vmem:[#allocation3 + $0x6f8] sm:$0xff]  ;;  %v671_v33 = vrot.slane %v20875_v21, %v22492_v54  ;;  %v16026_v41 = vcombine.high %v605_v24, %v621_v26  ;;  %v16025_v57 = vcombine.low %v605_v24, %v621_v26 }
 0x335   : > { %v16028_v47 = vcombine.high %v606_v29, %v622_v30  ;;  %v16027_v62 = vcombine.low %v606_v29, %v622_v30 }
 0x337   : > { %2611 = vmatpush1.bf16.msra.mxu0 %v16053_v35  ;;  %2652 = vmatpush1.bf16.msra.mxu1 %v16055_v38  ;;  %v675_v35 = vrot.slane %v20875_v21, %v20866_v55  ;;  %v653_v38 = vld [vmem:[#allocation3 + $0x7f0] sm:$0xff] }
 0x338   : > { %2678 = vmatprep.subr.bf16.mxu0 %v15834_v39  ;;  %2719 = vmatprep.subr.bf16.mxu1 %v15836_v42  ;;  %v679_v39 = vrot.slane %v20875_v21, %v20869_v58  ;;  %v638_v42 = vld [vmem:[#allocation3 + $0x778] sm:$0xff] }
 0x33a   : > { %2629 = vmatmul.mubr.bf16.vlgmr.msra.gmra.mrb[24].mxu0 %v20830_v43  ;;  %2670 = vmatmul.mubr.bf16.vlgmr.msra.gmra.mrb[24].mxu1 %v20830_v43 }
 0x33b   : > { %2679 = vmatpush1.bf16.msra.mxu0 %v15833_v45  ;;  %2720 = vmatpush1.bf16.msra.mxu1 %v15835_v48  ;;  %v654_v45 = vld [vmem:[#allocation3 + $0x7f8] sm:$0xff] }
 0x33c   : > { %2680 = vmatprep.subr.bf16.mxu0 %v15866_v49  ;;  %2721 = vmatprep.subr.bf16.mxu1 %v15868_v52  ;;  %v16060_v8 = vcombine.high %v638_v42, %v654_v45  ;;  %v16059_v11 = vcombine.low %v638_v42, %v654_v45 }
 0x33d   : > { %2710 = vmatprep.mubr.bf16.mxu0 %v20441_v34  ;;  %2751 = vmatprep.mubr.bf16.mxu1 %v20441_v34 }
 0x33f   : > { %2681 = vmatpush1.bf16.msra.mxu0 %v15865_v25  ;;  %2722 = vmatpush1.bf16.msra.mxu1 %v15867_v59 }
 0x340   : > { %2682 = vmatprep.subr.bf16.mxu0 %v15898_v60  ;;  %2723 = vmatprep.subr.bf16.mxu1 %v15900_v63  ;;  %v16058_v63 = vcombine.high %v637_v37, %v653_v38 }
 0x343   : > { %2683 = vmatpush1.bf16.msra.mxu0 %v15897_v6  ;;  %2724 = vmatpush1.bf16.msra.mxu1 %v15899_v9 }
 0x344   : > { %2684 = vmatprep.subr.bf16.mxu0 %v15930_v10  ;;  %2725 = vmatprep.subr.bf16.mxu1 %v15932_v13  ;;  %v16057_v10 = vcombine.low %v637_v37, %v653_v38  ;;  %v20903_v13 = vsub.s32 5, %v20856_v44 }
 0x347   : > { %2685 = vmatpush1.bf16.msra.mxu0 %v15929_v14  ;;  %2726 = vmatpush1.bf16.msra.mxu1 %v15931_v17  ;;  %v20906_v14 = vsub.s32 6, %v20856_v44  ;;  %v687_v17 = vrot.slane %v20875_v21, %v20903_v13 }
 0x348   : > { %2686 = vmatprep.subr.bf16.mxu0 %v15962_v18  ;;  %2727 = vmatprep.subr.bf16.mxu1 %v15964_v22  ;;  %v695_v18 = vrot.slane %v20875_v21, %v20909_v15 }
 0x34b   : > { %2687 = vmatpush1.bf16.msra.mxu0 %v15961_v23  ;;  %2728 = vmatpush1.bf16.msra.mxu1 %v15963_v27 }
 0x34c   : > { %2688 = vmatprep.subr.bf16.mxu0 %v15994_v28  ;;  %2729 = vmatprep.subr.bf16.mxu1 %v15996_v31 }
 0x34d   : > { %v2138_v46 = vpop.f32.mrb[0].mxu0  ;;  %v2179_v50 = vpop.f32.mrb[0].mxu1 }
 0x34e   : > { %v20885_v48 = vadd.f32 %v2138_v46, %v667_v32  ;;  %v2140_v49 = vpop.f32.mrb[1].mxu0  ;;  %v20889_v25 = vadd.f32 %v2179_v50, %v675_v35  ;;  %v2181_v56 = vpop.f32.mrb[1].mxu1 }
 0x34f   : > { %v20887_v51 = vadd.f32 %v2140_v49, %v671_v33  ;;  %v2142_v52 = vpop.f32.mrb[2].mxu0  ;;  %2689 = vmatpush1.bf16.msra.mxu0 %v15993_v36  ;;  %v20891_v60 = vadd.f32 %v2181_v56, %v679_v39  ;;  %v2183_v61 = vpop.f32.mrb[2].mxu1  ;;  %2730 = vmatpush1.bf16.msra.mxu1 %v15995_v40  ;;  %v20931_v33 = vld [vmem:[#allocation5 + $0x8] sm:$0xff] }
 0x350   : > { %v2143_v59 = vpop.f32.mrb[3].mxu0  ;;  %2690 = vmatprep.subr.bf16.mxu0 %v16026_v41  ;;  %v2184_v6 = vpop.f32.mrb[3].mxu1  ;;  %2731 = vmatprep.subr.bf16.mxu1 %v16028_v47  ;;  %v699_v35 = vrot.slane %v20931_v33, %v20860_v53  ;;  %v707_v36 = vrot.slane %v20931_v33, %v20866_v55  ;;  %v703_v37 = vrot.slane %v20931_v33, %v22492_v54 }
 0x351   : > { %v2760_v7 = vmax.f32 %v20885_v48, %v20887_v51  ;;  %v2779_v9 = vmax.f32 %v20889_v25, %v20891_v60  ;;  %v711_v38 = vrot.slane %v20931_v33, %v20869_v58  ;;  %v18591_v6 = vld [vmem:[#allocation7 + $0xc0] sm:$0xff]  }
 0x353   : > { %2761 = vmax.xlane.f32.xlu0 %v2760_v7  ;;  %2691 = vmatpush1.bf16.msra.mxu0 %v16025_v57  ;;  %v18592_v7 = vld [vmem:[#allocation7 + $0x48] sm:$0xff]  }
 0x354   : > { %2732 = vmatpush1.bf16.msra.mxu1 %v16027_v62  ;;  %2692 = vmatprep.subr.bf16.mxu0 %v16058_v63  ;;  %v18589_v62 = vld [vmem:[#allocation7 + $0x40] sm:$0xff]  }
 0x355   : > { %2733 = vmatprep.subr.bf16.mxu1 %v16060_v8  ;;  %v18590_v63 = vld [vmem:[#allocation7] sm:$0xff]  }
 0x356   : > { %v18593_v8 = vld [vmem:[#allocation7 + $0x80] sm:$0xff]  }
 0x357   : > { %2780 = vmax.xlane.f32.xlu0 %v2779_v9  ;;  %2693 = vmatpush1.bf16.msra.mxu0 %v16057_v10  ;;  %v18595_v9 = vld [vmem:[#allocation7 + $0xc8] sm:$0xff]  }
 0x358   : > { %2734 = vmatpush1.bf16.msra.mxu1 %v16059_v11  ;;  %17461 = vmatprep.subr.bf16.mxu0 %v18589_v62  ;;  %v18594_v11 = vld [vmem:[#allocation7 + $0x8] sm:$0xff]  }
 0x359   : > { %17483 = vmatprep.subr.bf16.mxu1 %v18591_v6 }
 0x35a   : > { %2711 = vmatmul.mubr.bf16.vlgmr.msra.gmra.mrb[28].mxu0 %v20830_v43 }
 0x35b   : > { %2752 = vmatmul.mubr.bf16.vlgmr.msra.gmra.mrb[28].mxu1 %v20830_v43  ;;  %v691_v43 = vrot.slane %v20875_v21, %v20906_v14  ;;  %17462 = vmatpush3.bf16.msra.mxu0 %v18590_v63 }
 0x35c   : > { %17484 = vmatpush3.bf16.msra.mxu1 %v18593_v8  ;;  %17463 = vmatprep.subr.bf16.mxu0 %v18592_v7 }
 0x35d   : > { %17485 = vmatprep.subr.bf16.mxu1 %v18595_v9 }
 0x35f   : > { %17464 = vmatpush3.bf16.msra.mxu0 %v18594_v11 }
 0x36d   : > { %v2220_v19 = vpop.f32.mrb[4].mxu0  ;;  %v2261_v23 = vpop.f32.mrb[4].mxu1 }
 0x36e   : > { %v20919_v20 = vadd.f32 %v2220_v19, %v683_v16  ;;  %v2222_v22 = vpop.f32.mrb[5].mxu0  ;;  %v20923_v44 = vadd.f32 %v2261_v23, %v691_v43  ;;  %v2263_v27 = vpop.f32.mrb[5].mxu1  ;;  %v18597_v16 = vld [vmem:[#allocation7 + $0x88] sm:$0xff]   ;;  %v18599_v19 = vld [vmem:[#allocation7 + $0xd0] sm:$0xff]  }
 0x36f   : > { %v20921_v24 = vadd.f32 %v2222_v22, %v687_v17  ;;  %v2224_v26 = vpop.f32.mrb[6].mxu0  ;;  %v20925_v28 = vadd.f32 %v2263_v27, %v695_v18  ;;  %v2265_v30 = vpop.f32.mrb[6].mxu1  ;;  %v18596_v18 = vld [vmem:[#allocation7 + $0x50] sm:$0xff]   ;;  %17486 = vmatpush3.bf16.msra.mxu1 %v18597_v16 }
 0x370   : > { %v2225_v29 = vpop.f32.mrb[7].mxu0  ;;  %v2266_v31 = vpop.f32.mrb[7].mxu1  ;;  %v18598_v26 = vld [vmem:[#allocation7 + $0x10] sm:$0xff]   ;;  %17465 = vmatprep.subr.bf16.mxu0 %v18596_v18  ;;  %17487 = vmatprep.subr.bf16.mxu1 %v18599_v19 }
 0x371   : > { %v2798_v32 = vmax.f32 %v20919_v20, %v20921_v24  ;;  %v2817_v21 = vmax.f32 %v20923_v44, %v20925_v28  ;;  %v18601_v27 = vld [vmem:[#allocation7 + $0x90] sm:$0xff]   ;;  %v18600_v31 = vld [vmem:[#allocation7 + $0x58] sm:$0xff]   ;;  %17466 = vmatpush3.bf16.msra.mxu0 %v18598_v26 }
 0x372   : > { %17467 = vmatprep.subr.bf16.mxu0 %v18600_v31 }
 0x373   : > { %2799 = vmax.xlane.f32.xlu1 %v2798_v32  ;;  %17488 = vmatpush3.bf16.msra.mxu1 %v18601_v27 }
 0x377   : > { %2818 = vmax.xlane.f32.xlu1 %v2817_v21  ;;  %v18602_v21 = vld [vmem:[#allocation7 + $0x18] sm:$0xff]  }
 0x378   : > { %17468 = vmatpush3.bf16.msra.mxu0 %v18602_v21  ;;  %v18610_v21 = vld [vmem:[#allocation7 + $0x28] sm:$0xff]  }
 0x38d   : > { %v2302_v39 = vpop.f32.mrb[8].mxu0  ;;  %v2343_v41 = vpop.f32.mrb[8].mxu1 }
 0x38e   : > { %v20941_v40 = vadd.f32 %v2302_v39, %v699_v35  ;;  %v2304_v42 = vpop.f32.mrb[9].mxu0  ;;  %v20943_v45 = vadd.f32 %v2343_v41, %v707_v36  ;;  %v2345_v47 = vpop.f32.mrb[9].mxu1 }
 0x38f   : > { %v20945_v46 = vadd.f32 %v2304_v42, %v703_v37  ;;  %v2306_v49 = vpop.f32.mrb[10].mxu0  ;;  %v20947_v50 = vadd.f32 %v2345_v47, %v711_v38  ;;  %v2347_v56 = vpop.f32.mrb[10].mxu1 }
 0x390   : > { %v2307_v52 = vpop.f32.mrb[11].mxu0  ;;  %v2348_v59 = vpop.f32.mrb[11].mxu1  ;;  %v715_v49 = vrot.slane %v20931_v33, %v20900_v12 }
 0x391   : > { %v2836_v57 = vmax.f32 %v20941_v40, %v20945_v46  ;;  %v2855_v61 = vmax.f32 %v20943_v45, %v20947_v50  ;;  %v719_v52 = vrot.slane %v20931_v33, %v20903_v13  ;;  %v727_v59 = vrot.slane %v20931_v33, %v20909_v15 }
 0x393   : > { %2837 = vmax.xlane.f32.xlu0 %v2836_v57  ;;  %2856 = vmax.xlane.f32.xlu1 %v2855_v61  ;;  %v723_v57 = vrot.slane %v20931_v33, %v20906_v14 }
 0x3ad   : > { %v2384_v10 = vpop.f32.mrb[12].mxu0  ;;  %v2425_v43 = vpop.f32.mrb[12].mxu1 }
 0x3ae   : > { %v2386_v17 = vpop.f32.mrb[13].mxu0  ;;  %v2427_v23 = vpop.f32.mrb[13].mxu1  ;;  %v20971_v61 = vadd.f32 %v2384_v10, %v715_v49  ;;  %v20977_v9 = vadd.f32 %v2425_v43, %v723_v57  ;;  %v18605_v43 = vld [vmem:[#allocation7 + $0x98] sm:$0xff]   ;;  %v18614_v49 = vld [vmem:[#allocation7 + $0x30] sm:$0xff]  }
 0x3af   : > { %v2388_v22 = vpop.f32.mrb[14].mxu0  ;;  %v2429_v30 = vpop.f32.mrb[14].mxu1  ;;  %v20973_v62 = vadd.f32 %v2386_v17, %v719_v52  ;;  %v18603_v17 = vld [vmem:[#allocation7 + $0xd8] sm:$0xff]   ;;  %v18615_v52 = vld [vmem:[#allocation7 + $0xf0] sm:$0xff]  }
 0x3b0   : > { %v2389_v29 = vpop.f32.mrb[15].mxu0  ;;  %v2430_v32 = vpop.f32.mrb[15].mxu1  ;;  %17489 = vmatprep.subr.bf16.mxu1 %v18603_v17  ;;  %v18609_v30 = vld [vmem:[#allocation7 + $0xa0] sm:$0xff]   ;;  %v18617_v57 = vld [vmem:[#allocation7 + $0xb0] sm:$0xff]  }
 0x3b1   : > { %17490 = vmatpush3.bf16.msra.mxu1 %v18605_v43  ;;  %v18608_v29 = vld [vmem:[#allocation7 + $0x68] sm:$0xff]  }
 0x3cd   : > { %v20953_v35 = vpop.f32.mrb[16].mxu0  ;;  %v20957_v37 = vpop.f32.mrb[16].mxu1 }
 0x3ce   : > { %v20955_v36 = vpop.f32.mrb[17].mxu0  ;;  %v20959_v39 = vpop.f32.mrb[17].mxu1 }
 0x3cf   : > { %v2470_v38 = vpop.f32.mrb[18].mxu0  ;;  %v2511_v42 = vpop.f32.mrb[18].mxu1 }
 0x3d0   : > { %v2471_v41 = vpop.f32.mrb[19].mxu0  ;;  %v2512_v47 = vpop.f32.mrb[19].mxu1  ;;  %v18612_v42 = vld [vmem:[#allocation7 + $0x70] sm:$0xff]  }
 0x3d1   : > { %v18611_v41 = vld [vmem:[#allocation7 + $0xe8] sm:$0xff]  }
 0x3d2   : > { %v18613_v47 = vld [vmem:[#allocation7 + $0xa8] sm:$0xff]  }
 0x3e0   : > { %v2762_v56 = vpop.xlane.xlu0 %2761 }
 0x3e1   : > { %vm2763_vm1 = vcmp.eq.f32.partialorder %v20885_v48, %v2762_v56  ;;  %vm2764_vm2 = vcmp.eq.f32.partialorder %v20887_v51, %v2762_v56  ;;  %v20981_v48 = vadd.f32 %v2427_v23, %v727_v59  ;;  %v2874_v51 = vmax.f32 %v20971_v61, %v20973_v62  ;;  %v18607_v23 = vld [vmem:[#allocation7 + $0xe0] sm:$0xff]   ;;  %v18616_v56 = vld [vmem:[#allocation7 + $0x78] sm:$0xff]  }
 0x3e2   : > { %v2765_v63 = vsel %vm2763_vm1, %v20774_v4, 256.0  ;;  %v2766_v6 = vsel %vm2764_vm2, %v20777_v5, 256.0  ;;  %17491 = vmatprep.subr.bf16.mxu1 %v18607_v23  ;;  %v18618_v59 = vld [vmem:[#allocation7 + $0x38] sm:$0xff]  }
 0x3e3   : > { %v2767_v7 = vmin.f32 %v2765_v63, %v2766_v6  ;;  %v2893_v16 = vmax.f32 %v20977_v9, %v20981_v48  ;;  %17492 = vmatpush3.bf16.msra.mxu1 %v18609_v30  ;;  %v657_v63 = vld [vmem:[#allocation5 + $0x10] sm:$0xff]  ;;  %v18619_v6 = vld [vmem:[#allocation7 + $0xf8] sm:$0xff]  }
 0x3e4   : > { %v2781_v8 = vpop.xlane.xlu0 %2780  ;;  %17493 = vmatprep.subr.bf16.mxu1 %v18611_v41  ;;  %v743_v17 = vrot.slane %v657_v63, %v20869_v58 }
 0x3e5   : > { %vm2782_vm3 = vcmp.eq.f32.partialorder %v20889_v25, %v2781_v8  ;;  %vm2783_vm4 = vcmp.eq.f32.partialorder %v20891_v60, %v2781_v8  ;;  %2768 = vmin.xlane.f32.xlu0 %v2767_v7  ;;  %v18604_v25 = vld [vmem:[#allocation7 + $0x60] sm:$0xff]   ;;  %v18620_v7 = vld [vmem:[#allocation7 + $0xb8] sm:$0xff]  }
 0x3e6   : > { %v2784_v33 = vsel %vm2782_vm3, %v20774_v4, 256.0  ;;  %v2785_v10 = vsel %vm2783_vm4, %v20777_v5, 256.0  ;;  %v18606_v60 = vld [vmem:[#allocation7 + $0x20] sm:$0xff]   ;;  %17469 = vmatprep.subr.bf16.mxu0 %v18604_v25 }
 0x3e7   : > { %v2786_v11 = vmin.f32 %v2784_v33, %v2785_v10  ;;  %17470 = vmatpush3.bf16.msra.mxu0 %v18606_v60  ;;  %17494 = vmatpush3.bf16.msra.mxu1 %v18613_v47  ;;  %v18621_v8 = vld [vmem:[#allocation7 + $0x140] sm:$0xff]   ;;  %v735_v33 = vrot.slane %v657_v63, %v22492_v54  ;;  %v747_v47 = vrot.slane %v657_v63, %v20900_v12 }
 0x3e8   : > { %17471 = vmatprep.subr.bf16.mxu0 %v18608_v29  ;;  %17495 = vmatprep.subr.bf16.mxu1 %v18615_v52  ;;  %v18623_v10 = vld [vmem:[#allocation7 + $0x1c0] sm:$0xff]   ;;  %v751_v52 = vrot.slane %v657_v63, %v20903_v13 }
 0x3e9   : > { %2875 = vmax.xlane.f32.xlu0 %v2874_v51  ;;  %2787 = vmin.xlane.f32.xlu1 %v2786_v11  ;;  %v731_v51 = vrot.slane %v657_v63, %v20860_v53  ;;  %v21007_v43 = vadd.f32 %v20955_v36, %v735_v33 }
 0x3eb   : > { %17472 = vmatpush3.bf16.msra.mxu0 %v18610_v21  ;;  %17496 = vmatpush3.bf16.msra.mxu1 %v18617_v57  ;;  %v21004_v25 = vadd.f32 %v20953_v35, %v731_v51 }
 0x3ec   : > { %17473 = vmatprep.subr.bf16.mxu0 %v18612_v42  ;;  %17497 = vmatprep.subr.bf16.mxu1 %v18619_v6 }
 0x3ed   : > { %2894 = vmax.xlane.f32.xlu1 %v2893_v16  ;;  %v20989_v18 = vpop.f32.mrb[20].mxu0  ;;  %v20991_v19 = vpop.f32.mrb[20].mxu1  ;;  %v739_v16 = vrot.slane %v657_v63, %v20866_v55 }
 0x3ee   : > { %v20993_v22 = vpop.f32.mrb[21].mxu0  ;;  %v20995_v26 = vpop.f32.mrb[21].mxu1 }
 0x3ef   : > { %v2552_v27 = vpop.f32.mrb[22].mxu0  ;;  %v2593_v32 = vpop.f32.mrb[22].mxu1  ;;  %17474 = vmatpush3.bf16.msra.mxu0 %v18614_v49  ;;  %17498 = vmatpush3.bf16.msra.mxu1 %v18620_v7  ;;  %v21012_v29 = vadd.f32 %v20957_v37, %v739_v16  ;;  %v755_v49 = vrot.slane %v657_v63, %v20906_v14 }
 0x3f0   : > { %v2553_v31 = vpop.f32.mrb[23].mxu0  ;;  %v2594_v38 = vpop.f32.mrb[23].mxu1  ;;  %17475 = vmatprep.subr.bf16.mxu0 %v18616_v56  ;;  %17527 = vmatprep.subr.bf16.mxu1 %v18623_v10  ;;  %v759_v56 = vrot.slane %v657_v63, %v20909_v15 }
 0x3f1   : > { %v21033_v6 = vadd.f32 %v20991_v19, %v755_v49 }
 0x3f2   : > { %v21041_v51 = vadd.f32 %v20995_v26, %v759_v56  ;;  %v18622_v56 = vld [vmem:[#allocation7 + $0x100] sm:$0xff]  }
 0x3f3   : > { %17476 = vmatpush3.bf16.msra.mxu0 %v18618_v59  ;;  %v21030_v59 = vadd.f32 %v20989_v18, %v747_v47 }
 0x3f4   : > { %17505 = vmatprep.subr.bf16.mxu0 %v18621_v8  ;;  %v21038_v8 = vadd.f32 %v20993_v22, %v751_v52 }
 0x3f6   : > { %v2950_v22 = vmax.f32 %v21030_v59, %v21038_v8 }
 0x400   : > { %v2800_v11 = vpop.xlane.xlu1 %2799 }
 0x401   : > { %vm2801_vm5 = vcmp.eq.f32.partialorder %v20919_v20, %v2800_v11  ;;  %vm2802_vm6 = vcmp.eq.f32.partialorder %v20921_v24, %v2800_v11  ;;  %v21017_v20 = vadd.f32 %v20959_v39, %v743_v17  ;;  %v2912_v24 = vmax.f32 %v21004_v25, %v21007_v43 }
 0x402   : > { %v2803_v60 = vsel %vm2801_vm5, %v20774_v4, 256.0  ;;  %v2804_v23 = vsel %vm2802_vm6, %v20777_v5, 256.0 }
 0x403   : > { %v2805_v27 = vmin.f32 %v2803_v60, %v2804_v23  ;;  %v2931_v37 = vmax.f32 %v21012_v29, %v21017_v20 }
 0x404   : > { %v2819_v30 = vpop.xlane.xlu1 %2818 }
 0x405   : > { %vm2820_vm7 = vcmp.eq.f32.partialorder %v20923_v44, %v2819_v30  ;;  %vm2821_vm8 = vcmp.eq.f32.partialorder %v20925_v28, %v2819_v30  ;;  %2806 = vmin.xlane.f32.xlu0 %v2805_v27  ;;  %v21061_v27 = vld [vmem:[#allocation5 + $0x18] sm:$0xff] }
 0x406   : > { %v2822_v35 = vsel %vm2820_vm7, %v20774_v4, 256.0  ;;  %v2823_v36 = vsel %vm2821_vm8, %v20777_v5, 256.0  ;;  %v775_v47 = vrot.slane %v21061_v27, %v20869_v58 }
 0x407   : > { %v2824_v31 = vmin.f32 %v2822_v35, %v2823_v36  ;;  %v767_v35 = vrot.slane %v21061_v27, %v22492_v54 }
 0x409   : > { %2913 = vmax.xlane.f32.xlu0 %v2912_v24  ;;  %2825 = vmin.xlane.f32.xlu1 %v2824_v31  ;;  %v763_v24 = vrot.slane %v21061_v27, %v20860_v53 }
 0x40d   : > { %2932 = vmax.xlane.f32.xlu1 %v2931_v37  ;;  %v2630_v44 = vpop.f32.mrb[24].mxu0  ;;  %v2671_v32 = vpop.f32.mrb[24].mxu1 }
 0x40e   : > { %v2632_v28 = vpop.f32.mrb[25].mxu0  ;;  %v2673_v21 = vpop.f32.mrb[25].mxu1 }
 0x40f   : > { %v2634_v39 = vpop.f32.mrb[26].mxu0  ;;  %v2675_v41 = vpop.f32.mrb[26].mxu1 }
 0x410   : > { %v2635_v38 = vpop.f32.mrb[27].mxu0  ;;  %v2676_v42 = vpop.f32.mrb[27].mxu1  ;;  %v21069_v41 = vadd.f32 %v2632_v28, %v767_v35  ;;  %v18636_v35 = vld [vmem:[#allocation7 + $0x160] sm:$0xff]  }
 0x411   : > { %v21067_v38 = vadd.f32 %v2630_v44, %v763_v24  ;;  %v771_v42 = vrot.slane %v21061_v27, %v20866_v55  ;;  %v18635_v24 = vld [vmem:[#allocation7 + $0x1d8] sm:$0xff]  }
 0x420   : > { %v2838_v57 = vpop.xlane.xlu0 %2837  ;;  %v2857_v7 = vpop.xlane.xlu1 %2856 }
 0x421   : > { %vm2839_vm9 = vcmp.eq.f32.partialorder %v20941_v40, %v2838_v57  ;;  %vm2840_vm10 = vcmp.eq.f32.partialorder %v20945_v46, %v2838_v57  ;;  %vm2858_vm11 = vcmp.eq.f32.partialorder %v20943_v45, %v2857_v7  ;;  %vm2859_vm12 = vcmp.eq.f32.partialorder %v20947_v50, %v2857_v7 }
 0x422   : > { %v2841_v18 = vsel %vm2839_vm9, %v20774_v4, 256.0  ;;  %v2842_v19 = vsel %vm2840_vm10, %v20777_v5, 256.0  ;;  %v2860_v63 = vsel %vm2858_vm11, %v20774_v4, 256.0  ;;  %v2861_v40 = vsel %vm2859_vm12, %v20777_v5, 256.0 }
 0x423   : > { %v2843_v33 = vmin.f32 %v2841_v18, %v2842_v19  ;;  %v2862_v46 = vmin.f32 %v2860_v63, %v2861_v40  ;;  %v2969_v45 = vmax.f32 %v21033_v6, %v21041_v51  ;;  %v21081_v7 = vadd.f32 %v2671_v32, %v771_v42  ;;  %v18624_v40 = vld [vmem:[#allocation7 + $0x148] sm:$0xff]   ;;  %v18641_v42 = vld [vmem:[#allocation7 + $0x1a0] sm:$0xff]  }
 0x424   : > { %v21083_v19 = vadd.f32 %v2673_v21, %v775_v47  ;;  %v2988_v63 = vmax.f32 %v21067_v38, %v21069_v41  ;;  %v18626_v21 = vld [vmem:[#allocation7 + $0x108] sm:$0xff]  }
 0x425   : > { %2844 = vmin.xlane.f32.xlu0 %v2843_v33  ;;  %2863 = vmin.xlane.f32.xlu1 %v2862_v46  ;;  %v18627_v33 = vld [vmem:[#allocation7 + $0x1c8] sm:$0xff]   ;;  %v18628_v46 = vld [vmem:[#allocation7 + $0x150] sm:$0xff]  }
 0x426   : > { %v18642_v47 = vld [vmem:[#allocation7 + $0x128] sm:$0xff]  }
 0x429   : > { %2951 = vmax.xlane.f32.xlu0 %v2950_v22  ;;  %2970 = vmax.xlane.f32.xlu1 %v2969_v45  ;;  %v3007_v22 = vmax.f32 %v21081_v7, %v21083_v19  ;;  %v18629_v45 = vld [vmem:[#allocation7 + $0x188] sm:$0xff]  }
 0x42d   : > { %v21053_v50 = vpop.f32.mrb[28].mxu0 }
 0x42e   : > { %v21055_v26 = vpop.f32.mrb[29].mxu0  ;;  %v21057_v10 = vpop.f32.mrb[28].mxu1 }
 0x42f   : > { %v2716_v11 = vpop.f32.mrb[30].mxu0  ;;  %v21059_v16 = vpop.f32.mrb[29].mxu1 }
 0x430   : > { %v2717_v17 = vpop.f32.mrb[31].mxu0  ;;  %v2757_v60 = vpop.f32.mrb[30].mxu1  ;;  %v18630_v11 = vld [vmem:[#allocation7 + $0x110] sm:$0xff]  }
 0x431   : > { %v2758_v23 = vpop.f32.mrb[31].mxu1  ;;  %v18631_v17 = vld [vmem:[#allocation7 + $0x1d0] sm:$0xff]   ;;  %v18632_v60 = vld [vmem:[#allocation7 + $0x158] sm:$0xff]  }
 0x432   : > { %v18633_v23 = vld [vmem:[#allocation7 + $0x190] sm:$0xff]  }
 0x472   : > { %v2769_v30 = vpop.xlane.xlu0 %2768 }
 0x473   : > { %v18467_v36 = vtrunc.f32 %v2769_v30  ;;  %v18634_v30 = vld [vmem:[#allocation7 + $0x118] sm:$0xff]  }
 0x475   : > { %v18468_v31 = vcvt.f32.s32 %v18467_v36  ;;  %v18637_v36 = vld [vmem:[#allocation7 + $0x198] sm:$0xff]  }
 0x476   : > { %v2788_v37 = vpop.xlane.xlu1 %2787  ;;  %v2876_v39 = vpop.xlane.xlu0 %2875 }
 0x477   : > { %vm2771_vm13 = vcmp.eq.s32.totalorder %v20768_v2, %v18468_v31  ;;  %vm2772_vm14 = vcmp.eq.s32.totalorder %v20771_v3, %v18468_v31  ;;  %v18469_v49 = vtrunc.f32 %v2788_v37  ;;  %vm2877_vm15 = vcmp.eq.f32.partialorder %v20971_v61, %v2876_v39  ;;  %v18638_v31 = vld [vmem:[#allocation7 + $0x120] sm:$0xff]  }
 0x478   : > { %vm2878_vm1 = vcmp.eq.f32.partialorder %v20973_v62, %v2876_v39  ;;  %v2879_v44 = vsel %vm2877_vm15, %v20774_v4, 256.0  ;;  %vm19901_vm6 = vmpackc.low %vm2772_vm14, %vm2772_vm14  ;;  %v20442_v61 = vmov 1.0|1.0   ;;  %v18639_v37 = vld [vmem:[#allocation7 + $0x1e0] sm:$0xff]   ;;  %v18640_v39 = vld [vmem:[#allocation7 + $0x168] sm:$0xff]  }
 0x479   : > { %v18470_v52 = vcvt.f32.s32 %v18469_v49  ;;  %v2880_v28 = vsel %vm2878_vm1, %v20777_v5, 256.0  ;;  %19902 = vmatprep.mubr.msk.bf16.mxu0 %vm19901_vm6, %v20442_v61  ;;  %vm19903_vm7 = vmpackc.low %vm2771_vm13, %vm2771_vm13  ;;  %v18643_v49 = vld [vmem:[#allocation7 + $0x1e8] sm:$0xff]  }
 0x47a   : > { %v2895_v57 = vpop.xlane.xlu1 %2894  ;;  %v2881_v18 = vmin.f32 %v2879_v44, %v2880_v28  ;;  %19904 = vmatmul.mubr.msk.bf16.vlgmr.msra.gmra.mrb[32].mxu0 %vm19903_vm7, %v20442_v61  ;;  %v18644_v44 = vld [vmem:[#allocation7 + $0x170] sm:$0xff]  }
 0x47b   : > { %vm2790_vm2 = vcmp.eq.s32.totalorder %v20768_v2, %v18470_v52  ;;  %vm2791_vm3 = vcmp.eq.s32.totalorder %v20771_v3, %v18470_v52  ;;  %vm2896_vm4 = vcmp.eq.f32.partialorder %v20977_v9, %v2895_v57  ;;  %vm2897_vm5 = vcmp.eq.f32.partialorder %v20981_v48, %v2895_v57  ;;  %17506 = vmatpush3.bf16.msra.mxu0 %v18622_v56  ;;  %v18625_v48 = vld [vmem:[#allocation7 + $0x180] sm:$0xff]   ;;  %v18645_v52 = vld [vmem:[#allocation7 + $0x1a8] sm:$0xff]   ;;  %v18646_v28 = vld [vmem:[#allocation7 + $0x130] sm:$0xff]  }
 0x47c   : > { %v2898_v62 = vsel %vm2896_vm4, %v20774_v4, 256.0  ;;  %v2899_v32 = vsel %vm2897_vm5, %v20777_v5, 256.0  ;;  %2882 = vmin.xlane.f32.xlu0 %v2881_v18  ;;  %17507 = vmatprep.subr.bf16.mxu0 %v18624_v40  ;;  %vm19905_vm8 = vmpackc.low %vm2791_vm3, %vm2791_vm3  ;;  %v779_v57 = vrot.slane %v21061_v27, %v20900_v12  ;;  %v783_v18 = vrot.slane %v21061_v27, %v20903_v13  ;;  %v18647_v40 = vld [vmem:[#allocation7 + $0x1f0] sm:$0xff]  }
 0x47d   : > { %v2900_v9 = vmin.f32 %v2898_v62, %v2899_v32  ;;  %19906 = vmatprep.mubr.msk.bf16.mxu1 %vm19905_vm8, %v20442_v61  ;;  %vm19907_vm9 = vmpackc.low %vm2790_vm2, %vm2790_vm2  ;;  %v18648_v62 = vld [vmem:[#allocation7 + $0x178] sm:$0xff]  }
 0x47e   : > { %19908 = vmatmul.mubr.msk.bf16.vlgmr.msra.gmra.mrb[32].mxu1 %vm19907_vm9, %v20442_v61 }
 0x47f   : > { %2901 = vmin.xlane.f32.xlu1 %v2900_v9  ;;  %17528 = vmatpush3.bf16.msra.mxu1 %v18625_v48  ;;  %v791_v48 = vrot.slane %v21061_v27, %v20909_v15 }
 0x480   : > { %2989 = vmax.xlane.f32.xlu0 %v2988_v63  ;;  %17508 = vmatpush3.bf16.msra.mxu0 %v18626_v21  ;;  %v787_v63 = vrot.slane %v21061_v27, %v20906_v14  ;;  %v18649_v21 = vld [vmem:[#allocation7 + $0x1b0] sm:$0xff]  }
 0x481   : > { %17529 = vmatprep.subr.bf16.mxu1 %v18627_v33  ;;  %17509 = vmatprep.subr.bf16.mxu0 %v18628_v46  ;;  %v18650_v33 = vld [vmem:[#allocation7 + $0x138] sm:$0xff]  }
 0x483   : > { %3008 = vmax.xlane.f32.xlu1 %v3007_v22  ;;  %17530 = vmatpush3.bf16.msra.mxu1 %v18629_v45  ;;  %v21120_v45 = vadd.f32 %v21053_v50, %v779_v57  ;;  %v18664_v57 = vld [vmem:[#allocation7 + $0x258] sm:$0xff]  }
 0x484   : > { %17510 = vmatpush3.bf16.msra.mxu0 %v18630_v11  ;;  %17531 = vmatprep.subr.bf16.mxu1 %v18631_v17  ;;  %v21123_v11 = vadd.f32 %v21055_v26, %v783_v18  ;;  %v21126_v17 = vadd.f32 %v21057_v10, %v787_v63  ;;  %v18652_v10 = vld [vmem:[#allocation7 + $0x1b8] sm:$0xff]   ;;  %v18665_v18 = vld [vmem:[#allocation7 + $0x290] sm:$0xff]  }
 0x485   : > { %17511 = vmatprep.subr.bf16.mxu0 %v18632_v60  ;;  %v18651_v60 = vld [vmem:[#allocation7 + $0x1f8] sm:$0xff]  }
 0x486   : > { %v18666_v63 = vld [vmem:[#allocation7 + $0x218] sm:$0xff]  }
 0x487   : > { %17532 = vmatpush3.bf16.msra.mxu1 %v18633_v23  ;;  %v18653_v23 = vld [vmem:[#allocation7 + $0x240] sm:$0xff]  }
 0x488   : > { %17512 = vmatpush3.bf16.msra.mxu0 %v18634_v30  ;;  %17533 = vmatprep.subr.bf16.mxu1 %v18635_v24  ;;  %v18654_v24 = vld [vmem:[#allocation7 + $0x200] sm:$0xff]  }
 0x489   : > { %17513 = vmatprep.subr.bf16.mxu0 %v18636_v35 }
 0x48b   : > { %17534 = vmatpush3.bf16.msra.mxu1 %v18637_v36  ;;  %v21135_v36 = vadd.f32 %v21059_v16, %v791_v48  ;;  %v18671_v48 = vld [vmem:[#allocation7 + $0x2e0] sm:$0xff]  }
 0x48c   : > { %17514 = vmatpush3.bf16.msra.mxu0 %v18638_v31  ;;  %17535 = vmatprep.subr.bf16.mxu1 %v18639_v37  ;;  %v3026_v37 = vmax.f32 %v21120_v45, %v21123_v11 }
 0x48d   : > { %17515 = vmatprep.subr.bf16.mxu0 %v18640_v39 }
 0x48f   : > { %17536 = vmatpush3.bf16.msra.mxu1 %v18641_v42  ;;  %v18658_v42 = vld [vmem:[#allocation7 + $0x208] sm:$0xff]  }
 0x490   : > { %17516 = vmatpush3.bf16.msra.mxu0 %v18642_v47  ;;  %17537 = vmatprep.subr.bf16.mxu1 %v18643_v49  ;;  %v18659_v47 = vld [vmem:[#allocation7 + $0x2c8] sm:$0xff]   ;;  %v18660_v49 = vld [vmem:[#allocation7 + $0x250] sm:$0xff]  }
 0x491   : > { %17517 = vmatprep.subr.bf16.mxu0 %v18644_v44  ;;  %v3045_v44 = vmax.f32 %v21126_v17, %v21135_v36 }
 0x492   : > { %v2807_v56 = vpop.xlane.xlu0 %2806 }
 0x493   : > { %v18471_v32 = vtrunc.f32 %v2807_v56  ;;  %17538 = vmatpush3.bf16.msra.mxu1 %v18645_v52  ;;  %v18661_v52 = vld [vmem:[#allocation7 + $0x288] sm:$0xff]   ;;  %v18663_v56 = vld [vmem:[#allocation7 + $0x2d0] sm:$0xff]  }
 0x494   : > { %17518 = vmatpush3.bf16.msra.mxu0 %v18646_v28  ;;  %17539 = vmatprep.subr.bf16.mxu1 %v18647_v40  ;;  %v18662_v28 = vld [vmem:[#allocation7 + $0x210] sm:$0xff]   ;;  %v18667_v40 = vld [vmem:[#allocation7 + $0x2d8] sm:$0xff]  }
 0x495   : > { %v18472_v9 = vcvt.f32.s32 %v18471_v32  ;;  %17519 = vmatprep.subr.bf16.mxu0 %v18648_v62  ;;  %v18668_v62 = vld [vmem:[#allocation7 + $0x260] sm:$0xff]   ;;  %v18669_v32 = vld [vmem:[#allocation7 + $0x298] sm:$0xff]  }
 0x496   : > { %v2826_v46 = vpop.xlane.xlu1 %2825  ;;  %v2914_v22 = vpop.xlane.xlu0 %2913 }
 0x497   : > { %vm2809_vm10 = vcmp.eq.s32.totalorder %v20768_v2, %v18472_v9  ;;  %vm2810_vm11 = vcmp.eq.s32.totalorder %v20771_v3, %v18472_v9  ;;  %v18473_v27 = vtrunc.f32 %v2826_v46  ;;  %vm2915_vm12 = vcmp.eq.f32.partialorder %v21004_v25, %v2914_v22  ;;  %17540 = vmatpush3.bf16.msra.mxu1 %v18649_v21  ;;  %v18655_v25 = vld [vmem:[#allocation7 + $0x2c0] sm:$0xff]   ;;  %v18672_v21 = vld [vmem:[#allocation7 + $0x268] sm:$0xff]  }
 0x498   : > { %vm2916_vm13 = vcmp.eq.f32.partialorder %v21007_v43, %v2914_v22  ;;  %v2917_v50 = vsel %vm2915_vm12, %v20774_v4, 256.0  ;;  %17520 = vmatpush3.bf16.msra.mxu0 %v18650_v33  ;;  %17541 = vmatprep.subr.bf16.mxu1 %v18651_v60  ;;  %v18656_v43 = vld [vmem:[#allocation7 + $0x248] sm:$0xff]   ;;  %vm19909_vm3 = vmpackc.low %vm2810_vm11, %vm2810_vm11  ;;  %v18670_v9 = vld [vmem:[#allocation7 + $0x220] sm:$0xff]  }
 0x499   : > { %v18474_v26 = vcvt.f32.s32 %v18473_v27  ;;  %v2918_v30 = vsel %vm2916_vm13, %v20777_v5, 256.0  ;;  %17549 = vmatprep.subr.bf16.mxu0 %v18653_v23  ;;  %19910 = vmatprep.mubr.msk.bf16.mxu0 %vm19909_vm3, %v20442_v61  ;;  %vm19911_vm4 = vmpackc.low %vm2809_vm10, %vm2809_vm10  ;;  %v18673_v33 = vld [vmem:[#allocation7 + $0x2a0] sm:$0xff]   ;;  %v18674_v46 = vld [vmem:[#allocation7 + $0x228] sm:$0xff]  }
 0x49a   : > { %v2933_v35 = vpop.xlane.xlu1 %2932  ;;  %v2919_v31 = vmin.f32 %v2917_v50, %v2918_v30  ;;  %v18675_v22 = vld [vmem:[#allocation7 + $0x2e8] sm:$0xff]   ;;  %v18676_v60 = vld [vmem:[#allocation7 + $0x270] sm:$0xff]   ;;  %v18680_v30 = vld [vmem:[#allocation7 + $0x278] sm:$0xff]  }
 0x49b   : > { %vm2828_vm14 = vcmp.eq.s32.totalorder %v20768_v2, %v18474_v26  ;;  %vm2829_vm15 = vcmp.eq.s32.totalorder %v20771_v3, %v18474_v26  ;;  %vm2934_vm1 = vcmp.eq.f32.partialorder %v21012_v29, %v2933_v35  ;;  %vm2935_vm2 = vcmp.eq.f32.partialorder %v21017_v20, %v2933_v35  ;;  %19912 = vmatmul.mubr.msk.bf16.vlgmr.msra.gmra.mrb[36].mxu0 %vm19911_vm4, %v20442_v61  ;;  %v18657_v20 = vld [vmem:[#allocation7 + $0x280] sm:$0xff]   ;;  %v18677_v23 = vld [vmem:[#allocation7 + $0x2a8] sm:$0xff]   ;;  %v18678_v27 = vld [vmem:[#allocation7 + $0x230] sm:$0xff]  }
 0x49c   : > { %v2936_v16 = vsel %vm2934_vm1, %v20774_v4, 256.0  ;;  %v2937_v39 = vsel %vm2935_vm2, %v20777_v5, 256.0  ;;  %2920 = vmin.xlane.f32.xlu0 %v2919_v31  ;;  %17542 = vmatpush3.bf16.msra.mxu1 %v18652_v10  ;;  %vm19913_vm5 = vmpackc.low %vm2829_vm15, %vm2829_vm15  ;;  %v18679_v26 = vld [vmem:[#allocation7 + $0x2f0] sm:$0xff]  }
 0x49d   : > { %v2938_v29 = vmin.f32 %v2936_v16, %v2937_v39  ;;  %17550 = vmatpush3.bf16.msra.mxu0 %v18654_v24  ;;  %17571 = vmatprep.subr.bf16.mxu1 %v18655_v25  ;;  %vm19915_vm6 = vmpackc.low %vm2828_vm14, %vm2828_vm14  ;;  %v18682_v25 = vld [vmem:[#allocation7 + $0x238] sm:$0xff]  }
 0x49e   : > { %17551 = vmatprep.subr.bf16.mxu0 %v18656_v43  ;;  %19914 = vmatprep.mubr.msk.bf16.mxu1 %vm19913_vm5, %v20442_v61  ;;  %v18683_v39 = vld [vmem:[#allocation7 + $0x2f8] sm:$0xff]  }
 0x49f   : > { %2939 = vmin.xlane.f32.xlu1 %v2938_v29  ;;  %19916 = vmatmul.mubr.msk.bf16.vlgmr.msra.gmra.mrb[36].mxu1 %vm19915_vm6, %v20442_v61  ;;  %v18685_v29 = vld [vmem:[#allocation7 + $0x340] sm:$0xff]  }
 0x4a0   : > { %3027 = vmax.xlane.f32.xlu0 %v3026_v37  ;;  %17572 = vmatpush3.bf16.msra.mxu1 %v18657_v20  ;;  %v18681_v37 = vld [vmem:[#allocation7 + $0x2b0] sm:$0xff]  }
 0x4a1   : > { %17552 = vmatpush3.bf16.msra.mxu0 %v18658_v42  ;;  %17573 = vmatprep.subr.bf16.mxu1 %v18659_v47 }
 0x4a2   : > { %17553 = vmatprep.subr.bf16.mxu0 %v18660_v49 }
 0x4a3   : > { %3046 = vmax.xlane.f32.xlu1 %v3045_v44 }
 0x4a4   : > { %17574 = vmatpush3.bf16.msra.mxu1 %v18661_v52  ;;  %v18684_v52 = vld [vmem:[#allocation7 + $0x2b8] sm:$0xff]  }
 0x4a5   : > { %17554 = vmatpush3.bf16.msra.mxu0 %v18662_v28  ;;  %17575 = vmatprep.subr.bf16.mxu1 %v18663_v56  ;;  %v18686_v28 = vld [vmem:[#allocation7 + $0x300] sm:$0xff]  }
 0x4a6   : > { %17555 = vmatprep.subr.bf16.mxu0 %v18664_v57  ;;  %v18687_v56 = vld [vmem:[#allocation7 + $0x3c0] sm:$0xff]   ;;  %v18690_v57 = vld [vmem:[#allocation7 + $0x308] sm:$0xff]  }
 0x4a8   : > { %17576 = vmatpush3.bf16.msra.mxu1 %v18665_v18  ;;  %v18691_v18 = vld [vmem:[#allocation7 + $0x3c8] sm:$0xff]  }
 0x4a9   : > { %17556 = vmatpush3.bf16.msra.mxu0 %v18666_v63  ;;  %17577 = vmatprep.subr.bf16.mxu1 %v18667_v40  ;;  %v18692_v63 = vld [vmem:[#allocation7 + $0x350] sm:$0xff]   ;;  %v18693_v40 = vld [vmem:[#allocation7 + $0x388] sm:$0xff]  }
 0x4aa   : > { %17557 = vmatprep.subr.bf16.mxu0 %v18668_v62  ;;  %v18694_v62 = vld [vmem:[#allocation7 + $0x310] sm:$0xff]  }
 0x4ac   : > { %17578 = vmatpush3.bf16.msra.mxu1 %v18669_v32  ;;  %v18695_v32 = vld [vmem:[#allocation7 + $0x3d0] sm:$0xff]  }
 0x4ad   : > { %17558 = vmatpush3.bf16.msra.mxu0 %v18670_v9  ;;  %17579 = vmatprep.subr.bf16.mxu1 %v18671_v48  ;;  %v18696_v9 = vld [vmem:[#allocation7 + $0x358] sm:$0xff]   ;;  %v18697_v48 = vld [vmem:[#allocation7 + $0x390] sm:$0xff]  }
 0x4ae   : > { %17559 = vmatprep.subr.bf16.mxu0 %v18672_v21  ;;  %v18698_v21 = vld [vmem:[#allocation7 + $0x318] sm:$0xff]  }
 0x4b0   : > { %17580 = vmatpush3.bf16.msra.mxu1 %v18673_v33  ;;  %v18699_v33 = vld [vmem:[#allocation7 + $0x3d8] sm:$0xff]  }
 0x4b1   : > { %17560 = vmatpush3.bf16.msra.mxu0 %v18674_v46  ;;  %17581 = vmatprep.subr.bf16.mxu1 %v18675_v22  ;;  %v18700_v46 = vld [vmem:[#allocation7 + $0x360] sm:$0xff]   ;;  %v18701_v22 = vld [vmem:[#allocation7 + $0x398] sm:$0xff]  }
 0x4b2   : > { %v2845_v50 = vpop.xlane.xlu0 %2844  ;;  %17561 = vmatprep.subr.bf16.mxu0 %v18676_v60  ;;  %v2864_v10 = vpop.xlane.xlu1 %2863  ;;  %v18702_v60 = vld [vmem:[#allocation7 + $0x320] sm:$0xff]  }
 0x4b3   : > { %v18475_v24 = vtrunc.f32 %v2845_v50  ;;  %v18477_v35 = vtrunc.f32 %v2864_v10  ;;  %v18705_v50 = vld [vmem:[#allocation7 + $0x3a0] sm:$0xff]   ;;  %v18708_v10 = vld [vmem:[#allocation7 + $0x370] sm:$0xff]  }
 0x4b4   : > { %17582 = vmatpush3.bf16.msra.mxu1 %v18677_v23  ;;  %v18703_v23 = vld [vmem:[#allocation7 + $0x3e0] sm:$0xff]  }
 0x4b5   : > { %v18476_v31 = vcvt.f32.s32 %v18475_v24  ;;  %17562 = vmatpush3.bf16.msra.mxu0 %v18678_v27  ;;  %v18478_v43 = vcvt.f32.s32 %v18477_v35  ;;  %17583 = vmatprep.subr.bf16.mxu1 %v18679_v26  ;;  %v18704_v27 = vld [vmem:[#allocation7 + $0x368] sm:$0xff]   ;;  %v18710_v35 = vld [vmem:[#allocation7 + $0x330] sm:$0xff]  }
 0x4b6   : > { %v2952_v16 = vpop.xlane.xlu0 %2951  ;;  %17563 = vmatprep.subr.bf16.mxu0 %v18680_v30  ;;  %v2971_v20 = vpop.xlane.xlu1 %2970  ;;  %v18706_v26 = vld [vmem:[#allocation7 + $0x328] sm:$0xff]  }
 0x4b7   : > { %vm2847_vm7 = vcmp.eq.s32.totalorder %v20768_v2, %v18476_v31  ;;  %vm2848_vm8 = vcmp.eq.s32.totalorder %v20771_v3, %v18476_v31  ;;  %vm2953_vm9 = vcmp.eq.f32.partialorder %v21030_v59, %v2952_v16  ;;  %vm2954_vm10 = vcmp.eq.f32.partialorder %v21038_v8, %v2952_v16  ;;  %v18707_v30 = vld [vmem:[#allocation7 + $0x3e8] sm:$0xff]   ;;  %v18711_v31 = vld [vmem:[#allocation7 + $0x3f0] sm:$0xff]   ;;  %v18715_v16 = vld [vmem:[#allocation7 + $0x3f8] sm:$0xff]  }
 0x4b8   : > { %vm2866_vm11 = vcmp.eq.s32.totalorder %v20768_v2, %v18478_v43  ;;  %vm2867_vm12 = vcmp.eq.s32.totalorder %v20771_v3, %v18478_v43  ;;  %vm2972_vm13 = vcmp.eq.f32.partialorder %v21033_v6, %v2971_v20  ;;  %vm2973_vm14 = vcmp.eq.f32.partialorder %v21041_v51, %v2971_v20  ;;  %17584 = vmatpush3.bf16.msra.mxu1 %v18681_v37  ;;  %v18688_v6 = vld [vmem:[#allocation7 + $0x348] sm:$0xff]   ;;  %vm19917_vm15 = vmpackc.low %vm2848_vm8, %vm2848_vm8  ;;  %v18689_v51 = vld [vmem:[#allocation7 + $0x380] sm:$0xff]  }
 0x4b9   : > { %17564 = vmatpush3.bf16.msra.mxu0 %v18682_v25  ;;  %v2974_v42 = vsel %vm2972_vm13, %v20774_v4, 256.0  ;;  %v2975_v47 = vsel %vm2973_vm14, %v20777_v5, 256.0  ;;  %v2955_v49 = vsel %vm2953_vm9, %v20774_v4, 256.0  ;;  %v2956_v59 = vsel %vm2954_vm10, %v20777_v5, 256.0  ;;  %17585 = vmatprep.subr.bf16.mxu1 %v18683_v39  ;;  %vm19919_vm1 = vmpackc.low %vm2867_vm12, %vm2867_vm12  ;;  %v18709_v24 = vld [vmem:[#allocation7 + $0x3a8] sm:$0xff]   ;;  %v18712_v37 = vld [vmem:[#allocation7 + $0x378] sm:$0xff]  }
 0x4ba   : > { %17593 = vmatprep.subr.bf16.mxu0 %v18685_v29  ;;  %v2976_v8 = vmin.f32 %v2974_v42, %v2975_v47  ;;  %v2957_v44 = vmin.f32 %v2955_v49, %v2956_v59  ;;  %19918 = vmatprep.mubr.msk.bf16.mxu0 %vm19917_vm15, %v20442_v61  ;;  %vm19921_vm2 = vmpackc.low %vm2847_vm7, %vm2847_vm7  ;;  %v18713_v25 = vld [vmem:[#allocation7 + $0x3b0] sm:$0xff]   ;;  %v18714_v43 = vld [vmem:[#allocation7 + $0x338] sm:$0xff]  }
 0x4bb   : > { %19920 = vmatprep.mubr.msk.bf16.mxu1 %vm19919_vm1, %v20442_v61  ;;  %vm19923_vm3 = vmpackc.low %vm2866_vm11, %vm2866_vm11  ;;  %v18717_v39 = vld [vmem:[#allocation7 + $0x440] sm:$0xff]   ;;  %v18716_v29 = vld [vmem:[#allocation7 + $0x3b8] sm:$0xff]  }
 0x4bc   : > { %2977 = vmin.xlane.f32.xlu1 %v2976_v8  ;;  %2958 = vmin.xlane.f32.xlu0 %v2957_v44  ;;  %v18719_v20 = vld [vmem:[#allocation7 + $0x4c0] sm:$0xff]  }
 0x4bd   : > { %19922 = vmatmul.mubr.msk.bf16.vlgmr.msra.gmra.mrb[40].mxu0 %vm19921_vm2, %v20442_v61  ;;  %17586 = vmatpush3.bf16.msra.mxu1 %v18684_v52 }
 0x4be   : > { %17594 = vmatpush3.bf16.msra.mxu0 %v18686_v28  ;;  %17615 = vmatprep.subr.bf16.mxu1 %v18687_v56 }
 0x4bf   : > { %17595 = vmatprep.subr.bf16.mxu0 %v18688_v6 }
 0x4c0   : > { %19924 = vmatmul.mubr.msk.bf16.vlgmr.msra.gmra.mrb[40].mxu1 %vm19923_vm3, %v20442_v61 }
 0x4c1   : > { %17616 = vmatpush3.bf16.msra.mxu1 %v18689_v51  ;;  %v18718_v51 = vld [vmem:[#allocation7 + $0x400] sm:$0xff]  }
 0x4c2   : > { %17596 = vmatpush3.bf16.msra.mxu0 %v18690_v57  ;;  %17617 = vmatprep.subr.bf16.mxu1 %v18691_v18 }
 0x4c3   : > { %17597 = vmatprep.subr.bf16.mxu0 %v18692_v63 }
 0x4c5   : > { %17618 = vmatpush3.bf16.msra.mxu1 %v18693_v40  ;;  %v18722_v40 = vld [vmem:[#allocation7 + $0x408] sm:$0xff]  }
 0x4c6   : > { %17598 = vmatpush3.bf16.msra.mxu0 %v18694_v62  ;;  %17619 = vmatprep.subr.bf16.mxu1 %v18695_v32  ;;  %v18724_v62 = vld [vmem:[#allocation7 + $0x450] sm:$0xff]   ;;  %v18725_v32 = vld [vmem:[#allocation7 + $0x488] sm:$0xff]  }
 0x4c7   : > { %17599 = vmatprep.subr.bf16.mxu0 %v18696_v9  ;;  %v18726_v9 = vld [vmem:[#allocation7 + $0x410] sm:$0xff]  }
 0x4c9   : > { %17620 = vmatpush3.bf16.msra.mxu1 %v18697_v48  ;;  %v18727_v48 = vld [vmem:[#allocation7 + $0x4d0] sm:$0xff]  }
 0x4ca   : > { %17600 = vmatpush3.bf16.msra.mxu0 %v18698_v21  ;;  %17621 = vmatprep.subr.bf16.mxu1 %v18699_v33  ;;  %v18728_v21 = vld [vmem:[#allocation7 + $0x458] sm:$0xff]   ;;  %v18729_v33 = vld [vmem:[#allocation7 + $0x490] sm:$0xff]  }
 0x4cb   : > { %17601 = vmatprep.subr.bf16.mxu0 %v18700_v46  ;;  %v18730_v46 = vld [vmem:[#allocation7 + $0x418] sm:$0xff]  }
 0x4cd   : > { %17622 = vmatpush3.bf16.msra.mxu1 %v18701_v22  ;;  %v18731_v22 = vld [vmem:[#allocation7 + $0x4d8] sm:$0xff]  }
 0x4ce   : > { %17602 = vmatpush3.bf16.msra.mxu0 %v18702_v60  ;;  %17623 = vmatprep.subr.bf16.mxu1 %v18703_v23  ;;  %v18732_v60 = vld [vmem:[#allocation7 + $0x460] sm:$0xff]   ;;  %v18733_v23 = vld [vmem:[#allocation7 + $0x498] sm:$0xff]  }
 0x4cf   : > { %17603 = vmatprep.subr.bf16.mxu0 %v18704_v27  ;;  %v18734_v27 = vld [vmem:[#allocation7 + $0x420] sm:$0xff]  }
 0x4d1   : > { %17624 = vmatpush3.bf16.msra.mxu1 %v18705_v50  ;;  %v18735_v50 = vld [vmem:[#allocation7 + $0x4e0] sm:$0xff]  }
 0x4d2   : > { %17604 = vmatpush3.bf16.msra.mxu0 %v18706_v26  ;;  %17625 = vmatprep.subr.bf16.mxu1 %v18707_v30  ;;  %v18736_v26 = vld [vmem:[#allocation7 + $0x468] sm:$0xff]   ;;  %v18737_v30 = vld [vmem:[#allocation7 + $0x4a0] sm:$0xff]  }
 0x4d3   : > { %17605 = vmatprep.subr.bf16.mxu0 %v18708_v10  ;;  %v18738_v10 = vld [vmem:[#allocation7 + $0x428] sm:$0xff]  }
 0x4d5   : > { %17626 = vmatpush3.bf16.msra.mxu1 %v18709_v24  ;;  %v18739_v24 = vld [vmem:[#allocation7 + $0x4e8] sm:$0xff]  }
 0x4d6   : > { %17606 = vmatpush3.bf16.msra.mxu0 %v18710_v35  ;;  %17627 = vmatprep.subr.bf16.mxu1 %v18711_v31  ;;  %v18740_v35 = vld [vmem:[#allocation7 + $0x470] sm:$0xff]   ;;  %v18741_v31 = vld [vmem:[#allocation7 + $0x4a8] sm:$0xff]  }
 0x4d7   : > { %17607 = vmatprep.subr.bf16.mxu0 %v18712_v37  ;;  %v18742_v37 = vld [vmem:[#allocation7 + $0x430] sm:$0xff]  }
 0x4d9   : > { %17628 = vmatpush3.bf16.msra.mxu1 %v18713_v25 }
 0x4da   : > { %17608 = vmatpush3.bf16.msra.mxu0 %v18714_v43  ;;  %17629 = vmatprep.subr.bf16.mxu1 %v18715_v16  ;;  %v18743_v43 = vld [vmem:[#allocation7 + $0x4f0] sm:$0xff]   ;;  %v18744_v16 = vld [vmem:[#allocation7 + $0x478] sm:$0xff]  }
 0x4db   : > { %17637 = vmatprep.subr.bf16.mxu0 %v18717_v39 }
 0x4dd   : > { %17630 = vmatpush3.bf16.msra.mxu1 %v18716_v29 }
 0x4de   : > { %17659 = vmatprep.subr.bf16.mxu1 %v18719_v20 }
 0x509   : > { %v2883_v42 = vpop.xlane.xlu0 %2882 }
 0x50a   : > { %v18479_v47 = vtrunc.f32 %v2883_v42  ;;  %v18745_v42 = vld [vmem:[#allocation7 + $0x4b0] sm:$0xff]  }
 0x50c   : > { %v18480_v49 = vcvt.f32.s32 %v18479_v47  ;;  %v2902_v59 = vpop.xlane.xlu1 %2901  ;;  %v18746_v47 = vld [vmem:[#allocation7 + $0x438] sm:$0xff]  }
 0x50d   : > { %v18481_v8 = vtrunc.f32 %v2902_v59  ;;  %v2990_v44 = vpop.xlane.xlu0 %2989 }
 0x50e   : > { %vm2885_vm4 = vcmp.eq.s32.totalorder %v20768_v2, %v18480_v49  ;;  %vm2886_vm5 = vcmp.eq.s32.totalorder %v20771_v3, %v18480_v49  ;;  %vm2991_vm6 = vcmp.eq.f32.partialorder %v21067_v38, %v2990_v44  ;;  %vm2992_vm7 = vcmp.eq.f32.partialorder %v21069_v41, %v2990_v44  ;;  %v18720_v41 = vld [vmem:[#allocation7 + $0x448] sm:$0xff]   ;;  %v18749_v44 = vld [vmem:[#allocation7 + $0x540] sm:$0xff]  }
 0x50f   : > { %v18482_v52 = vcvt.f32.s32 %v18481_v8  ;;  %v2993_v28 = vsel %vm2991_vm6, %v20774_v4, 256.0  ;;  %v2994_v56 = vsel %vm2992_vm7, %v20777_v5, 256.0  ;;  %vm19925_vm12 = vmpackc.low %vm2886_vm5, %vm2886_vm5  ;;  %v18747_v8 = vld [vmem:[#allocation7 + $0x4f8] sm:$0xff]  }
 0x510   : > { %v3009_v6 = vpop.xlane.xlu1 %3008  ;;  %19926 = vmatprep.mubr.msk.bf16.mxu0 %vm19925_vm12, %v20442_v61  ;;  %v2995_v18 = vmin.f32 %v2993_v28, %v2994_v56  ;;  %vm19927_vm13 = vmpackc.low %vm2885_vm4, %vm2885_vm4 }
 0x511   : > { %vm2904_vm8 = vcmp.eq.s32.totalorder %v20768_v2, %v18482_v52  ;;  %vm2905_vm9 = vcmp.eq.s32.totalorder %v20771_v3, %v18482_v52  ;;  %vm3010_vm10 = vcmp.eq.f32.partialorder %v21081_v7, %v3009_v6  ;;  %vm3011_vm11 = vcmp.eq.f32.partialorder %v21083_v19, %v3009_v6  ;;  %19928 = vmatmul.mubr.msk.bf16.vlgmr.msra.gmra.mrb[44].mxu0 %vm19927_vm13, %v20442_v61  ;;  %v18721_v7 = vld [vmem:[#allocation7 + $0x480] sm:$0xff]   ;;  %v18723_v19 = vld [vmem:[#allocation7 + $0x4c8] sm:$0xff]  }
 0x512   : > { %v3012_v57 = vsel %vm3010_vm10, %v20774_v4, 256.0  ;;  %v3013_v38 = vsel %vm3011_vm11, %v20777_v5, 256.0  ;;  %17638 = vmatpush3.bf16.msra.mxu0 %v18718_v51  ;;  %2996 = vmin.xlane.f32.xlu0 %v2995_v18  ;;  %vm19929_vm14 = vmpackc.low %vm2905_vm9, %vm2905_vm9  ;;  %v18748_v51 = vld [vmem:[#allocation7 + $0x4b8] sm:$0xff]  }
 0x513   : > { %v3014_v63 = vmin.f32 %v3012_v57, %v3013_v38  ;;  %19930 = vmatprep.mubr.msk.bf16.mxu1 %vm19929_vm14, %v20442_v61  ;;  %17639 = vmatprep.subr.bf16.mxu0 %v18720_v41  ;;  %vm19931_vm15 = vmpackc.low %vm2904_vm8, %vm2904_vm8  ;;  %v18750_v57 = vld [vmem:[#allocation7 + $0x500] sm:$0xff]  }
 0x514   : > { %19932 = vmatmul.mubr.msk.bf16.vlgmr.msra.gmra.mrb[44].mxu1 %vm19931_vm15, %v20442_v61  ;;  %v18751_v38 = vld [vmem:[#allocation7 + $0x5c0] sm:$0xff]  }
 0x515   : > { %3015 = vmin.xlane.f32.xlu1 %v3014_v63  ;;  %17660 = vmatpush3.bf16.msra.mxu1 %v18721_v7  ;;  %v18754_v63 = vld [vmem:[#allocation7 + $0x508] sm:$0xff]  }
 0x516   : > { %17640 = vmatpush3.bf16.msra.mxu0 %v18722_v40  ;;  %17661 = vmatprep.subr.bf16.mxu1 %v18723_v19  ;;  %v18755_v7 = vld [vmem:[#allocation7 + $0x5c8] sm:$0xff]   ;;  %v18756_v40 = vld [vmem:[#allocation7 + $0x550] sm:$0xff]  }
 0x517   : > { %17641 = vmatprep.subr.bf16.mxu0 %v18724_v62  ;;  %v18757_v19 = vld [vmem:[#allocation7 + $0x588] sm:$0xff]   ;;  %v18758_v62 = vld [vmem:[#allocation7 + $0x510] sm:$0xff]  }
 0x519   : > { %17662 = vmatpush3.bf16.msra.mxu1 %v18725_v32  ;;  %v18759_v32 = vld [vmem:[#allocation7 + $0x5d0] sm:$0xff]  }
 0x51a   : > { %17642 = vmatpush3.bf16.msra.mxu0 %v18726_v9  ;;  %17663 = vmatprep.subr.bf16.mxu1 %v18727_v48  ;;  %v18760_v9 = vld [vmem:[#allocation7 + $0x558] sm:$0xff]   ;;  %v18761_v48 = vld [vmem:[#allocation7 + $0x590] sm:$0xff]  }
 0x51b   : > { %17643 = vmatprep.subr.bf16.mxu0 %v18728_v21  ;;  %v18762_v21 = vld [vmem:[#allocation7 + $0x518] sm:$0xff]  }
 0x51d   : > { %17664 = vmatpush3.bf16.msra.mxu1 %v18729_v33  ;;  %v18763_v33 = vld [vmem:[#allocation7 + $0x5d8] sm:$0xff]  }
 0x51e   : > { %17644 = vmatpush3.bf16.msra.mxu0 %v18730_v46  ;;  %17665 = vmatprep.subr.bf16.mxu1 %v18731_v22  ;;  %v18764_v46 = vld [vmem:[#allocation7 + $0x560] sm:$0xff]   ;;  %v18765_v22 = vld [vmem:[#allocation7 + $0x598] sm:$0xff]  }
 0x51f   : > { %17645 = vmatprep.subr.bf16.mxu0 %v18732_v60  ;;  %v18766_v60 = vld [vmem:[#allocation7 + $0x520] sm:$0xff]  }
 0x521   : > { %17666 = vmatpush3.bf16.msra.mxu1 %v18733_v23  ;;  %v18767_v23 = vld [vmem:[#allocation7 + $0x5e0] sm:$0xff]  }
 0x522   : > { %17646 = vmatpush3.bf16.msra.mxu0 %v18734_v27  ;;  %17667 = vmatprep.subr.bf16.mxu1 %v18735_v50  ;;  %v18768_v27 = vld [vmem:[#allocation7 + $0x568] sm:$0xff]   ;;  %v18769_v50 = vld [vmem:[#allocation7 + $0x5a0] sm:$0xff]  }
 0x523   : > { %17647 = vmatprep.subr.bf16.mxu0 %v18736_v26  ;;  %v18770_v26 = vld [vmem:[#allocation7 + $0x528] sm:$0xff]  }
 0x525   : > { %17668 = vmatpush3.bf16.msra.mxu1 %v18737_v30  ;;  %v18771_v30 = vld [vmem:[#allocation7 + $0x5e8] sm:$0xff]  }
 0x526   : > { %17648 = vmatpush3.bf16.msra.mxu0 %v18738_v10  ;;  %17669 = vmatprep.subr.bf16.mxu1 %v18739_v24  ;;  %v18772_v10 = vld [vmem:[#allocation7 + $0x570] sm:$0xff]   ;;  %v18773_v24 = vld [vmem:[#allocation7 + $0x5a8] sm:$0xff]  }
 0x527   : > { %17649 = vmatprep.subr.bf16.mxu0 %v18740_v35  ;;  %v18774_v35 = vld [vmem:[#allocation7 + $0x530] sm:$0xff]  }
 0x529   : > { %v2921_v25 = vpop.xlane.xlu0 %2920  ;;  %17670 = vmatpush3.bf16.msra.mxu1 %v18741_v31  ;;  %v18775_v31 = vld [vmem:[#allocation7 + $0x5f0] sm:$0xff]  }
 0x52a   : > { %v18483_v39 = vtrunc.f32 %v2921_v25  ;;  %17650 = vmatpush3.bf16.msra.mxu0 %v18742_v37  ;;  %17671 = vmatprep.subr.bf16.mxu1 %v18743_v43  ;;  %v18776_v37 = vld [vmem:[#allocation7 + $0x578] sm:$0xff]  }
 0x52b   : > { %17651 = vmatprep.subr.bf16.mxu0 %v18744_v16 }
 0x52c   : > { %v18484_v29 = vcvt.f32.s32 %v18483_v39  ;;  %v2940_v20 = vpop.xlane.xlu1 %2939 }
 0x52d   : > { %v18485_v49 = vtrunc.f32 %v2940_v20  ;;  %v3028_v59 = vpop.xlane.xlu0 %3027  ;;  %17672 = vmatpush3.bf16.msra.mxu1 %v18745_v42  ;;  %v18778_v20 = vld [vmem:[#allocation7 + $0x538] sm:$0xff]  }
 0x52e   : > { %vm2923_vm1 = vcmp.eq.s32.totalorder %v20768_v2, %v18484_v29  ;;  %vm2924_vm2 = vcmp.eq.s32.totalorder %v20771_v3, %v18484_v29  ;;  %vm3029_vm3 = vcmp.eq.f32.partialorder %v21120_v45, %v3028_v59  ;;  %vm3030_vm4 = vcmp.eq.f32.partialorder %v21123_v11, %v3028_v59  ;;  %17652 = vmatpush3.bf16.msra.mxu0 %v18746_v47  ;;  %v18777_v29 = vld [vmem:[#allocation7 + $0x5b0] sm:$0xff]   ;;  %v18781_v59 = vld [vmem:[#allocation7 + $0x640] sm:$0xff]  }
 0x52f   : > { %v18486_v52 = vcvt.f32.s32 %v18485_v49  ;;  %v3031_v28 = vsel %vm3029_vm3, %v20774_v4, 256.0  ;;  %v3032_v56 = vsel %vm3030_vm4, %v20777_v5, 256.0  ;;  %17673 = vmatprep.subr.bf16.mxu1 %v18747_v8  ;;  %vm19933_vm9 = vmpackc.low %vm2924_vm2, %vm2924_vm2  ;;  %17681 = vmatprep.subr.bf16.mxu0 %v18749_v44  ;;  %v18779_v49 = vld [vmem:[#allocation7 + $0x5f8] sm:$0xff]  }
 0x530   : > { %v3047_v6 = vpop.xlane.xlu1 %3046  ;;  %19934 = vmatprep.mubr.msk.bf16.mxu0 %vm19933_vm9, %v20442_v61  ;;  %v3033_v41 = vmin.f32 %v3031_v28, %v3032_v56  ;;  %vm19935_vm10 = vmpackc.low %vm2923_vm1, %vm2923_vm1 }
 0x531   : > { %vm2942_vm5 = vcmp.eq.s32.totalorder %v20768_v2, %v18486_v52  ;;  %vm2943_vm6 = vcmp.eq.s32.totalorder %v20771_v3, %v18486_v52  ;;  %vm3048_vm7 = vcmp.eq.f32.partialorder %v21126_v17, %v3047_v6  ;;  %vm3049_vm8 = vcmp.eq.f32.partialorder %v21135_v36, %v3047_v6  ;;  %19936 = vmatmul.mubr.msk.bf16.vlgmr.msra.gmra.mrb[48].mxu0 %vm19935_vm10, %v20442_v61  ;;  %v18752_v17 = vld [vmem:[#allocation7 + $0x548] sm:$0xff]   ;;  %v18753_v36 = vld [vmem:[#allocation7 + $0x580] sm:$0xff]   ;;  %v18780_v52 = vld [vmem:[#allocation7 + $0x5b8] sm:$0xff]  }
 0x532   : > { %v3050_v45 = vsel %vm3048_vm7, %v20774_v4, 256.0  ;;  %v3051_v11 = vsel %vm3049_vm8, %v20777_v5, 256.0  ;;  %17674 = vmatpush3.bf16.msra.mxu1 %v18748_v51  ;;  %17682 = vmatpush3.bf16.msra.mxu0 %v18750_v57  ;;  %vm19937_vm11 = vmpackc.low %vm2943_vm6, %vm2943_vm6  ;;  %v18782_v6 = vld [vmem:[#allocation7 + $0x600] sm:$0xff]  }
 0x533   : > { %v3052_v18 = vmin.f32 %v3050_v45, %v3051_v11  ;;  %3034 = vmin.xlane.f32.xlu0 %v3033_v41  ;;  %19938 = vmatprep.mubr.msk.bf16.mxu1 %vm19937_vm11, %v20442_v61  ;;  %vm19939_vm12 = vmpackc.low %vm2942_vm5, %vm2942_vm5  ;;  %v18784_v51 = vld [vmem:[#allocation7 + $0x6c0] sm:$0xff]   ;;  %v18783_v11 = vld [vmem:[#allocation7 + $0x648] sm:$0xff]  }
 0x534   : > { %17703 = vmatprep.subr.bf16.mxu1 %v18751_v38  ;;  %17683 = vmatprep.subr.bf16.mxu0 %v18752_v17  ;;  %v16093_v57 = vld [vmem:[#allocation8] ss:$0 sm:$0xff] }
 0x535   : > { %3053 = vmin.xlane.f32.xlu1 %v3052_v18  ;;  %19940 = vmatmul.mubr.msk.bf16.vlgmr.msra.gmra.mrb[48].mxu1 %vm19939_vm12, %v20442_v61  ;;  %v18786_v18 = vld [vmem:[#allocation7 + $0x680] sm:$0xff]  }
 0x536   : > { %17704 = vmatpush3.bf16.msra.mxu1 %v18753_v36  ;;  %17684 = vmatpush3.bf16.msra.mxu0 %v18754_v63 }
 0x537   : > { %17705 = vmatprep.subr.bf16.mxu1 %v18755_v7  ;;  %17685 = vmatprep.subr.bf16.mxu0 %v18756_v40  ;;  %v18785_v7 = vld [vmem:[#allocation7 + $0x608] sm:$0xff]  }
 0x538   : > { %v18788_v40 = vld [vmem:[#allocation7 + $0x6c8] sm:$0xff]  }
 0x53a   : > { %17706 = vmatpush3.bf16.msra.mxu1 %v18757_v19  ;;  %17686 = vmatpush3.bf16.msra.mxu0 %v18758_v62  ;;  %v18787_v62 = vld [vmem:[#allocation7 + $0x650] sm:$0xff]  }
 0x53b   : > { %17707 = vmatprep.subr.bf16.mxu1 %v18759_v32  ;;  %17687 = vmatprep.subr.bf16.mxu0 %v18760_v9  ;;  %v18790_v9 = vld [vmem:[#allocation7 + $0x688] sm:$0xff]  }
 0x53e   : > { %17708 = vmatpush3.bf16.msra.mxu1 %v18761_v48  ;;  %17688 = vmatpush3.bf16.msra.mxu0 %v18762_v21  ;;  %v18789_v48 = vld [vmem:[#allocation7 + $0x610] sm:$0xff]  }
 0x53f   : > { %17709 = vmatprep.subr.bf16.mxu1 %v18763_v33  ;;  %17689 = vmatprep.subr.bf16.mxu0 %v18764_v46  ;;  %v18792_v21 = vld [vmem:[#allocation7 + $0x6d0] sm:$0xff]   ;;  %v18791_v33 = vld [vmem:[#allocation7 + $0x658] sm:$0xff]  }
 0x540   : > { %v18794_v46 = vld [vmem:[#allocation7 + $0x690] sm:$0xff]  }
 0x542   : > { %17710 = vmatpush3.bf16.msra.mxu1 %v18765_v22  ;;  %17690 = vmatpush3.bf16.msra.mxu0 %v18766_v60  ;;  %v18793_v22 = vld [vmem:[#allocation7 + $0x618] sm:$0xff]  }
 0x543   : > { %17711 = vmatprep.subr.bf16.mxu1 %v18767_v23  ;;  %17691 = vmatprep.subr.bf16.mxu0 %v18768_v27  ;;  %v18796_v60 = vld [vmem:[#allocation7 + $0x6d8] sm:$0xff]   ;;  %v18795_v23 = vld [vmem:[#allocation7 + $0x660] sm:$0xff]  }
 0x544   : > { %v18798_v27 = vld [vmem:[#allocation7 + $0x698] sm:$0xff]  }
 0x546   : > { %17712 = vmatpush3.bf16.msra.mxu1 %v18769_v50  ;;  %17692 = vmatpush3.bf16.msra.mxu0 %v18770_v26  ;;  %v18797_v50 = vld [vmem:[#allocation7 + $0x620] sm:$0xff]  }
 0x547   : > { %17713 = vmatprep.subr.bf16.mxu1 %v18771_v30  ;;  %17693 = vmatprep.subr.bf16.mxu0 %v18772_v10  ;;  %v18800_v26 = vld [vmem:[#allocation7 + $0x6e0] sm:$0xff]   ;;  %v18799_v30 = vld [vmem:[#allocation7 + $0x668] sm:$0xff]  }
 0x548   : > { %v18802_v10 = vld [vmem:[#allocation7 + $0x6a0] sm:$0xff]  }
 0x549   : > { %v2978_v25 = vpop.xlane.xlu1 %2977  ;;  %v2959_v43 = vpop.xlane.xlu0 %2958 }
 0x54a   : > { %v18489_v16 = vtrunc.f32 %v2978_v25  ;;  %v18487_v39 = vtrunc.f32 %v2959_v43  ;;  %17714 = vmatpush3.bf16.msra.mxu1 %v18773_v24  ;;  %17694 = vmatpush3.bf16.msra.mxu0 %v18774_v35  ;;  %v18801_v24 = vld [vmem:[#allocation7 + $0x628] sm:$0xff]   ;;  %v18805_v25 = vld [vmem:[#allocation7 + $0x630] sm:$0xff]  }
 0x54b   : > { %17715 = vmatprep.subr.bf16.mxu1 %v18775_v31  ;;  %17695 = vmatprep.subr.bf16.mxu0 %v18776_v37  ;;  %v18804_v35 = vld [vmem:[#allocation7 + $0x6e8] sm:$0xff]   ;;  %v18803_v31 = vld [vmem:[#allocation7 + $0x670] sm:$0xff]  }
 0x54c   : > { %v18490_v42 = vcvt.f32.s32 %v18489_v16  ;;  %v18488_v47 = vcvt.f32.s32 %v18487_v39  ;;  %v18806_v37 = vld [vmem:[#allocation7 + $0x6a8] sm:$0xff]   ;;  %v18808_v43 = vld [vmem:[#allocation7 + $0x6f0] sm:$0xff]   ;;  %v18807_v16 = vld [vmem:[#allocation7 + $0x678] sm:$0xff]  }
 0x54d   : > { %v17477_v8 = vpop.f32.mrb[32].mxu0  ;;  %v18810_v39 = vld [vmem:[#allocation7 + $0x6b0] sm:$0xff]  }
 0x54e   : > { %vm2980_vm13 = vcmp.eq.s32.totalorder %v20768_v2, %v18490_v42  ;;  %vm2981_vm14 = vcmp.eq.s32.totalorder %v20771_v3, %v18490_v42  ;;  %vm2961_vm15 = vcmp.eq.s32.totalorder %v20768_v2, %v18488_v47  ;;  %vm2962_vm1 = vcmp.eq.s32.totalorder %v20771_v3, %v18488_v47  ;;  %17716 = vmatpush3.bf16.msra.mxu1 %v18777_v29  ;;  %v17478_v44 = vpop.f32.mrb[33].mxu0  ;;  %v18809_v29 = vld [vmem:[#allocation7 + $0x638] sm:$0xff]   ;;  %v18812_v42 = vld [vmem:[#allocation7 + $0x740] sm:$0xff]  }
 0x54f   : > { %17696 = vmatpush3.bf16.msra.mxu0 %v18778_v20  ;;  %v17479_v28 = vadd.f32 %v17478_v44, %v17477_v8  ;;  %v17480_v56 = vpop.f32.mrb[34].mxu0  ;;  %17717 = vmatprep.subr.bf16.mxu1 %v18779_v49  ;;  %vm19941_vm2 = vmpackc.low %vm2962_vm1, %vm2962_vm1  ;;  %v18811_v20 = vld [vmem:[#allocation7 + $0x6f8] sm:$0xff]  }
 0x550   : > { %v17481_v45 = vpop.f32.mrb[35].mxu0  ;;  %17725 = vmatprep.subr.bf16.mxu0 %v18781_v59  ;;  %19942 = vmatprep.mubr.msk.bf16.mxu0 %vm19941_vm2, %v20442_v61  ;;  %vm19943_vm3 = vmpackc.low %vm2981_vm14, %vm2981_vm14  ;;  %v18813_v59 = vld [vmem:[#allocation7 + $0x6b8] sm:$0xff]  }
 0x551   : > { %19944 = vmatprep.mubr.msk.bf16.mxu1 %vm19943_vm3, %v20442_v61  ;;  %v17499_v38 = vpop.f32.mrb[32].mxu1  ;;  %vm19945_vm4 = vmpackc.low %vm2961_vm15, %vm2961_vm15  ;;  %v5218_v17 = vadd.f32 %v17479_v28, %v16093_v57 }
 0x552   : > { %19946 = vmatmul.mubr.msk.bf16.vlgmr.msra.gmra.mrb[52].mxu0 %vm19945_vm4, %v20442_v61  ;;  %17718 = vmatpush3.bf16.msra.mxu1 %v18780_v52  ;;  %v17500_v41 = vpop.f32.mrb[33].mxu1  ;;  %vm19947_vm5 = vmpackc.low %vm2980_vm13, %vm2980_vm13  ;;  %v18816_v52 = vld [vmem:[#allocation7 + $0x7c0] sm:$0xff]  }
 0x553   : > { %v17501_v36 = vadd.f32 %v17500_v41, %v17499_v38  ;;  %v17502_v63 = vpop.f32.mrb[34].mxu1  ;;  %17726 = vmatpush3.bf16.msra.mxu0 %v18782_v6  ;;  %17747 = vmatprep.subr.bf16.mxu1 %v18784_v51 }
 0x554   : > { %v17503_v19 = vpop.f32.mrb[35].mxu1  ;;  %17727 = vmatprep.subr.bf16.mxu0 %v18783_v11 }
 0x555   : > { %v5258_v32 = vadd.f32 %v17501_v36, %v5218_v17  ;;  %19948 = vmatmul.mubr.msk.bf16.vlgmr.msra.gmra.mrb[52].mxu1 %vm19947_vm5, %v20442_v61 }
 0x556   : > { %17748 = vmatpush3.bf16.msra.mxu1 %v18786_v18 }
 0x557   : > { %17728 = vmatpush3.bf16.msra.mxu0 %v18785_v7  ;;  %17749 = vmatprep.subr.bf16.mxu1 %v18788_v40 }
 0x558   : > { %17729 = vmatprep.subr.bf16.mxu0 %v18787_v62 }
 0x55a   : > { %17750 = vmatpush3.bf16.msra.mxu1 %v18790_v9 }
 0x55b   : > { %17730 = vmatpush3.bf16.msra.mxu0 %v18789_v48  ;;  %17751 = vmatprep.subr.bf16.mxu1 %v18792_v21 }
 0x55c   : > { %17731 = vmatprep.subr.bf16.mxu0 %v18791_v33 }
 0x55e   : > { %17752 = vmatpush3.bf16.msra.mxu1 %v18794_v46 }
 0x55f   : > { %17732 = vmatpush3.bf16.msra.mxu0 %v18793_v22  ;;  %17753 = vmatprep.subr.bf16.mxu1 %v18796_v60 }
 0x560   : > { %17733 = vmatprep.subr.bf16.mxu0 %v18795_v23 }
 0x562   : > { %17754 = vmatpush3.bf16.msra.mxu1 %v18798_v27  ;;  %v18814_v27 = vld [vmem:[#allocation7 + $0x700] sm:$0xff]  }
 0x563   : > { %17734 = vmatpush3.bf16.msra.mxu0 %v18797_v50  ;;  %17755 = vmatprep.subr.bf16.mxu1 %v18800_v26  ;;  %v18818_v50 = vld [vmem:[#allocation7 + $0x780] sm:$0xff]   ;;  %v18815_v26 = vld [vmem:[#allocation7 + $0x748] sm:$0xff]  }
 0x564   : > { %17735 = vmatprep.subr.bf16.mxu0 %v18799_v30  ;;  %v18820_v30 = vld [vmem:[#allocation7 + $0x7c8] sm:$0xff]  }
 0x566   : > { %17756 = vmatpush3.bf16.msra.mxu1 %v18802_v10  ;;  %v18817_v10 = vld [vmem:[#allocation7 + $0x708] sm:$0xff]  }
 0x567   : > { %17736 = vmatpush3.bf16.msra.mxu0 %v18801_v24  ;;  %17757 = vmatprep.subr.bf16.mxu1 %v18804_v35  ;;  %v18822_v24 = vld [vmem:[#allocation7 + $0x788] sm:$0xff]   ;;  %v18819_v35 = vld [vmem:[#allocation7 + $0x750] sm:$0xff]  }
 0x568   : > { %17737 = vmatprep.subr.bf16.mxu0 %v18803_v31  ;;  %v18824_v31 = vld [vmem:[#allocation7 + $0x7d0] sm:$0xff]  }
 0x56a   : > { %17758 = vmatpush3.bf16.msra.mxu1 %v18806_v37  ;;  %v18821_v37 = vld [vmem:[#allocation7 + $0x710] sm:$0xff]  }
 0x56b   : > { %17738 = vmatpush3.bf16.msra.mxu0 %v18805_v25  ;;  %17759 = vmatprep.subr.bf16.mxu1 %v18808_v43  ;;  %v18826_v25 = vld [vmem:[#allocation7 + $0x790] sm:$0xff]   ;;  %v18823_v43 = vld [vmem:[#allocation7 + $0x758] sm:$0xff]  }
 0x56c   : > { %17739 = vmatprep.subr.bf16.mxu0 %v18807_v16  ;;  %v18828_v16 = vld [vmem:[#allocation7 + $0x7d8] sm:$0xff]  }
 0x56e   : > { %v17521_v47 = vpop.f32.mrb[36].mxu0  ;;  %17760 = vmatpush3.bf16.msra.mxu1 %v18810_v39  ;;  %v18825_v39 = vld [vmem:[#allocation7 + $0x718] sm:$0xff]  }
 0x56f   : > { %v17522_v49 = vpop.f32.mrb[37].mxu0  ;;  %17740 = vmatpush3.bf16.msra.mxu0 %v18809_v29  ;;  %17761 = vmatprep.subr.bf16.mxu1 %v18811_v20  ;;  %v18830_v29 = vld [vmem:[#allocation7 + $0x798] sm:$0xff]   ;;  %v18827_v20 = vld [vmem:[#allocation7 + $0x760] sm:$0xff]  }
 0x570   : > { %v17523_v8 = vadd.f32 %v17522_v49, %v17521_v47  ;;  %v17524_v44 = vpop.f32.mrb[38].mxu0  ;;  %17769 = vmatprep.subr.bf16.mxu0 %v18812_v42  ;;  %v18832_v42 = vld [vmem:[#allocation7 + $0x7e0] sm:$0xff]  }
 0x571   : > { %v17525_v28 = vpop.f32.mrb[39].mxu0  ;;  %v18829_v47 = vld [vmem:[#allocation7 + $0x720] sm:$0xff]   ;;  %v18833_v44 = vld [vmem:[#allocation7 + $0x728] sm:$0xff]  }
 0x572   : > { %v5298_v56 = vadd.f32 %v17523_v8, %v5258_v32  ;;  %v17543_v6 = vpop.f32.mrb[36].mxu1  ;;  %17762 = vmatpush3.bf16.msra.mxu1 %v18813_v59  ;;  %v18834_v49 = vld [vmem:[#allocation7 + $0x7a0] sm:$0xff]   ;;  %v18831_v59 = vld [vmem:[#allocation7 + $0x768] sm:$0xff]   ;;  %v18835_v28 = vld [vmem:[#allocation7 + $0x770] sm:$0xff]  }
 0x573   : > { %v17544_v51 = vpop.f32.mrb[37].mxu1  ;;  %17791 = vmatprep.subr.bf16.mxu1 %v18816_v52  ;;  %v18836_v8 = vld [vmem:[#allocation7 + $0x7e8] sm:$0xff]  }
 0x574   : > { %v17545_v57 = vadd.f32 %v17544_v51, %v17543_v6  ;;  %v17546_v45 = vpop.f32.mrb[38].mxu1  ;;  %v18838_v52 = vld [vmem:[#allocation7 + $0x7a8] sm:$0xff]   ;;  %v18837_v6 = vld [vmem:[#allocation7 + $0x730] sm:$0xff]  }
 0x575   : > { %v17547_v11 = vpop.f32.mrb[39].mxu1  ;;  %v18842_v51 = vld [vmem:[#allocation7 + $0x7b0] sm:$0xff]  }
 0x576   : > { %v5338_v38 = vadd.f32 %v17545_v57, %v5298_v56  ;;  %v18840_v56 = vld [vmem:[#allocation7 + $0x7f0] sm:$0xff]   ;;  %v18839_v11 = vld [vmem:[#allocation7 + $0x778] sm:$0xff]  }
 0x590   : > { %v17565_v41 = vpop.f32.mrb[40].mxu0 }
 0x591   : > { %v17566_v18 = vpop.f32.mrb[41].mxu0 }
 0x592   : > { %v17567_v17 = vadd.f32 %v17566_v18, %v17565_v41  ;;  %v17568_v36 = vpop.f32.mrb[42].mxu0 }
 0x593   : > { %v17569_v63 = vpop.f32.mrb[43].mxu0  ;;  %v17587_v7 = vpop.f32.mrb[40].mxu1 }
 0x594   : > { %v5378_v40 = vadd.f32 %v17567_v17, %v5338_v38  ;;  %v17588_v19 = vpop.f32.mrb[41].mxu1  ;;  %v18843_v38 = vld [vmem:[#allocation7 + $0x7f8] sm:$0xff]  }
 0x595   : > { %v17589_v62 = vadd.f32 %v17588_v19, %v17587_v7  ;;  %v17590_v9 = vpop.f32.mrb[42].mxu1  ;;  %v18841_v63 = vld [vmem:[#allocation7 + $0x738] sm:$0xff]  }
 0x596   : > { %v17591_v48 = vpop.f32.mrb[43].mxu1  ;;  %v18844_v7 = vld [vmem:[#allocation7 + $0x7b8] sm:$0xff]  }
 0x597   : > { %v21261_v32 = vadd.f32 %v17589_v62, %v5378_v40  ;;  %v20443_v40 = vmov 0.0  }
 0x59f   : > { %v2997_v21 = vpop.xlane.xlu0 %2996 }
 0x5a0   : > { %v18491_v46 = vtrunc.f32 %v2997_v21 }
 0x5a2   : > { %v3016_v33 = vpop.xlane.xlu1 %3015  ;;  %v18492_v60 = vcvt.f32.s32 %v18491_v46 }
 0x5a3   : > { %v18493_v22 = vtrunc.f32 %v3016_v33 }
 0x5a4   : > { %vm2999_vm6 = vcmp.eq.s32.totalorder %v20768_v2, %v18492_v60  ;;  %vm3000_vm7 = vcmp.eq.s32.totalorder %v20771_v3, %v18492_v60 }
 0x5a5   : > { %v18494_v23 = vcvt.f32.s32 %v18493_v22  ;;  %vm19949_vm10 = vmpackc.low %vm3000_vm7, %vm3000_vm7  ;;  %vm20444_vm7 = vmmov 0  }
 0x5a6   : > { %19950 = vmatprep.mubr.msk.bf16.mxu0 %vm19949_vm10, %v20442_v61  ;;  %vm19953_vm12 = vmpackc.low %vm2999_vm6, %vm2999_vm6 }
 0x5a7   : > { %vm3018_vm8 = vcmp.eq.s32.totalorder %v20768_v2, %v18494_v23  ;;  %vm3019_vm9 = vcmp.eq.s32.totalorder %v20771_v3, %v18494_v23  ;;  %19954 = vmatmul.mubr.msk.bf16.vlgmr.msra.gmra.mrb[56].mxu0 %vm19953_vm12, %v20442_v61 }
 0x5a8   : > { %vm19951_vm11 = vmpackc.low %vm3019_vm9, %vm3019_vm9  ;;  %17770 = vmatpush3.bf16.msra.mxu0 %v18814_v27 }
 0x5a9   : > { %19952 = vmatprep.mubr.msk.bf16.mxu1 %vm19951_vm11, %v20442_v61  ;;  %vm19955_vm13 = vmpackc.low %vm3018_vm8, %vm3018_vm8  ;;  %17771 = vmatprep.subr.bf16.mxu0 %v18815_v26  ;;  %v18845_v26 = vld [vmem:[#allocation10] sm:$0xff]  }
 0x5aa   : > { %19956 = vmatmul.mubr.msk.bf16.vlgmr.msra.gmra.mrb[56].mxu1 %vm19955_vm13, %v20442_v61 }
 0x5ab   : > { %17792 = vmatpush3.bf16.msra.mxu1 %v18818_v50 }
 0x5ac   : > { %17793 = vmatprep.subr.bf16.mxu1 %v18820_v30  ;;  %17772 = vmatpush3.bf16.msra.mxu0 %v18817_v10 }
 0x5ad   : > { %17773 = vmatprep.subr.bf16.mxu0 %v18819_v35 }
 0x5af   : > { %17794 = vmatpush3.bf16.msra.mxu1 %v18822_v24 }
 0x5b0   : > { %17795 = vmatprep.subr.bf16.mxu1 %v18824_v31  ;;  %17774 = vmatpush3.bf16.msra.mxu0 %v18821_v37 }
 0x5b1   : > { %17775 = vmatprep.subr.bf16.mxu0 %v18823_v43 }
 0x5b3   : > { %17796 = vmatpush3.bf16.msra.mxu1 %v18826_v25 }
 0x5b4   : > { %17797 = vmatprep.subr.bf16.mxu1 %v18828_v16  ;;  %17776 = vmatpush3.bf16.msra.mxu0 %v18825_v39 }
 0x5b5   : > { %17777 = vmatprep.subr.bf16.mxu0 %v18827_v20 }
 0x5b7   : > { %17798 = vmatpush3.bf16.msra.mxu1 %v18830_v29 }
 0x5b8   : > { %17799 = vmatprep.subr.bf16.mxu1 %v18832_v42  ;;  %17778 = vmatpush3.bf16.msra.mxu0 %v18829_v47  ;;  %v18848_v42 = vld [vmem:[#allocation10 + $0x18] sm:$0xff]   ;;  %v18849_v47 = vld [vmem:[#allocation10 + $0x20] sm:$0xff]  }
 0x5b9   : > { %17779 = vmatprep.subr.bf16.mxu0 %v18831_v59  ;;  %v18851_v59 = vld [vmem:[#allocation10 + $0x30] sm:$0xff]  }
 0x5bb   : > { %17800 = vmatpush3.bf16.msra.mxu1 %v18834_v49  ;;  %v18850_v49 = vld [vmem:[#allocation10 + $0x28] sm:$0xff]  }
 0x5bc   : > { %17801 = vmatprep.subr.bf16.mxu1 %v18836_v8  ;;  %17780 = vmatpush3.bf16.msra.mxu0 %v18833_v44  ;;  %v18852_v8 = vld [vmem:[#allocation10 + $0x38] sm:$0xff]  }
 0x5bd   : > { %17781 = vmatprep.subr.bf16.mxu0 %v18835_v28 }
 0x5bf   : > { %17802 = vmatpush3.bf16.msra.mxu1 %v18838_v52 }
 0x5c0   : > { %v3035_v57 = vpop.xlane.xlu0 %3034  ;;  %17803 = vmatprep.subr.bf16.mxu1 %v18840_v56  ;;  %17782 = vmatpush3.bf16.msra.mxu0 %v18837_v6  ;;  %v18853_v6 = vld [vmem:[#allocation13] ss:$12 sps:$4 sm:$0xff]  }
 0x5c1   : > { %v18495_v41 = vtrunc.f32 %v3035_v57  ;;  %17783 = vmatprep.subr.bf16.mxu0 %v18839_v11 }
 0x5c2   : > { %v3054_v45 = vpop.xlane.xlu1 %3053 }
 0x5c3   : > { %v18497_v18 = vtrunc.f32 %v3054_v45  ;;  %v18496_v17 = vcvt.f32.s32 %v18495_v41  ;;  %17804 = vmatpush3.bf16.msra.mxu1 %v18842_v51  ;;  %v18855_v51 = vld [vmem:[#allocation13 + $0x4] ss:$12 sps:$4 sm:$0xff]   ;;  %v18859_v41 = vld [vmem:[#allocation13 + $0x1c] ss:$12 sps:$4 sm:$0xff]  }
 0x5c4   : > { %17805 = vmatprep.subr.bf16.mxu1 %v18843_v38  ;;  %17784 = vmatpush3.bf16.msra.mxu0 %v18841_v63 }
 0x5c5   : > { %v18498_v36 = vcvt.f32.s32 %v18497_v18  ;;  %vm3037_vm14 = vcmp.eq.s32.totalorder %v20768_v2, %v18496_v17  ;;  %vm3038_vm15 = vcmp.eq.s32.totalorder %v20771_v3, %v18496_v17  ;;  %18305 = vmatprep.subr.bf16.mxu0 %v20443_v40 }
 0x5c6   : > { %vm19957_vm3 = vmpackc.low %vm3038_vm15, %vm3038_vm15 }
 0x5c7   : > { %vm3056_vm1 = vcmp.eq.s32.totalorder %v20768_v2, %v18498_v36  ;;  %vm3057_vm2 = vcmp.eq.s32.totalorder %v20771_v3, %v18498_v36  ;;  %17806 = vmatpush3.bf16.msra.mxu1 %v18844_v7  ;;  %19958 = vmatprep.mubr.msk.bf16.mxu0 %vm19957_vm3, %v20442_v61  ;;  %vm19961_vm5 = vmpackc.low %vm3037_vm14, %vm3037_vm14  ;;  %v18857_v36 = vld [vmem:[#allocation13 + $0x18] ss:$12 sps:$4 sm:$0xff]  }
 0x5c8   : > { %vm19959_vm4 = vmpackc.low %vm3057_vm2, %vm3057_vm2  ;;  %19962 = vmatmul.mubr.msk.bf16.vlgmr.msra.gmra.mrb[60].mxu0 %vm19961_vm5, %v20442_v61  ;;  %6113 = vmatprep.subr.bf16.mxu1 %v18855_v51  ;;  %v18864_v51 = vld [vmem:[#allocation13 + $0x38] ss:$12 sps:$4 sm:$0xff]  }
 0x5c9   : > { %19960 = vmatprep.mubr.msk.bf16.mxu1 %vm19959_vm4, %v20442_v61  ;;  %vm19963_vm6 = vmpackc.low %vm3056_vm1, %vm3056_vm1  ;;  %18306 = vmatpush3.bf16.msra.mxu0 %v18845_v26 }
 0x5ca   : > { %19964 = vmatmul.mubr.msk.bf16.vlgmr.msra.gmra.mrb[60].mxu1 %vm19963_vm6, %v20442_v61  ;;  %v18846_v61 = vld [vmem:[#allocation10 + $0x8] sm:$0xff]   ;;  %18307 = vmatprep.subr.bf16.mxu0 %v20443_v40 }
 0x5cb   : > { %6145 = vmatprep.mubr.bf16.mxu1 %v20441_v34  ;;  %18321 = vmatprep.mubr.msk.bf16.mxu0 %vm20444_vm7, %v20443_v40 }
 0x5cc   : > { %6114 = vmatpush1.bf16.msra.mxu1 %v18853_v6  ;;  %v18860_v6 = vld [vmem:[#allocation13 + $0x20] ss:$12 sps:$4 sm:$0xff]  }
 0x5cd   : > { %18308 = vmatpush3.bf16.msra.mxu0 %v18846_v61  ;;  %6115 = vmatprep.subr.bf16.mxu1 %v18859_v41  ;;  %v18883_v41 = vld [vmem:[#allocation13 + $0xac] ss:$12 sps:$4 sm:$0xff]  }
 0x5ce   : > { %18309 = vmatprep.subr.bf16.mxu0 %v20443_v40 }
 0x5d0   : > { %6116 = vmatpush1.bf16.msra.mxu1 %v18857_v36  ;;  %v18887_v36 = vld [vmem:[%s22464_s11 + $0x4] ss:$12 sps:$4 sm:$0xff]  }
 0x5e4   : > { %v17609_v19 = vpop.f32.mrb[44].mxu0 }
 0x5e5   : > { %v17610_v62 = vpop.f32.mrb[45].mxu0 }
 0x5e6   : > { %v17611_v9 = vadd.f32 %v17610_v62, %v17609_v19  ;;  %v17612_v48 = vpop.f32.mrb[46].mxu0  ;;  %v18863_v19 = vld [vmem:[#allocation13 + $0x34] ss:$12 sps:$4 sm:$0xff]   ;;  %v18861_v62 = vld [vmem:[#allocation13 + $0x30] ss:$12 sps:$4 sm:$0xff]  }
 0x5e7   : > { %v17613_v21 = vpop.f32.mrb[47].mxu0  ;;  %v17631_v46 = vpop.f32.mrb[44].mxu1  ;;  %6117 = vmatprep.subr.bf16.mxu1 %v18863_v19  ;;  %v18865_v48 = vld [vmem:[#allocation13 + $0x48] ss:$12 sps:$4 sm:$0xff]  }
 0x5e8   : > { %v5458_v33 = vadd.f32 %v17611_v9, %v21261_v32  ;;  %v17632_v22 = vpop.f32.mrb[45].mxu1  ;;  %v18847_v32 = vld [vmem:[#allocation10 + $0x10] sm:$0xff]   ;;  %6118 = vmatpush1.bf16.msra.mxu1 %v18861_v62 }
 0x5e9   : > { %v17633_v60 = vadd.f32 %v17632_v22, %v17631_v46  ;;  %v17634_v23 = vpop.f32.mrb[46].mxu1  ;;  %18310 = vmatpush3.bf16.msra.mxu0 %v18847_v32  ;;  %v18867_v9 = vld [vmem:[#allocation13 + $0x4c] ss:$12 sps:$4 sm:$0xff]   ;;  %v18871_v21 = vld [vmem:[#allocation13 + $0x64] ss:$12 sps:$4 sm:$0xff]  }
 0x5ea   : > { %v17635_v27 = vpop.f32.mrb[47].mxu1  ;;  %18311 = vmatprep.subr.bf16.mxu0 %v20443_v40  ;;  %6119 = vmatprep.subr.bf16.mxu1 %v18867_v9  ;;  %v18875_v46 = vld [vmem:[#allocation13 + $0x7c] ss:$12 sps:$4 sm:$0xff]   ;;  %v18873_v22 = vld [vmem:[#allocation13 + $0x78] ss:$12 sps:$4 sm:$0xff]  }
 0x5eb   : > { %v5498_v50 = vadd.f32 %v17633_v60, %v5458_v33  ;;  %v18869_v33 = vld [vmem:[#allocation13 + $0x60] ss:$12 sps:$4 sm:$0xff]   ;;  %v18877_v23 = vld [vmem:[#allocation13 + $0x90] ss:$12 sps:$4 sm:$0xff]  }
 0x5ec   : > { %6120 = vmatpush1.bf16.msra.mxu1 %v18865_v48  ;;  %v18879_v60 = vld [vmem:[#allocation13 + $0x94] ss:$12 sps:$4 sm:$0xff]   ;;  %v18885_v48 = vld [vmem:[%s22464_s11] ss:$12 sps:$4 sm:$0xff]  }
 0x5ed   : > { %18312 = vmatpush3.bf16.msra.mxu0 %v18848_v42  ;;  %6121 = vmatprep.subr.bf16.mxu1 %v18871_v21 }
 0x5ee   : > { %18313 = vmatprep.subr.bf16.mxu0 %v20443_v40 }
 0x5f0   : > { %6122 = vmatpush1.bf16.msra.mxu1 %v18869_v33 }
 0x5f1   : > { %18314 = vmatpush3.bf16.msra.mxu0 %v18849_v47  ;;  %6123 = vmatprep.subr.bf16.mxu1 %v18875_v46  ;;  %v18890_v46 = vld [vmem:[%s22464_s11 + $0x1c] ss:$12 sps:$4 sm:$0xff]  }
 0x5f2   : > { %18315 = vmatprep.subr.bf16.mxu0 %v20443_v40 }
 0x5f4   : > { %6124 = vmatpush1.bf16.msra.mxu1 %v18873_v22  ;;  %v18888_v22 = vld [vmem:[%s22464_s11 + $0x18] ss:$12 sps:$4 sm:$0xff]  }
 0x5f5   : > { %18316 = vmatpush3.bf16.msra.mxu0 %v18850_v49  ;;  %6125 = vmatprep.subr.bf16.mxu1 %v18879_v60  ;;  %v18893_v60 = vld [vmem:[%s22464_s11 + $0x34] ss:$12 sps:$4 sm:$0xff]  }
 0x5f6   : > { %18317 = vmatprep.subr.bf16.mxu0 %v20443_v40 }
 0x5f8   : > { %6126 = vmatpush1.bf16.msra.mxu1 %v18877_v23  ;;  %v18891_v23 = vld [vmem:[%s22464_s11 + $0x30] ss:$12 sps:$4 sm:$0xff]  }
 0x5f9   : > { %18318 = vmatpush3.bf16.msra.mxu0 %v18851_v59  ;;  %6127 = vmatprep.subr.bf16.mxu1 %v18883_v41  ;;  %v18937_v41 = vld [vmem:[%s22464_s11 + $0x140] ss:$12 sps:$4 sm:$0xff]  }
 0x5fa   : > { %18319 = vmatprep.subr.bf16.mxu0 %v20443_v40 }
 0x5fd   : > { %18320 = vmatpush3.bf16.msra.mxu0 %v18852_v8 }
 0x5fe   : > { %18325 = vmatprep.subr.bf16.mxu0 %v20443_v40 }
 0x604   : > { %v17653_v30 = vpop.f32.mrb[48].mxu0 }
 0x605   : > { %v17654_v10 = vpop.f32.mrb[49].mxu0 }
 0x606   : > { %v17655_v24 = vadd.f32 %v17654_v10, %v17653_v30  ;;  %v17656_v35 = vpop.f32.mrb[50].mxu0 }
 0x607   : > { %v17657_v31 = vpop.f32.mrb[51].mxu0 }
 0x608   : > { %v5538_v37 = vadd.f32 %v17655_v24, %v5498_v50  ;;  %v17675_v25 = vpop.f32.mrb[48].mxu1 }
 0x609   : > { %v17676_v43 = vpop.f32.mrb[49].mxu1 }
 0x60a   : > { %v17677_v16 = vadd.f32 %v17676_v43, %v17675_v25  ;;  %v17678_v39 = vpop.f32.mrb[50].mxu1 }
 0x60b   : > { %v17679_v29 = vpop.f32.mrb[51].mxu1 }
 0x60c   : > { %v5578_v20 = vadd.f32 %v17677_v16, %v5538_v37 }
 0x625   : > { %v17697_v44 = vpop.f32.mrb[52].mxu0 }
 0x626   : > { %v17698_v52 = vpop.f32.mrb[53].mxu0 }
 0x627   : > { %v17699_v28 = vadd.f32 %v17698_v52, %v17697_v44  ;;  %v17700_v56 = vpop.f32.mrb[54].mxu0 }
 0x628   : > { %v17701_v57 = vpop.f32.mrb[55].mxu0  ;;  %v17719_v45 = vpop.f32.mrb[52].mxu1 }
 0x629   : > { %v5618_v11 = vadd.f32 %v17699_v28, %v5578_v20  ;;  %v17720_v38 = vpop.f32.mrb[53].mxu1  ;;  %v18856_v28 = vld [vmem:[#allocation13 + $0x8] ss:$12 sps:$4 sm:$0xff]   ;;  %v18868_v57 = vld [vmem:[#allocation13 + $0x50] ss:$12 sps:$4 sm:$0xff]  }
 0x62a   : > { %v17721_v18 = vadd.f32 %v17720_v38, %v17719_v45  ;;  %v17722_v17 = vpop.f32.mrb[54].mxu1  ;;  %v18872_v45 = vld [vmem:[#allocation13 + $0x68] ss:$12 sps:$4 sm:$0xff]   ;;  %v18880_v38 = vld [vmem:[#allocation13 + $0x98] ss:$12 sps:$4 sm:$0xff]  }
 0x62b   : > { %v17723_v63 = vpop.f32.mrb[55].mxu1  ;;  %v18884_v17 = vld [vmem:[#allocation13 + $0xb0] ss:$12 sps:$4 sm:$0xff]  }
 0x62c   : > { %v5658_v7 = vadd.f32 %v17721_v18, %v5618_v11  ;;  %v18876_v11 = vld [vmem:[#allocation13 + $0x80] ss:$12 sps:$4 sm:$0xff]   ;;  %v18881_v18 = vld [vmem:[#allocation13 + $0xa8] ss:$12 sps:$4 sm:$0xff]   ;;  %v16350_v63 = vld [vmem:[#allocation11] ss:$0 sm:$0xff] }
 0x62d   : > { %6128 = vmatpush1.bf16.msra.mxu1 %v18881_v18  ;;  %v18938_v18 = vld [vmem:[%s22464_s11 + $0x80] ss:$12 sps:$4 sm:$0xff]  }
 0x62e   : > { %6712 = vmatprep.subr.bf16.mxu1 %v18887_v36  ;;  %v18942_v36 = vld [vmem:[%s22464_s11 + $0x158] ss:$12 sps:$4 sm:$0xff]  }
 0x67a   : > { %v17741_v27 = vpop.f32.mrb[56].mxu0 }
 0x67b   : > { %v17742_v26 = vpop.f32.mrb[57].mxu0 }
 0x67c   : > { %v17743_v10 = vadd.f32 %v17742_v26, %v17741_v27  ;;  %v17744_v61 = vpop.f32.mrb[58].mxu0  ;;  %v18896_v27 = vld [vmem:[%s22464_s11 + $0x4c] ss:$12 sps:$4 sm:$0xff]   ;;  %v18899_v26 = vld [vmem:[%s22464_s11 + $0x64] ss:$12 sps:$4 sm:$0xff]  }
 0x67d   : > { %v17763_v50 = vpop.f32.mrb[56].mxu1  ;;  %v17745_v31 = vpop.f32.mrb[59].mxu0  ;;  %v18900_v61 = vld [vmem:[%s22464_s11 + $0x78] ss:$12 sps:$4 sm:$0xff]  }
 0x67e   : > { %v17764_v30 = vpop.f32.mrb[57].mxu1  ;;  %v5698_v25 = vadd.f32 %v17743_v10, %v5658_v7  ;;  %v18902_v10 = vld [vmem:[%s22464_s11 + $0x7c] ss:$12 sps:$4 sm:$0xff]   ;;  %v18908_v31 = vld [vmem:[%s22464_s11 + $0xac] ss:$12 sps:$4 sm:$0xff]  }
 0x67f   : > { %v17765_v24 = vadd.f32 %v17764_v30, %v17763_v50  ;;  %v17766_v35 = vpop.f32.mrb[58].mxu1  ;;  %v18894_v50 = vld [vmem:[%s22464_s11 + $0x48] ss:$12 sps:$4 sm:$0xff]   ;;  %v18897_v30 = vld [vmem:[%s22464_s11 + $0x60] ss:$12 sps:$4 sm:$0xff]  }
 0x680   : > { %v17767_v37 = vpop.f32.mrb[59].mxu1  ;;  %v18903_v35 = vld [vmem:[%s22464_s11 + $0x90] ss:$12 sps:$4 sm:$0xff]  }
 0x681   : > { %v5738_v43 = vadd.f32 %v17765_v24, %v5698_v25  ;;  %v18905_v24 = vld [vmem:[%s22464_s11 + $0x94] ss:$12 sps:$4 sm:$0xff]   ;;  %v18911_v25 = vld [vmem:[%s22464_s11 + $0xc4] ss:$12 sps:$4 sm:$0xff]  }
 0x682   : > { %v18906_v37 = vld [vmem:[%s22464_s11 + $0xa8] ss:$12 sps:$4 sm:$0xff]  }
 0x69b   : > { %v17785_v32 = vpop.f32.mrb[60].mxu0 }
 0x69c   : > { %v17786_v39 = vpop.f32.mrb[61].mxu0 }
 0x69d   : > { %v17807_v16 = vpop.f32.mrb[60].mxu1  ;;  %v17787_v20 = vadd.f32 %v17786_v39, %v17785_v32  ;;  %v17788_v42 = vpop.f32.mrb[62].mxu0  ;;  %v18909_v32 = vld [vmem:[%s22464_s11 + $0xc0] ss:$12 sps:$4 sm:$0xff]   ;;  %v18916_v39 = vld [vmem:[%s22464_s11 + $0xdc] ss:$12 sps:$4 sm:$0xff]  }
 0x69e   : > { %v17808_v29 = vpop.f32.mrb[61].mxu1  ;;  %v17789_v59 = vpop.f32.mrb[63].mxu0  ;;  %v18918_v42 = vld [vmem:[%s22464_s11 + $0x20] ss:$12 sps:$4 sm:$0xff]  }
 0x69f   : > { %v17809_v47 = vadd.f32 %v17808_v29, %v17807_v16  ;;  %v17810_v49 = vpop.f32.mrb[62].mxu1  ;;  %v5778_v44 = vadd.f32 %v17787_v20, %v5738_v43  ;;  %v18912_v43 = vld [vmem:[%s22464_s11 + $0xc8] ss:$12 sps:$4 sm:$0xff]   ;;  %v18917_v29 = vld [vmem:[%s22464_s11 + $0xe0] ss:$12 sps:$4 sm:$0xff]  }
 0x6a0   : > { %v17811_v8 = vpop.f32.mrb[63].mxu1  ;;  %v18913_v16 = vld [vmem:[%s22464_s11 + $0x8] ss:$12 sps:$4 sm:$0xff]   ;;  %v18914_v20 = vld [vmem:[%s22464_s11 + $0xd8] ss:$12 sps:$4 sm:$0xff]  }
 0x6a1   : > { %v5818_v52 = vadd.f32 %v17809_v47, %v5778_v44  ;;  %v18921_v47 = vld [vmem:[%s22464_s11 + $0xf4] ss:$12 sps:$4 sm:$0xff]   ;;  %v18922_v49 = vld [vmem:[%s22464_s11 + $0xf8] ss:$12 sps:$4 sm:$0xff]   ;;  %v18919_v59 = vld [vmem:[%s22464_s11 + $0xf0] ss:$12 sps:$4 sm:$0xff]  }
 0x6a2   : > { %v18923_v8 = vld [vmem:[%s22464_s11 + $0x38] ss:$12 sps:$4 sm:$0xff]  }
 0x6a3   : > { %v5840_v56 = vpack.c.bf16 %v5818_v52, %v5818_v52  ;;  %v18926_v44 = vld [vmem:[%s22464_s11 + $0x10c] ss:$12 sps:$4 sm:$0xff]   ;;  %v18927_v52 = vld [vmem:[%s22464_s11 + $0x110] ss:$12 sps:$4 sm:$0xff]  }
 0x6a5   : > { %18322 = vmatmul.mubr.bf16.vlgmr.msra.gmra.mrb[64].mxu0 %v5840_v56  ;;  %v18928_v56 = vld [vmem:[%s22464_s11 + $0x50] ss:$12 sps:$4 sm:$0xff]  }
 0x6a6   : > { %18326 = vmatpush3.bf16.msra.mxu0 %v18856_v28  ;;  %18341 = vmatprep.mubr.msk.bf16.mxu0 %vm20444_vm7, %v20443_v40  ;;  %v18924_v28 = vld [vmem:[%s22464_s11 + $0x108] ss:$12 sps:$4 sm:$0xff]  }
 0x6a7   : > { %18327 = vmatprep.subr.bf16.mxu0 %v20443_v40 }
 0x6aa   : > { %18328 = vmatpush3.bf16.msra.mxu0 %v18860_v6  ;;  %v18931_v6 = vld [vmem:[%s22464_s11 + $0x124] ss:$12 sps:$4 sm:$0xff]  }
 0x6ab   : > { %18329 = vmatprep.subr.bf16.mxu0 %v20443_v40 }
 0x6ae   : > { %18330 = vmatpush3.bf16.msra.mxu0 %v18864_v51  ;;  %v18932_v51 = vld [vmem:[%s22464_s11 + $0x128] ss:$12 sps:$4 sm:$0xff]  }
 0x6af   : > { %18331 = vmatprep.subr.bf16.mxu0 %v20443_v40 }
 0x6b2   : > { %18332 = vmatpush3.bf16.msra.mxu0 %v18868_v57  ;;  %v18929_v57 = vld [vmem:[%s22464_s11 + $0x120] ss:$12 sps:$4 sm:$0xff]  }
 0x6b3   : > { %18333 = vmatprep.subr.bf16.mxu0 %v20443_v40 }
 0x6b6   : > { %18334 = vmatpush3.bf16.msra.mxu0 %v18872_v45  ;;  %v18933_v45 = vld [vmem:[%s22464_s11 + $0x68] ss:$12 sps:$4 sm:$0xff]  }
 0x6b7   : > { %18335 = vmatprep.subr.bf16.mxu0 %v20443_v40 }
 0x6ba   : > { %18336 = vmatpush3.bf16.msra.mxu0 %v18876_v11  ;;  %v18934_v11 = vld [vmem:[%s22464_s11 + $0x138] ss:$12 sps:$4 sm:$0xff]  }
 0x6bb   : > { %18337 = vmatprep.subr.bf16.mxu0 %v20443_v40 }
 0x6be   : > { %18338 = vmatpush3.bf16.msra.mxu0 %v18880_v38  ;;  %v18936_v38 = vld [vmem:[%s22464_s11 + $0x13c] ss:$12 sps:$4 sm:$0xff]  }
 0x6bf   : > { %18339 = vmatprep.subr.bf16.mxu0 %v20443_v40 }
 0x6c2   : > { %18340 = vmatpush3.bf16.msra.mxu0 %v18884_v17  ;;  %v18941_v17 = vld [vmem:[%s22464_s11 + $0x154] ss:$12 sps:$4 sm:$0xff]  }
 0x6c3   : > { %17831 = vmatprep.subr.bf16.mxu0 %v18912_v43 }
 0x778   : > { %v5929_v7 = vpop.f32.mrb[64].mxu0 }
 0x779   : > { %v5930_v19 = vadd.f32 %v16350_v63, %v5929_v7  ;;  %v18323_v62 = vpop.f32.mrb[65].mxu0  ;;  %v18939_v63 = vld [vmem:[%s22464_s11 + $0x150] ss:$12 sps:$4 sm:$0xff]   ;;  %v18943_v7 = vld [vmem:[%s22464_s11 + $0x98] ss:$12 sps:$4 sm:$0xff]  }
 0x77a   : > { %v5932_v9 = vpop.f32.mrb[66].mxu0  ;;  %v18947_v62 = vld [vmem:[%s22464_s11 + $0x170] ss:$12 sps:$4 sm:$0xff]  }
 0x77b   : > { %v5968_v21 = vpack.c.bf16 %v5930_v19, %v5930_v19  ;;  %v18324_v33 = vpop.f32.mrb[67].mxu0  ;;  %v18946_v19 = vld [vmem:[%s22464_s11 + $0x16c] ss:$12 sps:$4 sm:$0xff]   ;;  %v18944_v9 = vld [vmem:[%s22464_s11 + $0x168] ss:$12 sps:$4 sm:$0xff]  }
 0x77c   : > { %v5967_v33 = vld [vmem:[#allocation14] sm:$0x7] }
 0x77d   : > { %6146 = vmatmul.mubr.bf16.vlgmr.msra.gmra.mrb[64].mxu1 %v5968_v21  ;;  %18342 = vmatmul.mubr.bf16.vlgmr.msra.gmra.mrb[68].mxu0 %v5968_v21  ;;  %v18951_v21 = vld [vmem:[%s22464_s11 + $0x184] ss:$12 sps:$4 sm:$0xff]  }
 0x77e   : > { %6713 = vmatpush1.bf16.msra.mxu1 %v18885_v48  ;;  %17832 = vmatpush3.bf16.msra.mxu0 %v18913_v16  ;;  %v18948_v48 = vld [vmem:[%s22464_s11 + $0xb0] ss:$12 sps:$4 sm:$0xff]  }
 0x77f   : > { %6714 = vmatprep.subr.bf16.mxu1 %v18890_v46  ;;  %17833 = vmatprep.subr.bf16.mxu0 %v18917_v29  ;;  %v5973_v46 = vrot.slane %v5967_v33, %v20860_v53 }
 0x782   : > { %6715 = vmatpush1.bf16.msra.mxu1 %v18888_v22  ;;  %17834 = vmatpush3.bf16.msra.mxu0 %v18918_v42  ;;  %v5977_v22 = vrot.slane %v5967_v33, %v22492_v54 }
 0x783   : > { %6716 = vmatprep.subr.bf16.mxu1 %v18893_v60  ;;  %17835 = vmatprep.subr.bf16.mxu0 %v18922_v49 }
 0x786   : > { %6717 = vmatpush1.bf16.msra.mxu1 %v18891_v23  ;;  %17836 = vmatpush3.bf16.msra.mxu0 %v18923_v8  ;;  %v18952_v8 = vld [vmem:[%s22464_s11 + $0x188] ss:$12 sps:$4 sm:$0xff]  }
 0x787   : > { %6718 = vmatprep.subr.bf16.mxu1 %v18896_v27  ;;  %17837 = vmatprep.subr.bf16.mxu0 %v18927_v52  ;;  %v18955_v52 = vld [vmem:[%s22464_s11 + $0x19c] ss:$12 sps:$4 sm:$0xff]  }
 0x78a   : > { %6719 = vmatpush1.bf16.msra.mxu1 %v18894_v50  ;;  %17838 = vmatpush3.bf16.msra.mxu0 %v18928_v56  ;;  %v18956_v56 = vld [vmem:[%s22464_s11 + $0x1a0] ss:$12 sps:$4 sm:$0xff]  }
 0x78b   : > { %6720 = vmatprep.subr.bf16.mxu1 %v18899_v26  ;;  %17839 = vmatprep.subr.bf16.mxu0 %v18932_v51  ;;  %v18957_v51 = vld [vmem:[%s22464_s11 + $0x1b0] ss:$12 sps:$4 sm:$0xff]  }
 0x78e   : > { %6721 = vmatpush1.bf16.msra.mxu1 %v18897_v30  ;;  %17840 = vmatpush3.bf16.msra.mxu0 %v18933_v45  ;;  %v18963_v45 = vld [vmem:[%s22464_s11 + $0x1cc] ss:$12 sps:$4 sm:$0xff]  }
 0x78f   : > { %6722 = vmatprep.subr.bf16.mxu1 %v18902_v10  ;;  %17841 = vmatprep.subr.bf16.mxu0 %v18937_v41 }
 0x792   : > { %6723 = vmatpush1.bf16.msra.mxu1 %v18900_v61  ;;  %17842 = vmatpush3.bf16.msra.mxu0 %v18938_v18  ;;  %v18967_v18 = vld [vmem:[%s22464_s11 + $0x1e4] ss:$12 sps:$4 sm:$0xff]  }
 0x793   : > { %6724 = vmatprep.subr.bf16.mxu1 %v18905_v24  ;;  %17843 = vmatprep.subr.bf16.mxu0 %v18942_v36  ;;  %v18965_v36 = vld [vmem:[%s22464_s11 + $0x1e0] ss:$12 sps:$4 sm:$0xff]  }
 0x796   : > { %6725 = vmatpush1.bf16.msra.mxu1 %v18903_v35  ;;  %17844 = vmatpush3.bf16.msra.mxu0 %v18943_v7  ;;  %v18971_v7 = vld [vmem:[%s22464_s11 + $0x1fc] ss:$12 sps:$4 sm:$0xff]  }
 0x797   : > { %6726 = vmatprep.subr.bf16.mxu1 %v18908_v31  ;;  %17845 = vmatprep.subr.bf16.mxu0 %v18947_v62  ;;  %v18972_v62 = vld [vmem:[%s22464_s11 + $0x200] ss:$12 sps:$4 sm:$0xff]  }
 0x79a   : > { %6727 = vmatpush1.bf16.msra.mxu1 %v18906_v37  ;;  %17846 = vmatpush3.bf16.msra.mxu0 %v18948_v48  ;;  %v18973_v48 = vld [vmem:[%s22464_s11 + $0x210] ss:$12 sps:$4 sm:$0xff]  }
 0x79b   : > { %6728 = vmatprep.subr.bf16.mxu1 %v18911_v25  ;;  %18345 = vmatprep.subr.bf16.mxu0 %v20443_v40 }
 0x79e   : > { %6729 = vmatpush1.bf16.msra.mxu1 %v18909_v32 }
 0x79f   : > { %6730 = vmatprep.subr.bf16.mxu1 %v18916_v39  ;;  %v5981_v39 = vrot.slane %v5967_v33, %v20866_v55  ;;  %v18979_v33 = vld [vmem:[%s22464_s11 + $0x22c] ss:$12 sps:$4 sm:$0xff]  }
 0x7a2   : > { %6731 = vmatpush1.bf16.msra.mxu1 %v18914_v20 }
 0x7a3   : > { %6732 = vmatprep.subr.bf16.mxu1 %v18921_v47 }
 0x7a6   : > { %6733 = vmatpush1.bf16.msra.mxu1 %v18919_v59  ;;  %v18949_v59 = vld [vmem:[%s22464_s11 + $0x180] ss:$12 sps:$4 sm:$0xff]  }
 0x7a7   : > { %6734 = vmatprep.subr.bf16.mxu1 %v18926_v44 }
 0x7aa   : > { %6735 = vmatpush1.bf16.msra.mxu1 %v18924_v28  ;;  %v18953_v28 = vld [vmem:[%s22464_s11 + $0x198] ss:$12 sps:$4 sm:$0xff]  }
 0x7ab   : > { %6736 = vmatprep.subr.bf16.mxu1 %v18931_v6  ;;  %v18959_v6 = vld [vmem:[%s22464_s11 + $0x1b4] ss:$12 sps:$4 sm:$0xff]  }
 0x7ae   : > { %6737 = vmatpush1.bf16.msra.mxu1 %v18929_v57  ;;  %v18960_v57 = vld [vmem:[%s22464_s11 + $0x1b8] ss:$12 sps:$4 sm:$0xff]  }
 0x7af   : > { %6738 = vmatprep.subr.bf16.mxu1 %v18936_v38  ;;  %v18964_v38 = vld [vmem:[%s22464_s11 + $0x1d0] ss:$12 sps:$4 sm:$0xff]  }
 0x7b2   : > { %6739 = vmatpush1.bf16.msra.mxu1 %v18934_v11  ;;  %v18961_v11 = vld [vmem:[%s22464_s11 + $0x1c8] ss:$12 sps:$4 sm:$0xff]  }
 0x7b3   : > { %6740 = vmatprep.subr.bf16.mxu1 %v18941_v17 }
 0x7b6   : > { %6741 = vmatpush1.bf16.msra.mxu1 %v18939_v63  ;;  %v18968_v63 = vld [vmem:[%s22464_s11 + $0x1e8] ss:$12 sps:$4 sm:$0xff]  }
 0x7b7   : > { %6742 = vmatprep.subr.bf16.mxu1 %v18946_v19  ;;  %v18969_v19 = vld [vmem:[%s22464_s11 + $0x1f8] ss:$12 sps:$4 sm:$0xff]  }
 0x7ba   : > { %6743 = vmatpush1.bf16.msra.mxu1 %v18944_v9  ;;  %v18975_v9 = vld [vmem:[%s22464_s11 + $0x214] ss:$12 sps:$4 sm:$0xff]  }
 0x7bb   : > { %6753 = vmatprep.subr.bf16.mxu1 %v18951_v21  ;;  %v18976_v21 = vld [vmem:[%s22464_s11 + $0x218] ss:$12 sps:$4 sm:$0xff]  }
 0x850   : > { %v6147_v60 = vpop.f32.mrb[64].mxu1  ;;  %v6188_v23 = vpop.f32.mrb[68].mxu0 }
 0x851   : > { %v6148_v27 = vadd.f32 %v6147_v60, %v5973_v46  ;;  %v6149_v50 = vpop.f32.mrb[65].mxu1  ;;  %v18343_v26 = vpop.f32.mrb[69].mxu0  ;;  %v6189_v29 = vadd.f32 %v6188_v23, %v5981_v39  ;;  %v18977_v46 = vld [vmem:[%s22464_s11 + $0x228] ss:$12 sps:$4 sm:$0xff]   ;;  %v18983_v60 = vld [vmem:[#allocation17 + $0x4] ss:$16 sps:$4 sm:$0xff]  }
 0x852   : > { %v6150_v30 = vadd.f32 %v6149_v50, %v5977_v22  ;;  %v6151_v10 = vpop.f32.mrb[66].mxu1  ;;  %v6191_v61 = vpop.f32.mrb[70].mxu0  ;;  %v18980_v22 = vld [vmem:[%s22464_s11 + $0x230] ss:$12 sps:$4 sm:$0xff]   ;;  %v18986_v23 = vld [vmem:[#allocation17 + $0xc] ss:$16 sps:$4 sm:$0xff]  }
 0x853   : > { %v16383_v24 = vmul.f32 -1.442695, %v6148_v27  ;;  %v6152_v35 = vpop.f32.mrb[67].mxu1  ;;  %v18344_v31 = vpop.f32.mrb[71].mxu0  ;;  %v16385_v47 = vmul.f32 -1.442695, %v6189_v29 }
 0x854   : > { %v16384_v37 = vmul.f32 -1.442695, %v6150_v30  ;;  %v18981_v50 = vld [vmem:[#allocation17] ss:$16 sps:$4 sm:$0xff]   ;;  %v18984_v26 = vld [vmem:[#allocation17 + $0x8] ss:$16 sps:$4 sm:$0xff]  }
 0x855   : > { %19549 = vpow2.f32 %v16383_v24  ;;  %v18989_v10 = vld [vmem:[#allocation17 + $0x24] ss:$16 sps:$4 sm:$0xff]   ;;  %v18992_v61 = vld [vmem:[#allocation17 + $0x2c] ss:$16 sps:$4 sm:$0xff]   ;;  %v18987_v24 = vld [vmem:[#allocation17 + $0x20] ss:$16 sps:$4 sm:$0xff]  }
 0x856   : > { %19551 = vpow2.f32 %v16384_v37  ;;  %v18990_v35 = vld [vmem:[#allocation17 + $0x28] ss:$16 sps:$4 sm:$0xff]   ;;  %v18995_v31 = vld [vmem:[#allocation17 + $0x44] ss:$16 sps:$4 sm:$0xff]   ;;  %v18998_v37 = vld [vmem:[#allocation17 + $0x4c] ss:$16 sps:$4 sm:$0xff]  }
 0x857   : > { %v18999_v39 = vld [vmem:[#allocation17 + $0x60] ss:$16 sps:$4 sm:$0xff]   ;;  %v19002_v29 = vld [vmem:[#allocation17 + $0x68] ss:$16 sps:$4 sm:$0xff]  }
 0x85f   : > { %v19550_v25 = vpop.eup %19549 }
 0x860   : > { %v6203_v43 = vadd.f32 1.0, %v19550_v25  ;;  %v19552_v32 = vpop.eup %19551  ;;  %v18993_v25 = vld [vmem:[#allocation17 + $0x40] ss:$16 sps:$4 sm:$0xff]  }
 0x861   : > { %v6204_v16 = vadd.f32 1.0, %v19552_v32  ;;  %v19001_v32 = vld [vmem:[#allocation17 + $0x64] ss:$16 sps:$4 sm:$0xff]  }
 0x862   : > { %19553 = vrcp.f32 %v6203_v43  ;;  %v18996_v43 = vld [vmem:[#allocation17 + $0x48] ss:$16 sps:$4 sm:$0xff]  }
 0x863   : > { %19555 = vrcp.f32 %v6204_v16  ;;  %v19004_v16 = vld [vmem:[#allocation17 + $0x6c] ss:$16 sps:$4 sm:$0xff]  }
 0x864   : > { %19557 = vpow2.f32 %v16385_v47  ;;  %v19005_v47 = vld [vmem:[#allocation17 + $0x80] ss:$16 sps:$4 sm:$0xff]  }
 0x86c   : > { %v19554_v20 = vpop.eup %19553 }
 0x86d   : > { %v19556_v42 = vpop.eup %19555  ;;  %v6309_v44 = vpack.c.bf16 %v19554_v20, %v19554_v20  ;;  %v19007_v20 = vld [vmem:[#allocation17 + $0x84] ss:$16 sps:$4 sm:$0xff]  }
 0x86e   : > { %v6310_v49 = vpack.c.bf16 %v19556_v42, %v19556_v42  ;;  %v19558_v41 = vpop.eup %19557  ;;  %v19010_v42 = vld [vmem:[#allocation17 + $0x8c] ss:$16 sps:$4 sm:$0xff]  }
 0x86f   : > { %v6205_v17 = vadd.f32 1.0, %v19558_v41  ;;  %v19031_v41 = vld [vmem:[#allocation17 + $0x104] ss:$16 sps:$4 sm:$0xff]  }
 0x870   : > { %6744 = vmatprep.mubr.bf16.mxu1 %v6310_v49  ;;  %6826 = vmatprep.mubr.bf16.mxu0 %v6310_v49  ;;  %v19008_v49 = vld [vmem:[#allocation17 + $0x88] ss:$16 sps:$4 sm:$0xff]  }
 0x871   : > { %6745 = vmatmul.mubr.bf16.vlgmr.msra.gmra.mrb[68].mxu1 %v6309_v44  ;;  %6827 = vmatmul.mubr.bf16.vlgmr.msra.gmra.mrb[72].mxu0 %v6309_v44  ;;  %19559 = vrcp.f32 %v6205_v17  ;;  %v19011_v44 = vld [vmem:[#allocation17 + $0xa0] ss:$16 sps:$4 sm:$0xff]  }
 0x872   : > { %6754 = vmatpush1.bf16.msra.mxu1 %v18949_v59  ;;  %18346 = vmatpush3.bf16.msra.mxu0 %v18952_v8  ;;  %v19013_v59 = vld [vmem:[#allocation17 + $0xa4] ss:$16 sps:$4 sm:$0xff]   ;;  %v19016_v8 = vld [vmem:[#allocation17 + $0xac] ss:$16 sps:$4 sm:$0xff]   ;;  %v19029_v17 = vld [vmem:[#allocation17 + $0x100] ss:$16 sps:$4 sm:$0xff]  }
 0x873   : > { %6755 = vmatprep.subr.bf16.mxu1 %v18955_v52  ;;  %18347 = vmatprep.subr.bf16.mxu0 %v20443_v40  ;;  %v19014_v52 = vld [vmem:[#allocation17 + $0xa8] ss:$16 sps:$4 sm:$0xff]  }
 0x874   : > { %6785 = vmatprep.mubr.bf16.mxu1 %v20441_v34  ;;  %18361 = vmatprep.mubr.msk.bf16.mxu0 %vm20444_vm7, %v20443_v40 }
 0x876   : > { %6756 = vmatpush1.bf16.msra.mxu1 %v18953_v28  ;;  %18348 = vmatpush3.bf16.msra.mxu0 %v18956_v56  ;;  %v19019_v28 = vld [vmem:[#allocation17 + $0xc4] ss:$16 sps:$4 sm:$0xff]   ;;  %v19022_v56 = vld [vmem:[#allocation17 + $0xcc] ss:$16 sps:$4 sm:$0xff]  }
 0x877   : > { %6757 = vmatprep.subr.bf16.mxu1 %v18959_v6  ;;  %18349 = vmatprep.subr.bf16.mxu0 %v20443_v40  ;;  %v19017_v6 = vld [vmem:[#allocation17 + $0xc0] ss:$16 sps:$4 sm:$0xff]  }
 0x87a   : > { %6758 = vmatpush1.bf16.msra.mxu1 %v18957_v51  ;;  %18350 = vmatpush3.bf16.msra.mxu0 %v18960_v57  ;;  %v19020_v51 = vld [vmem:[#allocation17 + $0xc8] ss:$16 sps:$4 sm:$0xff]   ;;  %v19025_v57 = vld [vmem:[#allocation17 + $0xe4] ss:$16 sps:$4 sm:$0xff]  }
 0x87b   : > { %6759 = vmatprep.subr.bf16.mxu1 %v18963_v45  ;;  %18351 = vmatprep.subr.bf16.mxu0 %v20443_v40  ;;  %v19560_v27 = vpop.eup %19559  ;;  %v19028_v45 = vld [vmem:[#allocation17 + $0xec] ss:$16 sps:$4 sm:$0xff]  }
 0x87c   : > { %v6311_v30 = vpack.c.bf16 %v19560_v27, %v19560_v27  ;;  %v19055_v27 = vld [vmem:[#allocation17 + $0x184] ss:$16 sps:$4 sm:$0xff]  }
 0x87e   : > { %6760 = vmatpush1.bf16.msra.mxu1 %v18961_v11  ;;  %18352 = vmatpush3.bf16.msra.mxu0 %v18964_v38  ;;  %v19023_v11 = vld [vmem:[#allocation17 + $0xe0] ss:$16 sps:$4 sm:$0xff]   ;;  %v19026_v38 = vld [vmem:[#allocation17 + $0xe8] ss:$16 sps:$4 sm:$0xff]  }
 0x87f   : > { %6761 = vmatprep.subr.bf16.mxu1 %v18967_v18  ;;  %18353 = vmatprep.subr.bf16.mxu0 %v20443_v40  ;;  %v19034_v18 = vld [vmem:[#allocation17 + $0x10c] ss:$16 sps:$4 sm:$0xff]  }
 0x882   : > { %6762 = vmatpush1.bf16.msra.mxu1 %v18965_v36  ;;  %18354 = vmatpush3.bf16.msra.mxu0 %v18968_v63  ;;  %v19032_v36 = vld [vmem:[#allocation17 + $0x108] ss:$16 sps:$4 sm:$0xff]   ;;  %v19037_v63 = vld [vmem:[#allocation17 + $0x124] ss:$16 sps:$4 sm:$0xff]  }
 0x883   : > { %6763 = vmatprep.subr.bf16.mxu1 %v18971_v7  ;;  %18355 = vmatprep.subr.bf16.mxu0 %v20443_v40  ;;  %v19040_v7 = vld [vmem:[#allocation17 + $0x12c] ss:$16 sps:$4 sm:$0xff]  }
 0x886   : > { %6764 = vmatpush1.bf16.msra.mxu1 %v18969_v19  ;;  %18356 = vmatpush3.bf16.msra.mxu0 %v18972_v62  ;;  %v19035_v19 = vld [vmem:[#allocation17 + $0x120] ss:$16 sps:$4 sm:$0xff]   ;;  %v19038_v62 = vld [vmem:[#allocation17 + $0x128] ss:$16 sps:$4 sm:$0xff]  }
 0x887   : > { %6765 = vmatprep.subr.bf16.mxu1 %v18975_v9  ;;  %18357 = vmatprep.subr.bf16.mxu0 %v20443_v40  ;;  %v19043_v9 = vld [vmem:[#allocation17 + $0x144] ss:$16 sps:$4 sm:$0xff]  }
 0x88a   : > { %6766 = vmatpush1.bf16.msra.mxu1 %v18973_v48  ;;  %18358 = vmatpush3.bf16.msra.mxu0 %v18976_v21  ;;  %v19046_v48 = vld [vmem:[#allocation17 + $0x14c] ss:$16 sps:$4 sm:$0xff]   ;;  %v19041_v21 = vld [vmem:[#allocation17 + $0x140] ss:$16 sps:$4 sm:$0xff]  }
 0x88b   : > { %6767 = vmatprep.subr.bf16.mxu1 %v18979_v33  ;;  %18359 = vmatprep.subr.bf16.mxu0 %v20443_v40  ;;  %v19044_v33 = vld [vmem:[#allocation17 + $0x148] ss:$16 sps:$4 sm:$0xff]  }
 0x88e   : > { %6768 = vmatpush1.bf16.msra.mxu1 %v18977_v46  ;;  %18360 = vmatpush3.bf16.msra.mxu0 %v18980_v22  ;;  %v19049_v46 = vld [vmem:[#allocation17 + $0x164] ss:$16 sps:$4 sm:$0xff]   ;;  %v19052_v22 = vld [vmem:[#allocation17 + $0x16c] ss:$16 sps:$4 sm:$0xff]  }
 0x88f   : > { %7493 = vmatprep.subr.bf16.mxu0 %v18983_v60  ;;  %7575 = vmatprep.subr.bf16.mxu1 %v18986_v23  ;;  %v19047_v60 = vld [vmem:[#allocation17 + $0x160] ss:$16 sps:$4 sm:$0xff]   ;;  %v19050_v23 = vld [vmem:[#allocation17 + $0x168] ss:$16 sps:$4 sm:$0xff]  }
 0x891   : > { %6786 = vmatmul.mubr.bf16.vlgmr.msra.gmra.mrb[68].mxu1 %v6311_v30  ;;  %18362 = vmatmul.mubr.bf16.vlgmr.msra.gmra.mrb[76].mxu0 %v6311_v30  ;;  %v19056_v30 = vld [vmem:[#allocation17 + $0x188] ss:$16 sps:$4 sm:$0xff]  }
 0x892   : > { %7494 = vmatpush1.bf16.msra.mxu0 %v18981_v50  ;;  %7576 = vmatpush1.bf16.msra.mxu1 %v18984_v26  ;;  %v19058_v50 = vld [vmem:[#allocation17 + $0x18c] ss:$16 sps:$4 sm:$0xff]   ;;  %v19053_v26 = vld [vmem:[#allocation17 + $0x180] ss:$16 sps:$4 sm:$0xff]  }
 0x893   : > { %7495 = vmatprep.subr.bf16.mxu0 %v18989_v10  ;;  %7577 = vmatprep.subr.bf16.mxu1 %v18992_v61  ;;  %v19061_v10 = vld [vmem:[#allocation17 + $0x1a4] ss:$16 sps:$4 sm:$0xff]   ;;  %v19064_v61 = vld [vmem:[#allocation17 + $0x1ac] ss:$16 sps:$4 sm:$0xff]  }
 0x896   : > { %7496 = vmatpush1.bf16.msra.mxu0 %v18987_v24  ;;  %7578 = vmatpush1.bf16.msra.mxu1 %v18990_v35  ;;  %v19059_v24 = vld [vmem:[#allocation17 + $0x1a0] ss:$16 sps:$4 sm:$0xff]   ;;  %v19062_v35 = vld [vmem:[#allocation17 + $0x1a8] ss:$16 sps:$4 sm:$0xff]  }
 0x897   : > { %7497 = vmatprep.subr.bf16.mxu0 %v18995_v31  ;;  %7579 = vmatprep.subr.bf16.mxu1 %v18998_v37  ;;  %v19067_v31 = vld [vmem:[#allocation17 + $0x1c4] ss:$16 sps:$4 sm:$0xff]   ;;  %v19070_v37 = vld [vmem:[#allocation17 + $0x1cc] ss:$16 sps:$4 sm:$0xff]  }
 0x89a   : > { %7498 = vmatpush1.bf16.msra.mxu0 %v18993_v25  ;;  %7580 = vmatpush1.bf16.msra.mxu1 %v18996_v43  ;;  %v19065_v25 = vld [vmem:[#allocation17 + $0x1c0] ss:$16 sps:$4 sm:$0xff]   ;;  %v19068_v43 = vld [vmem:[#allocation17 + $0x1c8] ss:$16 sps:$4 sm:$0xff]  }
 0x89b   : > { %7499 = vmatprep.subr.bf16.mxu0 %v19001_v32  ;;  %7581 = vmatprep.subr.bf16.mxu1 %v19004_v16  ;;  %v19073_v32 = vld [vmem:[#allocation17 + $0x1e4] ss:$16 sps:$4 sm:$0xff]   ;;  %v19076_v16 = vld [vmem:[#allocation17 + $0x1ec] ss:$16 sps:$4 sm:$0xff]  }
 0x89e   : > { %7500 = vmatpush1.bf16.msra.mxu0 %v18999_v39  ;;  %7582 = vmatpush1.bf16.msra.mxu1 %v19002_v29  ;;  %v19071_v39 = vld [vmem:[#allocation17 + $0x1e0] ss:$16 sps:$4 sm:$0xff]   ;;  %v19074_v29 = vld [vmem:[#allocation17 + $0x1e8] ss:$16 sps:$4 sm:$0xff]  }
 0x89f   : > { %7501 = vmatprep.subr.bf16.mxu0 %v19007_v20  ;;  %7583 = vmatprep.subr.bf16.mxu1 %v19010_v42  ;;  %v19079_v20 = vld [vmem:[#allocation17 + $0x204] ss:$16 sps:$4 sm:$0xff]   ;;  %v19082_v42 = vld [vmem:[#allocation17 + $0x20c] ss:$16 sps:$4 sm:$0xff]  }
 0x8a2   : > { %7502 = vmatpush1.bf16.msra.mxu0 %v19005_v47  ;;  %7584 = vmatpush1.bf16.msra.mxu1 %v19008_v49 }
 0x8a3   : > { %7503 = vmatprep.subr.bf16.mxu0 %v19013_v59  ;;  %7585 = vmatprep.subr.bf16.mxu1 %v19016_v8 }
 0x8a6   : > { %7504 = vmatpush1.bf16.msra.mxu0 %v19011_v44  ;;  %7586 = vmatpush1.bf16.msra.mxu1 %v19014_v52  ;;  %v6308_v52 = vld [vmem:[#allocation16] sm:$0x7] }
 0x8a7   : > { %7505 = vmatprep.subr.bf16.mxu0 %v19019_v28  ;;  %7587 = vmatprep.subr.bf16.mxu1 %v19022_v56  ;;  %v6324_v28 = vrot.slane %v6308_v52, %v20866_v55  ;;  %v6316_v56 = vrot.slane %v6308_v52, %v20860_v53 }
 0x8aa   : > { %7506 = vmatpush1.bf16.msra.mxu0 %v19017_v6  ;;  %7588 = vmatpush1.bf16.msra.mxu1 %v19020_v51  ;;  %v6320_v6 = vrot.slane %v6308_v52, %v22492_v54  ;;  %v19107_v52 = vld [vmem:[#allocation17 + $0x2a0] ss:$16 sps:$4 sm:$0xff]  }
 0x8ab   : > { %7507 = vmatprep.subr.bf16.mxu0 %v19025_v57  ;;  %7589 = vmatprep.subr.bf16.mxu1 %v19028_v45 }
 0x8ae   : > { %7508 = vmatpush1.bf16.msra.mxu0 %v19023_v11  ;;  %7590 = vmatpush1.bf16.msra.mxu1 %v19026_v38 }
 0x8af   : > { %7509 = vmatprep.subr.bf16.mxu0 %v19031_v41  ;;  %7591 = vmatprep.subr.bf16.mxu1 %v19034_v18 }
 0x8b2   : > { %7510 = vmatpush1.bf16.msra.mxu0 %v19029_v17  ;;  %7592 = vmatpush1.bf16.msra.mxu1 %v19032_v36 }
 0x8b3   : > { %7511 = vmatprep.subr.bf16.mxu0 %v19037_v63  ;;  %7593 = vmatprep.subr.bf16.mxu1 %v19040_v7 }
 0x8b6   : > { %7512 = vmatpush1.bf16.msra.mxu0 %v19035_v19  ;;  %7594 = vmatpush1.bf16.msra.mxu1 %v19038_v62 }
 0x8b7   : > { %7513 = vmatprep.subr.bf16.mxu0 %v19043_v9  ;;  %7595 = vmatprep.subr.bf16.mxu1 %v19046_v48 }
 0x8ba   : > { %7514 = vmatpush1.bf16.msra.mxu0 %v19041_v21  ;;  %7596 = vmatpush1.bf16.msra.mxu1 %v19044_v33 }
 0x8bb   : > { %7515 = vmatprep.subr.bf16.mxu0 %v19049_v46  ;;  %7597 = vmatprep.subr.bf16.mxu1 %v19052_v22 }
 0x8be   : > { %7516 = vmatpush1.bf16.msra.mxu0 %v19047_v60  ;;  %7598 = vmatpush1.bf16.msra.mxu1 %v19050_v23 }
 0x8bf   : > { %7517 = vmatprep.subr.bf16.mxu0 %v19055_v27  ;;  %7599 = vmatprep.subr.bf16.mxu1 %v19058_v50  ;;  %v19077_v50 = vld [vmem:[#allocation17 + $0x200] ss:$16 sps:$4 sm:$0xff]  }
 0x8c2   : > { %7518 = vmatpush1.bf16.msra.mxu0 %v19053_v26  ;;  %7600 = vmatpush1.bf16.msra.mxu1 %v19056_v30  ;;  %v19080_v26 = vld [vmem:[#allocation17 + $0x208] ss:$16 sps:$4 sm:$0xff]  }
 0x8c3   : > { %7519 = vmatprep.subr.bf16.mxu0 %v19061_v10  ;;  %7601 = vmatprep.subr.bf16.mxu1 %v19064_v61  ;;  %v19085_v10 = vld [vmem:[#allocation17 + $0x224] ss:$16 sps:$4 sm:$0xff]   ;;  %v19088_v61 = vld [vmem:[#allocation17 + $0x22c] ss:$16 sps:$4 sm:$0xff]  }
 0x8c6   : > { %7520 = vmatpush1.bf16.msra.mxu0 %v19059_v24  ;;  %7602 = vmatpush1.bf16.msra.mxu1 %v19062_v35  ;;  %v19083_v24 = vld [vmem:[#allocation17 + $0x220] ss:$16 sps:$4 sm:$0xff]   ;;  %v19086_v35 = vld [vmem:[#allocation17 + $0x228] ss:$16 sps:$4 sm:$0xff]  }
 0x8c7   : > { %7521 = vmatprep.subr.bf16.mxu0 %v19067_v31  ;;  %7603 = vmatprep.subr.bf16.mxu1 %v19070_v37  ;;  %v19091_v31 = vld [vmem:[#allocation17 + $0x244] ss:$16 sps:$4 sm:$0xff]   ;;  %v19094_v37 = vld [vmem:[#allocation17 + $0x24c] ss:$16 sps:$4 sm:$0xff]  }
 0x8ca   : > { %7522 = vmatpush1.bf16.msra.mxu0 %v19065_v25  ;;  %7604 = vmatpush1.bf16.msra.mxu1 %v19068_v43  ;;  %v19089_v25 = vld [vmem:[#allocation17 + $0x240] ss:$16 sps:$4 sm:$0xff]   ;;  %v19092_v43 = vld [vmem:[#allocation17 + $0x248] ss:$16 sps:$4 sm:$0xff]  }
 0x8cb   : > { %7523 = vmatprep.subr.bf16.mxu0 %v19073_v32  ;;  %7605 = vmatprep.subr.bf16.mxu1 %v19076_v16  ;;  %v19097_v32 = vld [vmem:[#allocation17 + $0x264] ss:$16 sps:$4 sm:$0xff]   ;;  %v19100_v16 = vld [vmem:[#allocation17 + $0x26c] ss:$16 sps:$4 sm:$0xff]  }
 0x8ce   : > { %7524 = vmatpush1.bf16.msra.mxu0 %v19071_v39  ;;  %7606 = vmatpush1.bf16.msra.mxu1 %v19074_v29  ;;  %v19095_v39 = vld [vmem:[#allocation17 + $0x260] ss:$16 sps:$4 sm:$0xff]   ;;  %v19098_v29 = vld [vmem:[#allocation17 + $0x268] ss:$16 sps:$4 sm:$0xff]  }
 0x8cf   : > { %7534 = vmatprep.subr.bf16.mxu0 %v19079_v20  ;;  %7616 = vmatprep.subr.bf16.mxu1 %v19082_v42  ;;  %v19103_v42 = vld [vmem:[#allocation17 + $0x284] ss:$16 sps:$4 sm:$0xff]  }
 0x944   : > { %v17847_v47 = vpop.f32.mrb[72].mxu0 }
 0x945   : > { %v17848_v49 = vpop.f32.mrb[73].mxu0 }
 0x946   : > { %v17849_v59 = vadd.f32 %v17848_v49, %v17847_v47  ;;  %v17850_v8 = vpop.f32.mrb[74].mxu0  ;;  %v19106_v47 = vld [vmem:[#allocation17 + $0x28c] ss:$16 sps:$4 sm:$0xff]  }
 0x947   : > { %v17851_v44 = vpop.f32.mrb[75].mxu0  ;;  %v19109_v8 = vld [vmem:[#allocation17 + $0x2a4] ss:$16 sps:$4 sm:$0xff]  }
 0x948   : > { %v6829_v51 = vadd.f32 %v17849_v59, %v6324_v28  ;;  %v19104_v59 = vld [vmem:[#allocation17 + $0x288] ss:$16 sps:$4 sm:$0xff]   ;;  %v19112_v44 = vld [vmem:[#allocation17 + $0x2ac] ss:$16 sps:$4 sm:$0xff]  }
 0x949   : > { %v19110_v28 = vld [vmem:[#allocation17 + $0x2a8] ss:$16 sps:$4 sm:$0xff]  }
 0x964   : > { %v6787_v57 = vpop.f32.mrb[68].mxu1  ;;  %v6868_v45 = vpop.f32.mrb[76].mxu0 }
 0x965   : > { %v18425_v11 = vadd.f32 %v6787_v57, %v6316_v56  ;;  %v6869_v38 = vadd.f32 %v6868_v45, %v6829_v51  ;;  %v6789_v41 = vpop.f32.mrb[69].mxu1  ;;  %v18363_v18 = vpop.f32.mrb[77].mxu0  ;;  %v19115_v56 = vld [vmem:[#allocation17 + $0x2c4] ss:$16 sps:$4 sm:$0xff]   ;;  %v19113_v51 = vld [vmem:[#allocation17 + $0x2c0] ss:$16 sps:$4 sm:$0xff]  }
 0x966   : > { %v18426_v17 = vadd.f32 %v6789_v41, %v6320_v6  ;;  %v6791_v36 = vpop.f32.mrb[70].mxu1  ;;  %v6871_v63 = vpop.f32.mrb[78].mxu0  ;;  %v19118_v6 = vld [vmem:[#allocation17 + $0x2cc] ss:$16 sps:$4 sm:$0xff]   ;;  %v19116_v57 = vld [vmem:[#allocation17 + $0x2c8] ss:$16 sps:$4 sm:$0xff]  }
 0x967   : > { %v16458_v7 = vmul.f32 -1.442695, %v18425_v11  ;;  %v6792_v19 = vpop.f32.mrb[71].mxu1  ;;  %v18364_v62 = vpop.f32.mrb[79].mxu0  ;;  %v16460_v23 = vmul.f32 -1.442695, %v6869_v38 }
 0x968   : > { %v16459_v9 = vmul.f32 -1.442695, %v18426_v17  ;;  %v19121_v45 = vld [vmem:[#allocation17 + $0x2e4] ss:$16 sps:$4 sm:$0xff]   ;;  %v19124_v11 = vld [vmem:[#allocation17 + $0x2ec] ss:$16 sps:$4 sm:$0xff]  }
 0x969   : > { %19561 = vpow2.f32 %v16458_v7  ;;  %v19119_v38 = vld [vmem:[#allocation17 + $0x2e0] ss:$16 sps:$4 sm:$0xff]   ;;  %v19122_v41 = vld [vmem:[#allocation17 + $0x2e8] ss:$16 sps:$4 sm:$0xff]   ;;  %v19125_v63 = vld [vmem:[%s22468_s15] ss:$16 sps:$4 sm:$0xff]  }
 0x96a   : > { %19563 = vpow2.f32 %v16459_v9  ;;  %v19127_v18 = vld [vmem:[%s22468_s15 + $0x4] ss:$16 sps:$4 sm:$0xff]   ;;  %v19130_v17 = vld [vmem:[%s22468_s15 + $0xc] ss:$16 sps:$4 sm:$0xff]   ;;  %v19128_v7 = vld [vmem:[%s22468_s15 + $0x8] ss:$16 sps:$4 sm:$0xff]  }
 0x96b   : > { %v19133_v62 = vld [vmem:[%s22468_s15 + $0x24] ss:$16 sps:$4 sm:$0xff]   ;;  %v19136_v9 = vld [vmem:[%s22468_s15 + $0x2c] ss:$16 sps:$4 sm:$0xff]  }
 0x973   : > { %v19562_v48 = vpop.eup %19561 }
 0x974   : > { %v6883_v21 = vadd.f32 1.0, %v19562_v48  ;;  %v19564_v33 = vpop.eup %19563  ;;  %v19131_v48 = vld [vmem:[%s22468_s15 + $0x20] ss:$16 sps:$4 sm:$0xff]  }
 0x975   : > { %v6884_v46 = vadd.f32 1.0, %v19564_v33  ;;  %v19139_v33 = vld [vmem:[%s22468_s15 + $0x44] ss:$16 sps:$4 sm:$0xff]  }
 0x976   : > { %19565 = vrcp.f32 %v6883_v21  ;;  %v19134_v21 = vld [vmem:[%s22468_s15 + $0x28] ss:$16 sps:$4 sm:$0xff]  }
 0x977   : > { %19567 = vrcp.f32 %v6884_v46  ;;  %v19142_v46 = vld [vmem:[%s22468_s15 + $0x4c] ss:$16 sps:$4 sm:$0xff]  }
 0x978   : > { %19569 = vpow2.f32 %v16460_v23  ;;  %v19145_v23 = vld [vmem:[%s22468_s15 + $0x64] ss:$16 sps:$4 sm:$0xff]  }
 0x980   : > { %v19566_v22 = vpop.eup %19565 }
 0x981   : > { %v19568_v60 = vpop.eup %19567  ;;  %v6989_v30 = vpack.c.bf16 %v19566_v22, %v19566_v22  ;;  %v19137_v22 = vld [vmem:[%s22468_s15 + $0x40] ss:$16 sps:$4 sm:$0xff]  }
 0x982   : > { %v6990_v27 = vpack.c.bf16 %v19568_v60, %v19568_v60  ;;  %v19570_v20 = vpop.eup %19569  ;;  %v19140_v60 = vld [vmem:[%s22468_s15 + $0x48] ss:$16 sps:$4 sm:$0xff]  }
 0x983   : > { %v6885_v49 = vadd.f32 1.0, %v19570_v20  ;;  %v19172_v20 = vld [vmem:[%s22468_s15 + $0xec] ss:$16 sps:$4 sm:$0xff]  }
 0x984   : > { %7525 = vmatprep.mubr.bf16.mxu0 %v6990_v27  ;;  %7607 = vmatprep.mubr.bf16.mxu1 %v6990_v27  ;;  %v19148_v27 = vld [vmem:[%s22468_s15 + $0x6c] ss:$16 sps:$4 sm:$0xff]  }
 0x985   : > { %7526 = vmatmul.mubr.bf16.vlgmr.msra.gmra.mrb[80].mxu0 %v6989_v30  ;;  %7608 = vmatmul.mubr.bf16.vlgmr.msra.gmra.mrb[72].mxu1 %v6989_v30  ;;  %19571 = vrcp.f32 %v6885_v49  ;;  %v19151_v30 = vld [vmem:[%s22468_s15 + $0x84] ss:$16 sps:$4 sm:$0xff]  }
 0x986   : > { %7535 = vmatpush1.bf16.msra.mxu0 %v19077_v50  ;;  %7617 = vmatpush1.bf16.msra.mxu1 %v19080_v26  ;;  %v19143_v50 = vld [vmem:[%s22468_s15 + $0x60] ss:$16 sps:$4 sm:$0xff]   ;;  %v19146_v26 = vld [vmem:[%s22468_s15 + $0x68] ss:$16 sps:$4 sm:$0xff]   ;;  %v19175_v49 = vld [vmem:[%s22468_s15 + $0x104] ss:$16 sps:$4 sm:$0xff]  }
 0x987   : > { %7536 = vmatprep.subr.bf16.mxu0 %v19085_v10  ;;  %7618 = vmatprep.subr.bf16.mxu1 %v19088_v61  ;;  %v19154_v10 = vld [vmem:[%s22468_s15 + $0x8c] ss:$16 sps:$4 sm:$0xff]   ;;  %v19149_v61 = vld [vmem:[%s22468_s15 + $0x80] ss:$16 sps:$4 sm:$0xff]  }
 0x988   : > { %7566 = vmatprep.mubr.bf16.mxu0 %v20441_v34  ;;  %7648 = vmatprep.mubr.bf16.mxu1 %v20441_v34  ;;  %v19101_v34 = vld [vmem:[#allocation17 + $0x280] ss:$16 sps:$4 sm:$0xff]  }
 0x98a   : > { %7537 = vmatpush1.bf16.msra.mxu0 %v19083_v24  ;;  %7619 = vmatpush1.bf16.msra.mxu1 %v19086_v35  ;;  %v19152_v24 = vld [vmem:[%s22468_s15 + $0x88] ss:$16 sps:$4 sm:$0xff]   ;;  %v19157_v35 = vld [vmem:[%s22468_s15 + $0xa4] ss:$16 sps:$4 sm:$0xff]  }
 0x98b   : > { %7538 = vmatprep.subr.bf16.mxu0 %v19091_v31  ;;  %7620 = vmatprep.subr.bf16.mxu1 %v19094_v37  ;;  %v19160_v31 = vld [vmem:[%s22468_s15 + $0xac] ss:$16 sps:$4 sm:$0xff]   ;;  %v19155_v37 = vld [vmem:[%s22468_s15 + $0xa0] ss:$16 sps:$4 sm:$0xff]  }
 0x98e   : > { %7539 = vmatpush1.bf16.msra.mxu0 %v19089_v25  ;;  %7621 = vmatpush1.bf16.msra.mxu1 %v19092_v43  ;;  %v19158_v25 = vld [vmem:[%s22468_s15 + $0xa8] ss:$16 sps:$4 sm:$0xff]   ;;  %v19163_v43 = vld [vmem:[%s22468_s15 + $0xc4] ss:$16 sps:$4 sm:$0xff]  }
 0x98f   : > { %7540 = vmatprep.subr.bf16.mxu0 %v19097_v32  ;;  %7622 = vmatprep.subr.bf16.mxu1 %v19100_v16  ;;  %v19572_v36 = vpop.eup %19571  ;;  %v19166_v32 = vld [vmem:[%s22468_s15 + $0xcc] ss:$16 sps:$4 sm:$0xff]   ;;  %v19161_v16 = vld [vmem:[%s22468_s15 + $0xc0] ss:$16 sps:$4 sm:$0xff]  }
 0x990   : > { %v6991_v19 = vpack.c.bf16 %v19572_v36, %v19572_v36  ;;  %v19202_v36 = vld [vmem:[%s22468_s15 + $0x18c] ss:$16 sps:$4 sm:$0xff]  }
 0x992   : > { %7541 = vmatpush1.bf16.msra.mxu0 %v19095_v39  ;;  %7623 = vmatpush1.bf16.msra.mxu1 %v19098_v29  ;;  %v19164_v39 = vld [vmem:[%s22468_s15 + $0xc8] ss:$16 sps:$4 sm:$0xff]   ;;  %v19169_v29 = vld [vmem:[%s22468_s15 + $0xe4] ss:$16 sps:$4 sm:$0xff]  }
 0x993   : > { %7542 = vmatprep.subr.bf16.mxu0 %v19103_v42  ;;  %7624 = vmatprep.subr.bf16.mxu1 %v19106_v47  ;;  %v19167_v42 = vld [vmem:[%s22468_s15 + $0xe0] ss:$16 sps:$4 sm:$0xff]   ;;  %v19170_v47 = vld [vmem:[%s22468_s15 + $0xe8] ss:$16 sps:$4 sm:$0xff]  }
 0x996   : > { %7543 = vmatpush1.bf16.msra.mxu0 %v19101_v34  ;;  %7625 = vmatpush1.bf16.msra.mxu1 %v19104_v59  ;;  %v19178_v34 = vld [vmem:[%s22468_s15 + $0x10c] ss:$16 sps:$4 sm:$0xff]   ;;  %v19173_v59 = vld [vmem:[%s22468_s15 + $0x100] ss:$16 sps:$4 sm:$0xff]  }
 0x997   : > { %7544 = vmatprep.subr.bf16.mxu0 %v19109_v8  ;;  %7626 = vmatprep.subr.bf16.mxu1 %v19112_v44  ;;  %v19176_v8 = vld [vmem:[%s22468_s15 + $0x108] ss:$16 sps:$4 sm:$0xff]   ;;  %v19181_v44 = vld [vmem:[%s22468_s15 + $0x124] ss:$16 sps:$4 sm:$0xff]  }
 0x99a   : > { %7545 = vmatpush1.bf16.msra.mxu0 %v19107_v52  ;;  %7627 = vmatpush1.bf16.msra.mxu1 %v19110_v28  ;;  %v19184_v52 = vld [vmem:[%s22468_s15 + $0x12c] ss:$16 sps:$4 sm:$0xff]   ;;  %v19179_v28 = vld [vmem:[%s22468_s15 + $0x120] ss:$16 sps:$4 sm:$0xff]  }
 0x99b   : > { %7546 = vmatprep.subr.bf16.mxu0 %v19115_v56  ;;  %7628 = vmatprep.subr.bf16.mxu1 %v19118_v6  ;;  %v19182_v56 = vld [vmem:[%s22468_s15 + $0x128] ss:$16 sps:$4 sm:$0xff]   ;;  %v19187_v6 = vld [vmem:[%s22468_s15 + $0x144] ss:$16 sps:$4 sm:$0xff]  }
 0x99e   : > { %7547 = vmatpush1.bf16.msra.mxu0 %v19113_v51  ;;  %7629 = vmatpush1.bf16.msra.mxu1 %v19116_v57  ;;  %v19190_v51 = vld [vmem:[%s22468_s15 + $0x14c] ss:$16 sps:$4 sm:$0xff]   ;;  %v19185_v57 = vld [vmem:[%s22468_s15 + $0x140] ss:$16 sps:$4 sm:$0xff]  }
 0x99f   : > { %7548 = vmatprep.subr.bf16.mxu0 %v19121_v45  ;;  %7630 = vmatprep.subr.bf16.mxu1 %v19124_v11  ;;  %v19188_v45 = vld [vmem:[%s22468_s15 + $0x148] ss:$16 sps:$4 sm:$0xff]   ;;  %v19193_v11 = vld [vmem:[%s22468_s15 + $0x164] ss:$16 sps:$4 sm:$0xff]  }
 0x9a2   : > { %7549 = vmatpush1.bf16.msra.mxu0 %v19119_v38  ;;  %7631 = vmatpush1.bf16.msra.mxu1 %v19122_v41  ;;  %v19196_v38 = vld [vmem:[%s22468_s15 + $0x16c] ss:$16 sps:$4 sm:$0xff]   ;;  %v19191_v41 = vld [vmem:[%s22468_s15 + $0x160] ss:$16 sps:$4 sm:$0xff]  }
 0x9a3   : > { %8475 = vmatprep.subr.bf16.mxu0 %v19127_v18  ;;  %8557 = vmatprep.subr.bf16.mxu1 %v19130_v17  ;;  %v19194_v18 = vld [vmem:[%s22468_s15 + $0x168] ss:$16 sps:$4 sm:$0xff]   ;;  %v19199_v17 = vld [vmem:[%s22468_s15 + $0x184] ss:$16 sps:$4 sm:$0xff]  }
 0x9a5   : > { %7567 = vmatmul.mubr.bf16.vlgmr.msra.gmra.mrb[80].mxu0 %v6991_v19  ;;  %7649 = vmatmul.mubr.bf16.vlgmr.msra.gmra.mrb[72].mxu1 %v6991_v19  ;;  %v19205_v19 = vld [vmem:[%s22468_s15 + $0x1a4] ss:$16 sps:$4 sm:$0xff]  }
 0x9a6   : > { %8476 = vmatpush1.bf16.msra.mxu0 %v19125_v63  ;;  %8558 = vmatpush1.bf16.msra.mxu1 %v19128_v7  ;;  %v19197_v63 = vld [vmem:[%s22468_s15 + $0x180] ss:$16 sps:$4 sm:$0xff]   ;;  %v19200_v7 = vld [vmem:[%s22468_s15 + $0x188] ss:$16 sps:$4 sm:$0xff]  }
 0x9a7   : > { %8477 = vmatprep.subr.bf16.mxu0 %v19133_v62  ;;  %8559 = vmatprep.subr.bf16.mxu1 %v19136_v9  ;;  %v19208_v62 = vld [vmem:[%s22468_s15 + $0x1ac] ss:$16 sps:$4 sm:$0xff]   ;;  %v19203_v9 = vld [vmem:[%s22468_s15 + $0x1a0] ss:$16 sps:$4 sm:$0xff]  }
 0x9aa   : > { %8478 = vmatpush1.bf16.msra.mxu0 %v19131_v48  ;;  %8560 = vmatpush1.bf16.msra.mxu1 %v19134_v21  ;;  %v19206_v48 = vld [vmem:[%s22468_s15 + $0x1a8] ss:$16 sps:$4 sm:$0xff]   ;;  %v19211_v21 = vld [vmem:[%s22468_s15 + $0x1c4] ss:$16 sps:$4 sm:$0xff]  }
 0x9ab   : > { %8479 = vmatprep.subr.bf16.mxu0 %v19139_v33  ;;  %8561 = vmatprep.subr.bf16.mxu1 %v19142_v46  ;;  %v19214_v33 = vld [vmem:[%s22468_s15 + $0x1cc] ss:$16 sps:$4 sm:$0xff]   ;;  %v19209_v46 = vld [vmem:[%s22468_s15 + $0x1c0] ss:$16 sps:$4 sm:$0xff]  }
 0x9ae   : > { %8480 = vmatpush1.bf16.msra.mxu0 %v19137_v22  ;;  %8562 = vmatpush1.bf16.msra.mxu1 %v19140_v60  ;;  %v19212_v22 = vld [vmem:[%s22468_s15 + $0x1c8] ss:$16 sps:$4 sm:$0xff]   ;;  %v19217_v60 = vld [vmem:[%s22468_s15 + $0x1e4] ss:$16 sps:$4 sm:$0xff]  }
 0x9af   : > { %8481 = vmatprep.subr.bf16.mxu0 %v19145_v23  ;;  %8563 = vmatprep.subr.bf16.mxu1 %v19148_v27  ;;  %v19220_v23 = vld [vmem:[%s22468_s15 + $0x1ec] ss:$16 sps:$4 sm:$0xff]   ;;  %v19215_v27 = vld [vmem:[%s22468_s15 + $0x1e0] ss:$16 sps:$4 sm:$0xff]  }
 0x9b2   : > { %8482 = vmatpush1.bf16.msra.mxu0 %v19143_v50  ;;  %8564 = vmatpush1.bf16.msra.mxu1 %v19146_v26  ;;  %v19218_v50 = vld [vmem:[%s22468_s15 + $0x1e8] ss:$16 sps:$4 sm:$0xff]   ;;  %v19223_v26 = vld [vmem:[%s22468_s15 + $0x204] ss:$16 sps:$4 sm:$0xff]  }
 0x9b3   : > { %8483 = vmatprep.subr.bf16.mxu0 %v19151_v30  ;;  %8565 = vmatprep.subr.bf16.mxu1 %v19154_v10  ;;  %v19226_v30 = vld [vmem:[%s22468_s15 + $0x20c] ss:$16 sps:$4 sm:$0xff]  }
 0x9b4   : > { %v21734_v10 = vld [vmem:[#allocation19] sm:$0xf] }
 0x9b6   : > { %8484 = vmatpush1.bf16.msra.mxu0 %v19149_v61  ;;  %8566 = vmatpush1.bf16.msra.mxu1 %v19152_v24  ;;  %v6996_v61 = vrot.slane %v21734_v10, %v20860_v53  ;;  %v7000_v24 = vrot.slane %v21734_v10, %v22492_v54 }
 0x9b7   : > { %8485 = vmatprep.subr.bf16.mxu0 %v19157_v35  ;;  %8567 = vmatprep.subr.bf16.mxu1 %v19160_v31  ;;  %v7008_v35 = vrot.slane %v21734_v10, %v20869_v58 }
 0x9ba   : > { %8486 = vmatpush1.bf16.msra.mxu0 %v19155_v37  ;;  %8568 = vmatpush1.bf16.msra.mxu1 %v19158_v25 }
 0x9bb   : > { %8487 = vmatprep.subr.bf16.mxu0 %v19163_v43  ;;  %8569 = vmatprep.subr.bf16.mxu1 %v19166_v32 }
 0x9be   : > { %8488 = vmatpush1.bf16.msra.mxu0 %v19161_v16  ;;  %8570 = vmatpush1.bf16.msra.mxu1 %v19164_v39 }
 0x9bf   : > { %8489 = vmatprep.subr.bf16.mxu0 %v19169_v29  ;;  %8571 = vmatprep.subr.bf16.mxu1 %v19172_v20 }
 0x9c2   : > { %8490 = vmatpush1.bf16.msra.mxu0 %v19167_v42  ;;  %8572 = vmatpush1.bf16.msra.mxu1 %v19170_v47 }
 0x9c3   : > { %8491 = vmatprep.subr.bf16.mxu0 %v19175_v49  ;;  %8573 = vmatprep.subr.bf16.mxu1 %v19178_v34 }
 0x9c6   : > { %8492 = vmatpush1.bf16.msra.mxu0 %v19173_v59  ;;  %8574 = vmatpush1.bf16.msra.mxu1 %v19176_v8 }
 0x9c7   : > { %8493 = vmatprep.subr.bf16.mxu0 %v19181_v44  ;;  %8575 = vmatprep.subr.bf16.mxu1 %v19184_v52 }
 0x9ca   : > { %8494 = vmatpush1.bf16.msra.mxu0 %v19179_v28  ;;  %8576 = vmatpush1.bf16.msra.mxu1 %v19182_v56 }
 0x9cb   : > { %8495 = vmatprep.subr.bf16.mxu0 %v19187_v6  ;;  %8577 = vmatprep.subr.bf16.mxu1 %v19190_v51 }
 0x9ce   : > { %8496 = vmatpush1.bf16.msra.mxu0 %v19185_v57  ;;  %8578 = vmatpush1.bf16.msra.mxu1 %v19188_v45 }
 0x9cf   : > { %8497 = vmatprep.subr.bf16.mxu0 %v19193_v11  ;;  %8579 = vmatprep.subr.bf16.mxu1 %v19196_v38  ;;  %v19221_v38 = vld [vmem:[%s22468_s15 + $0x200] ss:$16 sps:$4 sm:$0xff]  }
 0x9d2   : > { %8498 = vmatpush1.bf16.msra.mxu0 %v19191_v41  ;;  %8580 = vmatpush1.bf16.msra.mxu1 %v19194_v18  ;;  %v19224_v41 = vld [vmem:[%s22468_s15 + $0x208] ss:$16 sps:$4 sm:$0xff]  }
 0x9d3   : > { %8499 = vmatprep.subr.bf16.mxu0 %v19199_v17  ;;  %8581 = vmatprep.subr.bf16.mxu1 %v19202_v36  ;;  %v19229_v17 = vld [vmem:[%s22468_s15 + $0x224] ss:$16 sps:$4 sm:$0xff]   ;;  %v19232_v36 = vld [vmem:[%s22468_s15 + $0x22c] ss:$16 sps:$4 sm:$0xff]  }
 0x9d6   : > { %8500 = vmatpush1.bf16.msra.mxu0 %v19197_v63  ;;  %8582 = vmatpush1.bf16.msra.mxu1 %v19200_v7  ;;  %v19227_v7 = vld [vmem:[%s22468_s15 + $0x220] ss:$16 sps:$4 sm:$0xff]  }
 0x9d7   : > { %8501 = vmatprep.subr.bf16.mxu0 %v19205_v19  ;;  %8583 = vmatprep.subr.bf16.mxu1 %v19208_v62  ;;  %v19230_v19 = vld [vmem:[%s22468_s15 + $0x228] ss:$16 sps:$4 sm:$0xff]   ;;  %v19235_v62 = vld [vmem:[%s22468_s15 + $0x244] ss:$16 sps:$4 sm:$0xff]  }
 0x9da   : > { %8502 = vmatpush1.bf16.msra.mxu0 %v19203_v9  ;;  %8584 = vmatpush1.bf16.msra.mxu1 %v19206_v48  ;;  %v19238_v9 = vld [vmem:[%s22468_s15 + $0x24c] ss:$16 sps:$4 sm:$0xff]   ;;  %v19233_v48 = vld [vmem:[%s22468_s15 + $0x240] ss:$16 sps:$4 sm:$0xff]  }
 0x9db   : > { %8503 = vmatprep.subr.bf16.mxu0 %v19211_v21  ;;  %8585 = vmatprep.subr.bf16.mxu1 %v19214_v33  ;;  %v19236_v21 = vld [vmem:[%s22468_s15 + $0x248] ss:$16 sps:$4 sm:$0xff]   ;;  %v19241_v33 = vld [vmem:[%s22468_s15 + $0x264] ss:$16 sps:$4 sm:$0xff]  }
 0x9de   : > { %8504 = vmatpush1.bf16.msra.mxu0 %v19209_v46  ;;  %8586 = vmatpush1.bf16.msra.mxu1 %v19212_v22  ;;  %v19244_v46 = vld [vmem:[%s22468_s15 + $0x26c] ss:$16 sps:$4 sm:$0xff]   ;;  %v19239_v22 = vld [vmem:[%s22468_s15 + $0x260] ss:$16 sps:$4 sm:$0xff]  }
 0x9df   : > { %8505 = vmatprep.subr.bf16.mxu0 %v19217_v60  ;;  %8587 = vmatprep.subr.bf16.mxu1 %v19220_v23  ;;  %v19242_v60 = vld [vmem:[%s22468_s15 + $0x268] ss:$16 sps:$4 sm:$0xff]   ;;  %v19247_v23 = vld [vmem:[%s22468_s15 + $0x284] ss:$16 sps:$4 sm:$0xff]  }
 0x9e2   : > { %8506 = vmatpush1.bf16.msra.mxu0 %v19215_v27  ;;  %8588 = vmatpush1.bf16.msra.mxu1 %v19218_v50  ;;  %v19250_v27 = vld [vmem:[%s22468_s15 + $0x28c] ss:$16 sps:$4 sm:$0xff]   ;;  %v19245_v50 = vld [vmem:[%s22468_s15 + $0x280] ss:$16 sps:$4 sm:$0xff]  }
 0x9e3   : > { %8516 = vmatprep.subr.bf16.mxu0 %v19223_v26  ;;  %8598 = vmatprep.subr.bf16.mxu1 %v19226_v30  ;;  %v19248_v26 = vld [vmem:[%s22468_s15 + $0x288] ss:$16 sps:$4 sm:$0xff]   ;;  %v19253_v30 = vld [vmem:[%s22468_s15 + $0x2a4] ss:$16 sps:$4 sm:$0xff]  }
 0xa78   : > { %v7568_v31 = vpop.f32.mrb[80].mxu0  ;;  %v21742_v37 = vpop.f32.mrb[72].mxu1 }
 0xa79   : > { %v18427_v25 = vadd.f32 %v7568_v31, %v6996_v61  ;;  %v7570_v43 = vpop.f32.mrb[81].mxu0  ;;  %v7652_v32 = vpop.f32.mrb[73].mxu1  ;;  %v19256_v61 = vld [vmem:[%s22468_s15 + $0x2ac] ss:$16 sps:$4 sm:$0xff]   ;;  %v19259_v31 = vld [vmem:[%s22468_s15 + $0x2c4] ss:$16 sps:$4 sm:$0xff]  }
 0xa7a   : > { %v18428_v16 = vadd.f32 %v7570_v43, %v7000_v24  ;;  %v18430_v39 = vadd.f32 %v7652_v32, %v7008_v35  ;;  %v7572_v29 = vpop.f32.mrb[82].mxu0  ;;  %v7654_v20 = vpop.f32.mrb[74].mxu1  ;;  %v19251_v24 = vld [vmem:[%s22468_s15 + $0x2a0] ss:$16 sps:$4 sm:$0xff]   ;;  %v19254_v35 = vld [vmem:[%s22468_s15 + $0x2a8] ss:$16 sps:$4 sm:$0xff]   ;;  %v7004_v43 = vrot.slane %v21734_v10, %v20866_v55 }
 0xa7b   : > { %v16557_v42 = vmul.f32 -1.442695, %v18427_v25  ;;  %v7573_v47 = vpop.f32.mrb[83].mxu0  ;;  %v7655_v49 = vpop.f32.mrb[75].mxu1  ;;  %v19262_v25 = vld [vmem:[%s22468_s15 + $0x2cc] ss:$16 sps:$4 sm:$0xff]  }
 0xa7c   : > { %v16558_v34 = vmul.f32 -1.442695, %v18428_v16  ;;  %v16560_v59 = vmul.f32 -1.442695, %v18430_v39  ;;  %v19257_v32 = vld [vmem:[%s22468_s15 + $0x2c0] ss:$16 sps:$4 sm:$0xff]   ;;  %v18429_v29 = vadd.f32 %v21742_v37, %v7004_v43 }
 0xa7d   : > { %19573 = vpow2.f32 %v16557_v42  ;;  %v19260_v16 = vld [vmem:[%s22468_s15 + $0x2c8] ss:$16 sps:$4 sm:$0xff]   ;;  %v19265_v39 = vld [vmem:[%s22468_s15 + $0x2e4] ss:$16 sps:$4 sm:$0xff]   ;;  %v19268_v10 = vld [vmem:[%s22468_s15 + $0x2ec] ss:$16 sps:$4 sm:$0xff]  }
 0xa7e   : > { %19575 = vpow2.f32 %v16558_v34  ;;  %v19263_v20 = vld [vmem:[%s22468_s15 + $0x2e0] ss:$16 sps:$4 sm:$0xff]   ;;  %v19266_v42 = vld [vmem:[%s22468_s15 + $0x2e8] ss:$16 sps:$4 sm:$0xff]   ;;  %v19271_v47 = vld [vmem:[%s22468_s15 + $0x304] ss:$16 sps:$4 sm:$0xff]  }
 0xa7f   : > { %19577 = vpow2.f32 %v16560_v59  ;;  %v19274_v37 = vld [vmem:[%s22468_s15 + $0x30c] ss:$16 sps:$4 sm:$0xff]   ;;  %v16559_v49 = vmul.f32 -1.442695, %v18429_v29  ;;  %v19269_v34 = vld [vmem:[%s22468_s15 + $0x300] ss:$16 sps:$4 sm:$0xff]  }
 0xa80   : > { %v19272_v59 = vld [vmem:[%s22468_s15 + $0x308] ss:$16 sps:$4 sm:$0xff]   ;;  %v19334_v29 = vld [vmem:[#allocation22 + $0x4c] ss:$16 sps:$4 sm:$0xff]  }
 0xa81   : > { %v19325_v43 = vld [vmem:[#allocation22 + $0x24] ss:$16 sps:$4 sm:$0xff]  }
 0xa87   : > { %v19574_v8 = vpop.eup %19573 }
 0xa88   : > { %v7669_v44 = vadd.f32 1.0, %v19574_v8  ;;  %v19576_v52 = vpop.eup %19575  ;;  %v19277_v8 = vld [vmem:[%s22468_s15 + $0x324] ss:$16 sps:$4 sm:$0xff]  }
 0xa89   : > { %v19578_v28 = vpop.eup %19577  ;;  %v7670_v56 = vadd.f32 1.0, %v19576_v52  ;;  %v19275_v52 = vld [vmem:[%s22468_s15 + $0x320] ss:$16 sps:$4 sm:$0xff]  }
 0xa8a   : > { %19579 = vrcp.f32 %v7669_v44  ;;  %v7672_v6 = vadd.f32 1.0, %v19578_v28  ;;  %v19280_v44 = vld [vmem:[%s22468_s15 + $0x32c] ss:$16 sps:$4 sm:$0xff]   ;;  %v19278_v28 = vld [vmem:[%s22468_s15 + $0x328] ss:$16 sps:$4 sm:$0xff]  }
 0xa8b   : > { %19581 = vrcp.f32 %v7670_v56  ;;  %v19283_v56 = vld [vmem:[%s22468_s15 + $0x344] ss:$16 sps:$4 sm:$0xff]  }
 0xa8c   : > { %19583 = vrcp.f32 %v7672_v6  ;;  %v19286_v6 = vld [vmem:[%s22468_s15 + $0x34c] ss:$16 sps:$4 sm:$0xff]  }
 0xa8d   : > { %19585 = vpow2.f32 %v16559_v49  ;;  %v19335_v49 = vld [vmem:[#allocation22 + $0x60] ss:$16 sps:$4 sm:$0xff]  }
 0xa94   : > { %v19580_v51 = vpop.eup %19579 }
 0xa95   : > { %v19582_v57 = vpop.eup %19581  ;;  %v7810_v18 = vpack.c.bf16 %v19580_v51, %v19580_v51  ;;  %v19281_v51 = vld [vmem:[%s22468_s15 + $0x340] ss:$16 sps:$4 sm:$0xff]  }
 0xa96   : > { %v19584_v45 = vpop.eup %19583  ;;  %v7811_v11 = vpack.c.bf16 %v19582_v57, %v19582_v57  ;;  %v19284_v57 = vld [vmem:[%s22468_s15 + $0x348] ss:$16 sps:$4 sm:$0xff]  }
 0xa97   : > { %v7813_v63 = vpack.c.bf16 %v19584_v45, %v19584_v45  ;;  %v19289_v45 = vld [vmem:[%s22468_s15 + $0x364] ss:$16 sps:$4 sm:$0xff]  }
 0xa98   : > { %8507 = vmatprep.mubr.bf16.mxu0 %v7811_v11  ;;  %8589 = vmatprep.mubr.bf16.mxu1 %v7811_v11  ;;  %v19292_v11 = vld [vmem:[%s22468_s15 + $0x36c] ss:$16 sps:$4 sm:$0xff]  }
 0xa99   : > { %8508 = vmatmul.mubr.bf16.vlgmr.msra.gmra.mrb[84].mxu0 %v7810_v18  ;;  %8590 = vmatmul.mubr.bf16.vlgmr.msra.gmra.mrb[76].mxu1 %v7810_v18  ;;  %v19586_v18 = vpop.eup %19585 }
 0xa9a   : > { %8517 = vmatpush1.bf16.msra.mxu0 %v19221_v38  ;;  %8599 = vmatpush1.bf16.msra.mxu1 %v19224_v41  ;;  %v19287_v38 = vld [vmem:[%s22468_s15 + $0x360] ss:$16 sps:$4 sm:$0xff]   ;;  %v19290_v41 = vld [vmem:[%s22468_s15 + $0x368] ss:$16 sps:$4 sm:$0xff]  }
 0xa9b   : > { %8548 = vmatprep.mubr.bf16.mxu0 %v7813_v63  ;;  %8630 = vmatprep.mubr.bf16.mxu1 %v7813_v63  ;;  %v7671_v63 = vadd.f32 1.0, %v19586_v18  ;;  %v19364_v18 = vld [vmem:[#allocation22 + $0xec] ss:$16 sps:$4 sm:$0xff]  }
 0xa9c   : > { %8518 = vmatprep.subr.bf16.mxu0 %v19229_v17  ;;  %8600 = vmatprep.subr.bf16.mxu1 %v19232_v36  ;;  %v19295_v17 = vld [vmem:[%s22468_s15 + $0x384] ss:$16 sps:$4 sm:$0xff]   ;;  %v19298_v36 = vld [vmem:[%s22468_s15 + $0x38c] ss:$16 sps:$4 sm:$0xff]  }
 0xa9d   : > { %19587 = vrcp.f32 %v7671_v63  ;;  %v19367_v63 = vld [vmem:[#allocation22 + $0x104] ss:$16 sps:$4 sm:$0xff]  }
 0xa9e   : > { %8519 = vmatpush1.bf16.msra.mxu0 %v19227_v7  ;;  %8601 = vmatpush1.bf16.msra.mxu1 %v19230_v19  ;;  %v19293_v7 = vld [vmem:[%s22468_s15 + $0x380] ss:$16 sps:$4 sm:$0xff]   ;;  %v19296_v19 = vld [vmem:[%s22468_s15 + $0x388] ss:$16 sps:$4 sm:$0xff]  }
 0xa9f   : > { %8520 = vmatprep.subr.bf16.mxu0 %v19235_v62  ;;  %8602 = vmatprep.subr.bf16.mxu1 %v19238_v9  ;;  %v19301_v62 = vld [vmem:[%s22468_s15 + $0x3a4] ss:$16 sps:$4 sm:$0xff]   ;;  %v19304_v9 = vld [vmem:[%s22468_s15 + $0x3ac] ss:$16 sps:$4 sm:$0xff]  }
 0xaa2   : > { %8521 = vmatpush1.bf16.msra.mxu0 %v19233_v48  ;;  %8603 = vmatpush1.bf16.msra.mxu1 %v19236_v21  ;;  %v19299_v48 = vld [vmem:[%s22468_s15 + $0x3a0] ss:$16 sps:$4 sm:$0xff]   ;;  %v19302_v21 = vld [vmem:[%s22468_s15 + $0x3a8] ss:$16 sps:$4 sm:$0xff]  }
 0xaa3   : > { %8522 = vmatprep.subr.bf16.mxu0 %v19241_v33  ;;  %8604 = vmatprep.subr.bf16.mxu1 %v19244_v46  ;;  %v19307_v33 = vld [vmem:[%s22468_s15 + $0x3c4] ss:$16 sps:$4 sm:$0xff]   ;;  %v19310_v46 = vld [vmem:[%s22468_s15 + $0x3cc] ss:$16 sps:$4 sm:$0xff]  }
 0xaa6   : > { %8523 = vmatpush1.bf16.msra.mxu0 %v19239_v22  ;;  %8605 = vmatpush1.bf16.msra.mxu1 %v19242_v60  ;;  %v19305_v22 = vld [vmem:[%s22468_s15 + $0x3c0] ss:$16 sps:$4 sm:$0xff]   ;;  %v19308_v60 = vld [vmem:[%s22468_s15 + $0x3c8] ss:$16 sps:$4 sm:$0xff]  }
 0xaa7   : > { %8524 = vmatprep.subr.bf16.mxu0 %v19247_v23  ;;  %8606 = vmatprep.subr.bf16.mxu1 %v19250_v27  ;;  %v19313_v23 = vld [vmem:[%s22468_s15 + $0x3e4] ss:$16 sps:$4 sm:$0xff]   ;;  %v19316_v27 = vld [vmem:[%s22468_s15 + $0x3ec] ss:$16 sps:$4 sm:$0xff]  }
 0xaaa   : > { %8525 = vmatpush1.bf16.msra.mxu0 %v19245_v50  ;;  %8607 = vmatpush1.bf16.msra.mxu1 %v19248_v26  ;;  %v19311_v50 = vld [vmem:[%s22468_s15 + $0x3e0] ss:$16 sps:$4 sm:$0xff]   ;;  %v19314_v26 = vld [vmem:[%s22468_s15 + $0x3e8] ss:$16 sps:$4 sm:$0xff]  }
 0xaab   : > { %8526 = vmatprep.subr.bf16.mxu0 %v19253_v30  ;;  %8608 = vmatprep.subr.bf16.mxu1 %v19256_v61  ;;  %v19319_v30 = vld [vmem:[#allocation22 + $0x4] ss:$16 sps:$4 sm:$0xff]   ;;  %v19322_v61 = vld [vmem:[#allocation22 + $0xc] ss:$16 sps:$4 sm:$0xff]  }
 0xaae   : > { %8527 = vmatpush1.bf16.msra.mxu0 %v19251_v24  ;;  %8609 = vmatpush1.bf16.msra.mxu1 %v19254_v35  ;;  %v19588_v24 = vpop.eup %19587  ;;  %v19317_v35 = vld [vmem:[#allocation22] ss:$16 sps:$4 sm:$0xff]  }
 0xaaf   : > { %8528 = vmatprep.subr.bf16.mxu0 %v19259_v31  ;;  %8610 = vmatprep.subr.bf16.mxu1 %v19262_v25  ;;  %v19320_v31 = vld [vmem:[#allocation22 + $0x8] ss:$16 sps:$4 sm:$0xff]   ;;  %v7812_v25 = vpack.c.bf16 %v19588_v24, %v19588_v24  ;;  %v19394_v24 = vld [vmem:[#allocation22 + $0x18c] ss:$16 sps:$4 sm:$0xff]  }
 0xab2   : > { %8529 = vmatpush1.bf16.msra.mxu0 %v19257_v32  ;;  %8611 = vmatpush1.bf16.msra.mxu1 %v19260_v16  ;;  %v19328_v32 = vld [vmem:[#allocation22 + $0x2c] ss:$16 sps:$4 sm:$0xff]   ;;  %v19323_v16 = vld [vmem:[#allocation22 + $0x20] ss:$16 sps:$4 sm:$0xff]  }
 0xab3   : > { %8530 = vmatprep.subr.bf16.mxu0 %v19265_v39  ;;  %8612 = vmatprep.subr.bf16.mxu1 %v19268_v10  ;;  %v19326_v39 = vld [vmem:[#allocation22 + $0x28] ss:$16 sps:$4 sm:$0xff]   ;;  %v19331_v10 = vld [vmem:[#allocation22 + $0x44] ss:$16 sps:$4 sm:$0xff]  }
 0xab6   : > { %8531 = vmatpush1.bf16.msra.mxu0 %v19263_v20  ;;  %8613 = vmatpush1.bf16.msra.mxu1 %v19266_v42  ;;  %v19329_v20 = vld [vmem:[#allocation22 + $0x40] ss:$16 sps:$4 sm:$0xff]   ;;  %v19332_v42 = vld [vmem:[#allocation22 + $0x48] ss:$16 sps:$4 sm:$0xff]  }
 0xab7   : > { %8532 = vmatprep.subr.bf16.mxu0 %v19271_v47  ;;  %8614 = vmatprep.subr.bf16.mxu1 %v19274_v37  ;;  %v19337_v47 = vld [vmem:[#allocation22 + $0x64] ss:$16 sps:$4 sm:$0xff]   ;;  %v19340_v37 = vld [vmem:[#allocation22 + $0x6c] ss:$16 sps:$4 sm:$0xff]  }
 0xaba   : > { %8533 = vmatpush1.bf16.msra.mxu0 %v19269_v34  ;;  %8615 = vmatpush1.bf16.msra.mxu1 %v19272_v59  ;;  %v19338_v34 = vld [vmem:[#allocation22 + $0x68] ss:$16 sps:$4 sm:$0xff]   ;;  %v19343_v59 = vld [vmem:[#allocation22 + $0x84] ss:$16 sps:$4 sm:$0xff]  }
 0xabb   : > { %8534 = vmatprep.subr.bf16.mxu0 %v19277_v8  ;;  %8616 = vmatprep.subr.bf16.mxu1 %v19280_v44  ;;  %v19346_v8 = vld [vmem:[#allocation22 + $0x8c] ss:$16 sps:$4 sm:$0xff]   ;;  %v19341_v44 = vld [vmem:[#allocation22 + $0x80] ss:$16 sps:$4 sm:$0xff]  }
 0xabe   : > { %8535 = vmatpush1.bf16.msra.mxu0 %v19275_v52  ;;  %8617 = vmatpush1.bf16.msra.mxu1 %v19278_v28  ;;  %v19344_v52 = vld [vmem:[#allocation22 + $0x88] ss:$16 sps:$4 sm:$0xff]   ;;  %v19349_v28 = vld [vmem:[#allocation22 + $0xa4] ss:$16 sps:$4 sm:$0xff]  }
 0xabf   : > { %8536 = vmatprep.subr.bf16.mxu0 %v19283_v56  ;;  %8618 = vmatprep.subr.bf16.mxu1 %v19286_v6  ;;  %v19352_v56 = vld [vmem:[#allocation22 + $0xac] ss:$16 sps:$4 sm:$0xff]   ;;  %v19347_v6 = vld [vmem:[#allocation22 + $0xa0] ss:$16 sps:$4 sm:$0xff]  }
 0xac2   : > { %8537 = vmatpush1.bf16.msra.mxu0 %v19281_v51  ;;  %8619 = vmatpush1.bf16.msra.mxu1 %v19284_v57  ;;  %v19350_v51 = vld [vmem:[#allocation22 + $0xa8] ss:$16 sps:$4 sm:$0xff]   ;;  %v19355_v57 = vld [vmem:[#allocation22 + $0xc4] ss:$16 sps:$4 sm:$0xff]  }
 0xac3   : > { %8538 = vmatprep.subr.bf16.mxu0 %v19289_v45  ;;  %8620 = vmatprep.subr.bf16.mxu1 %v19292_v11  ;;  %v19358_v45 = vld [vmem:[#allocation22 + $0xcc] ss:$16 sps:$4 sm:$0xff]   ;;  %v19353_v11 = vld [vmem:[#allocation22 + $0xc0] ss:$16 sps:$4 sm:$0xff]  }
 0xac6   : > { %8539 = vmatpush1.bf16.msra.mxu0 %v19287_v38  ;;  %8621 = vmatpush1.bf16.msra.mxu1 %v19290_v41  ;;  %v19356_v38 = vld [vmem:[#allocation22 + $0xc8] ss:$16 sps:$4 sm:$0xff]   ;;  %v19361_v41 = vld [vmem:[#allocation22 + $0xe4] ss:$16 sps:$4 sm:$0xff]  }
 0xac7   : > { %8540 = vmatprep.subr.bf16.mxu0 %v19295_v17  ;;  %8622 = vmatprep.subr.bf16.mxu1 %v19298_v36  ;;  %v19359_v17 = vld [vmem:[#allocation22 + $0xe0] ss:$16 sps:$4 sm:$0xff]   ;;  %v19362_v36 = vld [vmem:[#allocation22 + $0xe8] ss:$16 sps:$4 sm:$0xff]  }
 0xaca   : > { %8541 = vmatpush1.bf16.msra.mxu0 %v19293_v7  ;;  %8623 = vmatpush1.bf16.msra.mxu1 %v19296_v19  ;;  %v19370_v7 = vld [vmem:[#allocation22 + $0x10c] ss:$16 sps:$4 sm:$0xff]   ;;  %v19365_v19 = vld [vmem:[#allocation22 + $0x100] ss:$16 sps:$4 sm:$0xff]  }
 0xacb   : > { %8542 = vmatprep.subr.bf16.mxu0 %v19301_v62  ;;  %8624 = vmatprep.subr.bf16.mxu1 %v19304_v9  ;;  %v19368_v62 = vld [vmem:[#allocation22 + $0x108] ss:$16 sps:$4 sm:$0xff]   ;;  %v19373_v9 = vld [vmem:[#allocation22 + $0x124] ss:$16 sps:$4 sm:$0xff]  }
 0xace   : > { %8543 = vmatpush1.bf16.msra.mxu0 %v19299_v48  ;;  %8625 = vmatpush1.bf16.msra.mxu1 %v19302_v21  ;;  %v19376_v48 = vld [vmem:[#allocation22 + $0x12c] ss:$16 sps:$4 sm:$0xff]   ;;  %v19371_v21 = vld [vmem:[#allocation22 + $0x120] ss:$16 sps:$4 sm:$0xff]  }
 0xacf   : > { %8544 = vmatprep.subr.bf16.mxu0 %v19307_v33  ;;  %8626 = vmatprep.subr.bf16.mxu1 %v19310_v46  ;;  %v19374_v33 = vld [vmem:[#allocation22 + $0x128] ss:$16 sps:$4 sm:$0xff]   ;;  %v19379_v46 = vld [vmem:[#allocation22 + $0x144] ss:$16 sps:$4 sm:$0xff]  }
 0xad2   : > { %8545 = vmatpush1.bf16.msra.mxu0 %v19305_v22  ;;  %8627 = vmatpush1.bf16.msra.mxu1 %v19308_v60  ;;  %v19382_v22 = vld [vmem:[#allocation22 + $0x14c] ss:$16 sps:$4 sm:$0xff]   ;;  %v19377_v60 = vld [vmem:[#allocation22 + $0x140] ss:$16 sps:$4 sm:$0xff]  }
 0xad3   : > { %8546 = vmatprep.subr.bf16.mxu0 %v19313_v23  ;;  %8628 = vmatprep.subr.bf16.mxu1 %v19316_v27  ;;  %v19380_v23 = vld [vmem:[#allocation22 + $0x148] ss:$16 sps:$4 sm:$0xff]   ;;  %v19385_v27 = vld [vmem:[#allocation22 + $0x164] ss:$16 sps:$4 sm:$0xff]  }
 0xad6   : > { %8547 = vmatpush1.bf16.msra.mxu0 %v19311_v50  ;;  %8629 = vmatpush1.bf16.msra.mxu1 %v19314_v26  ;;  %v19388_v50 = vld [vmem:[#allocation22 + $0x16c] ss:$16 sps:$4 sm:$0xff]   ;;  %v19383_v26 = vld [vmem:[#allocation22 + $0x160] ss:$16 sps:$4 sm:$0xff]  }
 0xad7   : > { %9457 = vmatprep.subr.bf16.mxu0 %v19319_v30  ;;  %9539 = vmatprep.subr.bf16.mxu1 %v19322_v61  ;;  %v19386_v30 = vld [vmem:[#allocation22 + $0x168] ss:$16 sps:$4 sm:$0xff]   ;;  %v19391_v61 = vld [vmem:[#allocation22 + $0x184] ss:$16 sps:$4 sm:$0xff]  }
 0xad9   : > { %8549 = vmatmul.mubr.bf16.vlgmr.msra.gmra.mrb[84].mxu0 %v7812_v25  ;;  %8631 = vmatmul.mubr.bf16.vlgmr.msra.gmra.mrb[76].mxu1 %v7812_v25  ;;  %v19397_v25 = vld [vmem:[#allocation22 + $0x1a4] ss:$16 sps:$4 sm:$0xff]  }
 0xada   : > { %9458 = vmatpush1.bf16.msra.mxu0 %v19317_v35  ;;  %9540 = vmatpush1.bf16.msra.mxu1 %v19320_v31  ;;  %v19389_v35 = vld [vmem:[#allocation22 + $0x180] ss:$16 sps:$4 sm:$0xff]   ;;  %v19392_v31 = vld [vmem:[#allocation22 + $0x188] ss:$16 sps:$4 sm:$0xff]  }
 0xadb   : > { %9459 = vmatprep.subr.bf16.mxu0 %v19325_v43  ;;  %9541 = vmatprep.subr.bf16.mxu1 %v19328_v32  ;;  %v19400_v43 = vld [vmem:[#allocation22 + $0x1ac] ss:$16 sps:$4 sm:$0xff]   ;;  %v19395_v32 = vld [vmem:[#allocation22 + $0x1a0] ss:$16 sps:$4 sm:$0xff]  }
 0xade   : > { %9460 = vmatpush1.bf16.msra.mxu0 %v19323_v16  ;;  %9542 = vmatpush1.bf16.msra.mxu1 %v19326_v39  ;;  %v19398_v16 = vld [vmem:[#allocation22 + $0x1a8] ss:$16 sps:$4 sm:$0xff]   ;;  %v19403_v39 = vld [vmem:[#allocation22 + $0x1c4] ss:$16 sps:$4 sm:$0xff]  }
 0xadf   : > { %9461 = vmatprep.subr.bf16.mxu0 %v19331_v10  ;;  %9543 = vmatprep.subr.bf16.mxu1 %v19334_v29  ;;  %v19406_v10 = vld [vmem:[#allocation22 + $0x1cc] ss:$16 sps:$4 sm:$0xff]   ;;  %v19401_v29 = vld [vmem:[#allocation22 + $0x1c0] ss:$16 sps:$4 sm:$0xff]  }
 0xae2   : > { %9462 = vmatpush1.bf16.msra.mxu0 %v19329_v20  ;;  %9544 = vmatpush1.bf16.msra.mxu1 %v19332_v42  ;;  %v19404_v20 = vld [vmem:[#allocation22 + $0x1c8] ss:$16 sps:$4 sm:$0xff]   ;;  %v19409_v42 = vld [vmem:[#allocation22 + $0x1e4] ss:$16 sps:$4 sm:$0xff]  }
 0xae3   : > { %9463 = vmatprep.subr.bf16.mxu0 %v19337_v47  ;;  %9545 = vmatprep.subr.bf16.mxu1 %v19340_v37  ;;  %v19412_v47 = vld [vmem:[#allocation22 + $0x1ec] ss:$16 sps:$4 sm:$0xff]   ;;  %v19407_v37 = vld [vmem:[#allocation22 + $0x1e0] ss:$16 sps:$4 sm:$0xff]  }
 0xae6   : > { %9464 = vmatpush1.bf16.msra.mxu0 %v19335_v49  ;;  %9546 = vmatpush1.bf16.msra.mxu1 %v19338_v34  ;;  %v19410_v49 = vld [vmem:[#allocation22 + $0x1e8] ss:$16 sps:$4 sm:$0xff]   ;;  %v19415_v34 = vld [vmem:[#allocation22 + $0x204] ss:$16 sps:$4 sm:$0xff]  }
 0xae7   : > { %9465 = vmatprep.subr.bf16.mxu0 %v19343_v59  ;;  %9547 = vmatprep.subr.bf16.mxu1 %v19346_v8  ;;  %v19418_v59 = vld [vmem:[#allocation22 + $0x20c] ss:$16 sps:$4 sm:$0xff]  }
 0xae8   : > { %v21933_v8 = vld [vmem:[#allocation20] sm:$0xf] }
 0xaea   : > { %9466 = vmatpush1.bf16.msra.mxu0 %v19341_v44  ;;  %9548 = vmatpush1.bf16.msra.mxu1 %v19344_v52  ;;  %v7818_v44 = vrot.slane %v21933_v8, %v20860_v53  ;;  %v7822_v52 = vrot.slane %v21933_v8, %v22492_v54 }
 0xaeb   : > { %9467 = vmatprep.subr.bf16.mxu0 %v19349_v28  ;;  %9549 = vmatprep.subr.bf16.mxu1 %v19352_v56  ;;  %v7830_v28 = vrot.slane %v21933_v8, %v20869_v58 }
 0xaee   : > { %9468 = vmatpush1.bf16.msra.mxu0 %v19347_v6  ;;  %9550 = vmatpush1.bf16.msra.mxu1 %v19350_v51 }
 0xaef   : > { %9469 = vmatprep.subr.bf16.mxu0 %v19355_v57  ;;  %9551 = vmatprep.subr.bf16.mxu1 %v19358_v45 }
 0xaf2   : > { %9470 = vmatpush1.bf16.msra.mxu0 %v19353_v11  ;;  %9552 = vmatpush1.bf16.msra.mxu1 %v19356_v38 }
 0xaf3   : > { %9471 = vmatprep.subr.bf16.mxu0 %v19361_v41  ;;  %9553 = vmatprep.subr.bf16.mxu1 %v19364_v18 }
 0xaf6   : > { %9472 = vmatpush1.bf16.msra.mxu0 %v19359_v17  ;;  %9554 = vmatpush1.bf16.msra.mxu1 %v19362_v36 }
 0xaf7   : > { %9473 = vmatprep.subr.bf16.mxu0 %v19367_v63  ;;  %9555 = vmatprep.subr.bf16.mxu1 %v19370_v7 }
 0xafa   : > { %9474 = vmatpush1.bf16.msra.mxu0 %v19365_v19  ;;  %9556 = vmatpush1.bf16.msra.mxu1 %v19368_v62 }
 0xafb   : > { %9475 = vmatprep.subr.bf16.mxu0 %v19373_v9  ;;  %9557 = vmatprep.subr.bf16.mxu1 %v19376_v48 }
 0xafe   : > { %9476 = vmatpush1.bf16.msra.mxu0 %v19371_v21  ;;  %9558 = vmatpush1.bf16.msra.mxu1 %v19374_v33 }
 0xaff   : > { %9477 = vmatprep.subr.bf16.mxu0 %v19379_v46  ;;  %9559 = vmatprep.subr.bf16.mxu1 %v19382_v22 }
 0xb02   : > { %9478 = vmatpush1.bf16.msra.mxu0 %v19377_v60  ;;  %9560 = vmatpush1.bf16.msra.mxu1 %v19380_v23 }
 0xb03   : > { %9479 = vmatprep.subr.bf16.mxu0 %v19385_v27  ;;  %9561 = vmatprep.subr.bf16.mxu1 %v19388_v50  ;;  %v19413_v50 = vld [vmem:[#allocation22 + $0x200] ss:$16 sps:$4 sm:$0xff]  }
 0xb06   : > { %9480 = vmatpush1.bf16.msra.mxu0 %v19383_v26  ;;  %9562 = vmatpush1.bf16.msra.mxu1 %v19386_v30  ;;  %v19416_v26 = vld [vmem:[#allocation22 + $0x208] ss:$16 sps:$4 sm:$0xff]  }
 0xb07   : > { %9481 = vmatprep.subr.bf16.mxu0 %v19391_v61  ;;  %9563 = vmatprep.subr.bf16.mxu1 %v19394_v24  ;;  %v19421_v61 = vld [vmem:[#allocation22 + $0x224] ss:$16 sps:$4 sm:$0xff]   ;;  %v19424_v24 = vld [vmem:[#allocation22 + $0x22c] ss:$16 sps:$4 sm:$0xff]  }
 0xb0a   : > { %9482 = vmatpush1.bf16.msra.mxu0 %v19389_v35  ;;  %9564 = vmatpush1.bf16.msra.mxu1 %v19392_v31  ;;  %v19419_v31 = vld [vmem:[#allocation22 + $0x220] ss:$16 sps:$4 sm:$0xff]  }
 0xb0b   : > { %9483 = vmatprep.subr.bf16.mxu0 %v19397_v25  ;;  %9565 = vmatprep.subr.bf16.mxu1 %v19400_v43  ;;  %v19422_v25 = vld [vmem:[#allocation22 + $0x228] ss:$16 sps:$4 sm:$0xff]   ;;  %v19427_v43 = vld [vmem:[#allocation22 + $0x244] ss:$16 sps:$4 sm:$0xff]  }
 0xb0e   : > { %9484 = vmatpush1.bf16.msra.mxu0 %v19395_v32  ;;  %9566 = vmatpush1.bf16.msra.mxu1 %v19398_v16  ;;  %v19430_v32 = vld [vmem:[#allocation22 + $0x24c] ss:$16 sps:$4 sm:$0xff]   ;;  %v19425_v16 = vld [vmem:[#allocation22 + $0x240] ss:$16 sps:$4 sm:$0xff]  }
 0xb0f   : > { %9485 = vmatprep.subr.bf16.mxu0 %v19403_v39  ;;  %9567 = vmatprep.subr.bf16.mxu1 %v19406_v10  ;;  %v19428_v39 = vld [vmem:[#allocation22 + $0x248] ss:$16 sps:$4 sm:$0xff]   ;;  %v19433_v10 = vld [vmem:[#allocation22 + $0x264] ss:$16 sps:$4 sm:$0xff]  }
 0xb12   : > { %9486 = vmatpush1.bf16.msra.mxu0 %v19401_v29  ;;  %9568 = vmatpush1.bf16.msra.mxu1 %v19404_v20  ;;  %v19436_v29 = vld [vmem:[#allocation22 + $0x26c] ss:$16 sps:$4 sm:$0xff]   ;;  %v19431_v20 = vld [vmem:[#allocation22 + $0x260] ss:$16 sps:$4 sm:$0xff]  }
 0xb13   : > { %9487 = vmatprep.subr.bf16.mxu0 %v19409_v42  ;;  %9569 = vmatprep.subr.bf16.mxu1 %v19412_v47  ;;  %v19434_v42 = vld [vmem:[#allocation22 + $0x268] ss:$16 sps:$4 sm:$0xff]   ;;  %v19439_v47 = vld [vmem:[#allocation22 + $0x284] ss:$16 sps:$4 sm:$0xff]  }
 0xb16   : > { %9488 = vmatpush1.bf16.msra.mxu0 %v19407_v37  ;;  %9570 = vmatpush1.bf16.msra.mxu1 %v19410_v49  ;;  %v19442_v37 = vld [vmem:[#allocation22 + $0x28c] ss:$16 sps:$4 sm:$0xff]   ;;  %v19437_v49 = vld [vmem:[#allocation22 + $0x280] ss:$16 sps:$4 sm:$0xff]  }
 0xb17   : > { %9498 = vmatprep.subr.bf16.mxu0 %v19415_v34  ;;  %9580 = vmatprep.subr.bf16.mxu1 %v19418_v59  ;;  %v19440_v34 = vld [vmem:[#allocation22 + $0x288] ss:$16 sps:$4 sm:$0xff]   ;;  %v19445_v59 = vld [vmem:[#allocation22 + $0x2a4] ss:$16 sps:$4 sm:$0xff]  }
 0xbac   : > { %v8550_v56 = vpop.f32.mrb[84].mxu0  ;;  %v21941_v6 = vpop.f32.mrb[76].mxu1 }
 0xbad   : > { %v18431_v51 = vadd.f32 %v8550_v56, %v7818_v44  ;;  %v8552_v57 = vpop.f32.mrb[85].mxu0  ;;  %v8634_v45 = vpop.f32.mrb[77].mxu1  ;;  %v19448_v44 = vld [vmem:[#allocation22 + $0x2ac] ss:$16 sps:$4 sm:$0xff]   ;;  %v19451_v56 = vld [vmem:[#allocation22 + $0x2c4] ss:$16 sps:$4 sm:$0xff]  }
 0xbae   : > { %v18432_v11 = vadd.f32 %v8552_v57, %v7822_v52  ;;  %v18434_v38 = vadd.f32 %v8634_v45, %v7830_v28  ;;  %v8554_v41 = vpop.f32.mrb[86].mxu0  ;;  %v8636_v18 = vpop.f32.mrb[78].mxu1  ;;  %v19443_v52 = vld [vmem:[#allocation22 + $0x2a0] ss:$16 sps:$4 sm:$0xff]   ;;  %v19446_v28 = vld [vmem:[#allocation22 + $0x2a8] ss:$16 sps:$4 sm:$0xff]   ;;  %v7826_v57 = vrot.slane %v21933_v8, %v20866_v55 }
 0xbaf   : > { %v16689_v17 = vmul.f32 -1.442695, %v18431_v51  ;;  %v8555_v36 = vpop.f32.mrb[87].mxu0  ;;  %v8637_v63 = vpop.f32.mrb[79].mxu1  ;;  %v19454_v51 = vld [vmem:[#allocation22 + $0x2cc] ss:$16 sps:$4 sm:$0xff]  }
 0xbb0   : > { %v16690_v7 = vmul.f32 -1.442695, %v18432_v11  ;;  %v16692_v19 = vmul.f32 -1.442695, %v18434_v38  ;;  %v19449_v45 = vld [vmem:[#allocation22 + $0x2c0] ss:$16 sps:$4 sm:$0xff]   ;;  %v18433_v18 = vadd.f32 %v21941_v6, %v7826_v57 }
 0xbb1   : > { %19589 = vpow2.f32 %v16689_v17  ;;  %v19452_v11 = vld [vmem:[#allocation22 + $0x2c8] ss:$16 sps:$4 sm:$0xff]   ;;  %v19457_v38 = vld [vmem:[#allocation22 + $0x2e4] ss:$16 sps:$4 sm:$0xff]   ;;  %v19460_v41 = vld [vmem:[#allocation22 + $0x2ec] ss:$16 sps:$4 sm:$0xff]  }
 0xbb2   : > { %19591 = vpow2.f32 %v16690_v7  ;;  %v19455_v17 = vld [vmem:[#allocation22 + $0x2e0] ss:$16 sps:$4 sm:$0xff]   ;;  %v19458_v36 = vld [vmem:[#allocation22 + $0x2e8] ss:$16 sps:$4 sm:$0xff]   ;;  %v19463_v63 = vld [vmem:[#allocation22 + $0x304] ss:$16 sps:$4 sm:$0xff]  }
 0xbb3   : > { %19593 = vpow2.f32 %v16692_v19  ;;  %v19466_v7 = vld [vmem:[#allocation22 + $0x30c] ss:$16 sps:$4 sm:$0xff]   ;;  %v16691_v19 = vmul.f32 -1.442695, %v18433_v18  ;;  %v19461_v8 = vld [vmem:[#allocation22 + $0x300] ss:$16 sps:$4 sm:$0xff]  }
 0xbb4   : > { %v19467_v6 = vld [vmem:[#allocation22 + $0x320] ss:$16 sps:$4 sm:$0xff]   ;;  %v19518_v18 = vld [vmem:[#allocation25 + $0xd0] sm:$0xff]  }
 0xbb5   : > { %v19513_v57 = vld [vmem:[#allocation25 + $0x48] sm:$0xff]  }
 0xbbb   : > { %v19590_v62 = vpop.eup %19589 }
 0xbbc   : > { %v8651_v9 = vadd.f32 1.0, %v19590_v62  ;;  %v19592_v48 = vpop.eup %19591  ;;  %v19464_v62 = vld [vmem:[#allocation22 + $0x308] ss:$16 sps:$4 sm:$0xff]  }
 0xbbd   : > { %v19594_v21 = vpop.eup %19593  ;;  %v8652_v33 = vadd.f32 1.0, %v19592_v48  ;;  %v19472_v48 = vld [vmem:[#allocation22 + $0x32c] ss:$16 sps:$4 sm:$0xff]  }
 0xbbe   : > { %19595 = vrcp.f32 %v8651_v9  ;;  %v8654_v46 = vadd.f32 1.0, %v19594_v21  ;;  %v19469_v9 = vld [vmem:[#allocation22 + $0x324] ss:$16 sps:$4 sm:$0xff]   ;;  %v19470_v21 = vld [vmem:[#allocation22 + $0x328] ss:$16 sps:$4 sm:$0xff]  }
 0xbbf   : > { %19597 = vrcp.f32 %v8652_v33  ;;  %v19475_v33 = vld [vmem:[#allocation22 + $0x344] ss:$16 sps:$4 sm:$0xff]  }
 0xbc0   : > { %19599 = vrcp.f32 %v8654_v46  ;;  %v19478_v46 = vld [vmem:[#allocation22 + $0x34c] ss:$16 sps:$4 sm:$0xff]  }
 0xbc1   : > { %19601 = vpow2.f32 %v16691_v19  ;;  %v19523_v19 = vld [vmem:[#allocation25 + $0x18] sm:$0xff]  }
 0xbc8   : > { %v19596_v22 = vpop.eup %19595 }
 0xbc9   : > { %v19598_v60 = vpop.eup %19597  ;;  %v8792_v30 = vpack.c.bf16 %v19596_v22, %v19596_v22  ;;  %v19473_v22 = vld [vmem:[#allocation22 + $0x340] ss:$16 sps:$4 sm:$0xff]  }
 0xbca   : > { %v19600_v23 = vpop.eup %19599  ;;  %v8793_v27 = vpack.c.bf16 %v19598_v60, %v19598_v60  ;;  %v19476_v60 = vld [vmem:[#allocation22 + $0x348] ss:$16 sps:$4 sm:$0xff]  }
 0xbcb   : > { %v8795_v35 = vpack.c.bf16 %v19600_v23, %v19600_v23  ;;  %v19481_v23 = vld [vmem:[#allocation22 + $0x364] ss:$16 sps:$4 sm:$0xff]  }
 0xbcc   : > { %9489 = vmatprep.mubr.bf16.mxu0 %v8793_v27  ;;  %9571 = vmatprep.mubr.bf16.mxu1 %v8793_v27  ;;  %v19484_v27 = vld [vmem:[#allocation22 + $0x36c] ss:$16 sps:$4 sm:$0xff]  }
 0xbcd   : > { %9490 = vmatmul.mubr.bf16.vlgmr.msra.gmra.mrb[88].mxu0 %v8792_v30  ;;  %9572 = vmatmul.mubr.bf16.vlgmr.msra.gmra.mrb[80].mxu1 %v8792_v30  ;;  %v19602_v30 = vpop.eup %19601 }
 0xbce   : > { %9499 = vmatpush1.bf16.msra.mxu0 %v19413_v50  ;;  %9581 = vmatpush1.bf16.msra.mxu1 %v19416_v26  ;;  %v19479_v50 = vld [vmem:[#allocation22 + $0x360] ss:$16 sps:$4 sm:$0xff]   ;;  %v19482_v26 = vld [vmem:[#allocation22 + $0x368] ss:$16 sps:$4 sm:$0xff]  }
 0xbcf   : > { %9530 = vmatprep.mubr.bf16.mxu0 %v8795_v35  ;;  %9612 = vmatprep.mubr.bf16.mxu1 %v8795_v35  ;;  %v8653_v35 = vadd.f32 1.0, %v19602_v30  ;;  %v19538_v30 = vld [vmem:[#allocation25 + $0xf8] sm:$0xff]  }
 0xbd0   : > { %9500 = vmatprep.subr.bf16.mxu0 %v19421_v61  ;;  %9582 = vmatprep.subr.bf16.mxu1 %v19424_v24  ;;  %v19487_v61 = vld [vmem:[#allocation22 + $0x384] ss:$16 sps:$4 sm:$0xff]   ;;  %v19490_v24 = vld [vmem:[#allocation22 + $0x38c] ss:$16 sps:$4 sm:$0xff]  }
 0xbd1   : > { %19603 = vrcp.f32 %v8653_v35  ;;  %v8791_v35 = vld [vmem:[#allocation23] sm:$0xf] }
 0xbd2   : > { %9501 = vmatpush1.bf16.msra.mxu0 %v19419_v31  ;;  %9583 = vmatpush1.bf16.msra.mxu1 %v19422_v25  ;;  %v19485_v31 = vld [vmem:[#allocation22 + $0x380] ss:$16 sps:$4 sm:$0xff]   ;;  %v19488_v25 = vld [vmem:[#allocation22 + $0x388] ss:$16 sps:$4 sm:$0xff]  }
 0xbd3   : > { %9502 = vmatprep.subr.bf16.mxu0 %v19427_v43  ;;  %9584 = vmatprep.subr.bf16.mxu1 %v19430_v32  ;;  %v19493_v43 = vld [vmem:[#allocation22 + $0x3a4] ss:$16 sps:$4 sm:$0xff]   ;;  %v19496_v32 = vld [vmem:[#allocation22 + $0x3ac] ss:$16 sps:$4 sm:$0xff]  }
 0xbd6   : > { %9503 = vmatpush1.bf16.msra.mxu0 %v19425_v16  ;;  %9585 = vmatpush1.bf16.msra.mxu1 %v19428_v39  ;;  %v19491_v16 = vld [vmem:[#allocation22 + $0x3a0] ss:$16 sps:$4 sm:$0xff]   ;;  %v19494_v39 = vld [vmem:[#allocation22 + $0x3a8] ss:$16 sps:$4 sm:$0xff]  }
 0xbd7   : > { %9504 = vmatprep.subr.bf16.mxu0 %v19433_v10  ;;  %9586 = vmatprep.subr.bf16.mxu1 %v19436_v29  ;;  %v19499_v10 = vld [vmem:[#allocation22 + $0x3c4] ss:$16 sps:$4 sm:$0xff]   ;;  %v19502_v29 = vld [vmem:[#allocation22 + $0x3cc] ss:$16 sps:$4 sm:$0xff]  }
 0xbda   : > { %9505 = vmatpush1.bf16.msra.mxu0 %v19431_v20  ;;  %9587 = vmatpush1.bf16.msra.mxu1 %v19434_v42  ;;  %v19497_v20 = vld [vmem:[#allocation22 + $0x3c0] ss:$16 sps:$4 sm:$0xff]   ;;  %v19500_v42 = vld [vmem:[#allocation22 + $0x3c8] ss:$16 sps:$4 sm:$0xff]  }
 0xbdb   : > { %9506 = vmatprep.subr.bf16.mxu0 %v19439_v47  ;;  %9588 = vmatprep.subr.bf16.mxu1 %v19442_v37  ;;  %v19505_v47 = vld [vmem:[#allocation22 + $0x3e4] ss:$16 sps:$4 sm:$0xff]   ;;  %v19508_v37 = vld [vmem:[#allocation22 + $0x3ec] ss:$16 sps:$4 sm:$0xff]  }
 0xbde   : > { %9507 = vmatpush1.bf16.msra.mxu0 %v19437_v49  ;;  %9589 = vmatpush1.bf16.msra.mxu1 %v19440_v34  ;;  %v19503_v49 = vld [vmem:[#allocation22 + $0x3e0] ss:$16 sps:$4 sm:$0xff]   ;;  %v19506_v34 = vld [vmem:[#allocation22 + $0x3e8] ss:$16 sps:$4 sm:$0xff]  }
 0xbdf   : > { %9508 = vmatprep.subr.bf16.mxu0 %v19445_v59  ;;  %9590 = vmatprep.subr.bf16.mxu1 %v19448_v44  ;;  %v19604_v59 = vpop.eup %19603 }
 0xbe0   : > { %v8794_v44 = vpack.c.bf16 %v19604_v59, %v19604_v59 }
 0xbe2   : > { %9509 = vmatpush1.bf16.msra.mxu0 %v19443_v52  ;;  %9591 = vmatpush1.bf16.msra.mxu1 %v19446_v28  ;;  %v19509_v52 = vld [vmem:[#allocation25 + $0x40] sm:$0xff]  }
 0xbe3   : > { %9510 = vmatprep.subr.bf16.mxu0 %v19451_v56  ;;  %9592 = vmatprep.subr.bf16.mxu1 %v19454_v51  ;;  %v19510_v28 = vld [vmem:[#allocation25 + $0xc0] sm:$0xff]  }
 0xbe4   : > { %v19511_v56 = vld [vmem:[#allocation25] sm:$0xff]  }
 0xbe5   : > { %v19512_v51 = vld [vmem:[#allocation25 + $0x80] sm:$0xff]  }
 0xbe6   : > { %9511 = vmatpush1.bf16.msra.mxu0 %v19449_v45  ;;  %9593 = vmatpush1.bf16.msra.mxu1 %v19452_v11  ;;  %v19514_v45 = vld [vmem:[#allocation25 + $0xc8] sm:$0xff]  }
 0xbe7   : > { %9512 = vmatprep.subr.bf16.mxu0 %v19457_v38  ;;  %9594 = vmatprep.subr.bf16.mxu1 %v19460_v41  ;;  %v19515_v11 = vld [vmem:[#allocation25 + $0x8] sm:$0xff]   ;;  %v19517_v41 = vld [vmem:[#allocation25 + $0x50] sm:$0xff]  }
 0xbe8   : > { %v19516_v38 = vld [vmem:[#allocation25 + $0x88] sm:$0xff]  }
 0xbea   : > { %9513 = vmatpush1.bf16.msra.mxu0 %v19455_v17  ;;  %9595 = vmatpush1.bf16.msra.mxu1 %v19458_v36  ;;  %v19519_v17 = vld [vmem:[#allocation25 + $0x10] sm:$0xff]  }
 0xbeb   : > { %9514 = vmatprep.subr.bf16.mxu0 %v19463_v63  ;;  %9596 = vmatprep.subr.bf16.mxu1 %v19466_v7  ;;  %v19520_v36 = vld [vmem:[#allocation25 + $0x90] sm:$0xff]   ;;  %v19521_v63 = vld [vmem:[#allocation25 + $0x58] sm:$0xff]  }
 0xbec   : > { %v19522_v7 = vld [vmem:[#allocation25 + $0xd8] sm:$0xff]  }
 0xbee   : > { %9515 = vmatpush1.bf16.msra.mxu0 %v19461_v8  ;;  %9597 = vmatpush1.bf16.msra.mxu1 %v19464_v62  ;;  %v19524_v8 = vld [vmem:[#allocation25 + $0x98] sm:$0xff]   ;;  %v19525_v62 = vld [vmem:[#allocation25 + $0x60] sm:$0xff]  }
 0xbef   : > { %9516 = vmatprep.subr.bf16.mxu0 %v19469_v9  ;;  %9598 = vmatprep.subr.bf16.mxu1 %v19472_v48  ;;  %v19526_v9 = vld [vmem:[#allocation25 + $0xe0] sm:$0xff]  }
 0xbf0   : > { %v19527_v48 = vld [vmem:[#allocation25 + $0x20] sm:$0xff]  }
 0xbf2   : > { %9517 = vmatpush1.bf16.msra.mxu0 %v19467_v6  ;;  %9599 = vmatpush1.bf16.msra.mxu1 %v19470_v21  ;;  %v19528_v6 = vld [vmem:[#allocation25 + $0xa0] sm:$0xff]   ;;  %v19529_v21 = vld [vmem:[#allocation25 + $0x68] sm:$0xff]  }
 0xbf3   : > { %9518 = vmatprep.subr.bf16.mxu0 %v19475_v33  ;;  %9600 = vmatprep.subr.bf16.mxu1 %v19478_v46  ;;  %v19530_v33 = vld [vmem:[#allocation25 + $0xe8] sm:$0xff]  }
 0xbf4   : > { %v19531_v46 = vld [vmem:[#allocation25 + $0x28] sm:$0xff]  }
 0xbf6   : > { %9519 = vmatpush1.bf16.msra.mxu0 %v19473_v22  ;;  %9601 = vmatpush1.bf16.msra.mxu1 %v19476_v60  ;;  %v19532_v22 = vld [vmem:[#allocation25 + $0xa8] sm:$0xff]   ;;  %v19533_v60 = vld [vmem:[#allocation25 + $0x70] sm:$0xff]  }
 0xbf7   : > { %9520 = vmatprep.subr.bf16.mxu0 %v19481_v23  ;;  %9602 = vmatprep.subr.bf16.mxu1 %v19484_v27  ;;  %v19534_v23 = vld [vmem:[#allocation25 + $0xf0] sm:$0xff]  }
 0xbf8   : > { %v19535_v27 = vld [vmem:[#allocation25 + $0x30] sm:$0xff]  }
 0xbfa   : > { %9521 = vmatpush1.bf16.msra.mxu0 %v19479_v50  ;;  %9603 = vmatpush1.bf16.msra.mxu1 %v19482_v26  ;;  %v19536_v50 = vld [vmem:[#allocation25 + $0xb0] sm:$0xff]   ;;  %v19537_v26 = vld [vmem:[#allocation25 + $0x78] sm:$0xff]  }
 0xbfb   : > { %9522 = vmatprep.subr.bf16.mxu0 %v19487_v61  ;;  %9604 = vmatprep.subr.bf16.mxu1 %v19490_v24  ;;  %v19539_v61 = vld [vmem:[#allocation25 + $0x38] sm:$0xff]  }
 0xbfc   : > { %v19540_v24 = vld [vmem:[#allocation25 + $0xb8] sm:$0xff]  }
 0xbfe   : > { %9523 = vmatpush1.bf16.msra.mxu0 %v19485_v31  ;;  %9605 = vmatpush1.bf16.msra.mxu1 %v19488_v25  ;;  %v8800_v31 = vrot.slane %v8791_v35, %v20860_v53  ;;  %v8808_v25 = vrot.slane %v8791_v35, %v20866_v55 }
 0xbff   : > { %9524 = vmatprep.subr.bf16.mxu0 %v19493_v43  ;;  %9606 = vmatprep.subr.bf16.mxu1 %v19496_v32  ;;  %v8804_v43 = vrot.slane %v8791_v35, %v22492_v54  ;;  %v8812_v32 = vrot.slane %v8791_v35, %v20869_v58 }
 0xc02   : > { %9525 = vmatpush1.bf16.msra.mxu0 %v19491_v16  ;;  %9607 = vmatpush1.bf16.msra.mxu1 %v19494_v39 }
 0xc03   : > { %9526 = vmatprep.subr.bf16.mxu0 %v19499_v10  ;;  %9608 = vmatprep.subr.bf16.mxu1 %v19502_v29 }
 0xc06   : > { %9527 = vmatpush1.bf16.msra.mxu0 %v19497_v20  ;;  %9609 = vmatpush1.bf16.msra.mxu1 %v19500_v42 }
 0xc07   : > { %9528 = vmatprep.subr.bf16.mxu0 %v19505_v47  ;;  %9610 = vmatprep.subr.bf16.mxu1 %v19508_v37 }
 0xc0a   : > { %9529 = vmatpush1.bf16.msra.mxu0 %v19503_v49  ;;  %9611 = vmatpush1.bf16.msra.mxu1 %v19506_v34 }
 0xc0b   : > { %17862 = vmatprep.subr.bf16.mxu0 %v19509_v52  ;;  %17884 = vmatprep.subr.bf16.mxu1 %v19510_v28 }
 0xc0d   : > { %9531 = vmatmul.mubr.bf16.vlgmr.msra.gmra.mrb[88].mxu0 %v8794_v44  ;;  %9613 = vmatmul.mubr.bf16.vlgmr.msra.gmra.mrb[80].mxu1 %v8794_v44 }
 0xc0e   : > { %17863 = vmatpush3.bf16.msra.mxu0 %v19511_v56  ;;  %17885 = vmatpush3.bf16.msra.mxu1 %v19512_v51 }
 0xc0f   : > { %17864 = vmatprep.subr.bf16.mxu0 %v19513_v57  ;;  %17886 = vmatprep.subr.bf16.mxu1 %v19514_v45 }
 0xc12   : > { %17865 = vmatpush3.bf16.msra.mxu0 %v19515_v11  ;;  %17887 = vmatpush3.bf16.msra.mxu1 %v19516_v38 }
 0xc13   : > { %17866 = vmatprep.subr.bf16.mxu0 %v19517_v41  ;;  %17888 = vmatprep.subr.bf16.mxu1 %v19518_v18 }
 0xc16   : > { %17867 = vmatpush3.bf16.msra.mxu0 %v19519_v17  ;;  %17889 = vmatpush3.bf16.msra.mxu1 %v19520_v36 }
 0xc17   : > { %17868 = vmatprep.subr.bf16.mxu0 %v19521_v63  ;;  %17890 = vmatprep.subr.bf16.mxu1 %v19522_v7 }
 0xc1a   : > { %17869 = vmatpush3.bf16.msra.mxu0 %v19523_v19  ;;  %17891 = vmatpush3.bf16.msra.mxu1 %v19524_v8 }
 0xc1b   : > { %17870 = vmatprep.subr.bf16.mxu0 %v19525_v62  ;;  %17892 = vmatprep.subr.bf16.mxu1 %v19526_v9 }
 0xc1e   : > { %17871 = vmatpush3.bf16.msra.mxu0 %v19527_v48  ;;  %17893 = vmatpush3.bf16.msra.mxu1 %v19528_v6 }
 0xc1f   : > { %17872 = vmatprep.subr.bf16.mxu0 %v19529_v21  ;;  %17894 = vmatprep.subr.bf16.mxu1 %v19530_v33  ;;  %v19541_v21 = vld [vmem:[%s10000_s3] sm:$0xff]   ;;  %v19542_v33 = vld [vmem:[%s10000_s3 + $0x8] sm:$0xff]  }
 0xc22   : > { %17873 = vmatpush3.bf16.msra.mxu0 %v19531_v46  ;;  %17895 = vmatpush3.bf16.msra.mxu1 %v19532_v22  ;;  %v19543_v46 = vld [vmem:[%s10000_s3 + $0x10] sm:$0xff]   ;;  %v19544_v22 = vld [vmem:[%s10000_s3 + $0x18] sm:$0xff]  }
 0xc23   : > { %17874 = vmatprep.subr.bf16.mxu0 %v19533_v60  ;;  %17896 = vmatprep.subr.bf16.mxu1 %v19534_v23  ;;  %v19545_v60 = vld [vmem:[%s10000_s3 + $0x20] sm:$0xff]   ;;  %v19546_v23 = vld [vmem:[%s10000_s3 + $0x28] sm:$0xff]  }
 0xc26   : > { %17875 = vmatpush3.bf16.msra.mxu0 %v19535_v27  ;;  %17897 = vmatpush3.bf16.msra.mxu1 %v19536_v50  ;;  %v19547_v27 = vld [vmem:[%s10000_s3 + $0x30] sm:$0xff]   ;;  %v19548_v50 = vld [vmem:[%s10000_s3 + $0x38] sm:$0xff]  }
 0xc27   : > { %17876 = vmatprep.subr.bf16.mxu0 %v19537_v26  ;;  %17898 = vmatprep.subr.bf16.mxu1 %v19538_v30 }
 0xc2a   : > { %17877 = vmatpush3.bf16.msra.mxu0 %v19539_v61  ;;  %17899 = vmatpush3.bf16.msra.mxu1 %v19540_v24  ;;  %v16825_v61 = vld [vmem:[#allocation26] ss:$0 sm:$0xff] }
 0xc2b   : > { %18365 = vmatprep.subr.bf16.mxu0 %v20443_v40 }
 0xce0   : > { %v9532_v16 = vpop.f32.mrb[88].mxu0  ;;  %v9614_v39 = vpop.f32.mrb[80].mxu1 }
 0xce1   : > { %v18435_v10 = vadd.f32 %v9532_v16, %v8800_v31  ;;  %v18437_v29 = vadd.f32 %v9614_v39, %v8808_v25  ;;  %v9534_v20 = vpop.f32.mrb[89].mxu0  ;;  %v9616_v42 = vpop.f32.mrb[81].mxu1 }
 0xce2   : > { %v18436_v47 = vadd.f32 %v9534_v20, %v8804_v43  ;;  %v18438_v37 = vadd.f32 %v9616_v42, %v8812_v32  ;;  %v9536_v49 = vpop.f32.mrb[90].mxu0  ;;  %v9618_v34 = vpop.f32.mrb[82].mxu1 }
 0xce3   : > { %v16821_v59 = vmul.f32 -1.442695, %v18435_v10  ;;  %v16823_v44 = vmul.f32 -1.442695, %v18437_v29  ;;  %v9537_v52 = vpop.f32.mrb[91].mxu0  ;;  %v9619_v28 = vpop.f32.mrb[83].mxu1 }
 0xce4   : > { %v16822_v56 = vmul.f32 -1.442695, %v18436_v47  ;;  %v16824_v51 = vmul.f32 -1.442695, %v18438_v37  ;;  %v16861_v49 = vld [vmem:[%s10017_s27] ss:$0 sm:$0xff] }
 0xce5   : > { %19605 = vpow2.f32 %v16821_v59 }
 0xce6   : > { %19607 = vpow2.f32 %v16823_v44 }
 0xce7   : > { %19609 = vpow2.f32 %v16822_v56 }
 0xce8   : > { %19611 = vpow2.f32 %v16824_v51 }
 0xcef   : > { %v19606_v57 = vpop.eup %19605 }
 0xcf0   : > { %v19608_v45 = vpop.eup %19607  ;;  %v9633_v11 = vadd.f32 1.0, %v19606_v57 }
 0xcf1   : > { %v19610_v38 = vpop.eup %19609  ;;  %v9635_v41 = vadd.f32 1.0, %v19608_v45 }
 0xcf2   : > { %v19612_v18 = vpop.eup %19611  ;;  %19613 = vrcp.f32 %v9633_v11  ;;  %v9634_v17 = vadd.f32 1.0, %v19610_v38  ;;  %v10120_v11 = vld [vmem:[#allocation3] sm:$0xff] (%p394_p2) }
 0xcf3   : > { %19615 = vrcp.f32 %v9635_v41  ;;  %v9636_v36 = vadd.f32 1.0, %v19612_v18  ;;  %v10136_v38 = vld [vmem:[#allocation3 + $0x80] sm:$0xff] (%p394_p2)  ;;  %v10121_v41 = vld [vmem:[#allocation3 + $0x8] sm:$0xff] (%p394_p2) }
 0xcf4   : > { %19617 = vrcp.f32 %v9634_v17  ;;  %v16872_v18 = vcombine.high (%p394_p2), %v10120_v11, %v10136_v38  ;;  %v10137_v17 = vld [vmem:[#allocation3 + $0x88] sm:$0xff] (%p394_p2) }
 0xcf5   : > { %19619 = vrcp.f32 %v9636_v36  ;;  %v16871_v36 = vcombine.low (%p394_p2), %v10120_v11, %v10136_v38  ;;  %v10329_v11 = vld [vmem:[#allocation3 + $0x688] sm:$0xff] (%p394_p2) }
 0xcfc   : > { %v19614_v63 = vpop.eup %19613 }
 0xcfd   : > { %v19616_v7 = vpop.eup %19615  ;;  %v9710_v48 = vpack.c.bf16 %v19614_v63, %v19614_v63  ;;  %v10152_v63 = vld [vmem:[#allocation3 + $0x100] sm:$0xff] (%p394_p2) }
 0xcfe   : > { %v19618_v19 = vpop.eup %19617  ;;  %v9712_v6 = vpack.c.bf16 %v19616_v7, %v19616_v7  ;;  %v10168_v7 = vld [vmem:[#allocation3 + $0x180] sm:$0xff] (%p394_p2) }
 0xcff   : > { %v19620_v8 = vpop.eup %19619  ;;  %v9711_v62 = vpack.c.bf16 %v19618_v19, %v19618_v19  ;;  %v20445_v19 = vmov (%p394_p2), 0  }
 0xd00   : > { %v9713_v9 = vpack.c.bf16 %v19620_v8, %v19620_v8  ;;  %v16874_v8 = vcombine.high (%p394_p2), %v10121_v41, %v10137_v17 }
 0xd01   : > { %9944 = vmatprep.mubr.bf16.mxu0 %v9711_v62  ;;  %v16873_v62 = vcombine.low (%p394_p2), %v10121_v41, %v10137_v17 }
 0xd02   : > { %9984 = vmatprep.mubr.bf16.mxu1 %v9713_v9  ;;  %9945 = vmatmul.mubr.bf16.vlgmr.msra.gmra.mrb[92].mxu0 %v9710_v48  ;;  %v16904_v9 = vcombine.high (%p394_p2), %v10152_v63, %v10168_v7  ;;  %v10153_v48 = vld [vmem:[#allocation3 + $0x108] sm:$0xff] (%p394_p2) }
 0xd03   : > { %9985 = vmatmul.mubr.bf16.vlgmr.msra.gmra.mrb[84].mxu1 %v9712_v6  ;;  %18381 = vmatprep.mubr.msk.bf16.mxu0 %vm20444_vm7, %v20443_v40  ;;  %v10169_v6 = vld [vmem:[#allocation3 + $0x188] sm:$0xff] (%p394_p2) }
 0xd04   : > { %18366 = vmatpush3.bf16.msra.mxu0 %v19541_v21  ;;  %11898 = vmatprep.mubr.bf16.mxu1 (%p394_p2), %v20445_v19  ;;  %v10184_v21 = vld [vmem:[#allocation3 + $0x200] sm:$0xff] (%p394_p2)  ;;  %v16906_v0 = vcombine.high (%p394_p2), %v10153_v48, %v10169_v6 }
 0xd05   : > { %18367 = vmatprep.subr.bf16.mxu0 %v20443_v40  ;;  %11866 = vmatprep.subr.bf16.mxu1 (%p394_p2), %v16874_v8  ;;  %v10361_v8 = vld [vmem:[#allocation3 + $0x788] sm:$0xff] (%p394_p2) }
 0xd06   :  { %11867 = vmatpush1.bf16.msra.mxu1 (%p394_p2), %v16873_v62 }
 0xd07   :  { %11868 = vmatprep.subr.bf16.mxu1 (%p394_p2), %v16906_v0  ;;  %v10138_v0 = vld [vmem:[#allocation3 + $0x90] sm:$0xff] (%p394_p2) }
 0xd08   : > { %18368 = vmatpush3.bf16.msra.mxu0 %v19542_v33  ;;  %v10200_v33 = vld [vmem:[#allocation3 + $0x280] sm:$0xff] (%p394_p2) }
 0xd09   : > { %18369 = vmatprep.subr.bf16.mxu0 %v20443_v40 }
 0xd0c   : > { %18370 = vmatpush3.bf16.msra.mxu0 %v19543_v46  ;;  %v10185_v46 = vld [vmem:[#allocation3 + $0x208] sm:$0xff] (%p394_p2) }
 0xd0d   : > { %18371 = vmatprep.subr.bf16.mxu0 %v20443_v40 }
 0xd10   : > { %18372 = vmatpush3.bf16.msra.mxu0 %v19544_v22  ;;  %v10201_v22 = vld [vmem:[#allocation3 + $0x288] sm:$0xff] (%p394_p2) }
 0xd11   : > { %18373 = vmatprep.subr.bf16.mxu0 %v20443_v40 }
 0xd14   : > { %18374 = vmatpush3.bf16.msra.mxu0 %v19545_v60  ;;  %v16903_v60 = vcombine.low (%p394_p2), %v10152_v63, %v10168_v7  ;;  %v10360_v63 = vld [vmem:[#allocation3 + $0x780] sm:$0xff] (%p394_p2)  ;;  %v10345_v7 = vld [vmem:[#allocation3 + $0x708] sm:$0xff] (%p394_p2) }
 0xd15   : > { %18375 = vmatprep.subr.bf16.mxu0 %v20443_v40 }
 0xd18   : > { %18376 = vmatpush3.bf16.msra.mxu0 %v19546_v23  ;;  %v16905_v23 = vcombine.low (%p394_p2), %v10153_v48, %v10169_v6  ;;  %v17098_v6 = vcombine.high (%p394_p2), %v10345_v7, %v10361_v8 }
 0xd19   : > { %18377 = vmatprep.subr.bf16.mxu0 %v20443_v40 }
 0xd1a   :  { %11869 = vmatpush1.bf16.msra.mxu1 (%p394_p2), %v16905_v23 }
 0xd1c   : > { %18378 = vmatpush3.bf16.msra.mxu0 %v19547_v27  ;;  %v16936_v27 = vcombine.high (%p394_p2), %v10184_v21, %v10200_v33 }
 0xd1d   : > { %18379 = vmatprep.subr.bf16.mxu0 %v20443_v40 }
 0xd20   : > { %18380 = vmatpush3.bf16.msra.mxu0 %v19548_v50  ;;  %v16938_v50 = vcombine.high (%p394_p2), %v10185_v46, %v10201_v22 }
 0xd21   :  { %11825 = vmatprep.subr.bf16.mxu0 (%p394_p2), %v16872_v18 }
 0xd22   :  { %11870 = vmatprep.subr.bf16.mxu1 (%p394_p2), %v16938_v50  ;;  %v10154_v50 = vld [vmem:[#allocation3 + $0x110] sm:$0xff] (%p394_p2) }
 0xdd5   : > { %v17878_v26 = vpop.f32.mrb[92].mxu0 }
 0xdd6   : > { %v17900_v30 = vpop.f32.mrb[84].mxu1  ;;  %v17879_v24 = vpop.f32.mrb[93].mxu0 }
 0xdd7   : > { %v17880_v35 = vadd.f32 %v17879_v24, %v17878_v26  ;;  %v17901_v31 = vpop.f32.mrb[85].mxu1  ;;  %v17881_v25 = vpop.f32.mrb[94].mxu0  ;;  %v10216_v26 = vld [vmem:[#allocation3 + $0x300] sm:$0xff] (%p394_p2)  ;;  %v10233_v24 = vld [vmem:[#allocation3 + $0x388] sm:$0xff] (%p394_p2) }
 0xdd8   : > { %v17902_v43 = vadd.f32 %v17901_v31, %v17900_v30  ;;  %v17903_v32 = vpop.f32.mrb[86].mxu1  ;;  %v17882_v16 = vpop.f32.mrb[95].mxu0  ;;  %v10232_v30 = vld [vmem:[#allocation3 + $0x380] sm:$0xff] (%p394_p2)  ;;  %v16937_v31 = vcombine.low (%p394_p2), %v10185_v46, %v10201_v22  ;;  %v10139_v46 = vld [vmem:[#allocation3 + $0x98] sm:$0xff] (%p394_p2) }
 0xdd9   : > { %v9947_v39 = vadd.f32 %v17880_v35, %v16825_v61  ;;  %v17904_v10 = vpop.f32.mrb[87].mxu1  ;;  %v10217_v61 = vld [vmem:[#allocation3 + $0x308] sm:$0xff] (%p394_p2)  ;;  %v16935_v35 = vcombine.low (%p394_p2), %v10184_v21, %v10200_v33  ;;  %v10248_v32 = vld [vmem:[#allocation3 + $0x400] sm:$0xff] (%p394_p2)  ;;  %v10122_v21 = vld [vmem:[#allocation3 + $0x10] sm:$0xff] (%p394_p2) }
 0xdda   :  { %v10264_v16 = vld [vmem:[#allocation3 + $0x480] sm:$0xff] (%p394_p2)  ;;  %v10265_v10 = vld [vmem:[#allocation3 + $0x488] sm:$0xff] (%p394_p2)  ;;  %11871 = vmatpush1.bf16.msra.mxu1 (%p394_p2), %v16937_v31  ;;  %v10123_v33 = vld [vmem:[#allocation3 + $0x18] sm:$0xff] (%p394_p2)  ;;  %v16876_v23 = vcombine.high (%p394_p2), %v10122_v21, %v10138_v0 }
 0xddb   : > { %v9987_v29 = vadd.f32 %v17902_v43, %v9947_v39  ;;  %v16970_v43 = vcombine.high (%p394_p2), %v10217_v61, %v10233_v24  ;;  %v10249_v39 = vld [vmem:[#allocation3 + $0x408] sm:$0xff] (%p394_p2)  ;;  %v16877_v31 = vcombine.low (%p394_p2), %v10123_v33, %v10139_v46 }
 0xddd   : > { %v16858_v20 = vmul.f32 -1.442695, %v9987_v29  ;;  %v16967_v29 = vcombine.low (%p394_p2), %v10216_v26, %v10232_v30  ;;  %11872 = vmatprep.subr.bf16.mxu1 (%p394_p2), %v16970_v43 }
 0xddf   : > { %19621 = vpow2.f32 %v16858_v20  ;;  %v16969_v20 = vcombine.low (%p394_p2), %v10217_v61, %v10233_v24  ;;  %v10155_v61 = vld [vmem:[#allocation3 + $0x118] sm:$0xff] (%p394_p2) }
 0xde0   :  { %v10171_v24 = vld [vmem:[#allocation3 + $0x198] sm:$0xff] (%p394_p2) }
 0xde1   :  { %11873 = vmatpush1.bf16.msra.mxu1 (%p394_p2), %v16969_v20  ;;  %v16910_v43 = vcombine.high (%p394_p2), %v10155_v61, %v10171_v24 }
 0xde9   : > { %v19622_v42 = vpop.eup %19621 }
 0xdea   : > { %v9995_v47 = vadd.f32 1.0, %v19622_v42  ;;  %v17000_v42 = vcombine.high (%p394_p2), %v10248_v32, %v10264_v16 }
 0xdec   : > { %19623 = vrcp.f32 %v9995_v47  ;;  %v17002_v47 = vcombine.high (%p394_p2), %v10249_v39, %v10265_v10 }
 0xdee   :  { %11874 = vmatprep.subr.bf16.mxu1 (%p394_p2), %v17002_v47  ;;  %v10218_v47 = vld [vmem:[#allocation3 + $0x310] sm:$0xff] (%p394_p2) }
 0xdf6   : > { %v19624_v40 = vpop.eup %19623 }
 0xdf7   : > { %v10019_v37 = vpack.c.bf16 %v19624_v40, %v19624_v40  ;;  %v10280_v40 = vld [vmem:[#allocation3 + $0x500] sm:$0xff] (%p394_p2) }
 0xdf9   : > { %18382 = vmatmul.mubr.bf16.vlgmr.msra.gmra.mrb[96].mxu0 %v10019_v37  ;;  %v10296_v37 = vld [vmem:[#allocation3 + $0x580] sm:$0xff] (%p394_p2) }
 0xdfa   :  { %11857 = vmatprep.mubr.bf16.mxu0 (%p394_p2), %v20445_v19  ;;  %11826 = vmatpush1.bf16.msra.mxu0 (%p394_p2), %v16871_v36  ;;  %v17031_v38 = vcombine.low (%p394_p2), %v10280_v40, %v10296_v37  ;;  %v10344_v36 = vld [vmem:[#allocation3 + $0x700] sm:$0xff] (%p394_p2) }
 0xdfb   :  { %11827 = vmatprep.subr.bf16.mxu0 (%p394_p2), %v16904_v9  ;;  %v17096_v48 = vcombine.high (%p394_p2), %v10344_v36, %v10360_v63  ;;  %v17095_v22 = vcombine.low (%p394_p2), %v10344_v36, %v10360_v63  ;;  %v10298_v36 = vld [vmem:[#allocation3 + $0x590] sm:$0xff] (%p394_p2)  ;;  %v10283_v63 = vld [vmem:[#allocation3 + $0x518] sm:$0xff] (%p394_p2) }
 0xdfe   :  { %11828 = vmatpush1.bf16.msra.mxu0 (%p394_p2), %v16903_v60  ;;  %v17097_v60 = vcombine.low (%p394_p2), %v10345_v7, %v10361_v8  ;;  %v10299_v7 = vld [vmem:[#allocation3 + $0x598] sm:$0xff] (%p394_p2) }
 0xdff   :  { %11829 = vmatprep.subr.bf16.mxu0 (%p394_p2), %v16936_v27  ;;  %v16878_v27 = vcombine.high (%p394_p2), %v10123_v33, %v10139_v46  ;;  %v10331_v33 = vld [vmem:[#allocation3 + $0x698] sm:$0xff] (%p394_p2) }
 0xe02   :  { %11830 = vmatpush1.bf16.msra.mxu0 (%p394_p2), %v16935_v35  ;;  %v16875_v35 = vcombine.low (%p394_p2), %v10122_v21, %v10138_v0  ;;  %v10330_v21 = vld [vmem:[#allocation3 + $0x690] sm:$0xff] (%p394_p2)  ;;  %v10315_v0 = vld [vmem:[#allocation3 + $0x618] sm:$0xff] (%p394_p2) }
 0xecc   : > { %v10108_v34 = vpop.f32.mrb[96].mxu0 }
 0xecd   : > { %v10109_v59 = vadd.f32 %v16861_v49, %v10108_v34  ;;  %v18383_v44 = vpop.f32.mrb[97].mxu0  ;;  %v10281_v49 = vld [vmem:[#allocation3 + $0x508] sm:$0xff] (%p394_p2) }
 0xece   : > { %v10111_v52 = vpop.f32.mrb[98].mxu0  ;;  %v10297_v34 = vld [vmem:[#allocation3 + $0x588] sm:$0xff] (%p394_p2)  ;;  %v17001_v44 = vcombine.low (%p394_p2), %v10249_v39, %v10265_v10  ;;  %v10187_v39 = vld [vmem:[#allocation3 + $0x218] sm:$0xff] (%p394_p2) }
 0xecf   : > { %v16870_v28 = vmul.f32 -1.442695, %v10109_v59  ;;  %v18384_v56 = vpop.f32.mrb[99].mxu0  ;;  %v16999_v59 = vcombine.low (%p394_p2), %v10248_v32, %v10264_v16  ;;  %v17032_v52 = vcombine.high (%p394_p2), %v10280_v40, %v10296_v37  ;;  %v17033_v41 = vcombine.low (%p394_p2), %v10281_v49, %v10297_v34  ;;  %v10186_v32 = vld [vmem:[#allocation3 + $0x210] sm:$0xff] (%p394_p2)  ;;  %v10203_v10 = vld [vmem:[#allocation3 + $0x298] sm:$0xff] (%p394_p2) }
 0xed0   :  { %v10312_v56 = vld [vmem:[#allocation3 + $0x600] sm:$0xff] (%p394_p2)  ;;  %11875 = vmatpush1.bf16.msra.mxu1 (%p394_p2), %v17001_v44  ;;  %v10202_v16 = vld [vmem:[#allocation3 + $0x290] sm:$0xff] (%p394_p2)  ;;  %v10219_v37 = vld [vmem:[#allocation3 + $0x318] sm:$0xff] (%p394_p2) }
 0xed1   : > { %19625 = vpow2.f32 %v16870_v28  ;;  %v17034_v28 = vcombine.high (%p394_p2), %v10281_v49, %v10297_v34  ;;  %v16940_v20 = vcombine.high (%p394_p2), %v10186_v32, %v10202_v16  ;;  %v10234_v40 = vld [vmem:[#allocation3 + $0x390] sm:$0xff] (%p394_p2)  ;;  %v10235_v49 = vld [vmem:[#allocation3 + $0x398] sm:$0xff] (%p394_p2)  ;;  %v16939_v34 = vcombine.low (%p394_p2), %v10186_v32, %v10202_v16  ;;  %v10140_v32 = vld [vmem:[#allocation3 + $0xa0] sm:$0xff] (%p394_p2) }
 0xed2   :  { %v16972_v44 = vcombine.high (%p394_p2), %v10218_v47, %v10234_v40  ;;  %v10125_v16 = vld [vmem:[#allocation3 + $0x28] sm:$0xff] (%p394_p2) }
 0xed3   :  { %11876 = vmatprep.subr.bf16.mxu1 (%p394_p2), %v17034_v28  ;;  %v10250_v28 = vld [vmem:[#allocation3 + $0x410] sm:$0xff] (%p394_p2) }
 0xed4   :  { %11877 = vmatpush1.bf16.msra.mxu1 (%p394_p2), %v17033_v41 }
 0xedb   : > { %v19626_v51 = vpop.eup %19625 }
 0xedc   : > { %v10117_v57 = vadd.f32 1.0, %v19626_v51  ;;  %v10328_v51 = vld [vmem:[#allocation3 + $0x680] sm:$0xff] (%p394_p2) }
 0xedd   :  { %v17064_v18 = vcombine.high (%p394_p2), %v10312_v56, %v10328_v51  ;;  %v17063_v62 = vcombine.low (%p394_p2), %v10312_v56, %v10328_v51  ;;  %v10266_v56 = vld [vmem:[#allocation3 + $0x490] sm:$0xff] (%p394_p2)  ;;  %v10251_v51 = vld [vmem:[#allocation3 + $0x418] sm:$0xff] (%p394_p2) }
 0xede   : > { %19627 = vrcp.f32 %v10117_v57  ;;  %v10313_v57 = vld [vmem:[#allocation3 + $0x608] sm:$0xff] (%p394_p2)  ;;  %v17004_v41 = vcombine.high (%p394_p2), %v10250_v28, %v10266_v56  ;;  %v17003_v8 = vcombine.low (%p394_p2), %v10250_v28, %v10266_v56 }
 0xedf   :  { %v17066_v17 = vcombine.high (%p394_p2), %v10313_v57, %v10329_v11  ;;  %v17065_v9 = vcombine.low (%p394_p2), %v10313_v57, %v10329_v11  ;;  %v10267_v57 = vld [vmem:[#allocation3 + $0x498] sm:$0xff] (%p394_p2)  ;;  %v16971_v11 = vcombine.low (%p394_p2), %v10218_v47, %v10234_v40  ;;  %v10172_v47 = vld [vmem:[#allocation3 + $0x1a0] sm:$0xff] (%p394_p2)  ;;  %v10157_v40 = vld [vmem:[#allocation3 + $0x128] sm:$0xff] (%p394_p2) }
 0xee0   :  { %v10189_v28 = vld [vmem:[#allocation3 + $0x228] sm:$0xff] (%p394_p2) }
 0xee1   :  { %11878 = vmatprep.subr.bf16.mxu1 (%p394_p2), %v17066_v17  ;;  %v10282_v17 = vld [vmem:[#allocation3 + $0x510] sm:$0xff] (%p394_p2)  ;;  %v10205_v56 = vld [vmem:[#allocation3 + $0x2a8] sm:$0xff] (%p394_p2) }
 0xee2   :  { %11879 = vmatpush1.bf16.msra.mxu1 (%p394_p2), %v17065_v9  ;;  %v17036_v9 = vcombine.high (%p394_p2), %v10282_v17, %v10298_v36  ;;  %v17035_v46 = vcombine.low (%p394_p2), %v10282_v17, %v10298_v36  ;;  %v10221_v17 = vld [vmem:[#allocation3 + $0x328] sm:$0xff] (%p394_p2) }
 0xee3   :  { %11880 = vmatprep.subr.bf16.mxu1 (%p394_p2), %v17098_v6  ;;  %v10314_v6 = vld [vmem:[#allocation3 + $0x610] sm:$0xff] (%p394_p2)  ;;  %v10237_v36 = vld [vmem:[#allocation3 + $0x3a8] sm:$0xff] (%p394_p2) }
 0xee4   :  { %396 = sbr.rel (!%p394_p2) target bundleno = 598 (0x256), region = 179 }
 0xee6   :  { %11881 = vmatpush1.bf16.msra.mxu1 (%p394_p2), %v17097_v60  ;;  %v17068_v60 = vcombine.high (%p394_p2), %v10314_v6, %v10330_v21 }
 0xee7   :  { %11948 = vmatprep.subr.bf16.mxu1 (%p394_p2), %v16878_v27  ;;  %v10346_v27 = vld [vmem:[#allocation3 + $0x710] sm:$0xff] (%p394_p2) }
 0xee8   : > { %v21968_v25 = vpop.eup %19627  }
 0xee9   : > { %v22493_v45 = vmov %v21968_v25 }
 0xeea   : > { %v22494_v25 = vmov %v22493_v45 }
 0xeeb   :  { %v16968_v25 = vcombine.high %v10216_v26, %v10232_v30  ;;  %v10170_v26 = vld [vmem:[#allocation3 + $0x190] sm:$0xff]  ;;  %v21980_v30 = vpack.c.bf16 %v22493_v45, %v22493_v45 }
 0xeec   :  { %v16907_v45 = vcombine.low %v10154_v50, %v10170_v26 }
 0xeed   :  { %11831 = vmatprep.subr.bf16.mxu0 %v16968_v25  ;;  %v16908_v25 = vcombine.high %v10154_v50, %v10170_v26  ;;  %11899 = vmatmul.mubr.bf16.vlgmr.msra.gmra.mrb[0].mxu1 %v21980_v30  ;;  %v10362_v50 = vld [vmem:[#allocation3 + $0x790] sm:$0xff]  ;;  %v10347_v26 = vld [vmem:[#allocation3 + $0x718] sm:$0xff] }
 0xeee   :  { %11832 = vmatpush1.bf16.msra.mxu0 %v16967_v29  ;;  %11949 = vmatpush1.bf16.msra.mxu1 %v16877_v31  ;;  %v16909_v29 = vcombine.low %v10155_v61, %v10171_v24  ;;  %v10363_v61 = vld [vmem:[#allocation3 + $0x798] sm:$0xff]  ;;  %v17067_v24 = vcombine.low %v10314_v6, %v10330_v21  ;;  %v17100_v31 = vcombine.high %v10346_v27, %v10362_v50  ;;  %v10253_v6 = vld [vmem:[#allocation3 + $0x428] sm:$0xff] }
 0xeef   :  { %11833 = vmatprep.subr.bf16.mxu0 %v17000_v42  ;;  %11950 = vmatprep.subr.bf16.mxu1 %v16910_v43  ;;  %v16942_v42 = vcombine.high %v10187_v39, %v10203_v10  ;;  %v10124_v43 = vld [vmem:[#allocation3 + $0x20] sm:$0xff]  ;;  %v10269_v21 = vld [vmem:[#allocation3 + $0x4a8] sm:$0xff] }
 0xef0   :  { %11980 = vmatprep.mubr.bf16.mxu1 %v20445_v19 }
 0xef2   :  { %11834 = vmatpush1.bf16.msra.mxu0 %v16999_v59  ;;  %11951 = vmatpush1.bf16.msra.mxu1 %v16909_v29  ;;  %v16941_v59 = vcombine.low %v10187_v39, %v10203_v10  ;;  %v10141_v39 = vld [vmem:[#allocation3 + $0xa8] sm:$0xff]  ;;  %v17099_v10 = vcombine.low %v10346_v27, %v10362_v50  ;;  %v16880_v29 = vcombine.high %v10124_v43, %v10140_v32 }
 0xef3   :  { %11835 = vmatprep.subr.bf16.mxu0 %v17032_v52  ;;  %11952 = vmatprep.subr.bf16.mxu1 %v16942_v42  ;;  %v16974_v52 = vcombine.high %v10219_v37, %v10235_v49  ;;  %v10156_v42 = vld [vmem:[#allocation3 + $0x120] sm:$0xff]  ;;  %v10285_v27 = vld [vmem:[#allocation3 + $0x528] sm:$0xff] }
 0xef4   :  { %v10301_v50 = vld [vmem:[#allocation3 + $0x5a8] sm:$0xff] }
 0xef6   :  { %11836 = vmatpush1.bf16.msra.mxu0 %v17031_v38  ;;  %11953 = vmatpush1.bf16.msra.mxu1 %v16941_v59  ;;  %v16973_v38 = vcombine.low %v10219_v37, %v10235_v49  ;;  %v10173_v37 = vld [vmem:[#allocation3 + $0x1a8] sm:$0xff]  ;;  %v16879_v49 = vcombine.low %v10124_v43, %v10140_v32  ;;  %v10204_v59 = vld [vmem:[#allocation3 + $0x2a0] sm:$0xff] }
 0xef7   :  { %11837 = vmatprep.subr.bf16.mxu0 %v17064_v18  ;;  %11954 = vmatprep.subr.bf16.mxu1 %v16974_v52  ;;  %v17006_v18 = vcombine.high %v10251_v51, %v10267_v57  ;;  %v16912_v52 = vcombine.high %v10156_v42, %v10172_v47  ;;  %v10317_v43 = vld [vmem:[#allocation3 + $0x628] sm:$0xff] }
 0xef8   :  { %v10333_v32 = vld [vmem:[#allocation3 + $0x6a8] sm:$0xff] }
 0xefa   :  { %11838 = vmatpush1.bf16.msra.mxu0 %v17063_v62  ;;  %11955 = vmatpush1.bf16.msra.mxu1 %v16973_v38  ;;  %v17005_v62 = vcombine.low %v10251_v51, %v10267_v57  ;;  %v16914_v51 = vcombine.high %v10157_v40, %v10173_v37  ;;  %v16911_v57 = vcombine.low %v10156_v42, %v10172_v47  ;;  %v10236_v38 = vld [vmem:[#allocation3 + $0x3a0] sm:$0xff]  ;;  %v10349_v42 = vld [vmem:[#allocation3 + $0x728] sm:$0xff] }
 0xefb   :  { %11839 = vmatprep.subr.bf16.mxu0 %v17096_v48  ;;  %11956 = vmatprep.subr.bf16.mxu1 %v17006_v18  ;;  %v17038_v48 = vcombine.high %v10283_v63, %v10299_v7  ;;  %v10365_v47 = vld [vmem:[#allocation3 + $0x7a8] sm:$0xff] }
 0xefe   :  { %11840 = vmatpush1.bf16.msra.mxu0 %v17095_v22  ;;  %11957 = vmatpush1.bf16.msra.mxu1 %v17005_v62  ;;  %v17037_v22 = vcombine.low %v10283_v63, %v10299_v7  ;;  %v16946_v63 = vcombine.high %v10189_v28, %v10205_v56  ;;  %v10268_v62 = vld [vmem:[#allocation3 + $0x4a0] sm:$0xff] }
 0xeff   :  { %11907 = vmatprep.subr.bf16.mxu0 %v16876_v23  ;;  %11958 = vmatprep.subr.bf16.mxu1 %v17038_v48  ;;  %v17070_v23 = vcombine.high %v10315_v0, %v10331_v33 }
 0xf01   :  { %11858 = vmatmul.mubr.bf16.vlgmr.msra.gmra.mrb[0].mxu0 %v21980_v30 }
 0xf02   :  { %11908 = vmatpush1.bf16.msra.mxu0 %v16875_v35  ;;  %11939 = vmatprep.mubr.bf16.mxu0 %v20445_v19  ;;  %v17069_v35 = vcombine.low %v10315_v0, %v10331_v33  ;;  %v16978_v0 = vcombine.high %v10221_v17, %v10237_v36 }
 0xf03   :  { %11909 = vmatprep.subr.bf16.mxu0 %v16908_v25  ;;  %11959 = vmatpush1.bf16.msra.mxu1 %v17037_v22  ;;  %v17102_v25 = vcombine.high %v10347_v26, %v10363_v61  ;;  %v10300_v22 = vld [vmem:[#allocation3 + $0x5a0] sm:$0xff] }
 0xf04   :  { %11960 = vmatprep.subr.bf16.mxu1 %v17070_v23 }
 0xf06   :  { %11910 = vmatpush1.bf16.msra.mxu0 %v16907_v45  ;;  %v17101_v45 = vcombine.low %v10347_v26, %v10363_v61  ;;  %v17010_v26 = vcombine.high %v10253_v6, %v10269_v21 }
 0xf07   :  { %11911 = vmatprep.subr.bf16.mxu0 %v16940_v20  ;;  %11961 = vmatpush1.bf16.msra.mxu1 %v17069_v35  ;;  %v16882_v20 = vcombine.high %v10125_v16, %v10141_v39  ;;  %v10332_v35 = vld [vmem:[#allocation3 + $0x6a0] sm:$0xff] }
 0xf08   :  { %11962 = vmatprep.subr.bf16.mxu1 %v17102_v25 }
 0xf0a   :  { %11912 = vmatpush1.bf16.msra.mxu0 %v16939_v34  ;;  %v10188_v34 = vld [vmem:[#allocation3 + $0x220] sm:$0xff] }
 0xf0b   :  { %11913 = vmatprep.subr.bf16.mxu0 %v16972_v44  ;;  %11963 = vmatpush1.bf16.msra.mxu1 %v17101_v45  ;;  %v16881_v44 = vcombine.low %v10125_v16, %v10141_v39  ;;  %v16944_v18 = vcombine.high %v10188_v34, %v10204_v59  ;;  %v16943_v7 = vcombine.low %v10188_v34, %v10204_v59  ;;  %v10364_v45 = vld [vmem:[#allocation3 + $0x7a0] sm:$0xff]  ;;  %v10142_v34 = vld [vmem:[#allocation3 + $0xb0] sm:$0xff] }
 0xf0c   :  { %12030 = vmatprep.subr.bf16.mxu1 %v16882_v20  ;;  %v17042_v16 = vcombine.high %v10285_v27, %v10301_v50  ;;  %v17073_v59 = vcombine.low %v10317_v43, %v10333_v32 }
 0xf0e   :  { %11914 = vmatpush1.bf16.msra.mxu0 %v16971_v11  ;;  %11981 = vmatmul.mubr.bf16.vlgmr.msra.gmra.mrb[4].mxu1 %v21980_v30  ;;  %v10220_v11 = vld [vmem:[#allocation3 + $0x320] sm:$0xff] }
 0xf0f   :  { %11915 = vmatprep.subr.bf16.mxu0 %v17004_v41  ;;  %12031 = vmatpush1.bf16.msra.mxu1 %v16881_v44  ;;  %v16913_v41 = vcombine.low %v10157_v40, %v10173_v37  ;;  %v16976_v48 = vcombine.high %v10220_v11, %v10236_v38  ;;  %v16975_v33 = vcombine.low %v10220_v11, %v10236_v38  ;;  %v10174_v11 = vld [vmem:[#allocation3 + $0x1b0] sm:$0xff] }
 0xf10   :  { %12032 = vmatprep.subr.bf16.mxu1 %v16914_v51  ;;  %12062 = vmatprep.mubr.bf16.mxu1 %v20445_v19  ;;  %v17074_v40 = vcombine.high %v10317_v43, %v10333_v32  ;;  %v17105_v38 = vcombine.low %v10349_v42, %v10365_v47  ;;  %v10271_v43 = vld [vmem:[#allocation3 + $0x4b8] sm:$0xff] }
 0xf12   :  { %11916 = vmatpush1.bf16.msra.mxu0 %v17003_v8  ;;  %v10252_v8 = vld [vmem:[#allocation3 + $0x420] sm:$0xff] }
 0xf13   :  { %11917 = vmatprep.subr.bf16.mxu0 %v17036_v9  ;;  %12033 = vmatpush1.bf16.msra.mxu1 %v16913_v41  ;;  %v16945_v9 = vcombine.low %v10189_v28, %v10205_v56  ;;  %v17008_v23 = vcombine.high %v10252_v8, %v10268_v62  ;;  %v17007_v61 = vcombine.low %v10252_v8, %v10268_v62  ;;  %v10143_v28 = vld [vmem:[#allocation3 + $0xb8] sm:$0xff]  ;;  %v10206_v8 = vld [vmem:[#allocation3 + $0x2b0] sm:$0xff] }
 0xf14   :  { %12034 = vmatprep.subr.bf16.mxu1 %v16946_v63  ;;  %v17106_v56 = vcombine.high %v10349_v42, %v10365_v47  ;;  %v10303_v42 = vld [vmem:[#allocation3 + $0x5b8] sm:$0xff] }
 0xf16   :  { %11918 = vmatpush1.bf16.msra.mxu0 %v17035_v46  ;;  %v10284_v46 = vld [vmem:[#allocation3 + $0x520] sm:$0xff] }
 0xf17   :  { %11919 = vmatprep.subr.bf16.mxu0 %v17068_v60  ;;  %12035 = vmatpush1.bf16.msra.mxu1 %v16945_v9  ;;  %v16977_v60 = vcombine.low %v10221_v17, %v10237_v36  ;;  %v17040_v25 = vcombine.high %v10284_v46, %v10300_v22  ;;  %v17039_v39 = vcombine.low %v10284_v46, %v10300_v22  ;;  %v10175_v17 = vld [vmem:[#allocation3 + $0x1b8] sm:$0xff]  ;;  %v10238_v46 = vld [vmem:[#allocation3 + $0x3b0] sm:$0xff] }
 0xf18   :  { %12036 = vmatprep.subr.bf16.mxu1 %v16978_v0 }
 0xf1a   :  { %11920 = vmatpush1.bf16.msra.mxu0 %v17067_v24  ;;  %v10316_v24 = vld [vmem:[#allocation3 + $0x620] sm:$0xff] }
 0xf1b   :  { %11921 = vmatprep.subr.bf16.mxu0 %v17100_v31  ;;  %12037 = vmatpush1.bf16.msra.mxu1 %v16977_v60  ;;  %v17009_v31 = vcombine.low %v10253_v6, %v10269_v21  ;;  %v17072_v20 = vcombine.high %v10316_v24, %v10332_v35  ;;  %v17071_v37 = vcombine.low %v10316_v24, %v10332_v35  ;;  %v10207_v6 = vld [vmem:[#allocation3 + $0x2b8] sm:$0xff]  ;;  %v10270_v24 = vld [vmem:[#allocation3 + $0x4b0] sm:$0xff] }
 0xf1c   :  { %12038 = vmatprep.subr.bf16.mxu1 %v17010_v26 }
 0xf1e   :  { %11922 = vmatpush1.bf16.msra.mxu0 %v17099_v10  ;;  %v10348_v10 = vld [vmem:[#allocation3 + $0x720] sm:$0xff] }
 0xf1f   :  { %11989 = vmatprep.subr.bf16.mxu0 %v16880_v29  ;;  %12039 = vmatpush1.bf16.msra.mxu1 %v17009_v31  ;;  %v17041_v29 = vcombine.low %v10285_v27, %v10301_v50  ;;  %v17104_v44 = vcombine.high %v10348_v10, %v10364_v45  ;;  %v17103_v51 = vcombine.low %v10348_v10, %v10364_v45  ;;  %v10239_v27 = vld [vmem:[#allocation3 + $0x3b8] sm:$0xff]  ;;  %v10302_v10 = vld [vmem:[#allocation3 + $0x5b0] sm:$0xff] }
 0xf20   :  { %12040 = vmatprep.subr.bf16.mxu1 %v17042_v16 }
 0xf21   :  { %11940 = vmatmul.mubr.bf16.vlgmr.msra.gmra.mrb[4].mxu0 %v21980_v30 }
 0xf22   :  { %11990 = vmatpush1.bf16.msra.mxu0 %v16879_v49  ;;  %12021 = vmatprep.mubr.bf16.mxu0 %v20445_v19  ;;  %v10126_v49 = vld [vmem:[#allocation3 + $0x30] sm:$0xff] }
 0xf23   :  { %11991 = vmatprep.subr.bf16.mxu0 %v16912_v52  ;;  %12041 = vmatpush1.bf16.msra.mxu1 %v17041_v29  ;;  %v10127_v52 = vld [vmem:[#allocation3 + $0x38] sm:$0xff]  ;;  %v16884_v41 = vcombine.high %v10126_v49, %v10142_v34  ;;  %v16883_v63 = vcombine.low %v10126_v49, %v10142_v34  ;;  %v10334_v49 = vld [vmem:[#allocation3 + $0x6b0] sm:$0xff] }
 0xf24   :  { %12042 = vmatprep.subr.bf16.mxu1 %v17074_v40  ;;  %v16886_v36 = vcombine.high %v10127_v52, %v10143_v28  ;;  %v16885_v62 = vcombine.low %v10127_v52, %v10143_v28  ;;  %v10335_v52 = vld [vmem:[#allocation3 + $0x6b8] sm:$0xff] }
 0xf26   :  { %11992 = vmatpush1.bf16.msra.mxu0 %v16911_v57  ;;  %v10158_v57 = vld [vmem:[#allocation3 + $0x130] sm:$0xff] }
 0xf27   :  { %11993 = vmatprep.subr.bf16.mxu0 %v16944_v18  ;;  %12043 = vmatpush1.bf16.msra.mxu1 %v17073_v59  ;;  %v10159_v18 = vld [vmem:[#allocation3 + $0x138] sm:$0xff]  ;;  %v16916_v9 = vcombine.high %v10158_v57, %v10174_v11  ;;  %v16915_v0 = vcombine.low %v10158_v57, %v10174_v11  ;;  %v10366_v57 = vld [vmem:[#allocation3 + $0x7b0] sm:$0xff] }
 0xf28   :  { %12044 = vmatprep.subr.bf16.mxu1 %v17106_v56  ;;  %v16918_v21 = vcombine.high %v10159_v18, %v10175_v17  ;;  %v16917_v22 = vcombine.low %v10159_v18, %v10175_v17  ;;  %v10367_v18 = vld [vmem:[#allocation3 + $0x7b8] sm:$0xff] }
 0xf2a   :  { %11994 = vmatpush1.bf16.msra.mxu0 %v16943_v7  ;;  %v10190_v7 = vld [vmem:[#allocation3 + $0x230] sm:$0xff] }
 0xf2b   :  { %11995 = vmatprep.subr.bf16.mxu0 %v16976_v48  ;;  %12045 = vmatpush1.bf16.msra.mxu1 %v17105_v38  ;;  %v10191_v48 = vld [vmem:[#allocation3 + $0x238] sm:$0xff]  ;;  %v16948_v60 = vcombine.high %v10190_v7, %v10206_v8  ;;  %v16947_v26 = vcombine.low %v10190_v7, %v10206_v8  ;;  %v10144_v7 = vld [vmem:[#allocation3 + $0xc0] sm:$0xff] }
 0xf2c   :  { %12112 = vmatprep.subr.bf16.mxu1 %v16886_v36  ;;  %v16950_v50 = vcombine.high %v10191_v48, %v10207_v6  ;;  %v16949_v35 = vcombine.low %v10191_v48, %v10207_v6  ;;  %v10145_v48 = vld [vmem:[#allocation3 + $0xc8] sm:$0xff] }
 0xf2e   :  { %11996 = vmatpush1.bf16.msra.mxu0 %v16975_v33  ;;  %12063 = vmatmul.mubr.bf16.vlgmr.msra.gmra.mrb[8].mxu1 %v21980_v30  ;;  %v10222_v33 = vld [vmem:[#allocation3 + $0x330] sm:$0xff] }
 0xf2f   :  { %11997 = vmatprep.subr.bf16.mxu0 %v17008_v23  ;;  %12113 = vmatpush1.bf16.msra.mxu1 %v16885_v62  ;;  %v10223_v23 = vld [vmem:[#allocation3 + $0x338] sm:$0xff]  ;;  %v16980_v31 = vcombine.high %v10222_v33, %v10238_v46  ;;  %v16979_v16 = vcombine.low %v10222_v33, %v10238_v46  ;;  %v10176_v33 = vld [vmem:[#allocation3 + $0x1c0] sm:$0xff] }
 0xf30   :  { %12114 = vmatprep.subr.bf16.mxu1 %v16918_v21  ;;  %12144 = vmatprep.mubr.bf16.mxu1 %v20445_v19  ;;  %v16982_v32 = vcombine.high %v10223_v23, %v10239_v27  ;;  %v16981_v45 = vcombine.low %v10223_v23, %v10239_v27  ;;  %v10177_v23 = vld [vmem:[#allocation3 + $0x1c8] sm:$0xff] }
 0xf32   :  { %11998 = vmatpush1.bf16.msra.mxu0 %v17007_v61  ;;  %v10254_v61 = vld [vmem:[#allocation3 + $0x430] sm:$0xff] }
 0xf33   :  { %11999 = vmatprep.subr.bf16.mxu0 %v17040_v25  ;;  %12115 = vmatpush1.bf16.msra.mxu1 %v16917_v22  ;;  %v10255_v25 = vld [vmem:[#allocation3 + $0x438] sm:$0xff]  ;;  %v17012_v29 = vcombine.high %v10254_v61, %v10270_v24  ;;  %v17011_v40 = vcombine.low %v10254_v61, %v10270_v24  ;;  %v10208_v61 = vld [vmem:[#allocation3 + $0x2c0] sm:$0xff] }
 0xf34   :  { %12116 = vmatprep.subr.bf16.mxu1 %v16950_v50  ;;  %v17014_v47 = vcombine.high %v10255_v25, %v10271_v43  ;;  %v17013_v34 = vcombine.low %v10255_v25, %v10271_v43  ;;  %v10209_v25 = vld [vmem:[#allocation3 + $0x2c8] sm:$0xff] }
 0xf36   :  { %12000 = vmatpush1.bf16.msra.mxu0 %v17039_v39  ;;  %v10286_v39 = vld [vmem:[#allocation3 + $0x530] sm:$0xff] }
 0xf37   :  { %12001 = vmatprep.subr.bf16.mxu0 %v17072_v20  ;;  %12117 = vmatpush1.bf16.msra.mxu1 %v16949_v35  ;;  %v10287_v20 = vld [vmem:[#allocation3 + $0x538] sm:$0xff]  ;;  %v17044_v59 = vcombine.high %v10286_v39, %v10302_v10  ;;  %v17043_v56 = vcombine.low %v10286_v39, %v10302_v10  ;;  %v10240_v39 = vld [vmem:[#allocation3 + $0x3c0] sm:$0xff] }
 0xf38   :  { %12118 = vmatprep.subr.bf16.mxu1 %v16982_v32  ;;  %v17046_v28 = vcombine.high %v10287_v20, %v10303_v42  ;;  %v17045_v11 = vcombine.low %v10287_v20, %v10303_v42  ;;  %v10241_v20 = vld [vmem:[#allocation3 + $0x3c8] sm:$0xff] }
 0xf3a   :  { %12002 = vmatpush1.bf16.msra.mxu0 %v17071_v37  ;;  %v10318_v37 = vld [vmem:[#allocation3 + $0x630] sm:$0xff] }
 0xf3b   :  { %12003 = vmatprep.subr.bf16.mxu0 %v17104_v44  ;;  %12119 = vmatpush1.bf16.msra.mxu1 %v16981_v45  ;;  %v10319_v44 = vld [vmem:[#allocation3 + $0x638] sm:$0xff]  ;;  %v17076_v38 = vcombine.high %v10318_v37, %v10334_v49  ;;  %v17075_v36 = vcombine.low %v10318_v37, %v10334_v49  ;;  %v10272_v37 = vld [vmem:[#allocation3 + $0x4c0] sm:$0xff] }
 0xf3c   :  { %12120 = vmatprep.subr.bf16.mxu1 %v17014_v47  ;;  %v17078_v17 = vcombine.high %v10319_v44, %v10335_v52  ;;  %v17077_v8 = vcombine.low %v10319_v44, %v10335_v52  ;;  %v10273_v44 = vld [vmem:[#allocation3 + $0x4c8] sm:$0xff] }
 0xf3e   :  { %12004 = vmatpush1.bf16.msra.mxu0 %v17103_v51  ;;  %v10350_v51 = vld [vmem:[#allocation3 + $0x730] sm:$0xff] }
 0xf3f   :  { %12071 = vmatprep.subr.bf16.mxu0 %v16884_v41  ;;  %12121 = vmatpush1.bf16.msra.mxu1 %v17013_v34  ;;  %v10351_v41 = vld [vmem:[#allocation3 + $0x738] sm:$0xff]  ;;  %v17108_v62 = vcombine.high %v10350_v51, %v10366_v57  ;;  %v17107_v21 = vcombine.low %v10350_v51, %v10366_v57  ;;  %v10304_v51 = vld [vmem:[#allocation3 + $0x5c0] sm:$0xff] }
 0xf40   :  { %12122 = vmatprep.subr.bf16.mxu1 %v17046_v28  ;;  %v17110_v6 = vcombine.high %v10351_v41, %v10367_v18  ;;  %v17109_v46 = vcombine.low %v10351_v41, %v10367_v18  ;;  %v10305_v41 = vld [vmem:[#allocation3 + $0x5c8] sm:$0xff] }
 0xf41   :  { %12022 = vmatmul.mubr.bf16.vlgmr.msra.gmra.mrb[8].mxu0 %v21980_v30 }
 0xf42   :  { %12072 = vmatpush1.bf16.msra.mxu0 %v16883_v63  ;;  %12103 = vmatprep.mubr.bf16.mxu0 %v20445_v19  ;;  %v10128_v63 = vld [vmem:[#allocation3 + $0x40] sm:$0xff] }
 0xf43   :  { %12073 = vmatprep.subr.bf16.mxu0 %v16916_v9  ;;  %12123 = vmatpush1.bf16.msra.mxu1 %v17045_v11  ;;  %v10129_v9 = vld [vmem:[#allocation3 + $0x48] sm:$0xff]  ;;  %v16888_v22 = vcombine.high %v10128_v63, %v10144_v7  ;;  %v16887_v50 = vcombine.low %v10128_v63, %v10144_v7  ;;  %v10336_v63 = vld [vmem:[#allocation3 + $0x6c0] sm:$0xff] }
 0xf44   :  { %12124 = vmatprep.subr.bf16.mxu1 %v17078_v17  ;;  %v16890_v27 = vcombine.high %v10129_v9, %v10145_v48  ;;  %v16889_v24 = vcombine.low %v10129_v9, %v10145_v48  ;;  %v10337_v9 = vld [vmem:[#allocation3 + $0x6c8] sm:$0xff] }
 0xf46   :  { %12074 = vmatpush1.bf16.msra.mxu0 %v16915_v0  ;;  %v10160_v0 = vld [vmem:[#allocation3 + $0x140] sm:$0xff] }
 0xf47   :  { %12075 = vmatprep.subr.bf16.mxu0 %v16948_v60  ;;  %12125 = vmatpush1.bf16.msra.mxu1 %v17077_v8  ;;  %v10161_v60 = vld [vmem:[#allocation3 + $0x148] sm:$0xff]  ;;  %v16920_v35 = vcombine.high %v10160_v0, %v10176_v33  ;;  %v16919_v32 = vcombine.low %v10160_v0, %v10176_v33  ;;  %v10368_v0 = vld [vmem:[#allocation3 + $0x7c0] sm:$0xff] }
 0xf48   :  { %12126 = vmatprep.subr.bf16.mxu1 %v17110_v6  ;;  %v16922_v43 = vcombine.high %v10161_v60, %v10177_v23  ;;  %v16921_v10 = vcombine.low %v10161_v60, %v10177_v23  ;;  %v10369_v60 = vld [vmem:[#allocation3 + $0x7c8] sm:$0xff] }
 0xf4a   :  { %12076 = vmatpush1.bf16.msra.mxu0 %v16947_v26  ;;  %v10192_v26 = vld [vmem:[#allocation3 + $0x240] sm:$0xff] }
 0xf4b   :  { %12077 = vmatprep.subr.bf16.mxu0 %v16980_v31  ;;  %12127 = vmatpush1.bf16.msra.mxu1 %v17109_v46  ;;  %v10193_v31 = vld [vmem:[#allocation3 + $0x248] sm:$0xff]  ;;  %v16952_v45 = vcombine.high %v10192_v26, %v10208_v61  ;;  %v16951_v47 = vcombine.low %v10192_v26, %v10208_v61  ;;  %v10146_v26 = vld [vmem:[#allocation3 + $0xd0] sm:$0xff] }
 0xf4c   :  { %12194 = vmatprep.subr.bf16.mxu1 %v16890_v27  ;;  %v16954_v42 = vcombine.high %v10193_v31, %v10209_v25  ;;  %v16953_v49 = vcombine.low %v10193_v31, %v10209_v25  ;;  %v10147_v31 = vld [vmem:[#allocation3 + $0xd8] sm:$0xff] }
 0xf4e   :  { %12078 = vmatpush1.bf16.msra.mxu0 %v16979_v16  ;;  %12145 = vmatmul.mubr.bf16.vlgmr.msra.gmra.mrb[12].mxu1 %v21980_v30  ;;  %v10224_v16 = vld [vmem:[#allocation3 + $0x340] sm:$0xff] }
 0xf4f   :  { %12079 = vmatprep.subr.bf16.mxu0 %v17012_v29  ;;  %12195 = vmatpush1.bf16.msra.mxu1 %v16889_v24  ;;  %v10225_v29 = vld [vmem:[#allocation3 + $0x348] sm:$0xff]  ;;  %v16984_v34 = vcombine.high %v10224_v16, %v10240_v39  ;;  %v16983_v28 = vcombine.low %v10224_v16, %v10240_v39  ;;  %v10178_v16 = vld [vmem:[#allocation3 + $0x1d0] sm:$0xff] }
 0xf50   :  { %12196 = vmatprep.subr.bf16.mxu1 %v16922_v43  ;;  %12226 = vmatprep.mubr.bf16.mxu1 %v20445_v19  ;;  %v16986_v52 = vcombine.high %v10225_v29, %v10241_v20  ;;  %v16985_v57 = vcombine.low %v10225_v29, %v10241_v20  ;;  %v10179_v29 = vld [vmem:[#allocation3 + $0x1d8] sm:$0xff] }
 0xf52   :  { %12080 = vmatpush1.bf16.msra.mxu0 %v17011_v40  ;;  %v10256_v40 = vld [vmem:[#allocation3 + $0x440] sm:$0xff] }
 0xf53   :  { %12081 = vmatprep.subr.bf16.mxu0 %v17044_v59  ;;  %12197 = vmatpush1.bf16.msra.mxu1 %v16921_v10  ;;  %v10257_v59 = vld [vmem:[#allocation3 + $0x448] sm:$0xff]  ;;  %v17016_v11 = vcombine.high %v10256_v40, %v10272_v37  ;;  %v17015_v17 = vcombine.low %v10256_v40, %v10272_v37  ;;  %v10194_v37 = vld [vmem:[#allocation3 + $0x250] sm:$0xff] }
 0xf54   :  { %12198 = vmatprep.subr.bf16.mxu1 %v16954_v42  ;;  %v17018_v18 = vcombine.high %v10257_v59, %v10273_v44  ;;  %v17017_v7 = vcombine.low %v10257_v59, %v10273_v44  ;;  %v10195_v59 = vld [vmem:[#allocation3 + $0x258] sm:$0xff] }
 0xf55   :  { %v10211_v44 = vld [vmem:[#allocation3 + $0x2d8] sm:$0xff] }
 0xf56   :  { %12082 = vmatpush1.bf16.msra.mxu0 %v17043_v56  ;;  %v10288_v56 = vld [vmem:[#allocation3 + $0x540] sm:$0xff] }
 0xf57   :  { %12083 = vmatprep.subr.bf16.mxu0 %v17076_v38  ;;  %12199 = vmatpush1.bf16.msra.mxu1 %v16953_v49  ;;  %v10289_v38 = vld [vmem:[#allocation3 + $0x548] sm:$0xff]  ;;  %v17048_v8 = vcombine.high %v10288_v56, %v10304_v51  ;;  %v17047_v6 = vcombine.low %v10288_v56, %v10304_v51  ;;  %v10242_v56 = vld [vmem:[#allocation3 + $0x3d0] sm:$0xff] }
 0xf58   :  { %12200 = vmatprep.subr.bf16.mxu1 %v16986_v52  ;;  %v17050_v48 = vcombine.high %v10289_v38, %v10305_v41  ;;  %v17049_v33 = vcombine.low %v10289_v38, %v10305_v41  ;;  %v10243_v38 = vld [vmem:[#allocation3 + $0x3d8] sm:$0xff]  ;;  %v16958_v41 = vcombine.high %v10195_v59, %v10211_v44 }
 0xf5a   :  { %12084 = vmatpush1.bf16.msra.mxu0 %v17075_v36  ;;  %v10320_v36 = vld [vmem:[#allocation3 + $0x640] sm:$0xff] }
 0xf5b   :  { %12085 = vmatprep.subr.bf16.mxu0 %v17108_v62  ;;  %12201 = vmatpush1.bf16.msra.mxu1 %v16985_v57  ;;  %v10321_v62 = vld [vmem:[#allocation3 + $0x648] sm:$0xff]  ;;  %v17080_v46 = vcombine.high %v10320_v36, %v10336_v63  ;;  %v17079_v27 = vcombine.low %v10320_v36, %v10336_v63  ;;  %v10274_v36 = vld [vmem:[#allocation3 + $0x4d0] sm:$0xff]  ;;  %v16957_v63 = vcombine.low %v10195_v59, %v10211_v44 }
 0xf5c   :  { %12202 = vmatprep.subr.bf16.mxu1 %v17018_v18  ;;  %v17082_v23 = vcombine.high %v10321_v62, %v10337_v9  ;;  %v17081_v61 = vcombine.low %v10321_v62, %v10337_v9  ;;  %v10275_v62 = vld [vmem:[#allocation3 + $0x4d8] sm:$0xff] }
 0xf5e   :  { %12086 = vmatpush1.bf16.msra.mxu0 %v17107_v21  ;;  %v10352_v21 = vld [vmem:[#allocation3 + $0x740] sm:$0xff] }
 0xf5f   :  { %12153 = vmatprep.subr.bf16.mxu0 %v16888_v22  ;;  %12203 = vmatpush1.bf16.msra.mxu1 %v17017_v7  ;;  %v10353_v22 = vld [vmem:[#allocation3 + $0x748] sm:$0xff]  ;;  %v17112_v24 = vcombine.high %v10352_v21, %v10368_v0  ;;  %v17111_v43 = vcombine.low %v10352_v21, %v10368_v0  ;;  %v10306_v21 = vld [vmem:[#allocation3 + $0x5d0] sm:$0xff] }
 0xf60   :  { %12204 = vmatprep.subr.bf16.mxu1 %v17050_v48  ;;  %v17114_v25 = vcombine.high %v10353_v22, %v10369_v60  ;;  %v17113_v39 = vcombine.low %v10353_v22, %v10369_v60  ;;  %v10307_v22 = vld [vmem:[#allocation3 + $0x5d8] sm:$0xff] }
 0xf61   :  { %12104 = vmatmul.mubr.bf16.vlgmr.msra.gmra.mrb[12].mxu0 %v21980_v30 }
 0xf62   :  { %12154 = vmatpush1.bf16.msra.mxu0 %v16887_v50  ;;  %12185 = vmatprep.mubr.bf16.mxu0 %v20445_v19  ;;  %v10130_v50 = vld [vmem:[#allocation3 + $0x50] sm:$0xff] }
 0xf63   :  { %12155 = vmatprep.subr.bf16.mxu0 %v16920_v35  ;;  %12205 = vmatpush1.bf16.msra.mxu1 %v17049_v33  ;;  %v10131_v35 = vld [vmem:[#allocation3 + $0x58] sm:$0xff]  ;;  %v16892_v10 = vcombine.high %v10130_v50, %v10146_v26  ;;  %v16891_v42 = vcombine.low %v10130_v50, %v10146_v26  ;;  %v10338_v50 = vld [vmem:[#allocation3 + $0x6d0] sm:$0xff] }
 0xf64   :  { %12206 = vmatprep.subr.bf16.mxu1 %v17082_v23  ;;  %v16894_v20 = vcombine.high %v10131_v35, %v10147_v31 }
 0xf66   :  { %12156 = vmatpush1.bf16.msra.mxu0 %v16919_v32  ;;  %v10162_v32 = vld [vmem:[#allocation3 + $0x150] sm:$0xff] }
 0xf67   :  { %12157 = vmatprep.subr.bf16.mxu0 %v16952_v45  ;;  %12207 = vmatpush1.bf16.msra.mxu1 %v17081_v61  ;;  %v10163_v45 = vld [vmem:[#allocation3 + $0x158] sm:$0xff]  ;;  %v16924_v40 = vcombine.high %v10162_v32, %v10178_v16  ;;  %v16923_v52 = vcombine.low %v10162_v32, %v10178_v16  ;;  %v10370_v32 = vld [vmem:[#allocation3 + $0x7d0] sm:$0xff] }
 0xf68   :  { %12208 = vmatprep.subr.bf16.mxu1 %v17114_v25  ;;  %v16926_v49 = vcombine.high %v10163_v45, %v10179_v29  ;;  %v16925_v51 = vcombine.low %v10163_v45, %v10179_v29  ;;  %v10355_v45 = vld [vmem:[#allocation3 + $0x758] sm:$0xff] }
 0xf69   :  { %v10371_v29 = vld [vmem:[#allocation3 + $0x7d8] sm:$0xff] }
 0xf6a   :  { %12158 = vmatpush1.bf16.msra.mxu0 %v16951_v47  ;;  %v16893_v47 = vcombine.low %v10131_v35, %v10147_v31  ;;  %v10339_v35 = vld [vmem:[#allocation3 + $0x6d8] sm:$0xff]  ;;  %v17118_v59 = vcombine.high %v10355_v45, %v10371_v29 }
 0xf6b   :  { %12159 = vmatprep.subr.bf16.mxu0 %v16984_v34  ;;  %12209 = vmatpush1.bf16.msra.mxu1 %v17113_v39  ;;  %v10210_v34 = vld [vmem:[#allocation3 + $0x2d0] sm:$0xff] }
 0xf6c   :  { %12276 = vmatprep.subr.bf16.mxu1 %v16894_v20  ;;  %v16956_v57 = vcombine.high %v10194_v37, %v10210_v34  ;;  %v16955_v18 = vcombine.low %v10194_v37, %v10210_v34  ;;  %v10149_v34 = vld [vmem:[#allocation3 + $0xe8] sm:$0xff] }
 0xf6e   :  { %12160 = vmatpush1.bf16.msra.mxu0 %v16983_v28  ;;  %12227 = vmatmul.mubr.bf16.vlgmr.msra.gmra.mrb[16].mxu1 %v21980_v30  ;;  %v10226_v28 = vld [vmem:[#allocation3 + $0x350] sm:$0xff] }
 0xf6f   :  { %12161 = vmatprep.subr.bf16.mxu0 %v17016_v11  ;;  %12277 = vmatpush1.bf16.msra.mxu1 %v16893_v47  ;;  %v10227_v11 = vld [vmem:[#allocation3 + $0x358] sm:$0xff]  ;;  %v16988_v7 = vcombine.high %v10226_v28, %v10242_v56  ;;  %v16987_v48 = vcombine.low %v10226_v28, %v10242_v56  ;;  %v10148_v47 = vld [vmem:[#allocation3 + $0xe0] sm:$0xff] }
 0xf70   :  { %12278 = vmatprep.subr.bf16.mxu1 %v16926_v49  ;;  %12308 = vmatprep.mubr.bf16.mxu1 %v20445_v19  ;;  %v16990_v9 = vcombine.high %v10227_v11, %v10243_v38  ;;  %v16989_v0 = vcombine.low %v10227_v11, %v10243_v38  ;;  %v10133_v49 = vld [vmem:[#allocation3 + $0x68] sm:$0xff] }
 0xf71   :  { %v16898_v56 = vcombine.high %v10133_v49, %v10149_v34  ;;  %v10165_v11 = vld [vmem:[#allocation3 + $0x168] sm:$0xff] }
 0xf72   :  { %12162 = vmatpush1.bf16.msra.mxu0 %v17015_v17  ;;  %v10258_v17 = vld [vmem:[#allocation3 + $0x450] sm:$0xff]  ;;  %v10181_v38 = vld [vmem:[#allocation3 + $0x1e8] sm:$0xff] }
 0xf73   :  { %12163 = vmatprep.subr.bf16.mxu0 %v17048_v8  ;;  %12279 = vmatpush1.bf16.msra.mxu1 %v16925_v51  ;;  %v10259_v8 = vld [vmem:[#allocation3 + $0x458] sm:$0xff]  ;;  %v17020_v33 = vcombine.high %v10258_v17, %v10274_v36  ;;  %v17019_v23 = vcombine.low %v10258_v17, %v10274_v36  ;;  %v10164_v51 = vld [vmem:[#allocation3 + $0x160] sm:$0xff]  ;;  %v16930_v36 = vcombine.high %v10165_v11, %v10181_v38 }
 0xf74   :  { %12280 = vmatprep.subr.bf16.mxu1 %v16958_v41  ;;  %v17022_v60 = vcombine.high %v10259_v8, %v10275_v62  ;;  %v17021_v26 = vcombine.low %v10259_v8, %v10275_v62  ;;  %v10197_v8 = vld [vmem:[#allocation3 + $0x268] sm:$0xff] }
 0xf75   :  { %v10213_v62 = vld [vmem:[#allocation3 + $0x2e8] sm:$0xff] }
 0xf76   :  { %12164 = vmatpush1.bf16.msra.mxu0 %v17047_v6  ;;  %v10290_v6 = vld [vmem:[#allocation3 + $0x550] sm:$0xff] }
 0xf77   :  { %12165 = vmatprep.subr.bf16.mxu0 %v17080_v46  ;;  %12281 = vmatpush1.bf16.msra.mxu1 %v16957_v63  ;;  %v10291_v46 = vld [vmem:[#allocation3 + $0x558] sm:$0xff]  ;;  %v17052_v61 = vcombine.high %v10290_v6, %v10306_v21  ;;  %v17051_v25 = vcombine.low %v10290_v6, %v10306_v21  ;;  %v10196_v63 = vld [vmem:[#allocation3 + $0x260] sm:$0xff]  ;;  %v16962_v21 = vcombine.high %v10197_v8, %v10213_v62 }
 0xf78   :  { %12282 = vmatprep.subr.bf16.mxu1 %v16990_v9  ;;  %v17054_v31 = vcombine.high %v10291_v46, %v10307_v22  ;;  %v17053_v16 = vcombine.low %v10291_v46, %v10307_v22  ;;  %v10229_v46 = vld [vmem:[#allocation3 + $0x368] sm:$0xff] }
 0xf79   :  { %v10245_v22 = vld [vmem:[#allocation3 + $0x3e8] sm:$0xff] }
 0xf7a   :  { %12166 = vmatpush1.bf16.msra.mxu0 %v17079_v27  ;;  %v10322_v27 = vld [vmem:[#allocation3 + $0x650] sm:$0xff] }
 0xf7b   :  { %12167 = vmatprep.subr.bf16.mxu0 %v17112_v24  ;;  %12283 = vmatpush1.bf16.msra.mxu1 %v16989_v0  ;;  %v10323_v24 = vld [vmem:[#allocation3 + $0x658] sm:$0xff]  ;;  %v17084_v39 = vcombine.high %v10322_v27, %v10338_v50  ;;  %v17083_v20 = vcombine.low %v10322_v27, %v10338_v50  ;;  %v10228_v0 = vld [vmem:[#allocation3 + $0x360] sm:$0xff]  ;;  %v16994_v50 = vcombine.high %v10229_v46, %v10245_v22 }
 0xf7c   :  { %12284 = vmatprep.subr.bf16.mxu1 %v17022_v60 }
 0xf7e   :  { %12168 = vmatpush1.bf16.msra.mxu0 %v17111_v43  ;;  %v10354_v43 = vld [vmem:[#allocation3 + $0x750] sm:$0xff] }
 0xf7f   :  { %12235 = vmatprep.subr.bf16.mxu0 %v16892_v10  ;;  %12285 = vmatpush1.bf16.msra.mxu1 %v17021_v26  ;;  %v17086_v10 = vcombine.high %v10323_v24, %v10339_v35  ;;  %v17116_v37 = vcombine.high %v10354_v43, %v10370_v32  ;;  %v17115_v44 = vcombine.low %v10354_v43, %v10370_v32  ;;  %v10260_v26 = vld [vmem:[#allocation3 + $0x460] sm:$0xff] }
 0xf80   :  { %12286 = vmatprep.subr.bf16.mxu1 %v17054_v31  ;;  %v10308_v43 = vld [vmem:[#allocation3 + $0x5e0] sm:$0xff]  ;;  %v16993_v32 = vcombine.low %v10229_v46, %v10245_v22 }
 0xf81   :  { %12186 = vmatmul.mubr.bf16.vlgmr.msra.gmra.mrb[16].mxu0 %v21980_v30 }
 0xf82   :  { %12236 = vmatpush1.bf16.msra.mxu0 %v16891_v42  ;;  %12267 = vmatprep.mubr.bf16.mxu0 %v20445_v19  ;;  %v10132_v42 = vld [vmem:[#allocation3 + $0x60] sm:$0xff] }
 0xf83   :  { %12237 = vmatprep.subr.bf16.mxu0 %v16924_v40  ;;  %12287 = vmatpush1.bf16.msra.mxu1 %v17053_v16  ;;  %v17085_v40 = vcombine.low %v10323_v24, %v10339_v35  ;;  %v16896_v28 = vcombine.high %v10132_v42, %v10148_v47  ;;  %v16895_v41 = vcombine.low %v10132_v42, %v10148_v47  ;;  %v10261_v24 = vld [vmem:[#allocation3 + $0x468] sm:$0xff]  ;;  %v10340_v42 = vld [vmem:[#allocation3 + $0x6e0] sm:$0xff] }
 0xf84   :  { %12288 = vmatprep.subr.bf16.mxu1 %v17086_v10  ;;  %v10277_v35 = vld [vmem:[#allocation3 + $0x4e8] sm:$0xff] }
 0xf85   :  { %v10309_v10 = vld [vmem:[#allocation3 + $0x5e8] sm:$0xff]  ;;  %v17025_v47 = vcombine.low %v10261_v24, %v10277_v35 }
 0xf86   :  { %12238 = vmatpush1.bf16.msra.mxu0 %v16923_v52  ;;  %v17117_v52 = vcombine.low %v10355_v45, %v10371_v29  ;;  %v17026_v45 = vcombine.high %v10261_v24, %v10277_v35 }
 0xf87   :  { %12239 = vmatprep.subr.bf16.mxu0 %v16956_v57  ;;  %12289 = vmatpush1.bf16.msra.mxu1 %v17085_v40  ;;  %v10180_v57 = vld [vmem:[#allocation3 + $0x1e0] sm:$0xff] }
 0xf88   :  { %12290 = vmatprep.subr.bf16.mxu1 %v17118_v59  ;;  %v16928_v17 = vcombine.high %v10164_v51, %v10180_v57  ;;  %v16927_v9 = vcombine.low %v10164_v51, %v10180_v57  ;;  %v10357_v51 = vld [vmem:[#allocation3 + $0x768] sm:$0xff] }
 0xf89   :  { %v10373_v57 = vld [vmem:[#allocation3 + $0x7e8] sm:$0xff] }
 0xf8a   :  { %12240 = vmatpush1.bf16.msra.mxu0 %v16955_v18  ;;  %v16897_v18 = vcombine.low %v10133_v49, %v10149_v34  ;;  %v10341_v49 = vld [vmem:[#allocation3 + $0x6e8] sm:$0xff] }
 0xf8b   :  { %12241 = vmatprep.subr.bf16.mxu0 %v16988_v7  ;;  %12291 = vmatpush1.bf16.msra.mxu1 %v17117_v52  ;;  %v10212_v7 = vld [vmem:[#allocation3 + $0x2e0] sm:$0xff] }
 0xf8c   :  { %12358 = vmatprep.subr.bf16.mxu1 %v16898_v56  ;;  %v16960_v6 = vcombine.high %v10196_v63, %v10212_v7  ;;  %v16959_v60 = vcombine.low %v10196_v63, %v10212_v7  ;;  %v10372_v52 = vld [vmem:[#allocation3 + $0x7e0] sm:$0xff]  ;;  %v10135_v63 = vld [vmem:[#allocation3 + $0x78] sm:$0xff] }
 0xf8d   :  { %v10151_v7 = vld [vmem:[#allocation3 + $0xf8] sm:$0xff] }
 0xf8e   :  { %12242 = vmatpush1.bf16.msra.mxu0 %v16987_v48  ;;  %12309 = vmatmul.mubr.bf16.vlgmr.msra.gmra.mrb[20].mxu1 %v21980_v30  ;;  %v16929_v48 = vcombine.low %v10165_v11, %v10181_v38  ;;  %v16902_v46 = vcombine.high %v10135_v63, %v10151_v7 }
 0xf8f   :  { %12243 = vmatprep.subr.bf16.mxu0 %v17020_v33  ;;  %12359 = vmatpush1.bf16.msra.mxu1 %v16897_v18  ;;  %v10244_v33 = vld [vmem:[#allocation3 + $0x3e0] sm:$0xff]  ;;  %v10150_v18 = vld [vmem:[#allocation3 + $0xf0] sm:$0xff] }
 0xf90   :  { %12360 = vmatprep.subr.bf16.mxu1 %v16930_v36  ;;  %12390 = vmatprep.mubr.bf16.mxu1 %v20445_v19  ;;  %v16992_v27 = vcombine.high %v10228_v0, %v10244_v33  ;;  %v16991_v31 = vcombine.low %v10228_v0, %v10244_v33  ;;  %v10167_v0 = vld [vmem:[#allocation3 + $0x178] sm:$0xff] }
 0xf91   :  { %v10183_v33 = vld [vmem:[#allocation3 + $0x1f8] sm:$0xff] }
 0xf92   :  { %12244 = vmatpush1.bf16.msra.mxu0 %v17019_v23  ;;  %v16961_v23 = vcombine.low %v10197_v8, %v10213_v62  ;;  %v17122_v8 = vcombine.high %v10357_v51, %v10373_v57  ;;  %v16934_v24 = vcombine.high %v10167_v0, %v10183_v33 }
 0xf93   :  { %12245 = vmatprep.subr.bf16.mxu0 %v17052_v61  ;;  %12361 = vmatpush1.bf16.msra.mxu1 %v16929_v48  ;;  %v10276_v61 = vld [vmem:[#allocation3 + $0x4e0] sm:$0xff]  ;;  %v10182_v48 = vld [vmem:[#allocation3 + $0x1f0] sm:$0xff] }
 0xf94   :  { %12362 = vmatprep.subr.bf16.mxu1 %v16962_v21  ;;  %v17024_v16 = vcombine.high %v10260_v26, %v10276_v61  ;;  %v17023_v29 = vcombine.low %v10260_v26, %v10276_v61  ;;  %v10199_v26 = vld [vmem:[#allocation3 + $0x278] sm:$0xff] }
 0xf95   :  { %v10215_v61 = vld [vmem:[#allocation3 + $0x2f8] sm:$0xff] }
 0xf96   :  { %12246 = vmatpush1.bf16.msra.mxu0 %v17051_v25  ;;  %v10292_v25 = vld [vmem:[#allocation3 + $0x560] sm:$0xff] }
 0xf97   :  { %12247 = vmatprep.subr.bf16.mxu0 %v17084_v39  ;;  %12363 = vmatpush1.bf16.msra.mxu1 %v16961_v23  ;;  %v10293_v39 = vld [vmem:[#allocation3 + $0x568] sm:$0xff]  ;;  %v17056_v40 = vcombine.high %v10292_v25, %v10308_v43  ;;  %v17055_v59 = vcombine.low %v10292_v25, %v10308_v43  ;;  %v10214_v23 = vld [vmem:[#allocation3 + $0x2f0] sm:$0xff]  ;;  %v16933_v43 = vcombine.low %v10167_v0, %v10183_v33 }
 0xf98   :  { %12364 = vmatprep.subr.bf16.mxu1 %v16994_v50  ;;  %v17058_v34 = vcombine.high %v10293_v39, %v10309_v10  ;;  %v10246_v25 = vld [vmem:[#allocation3 + $0x3f0] sm:$0xff] }
 0xf9a   :  { %12248 = vmatpush1.bf16.msra.mxu0 %v17083_v20  ;;  %v10324_v20 = vld [vmem:[#allocation3 + $0x660] sm:$0xff] }
 0xf9b   :  { %12249 = vmatprep.subr.bf16.mxu0 %v17116_v37  ;;  %12365 = vmatpush1.bf16.msra.mxu1 %v16993_v32  ;;  %v10325_v37 = vld [vmem:[#allocation3 + $0x668] sm:$0xff]  ;;  %v17088_v56 = vcombine.high %v10324_v20, %v10340_v42  ;;  %v17087_v38 = vcombine.low %v10324_v20, %v10340_v42  ;;  %v10278_v20 = vld [vmem:[#allocation3 + $0x4f0] sm:$0xff]  ;;  %v16965_v42 = vcombine.low %v10199_v26, %v10215_v61 }
 0xf9c   :  { %12366 = vmatprep.subr.bf16.mxu1 %v17026_v45  ;;  %v17090_v11 = vcombine.high %v10325_v37, %v10341_v49 }
 0xf9e   :  { %12250 = vmatpush1.bf16.msra.mxu0 %v17115_v44  ;;  %v10356_v44 = vld [vmem:[#allocation3 + $0x760] sm:$0xff] }
 0xf9f   :  { %12317 = vmatprep.subr.bf16.mxu0 %v16896_v28  ;;  %12367 = vmatpush1.bf16.msra.mxu1 %v17025_v47  ;;  %v17057_v28 = vcombine.low %v10293_v39, %v10309_v10  ;;  %v17120_v36 = vcombine.high %v10356_v44, %v10372_v52  ;;  %v17119_v62 = vcombine.low %v10356_v44, %v10372_v52  ;;  %v10247_v39 = vld [vmem:[#allocation3 + $0x3f8] sm:$0xff]  ;;  %v10310_v44 = vld [vmem:[#allocation3 + $0x5f0] sm:$0xff] }
 0xfa0   :  { %12368 = vmatprep.subr.bf16.mxu1 %v17058_v34  ;;  %v16966_v10 = vcombine.high %v10199_v26, %v10215_v61 }
 0xfa1   :  { %12268 = vmatmul.mubr.bf16.vlgmr.msra.gmra.mrb[20].mxu0 %v21980_v30 }
 0xfa2   :  { %12318 = vmatpush1.bf16.msra.mxu0 %v16895_v41  ;;  %12349 = vmatprep.mubr.bf16.mxu0 %v20445_v19  ;;  %v10134_v41 = vld [vmem:[#allocation3 + $0x70] sm:$0xff] }
 0xfa3   :  { %12319 = vmatprep.subr.bf16.mxu0 %v16928_v17  ;;  %12369 = vmatpush1.bf16.msra.mxu1 %v17057_v28  ;;  %v17089_v17 = vcombine.low %v10325_v37, %v10341_v49  ;;  %v16900_v21 = vcombine.high %v10134_v41, %v10150_v18  ;;  %v16899_v22 = vcombine.low %v10134_v41, %v10150_v18  ;;  %v10279_v37 = vld [vmem:[#allocation3 + $0x4f8] sm:$0xff]  ;;  %v10342_v41 = vld [vmem:[#allocation3 + $0x6f0] sm:$0xff] }
 0xfa4   :  { %12370 = vmatprep.subr.bf16.mxu1 %v17090_v11  ;;  %v10295_v28 = vld [vmem:[#allocation3 + $0x578] sm:$0xff] }
 0xfa6   :  { %12320 = vmatpush1.bf16.msra.mxu0 %v16927_v9  ;;  %v10166_v9 = vld [vmem:[#allocation3 + $0x170] sm:$0xff] }
 0xfa7   :  { %12321 = vmatprep.subr.bf16.mxu0 %v16960_v6  ;;  %12371 = vmatpush1.bf16.msra.mxu1 %v17089_v17  ;;  %v17121_v6 = vcombine.low %v10357_v51, %v10373_v57  ;;  %v16932_v50 = vcombine.high %v10166_v9, %v10182_v48  ;;  %v16931_v35 = vcombine.low %v10166_v9, %v10182_v48  ;;  %v22010_v51 = vld [vmem:[#allocation5] sm:$0xff] }
 0xfa8   :  { %12372 = vmatprep.subr.bf16.mxu1 %v17122_v8  ;;  %v10388_v8 = vrot.slane %v22010_v51, %v20860_v53  ;;  %v10396_v9 = vrot.slane %v22010_v51, %v20866_v55  ;;  %v10400_v0 = vrot.slane %v22010_v51, %v20869_v58 }
 0xfaa   :  { %12322 = vmatpush1.bf16.msra.mxu0 %v16959_v60  ;;  %v10198_v60 = vld [vmem:[#allocation3 + $0x270] sm:$0xff] }
 0xfab   :  { %12323 = vmatprep.subr.bf16.mxu0 %v16992_v27  ;;  %12373 = vmatpush1.bf16.msra.mxu1 %v17121_v6  ;;  %v16901_v27 = vcombine.low %v10135_v63, %v10151_v7  ;;  %v16964_v32 = vcombine.high %v10198_v60, %v10214_v23  ;;  %v16963_v45 = vcombine.low %v10198_v60, %v10214_v23  ;;  %v10343_v63 = vld [vmem:[#allocation3 + $0x6f8] sm:$0xff]  ;;  %v10358_v6 = vld [vmem:[#allocation3 + $0x770] sm:$0xff] }
 0xfac   :  { %12440 = vmatprep.subr.bf16.mxu1 %v16902_v46 }
 0xfae   :  { %12324 = vmatpush1.bf16.msra.mxu0 %v16991_v31  ;;  %12391 = vmatmul.mubr.bf16.vlgmr.msra.gmra.mrb[24].mxu1 %v21980_v30  ;;  %v10230_v31 = vld [vmem:[#allocation3 + $0x370] sm:$0xff] }
 0xfaf   :  { %12325 = vmatprep.subr.bf16.mxu0 %v17024_v16  ;;  %12441 = vmatpush1.bf16.msra.mxu1 %v16901_v27  ;;  %v10231_v16 = vld [vmem:[#allocation3 + $0x378] sm:$0xff]  ;;  %v16996_v47 = vcombine.high %v10230_v31, %v10246_v25  ;;  %v16995_v34 = vcombine.low %v10230_v31, %v10246_v25 }
 0xfb0   :  { %12442 = vmatprep.subr.bf16.mxu1 %v16934_v24  ;;  %12472 = vmatprep.mubr.bf16.mxu1 %v20445_v19  ;;  %v16998_v49 = vcombine.high %v10231_v16, %v10247_v39  ;;  %v16997_v52 = vcombine.low %v10231_v16, %v10247_v39  ;;  %v10375_v27 = vld [vmem:[#allocation3 + $0x7f8] sm:$0xff] }
 0xfb2   :  { %12326 = vmatpush1.bf16.msra.mxu0 %v17023_v29  ;;  %v10262_v29 = vld [vmem:[#allocation3 + $0x470] sm:$0xff] }
 0xfb3   :  { %12327 = vmatprep.subr.bf16.mxu0 %v17056_v40  ;;  %12443 = vmatpush1.bf16.msra.mxu1 %v16933_v43  ;;  %v10263_v40 = vld [vmem:[#allocation3 + $0x478] sm:$0xff]  ;;  %v17027_v11 = vcombine.low %v10262_v29, %v10278_v20 }
 0xfb4   :  { %12444 = vmatprep.subr.bf16.mxu1 %v16966_v10  ;;  %v17030_v57 = vcombine.high %v10263_v40, %v10279_v37  ;;  %v17029_v18 = vcombine.low %v10263_v40, %v10279_v37 }
 0xfb6   :  { %12328 = vmatpush1.bf16.msra.mxu0 %v17055_v59  ;;  %v10294_v59 = vld [vmem:[#allocation3 + $0x570] sm:$0xff] }
 0xfb7   :  { %12329 = vmatprep.subr.bf16.mxu0 %v17088_v56  ;;  %12445 = vmatpush1.bf16.msra.mxu1 %v16965_v42  ;;  %v10311_v56 = vld [vmem:[#allocation3 + $0x5f8] sm:$0xff]  ;;  %v17060_v17 = vcombine.high %v10294_v59, %v10310_v44  ;;  %v17059_v48 = vcombine.low %v10294_v59, %v10310_v44  ;;  %v10412_v59 = vrot.slane %v22010_v51, %v20906_v14 }
 0xfb8   :  { %12446 = vmatprep.subr.bf16.mxu1 %v16998_v49  ;;  %v17062_v7 = vcombine.high %v10295_v28, %v10311_v56  ;;  %v17061_v33 = vcombine.low %v10295_v28, %v10311_v56  ;;  %v10404_v49 = vrot.slane %v22010_v51, %v20900_v12  ;;  %v10416_v44 = vrot.slane %v22010_v51, %v20909_v15 }
 0xfba   :  { %12330 = vmatpush1.bf16.msra.mxu0 %v17087_v38  ;;  %v10326_v38 = vld [vmem:[#allocation3 + $0x670] sm:$0xff] }
 0xfbb   :  { %12331 = vmatprep.subr.bf16.mxu0 %v17120_v36  ;;  %12447 = vmatpush1.bf16.msra.mxu1 %v16997_v52  ;;  %v10327_v36 = vld [vmem:[#allocation3 + $0x678] sm:$0xff]  ;;  %v17092_v46 = vcombine.high %v10326_v38, %v10342_v41  ;;  %v17091_v43 = vcombine.low %v10326_v38, %v10342_v41 }
 0xfbc   :  { %12448 = vmatprep.subr.bf16.mxu1 %v17030_v57  ;;  %v17094_v23 = vcombine.high %v10327_v36, %v10343_v63  ;;  %v17093_v10 = vcombine.low %v10327_v36, %v10343_v63 }
 0xfbe   :  { %12332 = vmatpush1.bf16.msra.mxu0 %v17119_v62  ;;  %v10392_v62 = vrot.slane %v22010_v51, %v22492_v54 }
 0xfbf   :  { %12399 = vmatprep.subr.bf16.mxu0 %v16900_v21  ;;  %v10374_v21 = vld [vmem:[#allocation3 + $0x7f0] sm:$0xff]  ;;  %12449 = vmatpush1.bf16.msra.mxu1 %v17029_v18 }
 0xfc0   :  { %12450 = vmatprep.subr.bf16.mxu1 %v17062_v7  ;;  %v11900_v61 = vpop.f32.mrb[0].mxu1  ;;  %v17123_v40 = vcombine.low %v10358_v6, %v10374_v21  ;;  %v22054_v7 = vld [vmem:[#allocation5 + $0x8] sm:$0xff] }
 0xfc1   :  { %12350 = vmatmul.mubr.bf16.vlgmr.msra.gmra.mrb[24].mxu0 %v21980_v30  ;;  %v22024_v31 = vadd.f32 %v11900_v61, %v10396_v9  ;;  %v11902_v25 = vpop.f32.mrb[1].mxu1  ;;  %v10424_v9 = vrot.slane %v22054_v7, %v22492_v54 }
 0xfc2   :  { %12400 = vmatpush1.bf16.msra.mxu0 %v16899_v22  ;;  %12431 = vmatprep.mubr.bf16.mxu0 %v20445_v19  ;;  %v17028_v19 = vcombine.high %v10262_v29, %v10278_v20  ;;  %v10359_v22 = vld [vmem:[#allocation3 + $0x778] sm:$0xff]  ;;  %v22026_v16 = vadd.f32 %v11902_v25, %v10400_v0  ;;  %v11904_v39 = vpop.f32.mrb[2].mxu1 }
 0xfc3   :  { %12401 = vmatprep.subr.bf16.mxu0 %v16932_v50  ;;  %12451 = vmatpush1.bf16.msra.mxu1 %v17061_v33  ;;  %v11905_v29 = vpop.f32.mrb[3].mxu1  ;;  %v17126_v42 = vcombine.high %v10359_v22, %v10375_v27  ;;  %v17125_v37 = vcombine.low %v10359_v22, %v10375_v27  ;;  %v19630_v39 = vld [vmem:[#allocation7] sm:$0xff]  }
 0xfc4   :  { %12452 = vmatprep.subr.bf16.mxu1 %v17094_v23  ;;  %v19633_v29 = vld [vmem:[#allocation7 + $0x80] sm:$0xff]  }
 0xfc6   :  { %12402 = vmatpush1.bf16.msra.mxu0 %v16931_v35 }
 0xfc7   :  { %12403 = vmatprep.subr.bf16.mxu0 %v16964_v32  ;;  %12453 = vmatpush1.bf16.msra.mxu1 %v17093_v10  ;;  %v19631_v10 = vld [vmem:[#allocation7 + $0xc0] sm:$0xff]  }
 0xfc8   :  { %12454 = vmatprep.subr.bf16.mxu1 %v17126_v42 }
 0xfca   :  { %12404 = vmatpush1.bf16.msra.mxu0 %v16963_v45  ;;  %v17124_v45 = vcombine.high %v10358_v6, %v10374_v21 }
 0xfcb   :  { %12405 = vmatprep.subr.bf16.mxu0 %v16996_v47  ;;  %v12500_v47 = vmax.f32 %v22024_v31, %v22026_v16  ;;  %12455 = vmatpush1.bf16.msra.mxu1 %v17125_v37 }
 0xfcc   :  { %17937 = vmatprep.subr.bf16.mxu1 %v19631_v10 }
 0xfce   :  { %12406 = vmatpush1.bf16.msra.mxu0 %v16995_v34  ;;  %12473 = vmatmul.mubr.bf16.vlgmr.msra.gmra.mrb[28].mxu1 %v21980_v30  ;;  %v10408_v34 = vrot.slane %v22010_v51, %v20903_v13 }
 0xfcf   :  { %12407 = vmatprep.subr.bf16.mxu0 %v17028_v19  ;;  %17938 = vmatpush3.bf16.msra.mxu1 %v19633_v29 }
 0xfd2   :  { %12408 = vmatpush1.bf16.msra.mxu0 %v17027_v11 }
 0xfd3   :  { %12409 = vmatprep.subr.bf16.mxu0 %v17060_v17 }
 0xfd4   :  { %v11859_v60 = vpop.f32.mrb[0].mxu0 }
 0xfd5   :  { %v22020_v50 = vadd.f32 %v11859_v60, %v10388_v8  ;;  %v11861_v26 = vpop.f32.mrb[1].mxu0  ;;  %v10420_v8 = vrot.slane %v22054_v7, %v20860_v53 }
 0xfd6   :  { %v22022_v24 = vadd.f32 %v11861_v26, %v10392_v62  ;;  %v11863_v35 = vpop.f32.mrb[2].mxu0  ;;  %12410 = vmatpush1.bf16.msra.mxu0 %v17059_v48  ;;  %v10428_v62 = vrot.slane %v22054_v7, %v20866_v55  ;;  %v10432_v48 = vrot.slane %v22054_v7, %v20869_v58 }
 0xfd7   :  { %v11864_v32 = vpop.f32.mrb[3].mxu0  ;;  %12411 = vmatprep.subr.bf16.mxu0 %v17092_v46 }
 0xfd8   :  { %v12481_v20 = vmax.f32 %v22020_v50, %v22022_v24  ;;  %v19629_v32 = vld [vmem:[#allocation7 + $0x40] sm:$0xff]  }
 0xfda   :  { %12482 = vmax.xlane.f32.xlu0 %v12481_v20  ;;  %12412 = vmatpush1.bf16.msra.mxu0 %v17091_v43  ;;  %v19635_v20 = vld [vmem:[#allocation7 + $0xc8] sm:$0xff]  }
 0xfdb   :  { %12413 = vmatprep.subr.bf16.mxu0 %v17124_v45  ;;  %v19632_v45 = vld [vmem:[#allocation7 + $0x48] sm:$0xff]   ;;  %17939 = vmatprep.subr.bf16.mxu1 %v19635_v20 }
 0xfde   :  { %12501 = vmax.xlane.f32.xlu0 %v12500_v47  ;;  %12414 = vmatpush1.bf16.msra.mxu0 %v17123_v40  ;;  %v19634_v47 = vld [vmem:[#allocation7 + $0x8] sm:$0xff]  }
 0xfdf   :  { %17915 = vmatprep.subr.bf16.mxu0 %v19629_v32  ;;  %v19637_v40 = vld [vmem:[#allocation7 + $0x88] sm:$0xff]  }
 0xfe0   :  { %17940 = vmatpush3.bf16.msra.mxu1 %v19637_v40  ;;  %v19645_v40 = vld [vmem:[#allocation7 + $0x98] sm:$0xff]  }
 0xfe1   :  { %12432 = vmatmul.mubr.bf16.vlgmr.msra.gmra.mrb[28].mxu0 %v21980_v30  ;;  %v11982_v56 = vpop.f32.mrb[4].mxu1 }
 0xfe2   :  { %v22046_v30 = vadd.f32 %v11982_v56, %v10412_v59  ;;  %v11984_v38 = vpop.f32.mrb[5].mxu1  ;;  %17916 = vmatpush3.bf16.msra.mxu0 %v19630_v39  ;;  %v19639_v59 = vld [vmem:[#allocation7 + $0xd0] sm:$0xff]  }
 0xfe3   :  { %v22048_v41 = vadd.f32 %v11984_v38, %v10416_v44  ;;  %v11986_v17 = vpop.f32.mrb[6].mxu1  ;;  %17917 = vmatprep.subr.bf16.mxu0 %v19632_v45  ;;  %v19638_v38 = vld [vmem:[#allocation7 + $0x10] sm:$0xff]   ;;  %17941 = vmatprep.subr.bf16.mxu1 %v19639_v59  ;;  %v19647_v59 = vld [vmem:[#allocation7 + $0xe0] sm:$0xff]  }
 0xfe4   :  { %v11987_v36 = vpop.f32.mrb[7].mxu1  ;;  %v19640_v17 = vld [vmem:[#allocation7 + $0x58] sm:$0xff]  }
 0xfe5   :  { %v12538_v51 = vmax.f32 %v22046_v30, %v22048_v41  ;;  %v19642_v36 = vld [vmem:[#allocation7 + $0x18] sm:$0xff]  }
 0xfe6   :  { %17918 = vmatpush3.bf16.msra.mxu0 %v19634_v47  ;;  %v19643_v47 = vld [vmem:[#allocation7 + $0xd8] sm:$0xff]  }
 0xff4   :  { %v11941_v52 = vpop.f32.mrb[4].mxu0 }
 0xff5   :  { %v22042_v19 = vadd.f32 %v11941_v52, %v10404_v49  ;;  %v11943_v28 = vpop.f32.mrb[5].mxu0 }
 0xff6   :  { %v22044_v57 = vadd.f32 %v11943_v28, %v10408_v34  ;;  %v11945_v11 = vpop.f32.mrb[6].mxu0  ;;  %v19636_v34 = vld [vmem:[#allocation7 + $0x50] sm:$0xff]  }
 0xff7   :  { %v11946_v18 = vpop.f32.mrb[7].mxu0  ;;  %17919 = vmatprep.subr.bf16.mxu0 %v19636_v34 }
 0xff8   :  { %v12519_v63 = vmax.f32 %v22042_v19, %v22044_v57  ;;  %v19641_v18 = vld [vmem:[#allocation7 + $0x90] sm:$0xff]   ;;  %17920 = vmatpush3.bf16.msra.mxu0 %v19638_v38 }
 0xff9   :  { %17942 = vmatpush3.bf16.msra.mxu1 %v19641_v18  ;;  %17921 = vmatprep.subr.bf16.mxu0 %v19640_v17  ;;  %v19650_v18 = vld [vmem:[#allocation7 + $0x28] sm:$0xff]  }
 0xffa   :  { %12520 = vmax.xlane.f32.xlu1 %v12519_v63  ;;  %17943 = vmatprep.subr.bf16.mxu1 %v19643_v47 }
 0xffc   :  { %17922 = vmatpush3.bf16.msra.mxu0 %v19642_v36  ;;  %v19651_v36 = vld [vmem:[#allocation7 + $0xe8] sm:$0xff]  }
 0xffd   :  { %17944 = vmatpush3.bf16.msra.mxu1 %v19645_v40 }
 0xffe   :  { %12539 = vmax.xlane.f32.xlu1 %v12538_v51  ;;  %17945 = vmatprep.subr.bf16.mxu1 %v19647_v59 }
0x1001   :  { %v12064_v0 = vpop.f32.mrb[8].mxu1 }
0x1002   :  { %v22066_v46 = vadd.f32 %v12064_v0, %v10428_v62  ;;  %v12066_v60 = vpop.f32.mrb[9].mxu1 }
0x1003   :  { %v22070_v27 = vadd.f32 %v12066_v60, %v10432_v48  ;;  %v12068_v61 = vpop.f32.mrb[10].mxu1  ;;  %v10440_v60 = vrot.slane %v22054_v7, %v20903_v13 }
0x1004   :  { %v12069_v25 = vpop.f32.mrb[11].mxu1  ;;  %v10448_v61 = vrot.slane %v22054_v7, %v20909_v15 }
0x1005   :  { %v12576_v43 = vmax.f32 %v22066_v46, %v22070_v27 }
0x1007   :  { %12577 = vmax.xlane.f32.xlu1 %v12576_v43 }
0x1014   :  { %v12023_v6 = vpop.f32.mrb[8].mxu0 }
0x1015   :  { %v22064_v21 = vadd.f32 %v12023_v6, %v10420_v8  ;;  %v12025_v33 = vpop.f32.mrb[9].mxu0 }
0x1016   :  { %v22068_v22 = vadd.f32 %v12025_v33, %v10424_v9  ;;  %v12027_v23 = vpop.f32.mrb[10].mxu0  ;;  %v10436_v33 = vrot.slane %v22054_v7, %v20900_v12 }
0x1017   :  { %v12028_v26 = vpop.f32.mrb[11].mxu0 }
0x1018   :  { %v12557_v35 = vmax.f32 %v22064_v21, %v22068_v22  ;;  %v10444_v26 = vrot.slane %v22054_v7, %v20906_v14 }
0x101a   :  { %12558 = vmax.xlane.f32.xlu0 %v12557_v35 }
0x1021   :  { %v12146_v49 = vpop.f32.mrb[12].mxu1 }
0x1022   :  { %v12148_v52 = vpop.f32.mrb[13].mxu1  ;;  %v22100_v45 = vadd.f32 %v12146_v49, %v10444_v26  ;;  %v10378_v26 = vld [vmem:[#allocation5 + $0x10] sm:$0xff] }
0x1023   :  { %v12150_v56 = vpop.f32.mrb[14].mxu1 }
0x1024   :  { %v12151_v11 = vpop.f32.mrb[15].mxu1  ;;  %v19649_v56 = vld [vmem:[#allocation7 + $0xa0] sm:$0xff]  }
0x1025   :  { %17946 = vmatpush3.bf16.msra.mxu1 %v19649_v56 }
0x1026   :  { %17947 = vmatprep.subr.bf16.mxu1 %v19651_v36  ;;  %v10468_v36 = vrot.slane %v10378_v26, %v20900_v12 }
0x1034   :  { %v12105_v42 = vpop.f32.mrb[12].mxu0 }
0x1035   :  { %v12107_v37 = vpop.f32.mrb[13].mxu0  ;;  %v22094_v35 = vadd.f32 %v12105_v42, %v10436_v33  ;;  %v19656_v33 = vld [vmem:[#allocation7 + $0x78] sm:$0xff]  }
0x1036   :  { %v12109_v44 = vpop.f32.mrb[14].mxu0  ;;  %v22096_v25 = vadd.f32 %v12107_v37, %v10440_v60  ;;  %v19657_v60 = vld [vmem:[#allocation7 + $0xb0] sm:$0xff]  }
0x1037   :  { %v12110_v28 = vpop.f32.mrb[15].mxu0 }
0x1038   :  { %v19648_v28 = vld [vmem:[#allocation7 + $0x68] sm:$0xff]  }
0x1041   :  { %v22080_v8 = vpop.f32.mrb[16].mxu1 }
0x1042   :  { %v22082_v9 = vpop.f32.mrb[17].mxu1 }
0x1043   :  { %v12232_v6 = vpop.f32.mrb[18].mxu1 }
0x1044   :  { %v12233_v0 = vpop.f32.mrb[19].mxu1  ;;  %v19654_v6 = vld [vmem:[#allocation7 + $0x30] sm:$0xff]  }
0x1045   :  { %v19655_v0 = vld [vmem:[#allocation7 + $0xf0] sm:$0xff]  }
0x1054   :  { %v22076_v63 = vpop.f32.mrb[16].mxu0 }
0x1055   :  { %v22078_v51 = vpop.f32.mrb[17].mxu0 }
0x1056   :  { %v12191_v62 = vpop.f32.mrb[18].mxu0 }
0x1057   :  { %v12192_v48 = vpop.f32.mrb[19].mxu0  ;;  %v19652_v62 = vld [vmem:[#allocation7 + $0x70] sm:$0xff]  }
0x1058   :  { %v19653_v48 = vld [vmem:[#allocation7 + $0xa8] sm:$0xff]  }
0x1059   :  { %17948 = vmatpush3.bf16.msra.mxu1 %v19653_v48  ;;  %v10472_v48 = vrot.slane %v10378_v26, %v20903_v13 }
0x105a   :  { %17949 = vmatprep.subr.bf16.mxu1 %v19655_v0 }
0x105d   :  { %17950 = vmatpush3.bf16.msra.mxu1 %v19657_v60 }
0x1061   :  { %v22114_v49 = vpop.f32.mrb[20].mxu1 }
0x1062   :  { %v22118_v44 = vpop.f32.mrb[21].mxu1 }
0x1063   :  { %v12314_v38 = vpop.f32.mrb[22].mxu1 }
0x1064   :  { %v12315_v17 = vpop.f32.mrb[23].mxu1 }
0x1067   :  { %v12483_v23 = vpop.xlane.xlu0 %12482 }
0x1068   :  { %vm12484_vm8 = vcmp.eq.f32.partialorder %v22020_v50, %v12483_v23  ;;  %vm12485_vm9 = vcmp.eq.f32.partialorder %v22022_v24, %v12483_v23  ;;  %v22104_v50 = vadd.f32 %v12148_v52, %v10448_v61  ;;  %v12595_v24 = vmax.f32 %v22094_v35, %v22096_v25  ;;  %v19658_v23 = vld [vmem:[#allocation7 + $0x38] sm:$0xff]  }
0x1069   :  { %v12486_v43 = vsel %vm12484_vm8, %v20774_v4, 256.0  ;;  %v12487_v32 = vsel %vm12485_vm9, %v20777_v5, 256.0  ;;  %v19659_v61 = vld [vmem:[#allocation7 + $0xf8] sm:$0xff]  }
0x106a   :  { %v12488_v39 = vmin.f32 %v12486_v43, %v12487_v32  ;;  %v12614_v42 = vmax.f32 %v22100_v45, %v22104_v50  ;;  %v19660_v43 = vld [vmem:[#allocation7 + $0xb8] sm:$0xff]   ;;  %v19661_v32 = vld [vmem:[#allocation7 + $0x140] sm:$0xff]   ;;  %17951 = vmatprep.subr.bf16.mxu1 %v19659_v61 }
0x106b   :  { %v12502_v10 = vpop.xlane.xlu0 %12501  ;;  %17952 = vmatpush3.bf16.msra.mxu1 %v19660_v43 }
0x106c   :  { %vm12503_vm10 = vcmp.eq.f32.partialorder %v22024_v31, %v12502_v10  ;;  %vm12504_vm11 = vcmp.eq.f32.partialorder %v22026_v16, %v12502_v10  ;;  %12489 = vmin.xlane.f32.xlu0 %v12488_v39  ;;  %v19644_v31 = vld [vmem:[#allocation7 + $0x60] sm:$0xff]   ;;  %v10452_v39 = vrot.slane %v10378_v26, %v20860_v53  ;;  %v10456_v10 = vrot.slane %v10378_v26, %v22492_v54 }
0x106d   :  { %v12505_v7 = vsel %vm12503_vm10, %v20774_v4, 256.0  ;;  %v12506_v29 = vsel %vm12504_vm11, %v20777_v5, 256.0  ;;  %v19646_v16 = vld [vmem:[#allocation7 + $0x20] sm:$0xff]   ;;  %17923 = vmatprep.subr.bf16.mxu0 %v19644_v31 }
0x106e   :  { %v12507_v20 = vmin.f32 %v12505_v7, %v12506_v29  ;;  %17924 = vmatpush3.bf16.msra.mxu0 %v19646_v16  ;;  %v10460_v29 = vrot.slane %v10378_v26, %v20866_v55  ;;  %v22130_v47 = vadd.f32 %v22078_v51, %v10456_v10 }
0x106f   :  { %17925 = vmatprep.subr.bf16.mxu0 %v19648_v28 }
0x1070   :  { %12596 = vmax.xlane.f32.xlu0 %v12595_v24  ;;  %12508 = vmin.xlane.f32.xlu1 %v12507_v20  ;;  %v19663_v24 = vld [vmem:[#allocation7 + $0x1c0] sm:$0xff]   ;;  %v10464_v20 = vrot.slane %v10378_v26, %v20869_v58  ;;  %v22135_v59 = vadd.f32 %v22080_v8, %v10460_v29 }
0x1071   :  { %17981 = vmatprep.subr.bf16.mxu1 %v19663_v24 }
0x1072   :  { %17926 = vmatpush3.bf16.msra.mxu0 %v19650_v18 }
0x1073   :  { %17927 = vmatprep.subr.bf16.mxu0 %v19652_v62  ;;  %v10476_v62 = vrot.slane %v10378_v26, %v20906_v14 }
0x1074   :  { %12615 = vmax.xlane.f32.xlu1 %v12614_v42  ;;  %v22112_v37 = vpop.f32.mrb[20].mxu0  ;;  %v22127_v42 = vadd.f32 %v22076_v63, %v10452_v39 }
0x1075   :  { %v22116_v34 = vpop.f32.mrb[21].mxu0  ;;  %v22156_v60 = vadd.f32 %v22114_v49, %v10476_v62 }
0x1076   :  { %v12273_v52 = vpop.f32.mrb[22].mxu0  ;;  %17928 = vmatpush3.bf16.msra.mxu0 %v19654_v6  ;;  %v10480_v6 = vrot.slane %v10378_v26, %v20909_v15  ;;  %v22161_v61 = vadd.f32 %v22116_v34, %v10472_v48 }
0x1077   :  { %v12274_v11 = vpop.f32.mrb[23].mxu0  ;;  %17929 = vmatprep.subr.bf16.mxu0 %v19656_v33  ;;  %v22153_v33 = vadd.f32 %v22112_v37, %v10468_v36 }
0x1078   :  { %v22164_v43 = vadd.f32 %v22118_v44, %v10480_v6  ;;  %v19664_v6 = vld [vmem:[#allocation7 + $0x148] sm:$0xff]  }
0x1079   :  { %v12671_v34 = vmax.f32 %v22153_v33, %v22161_v61 }
0x107a   :  { %17930 = vmatpush3.bf16.msra.mxu0 %v19658_v23 }
0x107b   :  { %17959 = vmatprep.subr.bf16.mxu0 %v19661_v32 }
0x1081   :  { %v12392_v56 = vpop.f32.mrb[24].mxu1 }
0x1082   :  { %v12394_v11 = vpop.f32.mrb[25].mxu1 }
0x1083   :  { %v12396_v18 = vpop.f32.mrb[26].mxu1 }
0x1084   :  { %v12397_v17 = vpop.f32.mrb[27].mxu1 }
0x1085   :  { %v19662_v17 = vld [vmem:[#allocation7 + $0x100] sm:$0xff]  }
0x1087   :  { %v12521_v7 = vpop.xlane.xlu1 %12520 }
0x1088   :  { %vm12522_vm12 = vcmp.eq.f32.partialorder %v22042_v19, %v12521_v7  ;;  %vm12523_vm13 = vcmp.eq.f32.partialorder %v22044_v57, %v12521_v7  ;;  %v22140_v19 = vadd.f32 %v22082_v9, %v10464_v20  ;;  %v12633_v57 = vmax.f32 %v22127_v42, %v22130_v47 }
0x1089   :  { %v12524_v31 = vsel %vm12522_vm12, %v20774_v4, 256.0  ;;  %v12525_v40 = vsel %vm12523_vm13, %v20777_v5, 256.0 }
0x108a   :  { %v12526_v16 = vmin.f32 %v12524_v31, %v12525_v40  ;;  %v12652_v8 = vmax.f32 %v22135_v59, %v22140_v19  ;;  %v22184_v31 = vld [vmem:[#allocation5 + $0x18] sm:$0xff] }
0x108b   :  { %v12540_v52 = vpop.xlane.xlu1 %12539  ;;  %v10496_v18 = vrot.slane %v22184_v31, %v20869_v58 }
0x108c   :  { %vm12541_vm14 = vcmp.eq.f32.partialorder %v22046_v30, %v12540_v52  ;;  %vm12542_vm15 = vcmp.eq.f32.partialorder %v22048_v41, %v12540_v52  ;;  %12527 = vmin.xlane.f32.xlu0 %v12526_v16  ;;  %v10484_v16 = vrot.slane %v22184_v31, %v20860_v53  ;;  %v10488_v52 = vrot.slane %v22184_v31, %v22492_v54 }
0x108d   :  { %v12543_v63 = vsel %vm12541_vm14, %v20774_v4, 256.0  ;;  %v12544_v51 = vsel %vm12542_vm15, %v20777_v5, 256.0  ;;  %v22206_v58 = vadd.f32 %v12394_v11, %v10496_v18  ;;  %v19666_v11 = vld [vmem:[#allocation7 + $0x108] sm:$0xff]   ;;  %v10500_v18 = vrot.slane %v22184_v31, %v20900_v12 }
0x108e   :  { %v12545_v28 = vmin.f32 %v12543_v63, %v12544_v51 }
0x1090   :  { %12634 = vmax.xlane.f32.xlu0 %v12633_v57  ;;  %12546 = vmin.xlane.f32.xlu1 %v12545_v28 }
0x1094   :  { %12653 = vmax.xlane.f32.xlu1 %v12652_v8  ;;  %v12351_v30 = vpop.f32.mrb[24].mxu0  ;;  %v12578_v23 = vpop.xlane.xlu1 %12577 }
0x1095   :  { %v12353_v41 = vpop.f32.mrb[25].mxu0  ;;  %vm12579_vm3 = vcmp.eq.f32.partialorder %v22066_v46, %v12578_v23  ;;  %vm12580_vm4 = vcmp.eq.f32.partialorder %v22070_v27, %v12578_v23  ;;  %v12690_v46 = vmax.f32 %v22156_v60, %v22164_v43  ;;  %v22190_v8 = vadd.f32 %v12351_v30, %v10484_v16  ;;  %v19668_v23 = vld [vmem:[#allocation7 + $0x150] sm:$0xff]   ;;  %v19681_v16 = vld [vmem:[#allocation7 + $0x1a0] sm:$0xff]  }
0x1096   :  { %v12355_v9 = vpop.f32.mrb[26].mxu0  ;;  %v12581_v26 = vsel %vm12579_vm3, %v20774_v4, 256.0 }
0x1097   :  { %v12356_v38 = vpop.f32.mrb[27].mxu0  ;;  %v22192_v9 = vadd.f32 %v12353_v41, %v10488_v52  ;;  %v19682_v52 = vld [vmem:[#allocation7 + $0x128] sm:$0xff]  }
0x1098   :  { %v10492_v38 = vrot.slane %v22184_v31, %v20866_v55 }
0x1099   :  { %v12709_v48 = vmax.f32 %v22190_v8, %v22192_v9 }
0x109a   :  { %v22204_v55 = vadd.f32 %v12392_v56, %v10492_v38 }
0x10a1   :  { %v22180_v39 = vpop.f32.mrb[28].mxu1 }
0x10a2   :  { %v22182_v24 = vpop.f32.mrb[29].mxu1 }
0x10a3   :  { %v12478_v29 = vpop.f32.mrb[30].mxu1 }
0x10a4   :  { %v12479_v20 = vpop.f32.mrb[31].mxu1  ;;  %v19678_v29 = vld [vmem:[#allocation7 + $0x120] sm:$0xff]  }
0x10a5   :  { %v19679_v20 = vld [vmem:[#allocation7 + $0x1e0] sm:$0xff]  }
0x10a7   :  { %v12559_v0 = vpop.xlane.xlu0 %12558 }
0x10a8   :  { %vm12560_vm1 = vcmp.eq.f32.partialorder %v22064_v21, %v12559_v0  ;;  %vm12561_vm2 = vcmp.eq.f32.partialorder %v22068_v22, %v12559_v0  ;;  %v12582_v21 = vsel %vm12580_vm4, %v20777_v5, 256.0  ;;  %v19667_v0 = vld [vmem:[#allocation7 + $0x1c8] sm:$0xff]  }
0x10a9   :  { %v12562_v37 = vsel %vm12560_vm1, %v20774_v4, 256.0  ;;  %v12563_v49 = vsel %vm12561_vm2, %v20777_v5, 256.0  ;;  %v12583_v22 = vmin.f32 %v12581_v26, %v12582_v21  ;;  %v19670_v26 = vld [vmem:[#allocation7 + $0x110] sm:$0xff]  }
0x10aa   :  { %v12564_v32 = vmin.f32 %v12562_v37, %v12563_v49  ;;  %v12728_v37 = vmax.f32 %v22204_v55, %v22206_v58  ;;  %v19669_v49 = vld [vmem:[#allocation7 + $0x188] sm:$0xff]   ;;  %v19671_v21 = vld [vmem:[#allocation7 + $0x1d0] sm:$0xff]  }
0x10ab   :  { %12584 = vmin.xlane.f32.xlu1 %v12583_v22  ;;  %v19673_v22 = vld [vmem:[#allocation7 + $0x190] sm:$0xff]  }
0x10ac   :  { %12565 = vmin.xlane.f32.xlu0 %v12564_v32  ;;  %v19672_v32 = vld [vmem:[#allocation7 + $0x158] sm:$0xff]  }
0x10af   :  { %12691 = vmax.xlane.f32.xlu1 %v12690_v46  ;;  %v19675_v46 = vld [vmem:[#allocation7 + $0x1d8] sm:$0xff]  }
0x10b0   :  { %12672 = vmax.xlane.f32.xlu0 %v12671_v34  ;;  %v19674_v34 = vld [vmem:[#allocation7 + $0x118] sm:$0xff]  }
0x10b4   :  { %v22176_v27 = vpop.f32.mrb[28].mxu0 }
0x10b5   :  { %v22178_v44 = vpop.f32.mrb[29].mxu0 }
0x10b6   :  { %v12437_v10 = vpop.f32.mrb[30].mxu0 }
0x10b7   :  { %v12438_v7 = vpop.f32.mrb[31].mxu0  ;;  %v19676_v10 = vld [vmem:[#allocation7 + $0x160] sm:$0xff]  }
0x10b8   :  { %v19677_v7 = vld [vmem:[#allocation7 + $0x198] sm:$0xff]  }
0x10f9   :  { %v12490_v40 = vpop.xlane.xlu0 %12489 }
0x10fa   :  { %v18499_v57 = vtrunc.f32 %v12490_v40  ;;  %v19680_v40 = vld [vmem:[#allocation7 + $0x168] sm:$0xff]  }
0x10fc   :  { %v18500_v63 = vcvt.f32.s32 %v18499_v57  ;;  %v19683_v57 = vld [vmem:[#allocation7 + $0x1e8] sm:$0xff]  }
0x10fd   :  { %v12509_v51 = vpop.xlane.xlu1 %12508  ;;  %v12597_v28 = vpop.xlane.xlu0 %12596 }
0x10fe   :  { %vm12492_vm5 = vcmp.eq.s32.totalorder %v20768_v2, %v18500_v63  ;;  %vm12493_vm6 = vcmp.eq.s32.totalorder %v20771_v3, %v18500_v63  ;;  %v18501_v53 = vtrunc.f32 %v12509_v51  ;;  %vm12598_vm7 = vcmp.eq.f32.partialorder %v22094_v35, %v12597_v28  ;;  %v19684_v63 = vld [vmem:[#allocation7 + $0x170] sm:$0xff]   ;;  %v19685_v51 = vld [vmem:[#allocation7 + $0x1a8] sm:$0xff]  }
0x10ff   :  { %vm12599_vm8 = vcmp.eq.f32.partialorder %v22096_v25, %v12597_v28  ;;  %v12600_v54 = vsel %vm12598_vm7, %v20774_v4, 256.0  ;;  %vm19965_vm13 = vmpackc.low %vm12493_vm6, %vm12493_vm6  ;;  %v20446_v35 = vmov 1.0|1.0   ;;  %v19686_v28 = vld [vmem:[#allocation7 + $0x130] sm:$0xff]  }
0x1100   :  { %v18502_v30 = vcvt.f32.s32 %v18501_v53  ;;  %v12601_v41 = vsel %vm12599_vm8, %v20777_v5, 256.0  ;;  %19966 = vmatprep.mubr.msk.bf16.mxu0 %vm19965_vm13, %v20446_v35  ;;  %vm19967_vm14 = vmpackc.low %vm12492_vm5, %vm12492_vm5  ;;  %v10504_v53 = vrot.slane %v22184_v31, %v20903_v13  ;;  %v22243_v13 = vadd.f32 %v22176_v27, %v10500_v18  ;;  %v19714_v18 = vld [vmem:[#allocation7 + $0x228] sm:$0xff]  }
0x1101   :  { %v12616_v36 = vpop.xlane.xlu1 %12615  ;;  %v12602_v62 = vmin.f32 %v12600_v54, %v12601_v41  ;;  %19968 = vmatmul.mubr.msk.bf16.vlgmr.msra.gmra.mrb[32].mxu0 %vm19967_vm14, %v20446_v35  ;;  %v10508_v54 = vrot.slane %v22184_v31, %v20906_v14  ;;  %v19688_v41 = vld [vmem:[#allocation7 + $0x178] sm:$0xff]  }
0x1102   :  { %vm12511_vm9 = vcmp.eq.s32.totalorder %v20768_v2, %v18502_v30  ;;  %vm12512_vm10 = vcmp.eq.s32.totalorder %v20771_v3, %v18502_v30  ;;  %vm12617_vm11 = vcmp.eq.f32.partialorder %v22100_v45, %v12616_v36  ;;  %vm12618_vm12 = vcmp.eq.f32.partialorder %v22104_v50, %v12616_v36  ;;  %17960 = vmatpush3.bf16.msra.mxu0 %v19662_v17  ;;  %v19665_v50 = vld [vmem:[#allocation7 + $0x180] sm:$0xff]   ;;  %v19687_v30 = vld [vmem:[#allocation7 + $0x1f0] sm:$0xff]  }
0x1103   :  { %v12619_v25 = vsel %vm12617_vm11, %v20774_v4, 256.0  ;;  %v12620_v56 = vsel %vm12618_vm12, %v20777_v5, 256.0  ;;  %12603 = vmin.xlane.f32.xlu0 %v12602_v62  ;;  %17961 = vmatprep.subr.bf16.mxu0 %v19664_v6  ;;  %vm19969_vm15 = vmpackc.low %vm12512_vm10, %vm12512_vm10  ;;  %v10512_v62 = vrot.slane %v22184_v31, %v20909_v15  ;;  %v19690_v6 = vld [vmem:[#allocation7 + $0x138] sm:$0xff]   ;;  %v22246_v14 = vadd.f32 %v22178_v44, %v10504_v53  ;;  %v19715_v53 = vld [vmem:[#allocation7 + $0x2e8] sm:$0xff]  }
0x1104   :  { %v12621_v45 = vmin.f32 %v12619_v25, %v12620_v56  ;;  %19970 = vmatprep.mubr.msk.bf16.mxu1 %vm19969_vm15, %v20446_v35  ;;  %vm19971_vm1 = vmpackc.low %vm12511_vm9, %vm12511_vm9  ;;  %v22249_v56 = vadd.f32 %v22180_v39, %v10508_v54  ;;  %v19692_v39 = vld [vmem:[#allocation7 + $0x1b8] sm:$0xff]   ;;  %v19716_v54 = vld [vmem:[#allocation7 + $0x270] sm:$0xff]  }
0x1105   :  { %19972 = vmatmul.mubr.msk.bf16.vlgmr.msra.gmra.mrb[32].mxu1 %vm19971_vm1, %v20446_v35 }
0x1106   :  { %12622 = vmin.xlane.f32.xlu1 %v12621_v45  ;;  %17982 = vmatpush3.bf16.msra.mxu1 %v19665_v50  ;;  %v19691_v45 = vld [vmem:[#allocation7 + $0x1f8] sm:$0xff]   ;;  %v19693_v50 = vld [vmem:[#allocation7 + $0x240] sm:$0xff]  }
0x1107   :  { %12710 = vmax.xlane.f32.xlu0 %v12709_v48  ;;  %17962 = vmatpush3.bf16.msra.mxu0 %v19666_v11  ;;  %v19689_v48 = vld [vmem:[#allocation7 + $0x1b0] sm:$0xff]   ;;  %v19694_v11 = vld [vmem:[#allocation7 + $0x200] sm:$0xff]  }
0x1108   :  { %17983 = vmatprep.subr.bf16.mxu1 %v19667_v0  ;;  %17963 = vmatprep.subr.bf16.mxu0 %v19668_v23  ;;  %v22258_v23 = vadd.f32 %v22182_v24, %v10512_v62  ;;  %v19720_v62 = vld [vmem:[#allocation7 + $0x278] sm:$0xff]  }
0x110a   :  { %12729 = vmax.xlane.f32.xlu1 %v12728_v37  ;;  %17984 = vmatpush3.bf16.msra.mxu1 %v19669_v49  ;;  %v12747_v49 = vmax.f32 %v22243_v13, %v22246_v14 }
0x110b   :  { %17964 = vmatpush3.bf16.msra.mxu0 %v19670_v26  ;;  %17985 = vmatprep.subr.bf16.mxu1 %v19671_v21  ;;  %v19698_v21 = vld [vmem:[#allocation7 + $0x208] sm:$0xff]  }
0x110c   :  { %17965 = vmatprep.subr.bf16.mxu0 %v19672_v32  ;;  %v19699_v32 = vld [vmem:[#allocation7 + $0x2c8] sm:$0xff]  }
0x110e   :  { %17986 = vmatpush3.bf16.msra.mxu1 %v19673_v22  ;;  %v19700_v22 = vld [vmem:[#allocation7 + $0x250] sm:$0xff]  }
0x110f   :  { %17966 = vmatpush3.bf16.msra.mxu0 %v19674_v34  ;;  %17987 = vmatprep.subr.bf16.mxu1 %v19675_v46  ;;  %v12766_v34 = vmax.f32 %v22249_v56, %v22258_v23  ;;  %v19701_v46 = vld [vmem:[#allocation7 + $0x288] sm:$0xff]  }
0x1110   :  { %17967 = vmatprep.subr.bf16.mxu0 %v19676_v10  ;;  %v19702_v10 = vld [vmem:[#allocation7 + $0x210] sm:$0xff]  }
0x1112   :  { %17988 = vmatpush3.bf16.msra.mxu1 %v19677_v7  ;;  %v19703_v7 = vld [vmem:[#allocation7 + $0x2d0] sm:$0xff]  }
0x1113   :  { %17968 = vmatpush3.bf16.msra.mxu0 %v19678_v29  ;;  %17989 = vmatprep.subr.bf16.mxu1 %v19679_v20  ;;  %v19704_v29 = vld [vmem:[#allocation7 + $0x258] sm:$0xff]   ;;  %v19705_v20 = vld [vmem:[#allocation7 + $0x290] sm:$0xff]  }
0x1114   :  { %17969 = vmatprep.subr.bf16.mxu0 %v19680_v40  ;;  %v19706_v40 = vld [vmem:[#allocation7 + $0x218] sm:$0xff]  }
0x1116   :  { %17990 = vmatpush3.bf16.msra.mxu1 %v19681_v16  ;;  %v19707_v16 = vld [vmem:[#allocation7 + $0x2d8] sm:$0xff]  }
0x1117   :  { %17970 = vmatpush3.bf16.msra.mxu0 %v19682_v52  ;;  %17991 = vmatprep.subr.bf16.mxu1 %v19683_v57  ;;  %v19708_v52 = vld [vmem:[#allocation7 + $0x260] sm:$0xff]   ;;  %v19709_v57 = vld [vmem:[#allocation7 + $0x298] sm:$0xff]  }
0x1118   :  { %17971 = vmatprep.subr.bf16.mxu0 %v19684_v63  ;;  %v19710_v63 = vld [vmem:[#allocation7 + $0x220] sm:$0xff]  }
0x1119   :  { %v12528_v38 = vpop.xlane.xlu0 %12527 }
0x111a   :  { %v18503_v17 = vtrunc.f32 %v12528_v38  ;;  %17992 = vmatpush3.bf16.msra.mxu1 %v19685_v51  ;;  %v19711_v51 = vld [vmem:[#allocation7 + $0x2e0] sm:$0xff]  }
0x111b   :  { %17972 = vmatpush3.bf16.msra.mxu0 %v19686_v28  ;;  %17993 = vmatprep.subr.bf16.mxu1 %v19687_v30  ;;  %v19712_v28 = vld [vmem:[#allocation7 + $0x268] sm:$0xff]   ;;  %v19713_v38 = vld [vmem:[#allocation7 + $0x2a0] sm:$0xff]  }
0x111c   :  { %v18504_v36 = vcvt.f32.s32 %v18503_v17  ;;  %17973 = vmatprep.subr.bf16.mxu0 %v19688_v41  ;;  %v19717_v30 = vld [vmem:[#allocation7 + $0x2a8] sm:$0xff]   ;;  %v19718_v41 = vld [vmem:[#allocation7 + $0x230] sm:$0xff]  }
0x111d   :  { %v12547_v12 = vpop.xlane.xlu1 %12546  ;;  %v12635_v25 = vpop.xlane.xlu0 %12634 }
0x111e   :  { %vm12530_vm2 = vcmp.eq.s32.totalorder %v20768_v2, %v18504_v36  ;;  %vm12531_vm3 = vcmp.eq.s32.totalorder %v20771_v3, %v18504_v36  ;;  %v18505_v15 = vtrunc.f32 %v12547_v12  ;;  %vm12636_vm4 = vcmp.eq.f32.partialorder %v22127_v42, %v12635_v25  ;;  %17994 = vmatpush3.bf16.msra.mxu1 %v19689_v48  ;;  %v19695_v42 = vld [vmem:[#allocation7 + $0x2c0] sm:$0xff]   ;;  %v19719_v36 = vld [vmem:[#allocation7 + $0x2f0] sm:$0xff]  }
0x111f   :  { %vm12637_vm5 = vcmp.eq.f32.partialorder %v22130_v47, %v12635_v25  ;;  %v12638_v27 = vsel %vm12636_vm4, %v20774_v4, 256.0  ;;  %17974 = vmatpush3.bf16.msra.mxu0 %v19690_v6  ;;  %17995 = vmatprep.subr.bf16.mxu1 %v19691_v45  ;;  %v19696_v47 = vld [vmem:[#allocation7 + $0x248] sm:$0xff]   ;;  %vm19973_vm10 = vmpackc.low %vm12531_vm3, %vm12531_vm3  ;;  %v19721_v45 = vld [vmem:[#allocation7 + $0x2b0] sm:$0xff]  }
0x1120   :  { %v18506_v44 = vcvt.f32.s32 %v18505_v15  ;;  %v12639_v31 = vsel %vm12637_vm5, %v20777_v5, 256.0  ;;  %18003 = vmatprep.subr.bf16.mxu0 %v19693_v50  ;;  %19974 = vmatprep.mubr.msk.bf16.mxu0 %vm19973_vm10, %v20446_v35  ;;  %vm19975_vm11 = vmpackc.low %vm12530_vm2, %vm12530_vm2  ;;  %v19722_v50 = vld [vmem:[#allocation7 + $0x238] sm:$0xff]  }
0x1121   :  { %v12654_v0 = vpop.xlane.xlu1 %12653  ;;  %v12640_v37 = vmin.f32 %v12638_v27, %v12639_v31  ;;  %v19725_v31 = vld [vmem:[#allocation7 + $0x340] sm:$0xff]  }
0x1122   :  { %vm12549_vm6 = vcmp.eq.s32.totalorder %v20768_v2, %v18506_v44  ;;  %vm12550_vm7 = vcmp.eq.s32.totalorder %v20771_v3, %v18506_v44  ;;  %vm12655_vm8 = vcmp.eq.f32.partialorder %v22135_v59, %v12654_v0  ;;  %vm12656_vm9 = vcmp.eq.f32.partialorder %v22140_v19, %v12654_v0  ;;  %19976 = vmatmul.mubr.msk.bf16.vlgmr.msra.gmra.mrb[36].mxu0 %vm19975_vm11, %v20446_v35  ;;  %v19697_v19 = vld [vmem:[#allocation7 + $0x280] sm:$0xff]   ;;  %v19723_v44 = vld [vmem:[#allocation7 + $0x2f8] sm:$0xff]  }
0x1123   :  { %v12657_v24 = vsel %vm12655_vm8, %v20774_v4, 256.0  ;;  %v12658_v26 = vsel %vm12656_vm9, %v20777_v5, 256.0  ;;  %12641 = vmin.xlane.f32.xlu0 %v12640_v37  ;;  %17996 = vmatpush3.bf16.msra.mxu1 %v19692_v39  ;;  %vm19977_vm12 = vmpackc.low %vm12550_vm7, %vm12550_vm7 }
0x1124   :  { %v12659_v59 = vmin.f32 %v12657_v24, %v12658_v26  ;;  %18004 = vmatpush3.bf16.msra.mxu0 %v19694_v11  ;;  %18025 = vmatprep.subr.bf16.mxu1 %v19695_v42  ;;  %vm19979_vm13 = vmpackc.low %vm12549_vm6, %vm12549_vm6  ;;  %v19724_v42 = vld [vmem:[#allocation7 + $0x2b8] sm:$0xff]   ;;  %v19727_v24 = vld [vmem:[#allocation7 + $0x3c0] sm:$0xff]  }
0x1125   :  { %18005 = vmatprep.subr.bf16.mxu0 %v19696_v47  ;;  %19978 = vmatprep.mubr.msk.bf16.mxu1 %vm19977_vm12, %v20446_v35  ;;  %v19726_v47 = vld [vmem:[#allocation7 + $0x300] sm:$0xff]   ;;  %v19730_v26 = vld [vmem:[#allocation7 + $0x308] sm:$0xff]  }
0x1126   :  { %12660 = vmin.xlane.f32.xlu1 %v12659_v59  ;;  %19980 = vmatmul.mubr.msk.bf16.vlgmr.msra.gmra.mrb[36].mxu1 %vm19979_vm13, %v20446_v35  ;;  %v19731_v59 = vld [vmem:[#allocation7 + $0x3c8] sm:$0xff]  }
0x1127   :  { %12748 = vmax.xlane.f32.xlu0 %v12747_v49  ;;  %18026 = vmatpush3.bf16.msra.mxu1 %v19697_v19  ;;  %v19732_v19 = vld [vmem:[#allocation7 + $0x350] sm:$0xff]  }
0x1128   :  { %18006 = vmatpush3.bf16.msra.mxu0 %v19698_v21  ;;  %18027 = vmatprep.subr.bf16.mxu1 %v19699_v32  ;;  %v19733_v21 = vld [vmem:[#allocation7 + $0x388] sm:$0xff]   ;;  %v19734_v32 = vld [vmem:[#allocation7 + $0x310] sm:$0xff]  }
0x1129   :  { %18007 = vmatprep.subr.bf16.mxu0 %v19700_v22  ;;  %v19735_v22 = vld [vmem:[#allocation7 + $0x3d0] sm:$0xff]  }
0x112a   :  { %12767 = vmax.xlane.f32.xlu1 %v12766_v34  ;;  %v19736_v34 = vld [vmem:[#allocation7 + $0x358] sm:$0xff]  }
0x112b   :  { %18028 = vmatpush3.bf16.msra.mxu1 %v19701_v46  ;;  %v19737_v46 = vld [vmem:[#allocation7 + $0x390] sm:$0xff]  }
0x112c   :  { %18008 = vmatpush3.bf16.msra.mxu0 %v19702_v10  ;;  %18029 = vmatprep.subr.bf16.mxu1 %v19703_v7  ;;  %v19738_v10 = vld [vmem:[#allocation7 + $0x318] sm:$0xff]  }
0x112d   :  { %18009 = vmatprep.subr.bf16.mxu0 %v19704_v29  ;;  %v19739_v7 = vld [vmem:[#allocation7 + $0x3d8] sm:$0xff]   ;;  %v19740_v29 = vld [vmem:[#allocation7 + $0x360] sm:$0xff]  }
0x112f   :  { %18030 = vmatpush3.bf16.msra.mxu1 %v19705_v20  ;;  %v19741_v20 = vld [vmem:[#allocation7 + $0x398] sm:$0xff]  }
0x1130   :  { %18010 = vmatpush3.bf16.msra.mxu0 %v19706_v40  ;;  %18031 = vmatprep.subr.bf16.mxu1 %v19707_v16  ;;  %v19742_v40 = vld [vmem:[#allocation7 + $0x320] sm:$0xff]  }
0x1131   :  { %18011 = vmatprep.subr.bf16.mxu0 %v19708_v52  ;;  %v19743_v16 = vld [vmem:[#allocation7 + $0x3e0] sm:$0xff]   ;;  %v19744_v52 = vld [vmem:[#allocation7 + $0x368] sm:$0xff]  }
0x1133   :  { %18032 = vmatpush3.bf16.msra.mxu1 %v19709_v57  ;;  %v19745_v57 = vld [vmem:[#allocation7 + $0x3a0] sm:$0xff]  }
0x1134   :  { %18012 = vmatpush3.bf16.msra.mxu0 %v19710_v63  ;;  %18033 = vmatprep.subr.bf16.mxu1 %v19711_v51  ;;  %v19746_v63 = vld [vmem:[#allocation7 + $0x328] sm:$0xff]  }
0x1135   :  { %18013 = vmatprep.subr.bf16.mxu0 %v19712_v28  ;;  %v19747_v51 = vld [vmem:[#allocation7 + $0x3e8] sm:$0xff]   ;;  %v19748_v28 = vld [vmem:[#allocation7 + $0x370] sm:$0xff]  }
0x1137   :  { %18034 = vmatpush3.bf16.msra.mxu1 %v19713_v38  ;;  %v19749_v38 = vld [vmem:[#allocation7 + $0x3a8] sm:$0xff]  }
0x1138   :  { %18014 = vmatpush3.bf16.msra.mxu0 %v19714_v18  ;;  %18035 = vmatprep.subr.bf16.mxu1 %v19715_v53  ;;  %v12585_v48 = vpop.xlane.xlu1 %12584  ;;  %v19750_v18 = vld [vmem:[#allocation7 + $0x330] sm:$0xff]  }
0x1139   :  { %v12566_v17 = vpop.xlane.xlu0 %12565  ;;  %18015 = vmatprep.subr.bf16.mxu0 %v19716_v54  ;;  %v18509_v12 = vtrunc.f32 %v12585_v48  ;;  %v19751_v53 = vld [vmem:[#allocation7 + $0x3f0] sm:$0xff]   ;;  %v19752_v54 = vld [vmem:[#allocation7 + $0x378] sm:$0xff]   ;;  %v19759_v48 = vld [vmem:[#allocation7 + $0x4c0] sm:$0xff]  }
0x113a   :  { %v18507_v6 = vtrunc.f32 %v12566_v17  ;;  %v19755_v17 = vld [vmem:[#allocation7 + $0x3f8] sm:$0xff]  }
0x113b   :  { %18036 = vmatpush3.bf16.msra.mxu1 %v19717_v30  ;;  %v18510_v15 = vcvt.f32.s32 %v18509_v12  ;;  %v19753_v30 = vld [vmem:[#allocation7 + $0x3b0] sm:$0xff]  }
0x113c   :  { %v18508_v25 = vcvt.f32.s32 %v18507_v6  ;;  %18016 = vmatpush3.bf16.msra.mxu0 %v19718_v41  ;;  %18037 = vmatprep.subr.bf16.mxu1 %v19719_v36  ;;  %v12692_v39 = vpop.xlane.xlu1 %12691  ;;  %v19754_v41 = vld [vmem:[#allocation7 + $0x338] sm:$0xff]   ;;  %v19757_v36 = vld [vmem:[#allocation7 + $0x440] sm:$0xff]  }
0x113d   :  { %v12673_v27 = vpop.xlane.xlu0 %12672  ;;  %18017 = vmatprep.subr.bf16.mxu0 %v19720_v62  ;;  %vm12587_vm3 = vcmp.eq.s32.totalorder %v20768_v2, %v18510_v15  ;;  %vm12588_vm4 = vcmp.eq.s32.totalorder %v20771_v3, %v18510_v15  ;;  %vm12693_vm5 = vcmp.eq.f32.partialorder %v22156_v60, %v12692_v39  ;;  %vm12694_vm6 = vcmp.eq.f32.partialorder %v22164_v43, %v12692_v39  ;;  %v19728_v60 = vld [vmem:[#allocation7 + $0x348] sm:$0xff]   ;;  %v19729_v43 = vld [vmem:[#allocation7 + $0x380] sm:$0xff]   ;;  %v19756_v62 = vld [vmem:[#allocation7 + $0x3b8] sm:$0xff]  }
0x113e   :  { %vm12568_vm14 = vcmp.eq.s32.totalorder %v20768_v2, %v18508_v25  ;;  %vm12569_vm15 = vcmp.eq.s32.totalorder %v20771_v3, %v18508_v25  ;;  %vm12674_vm1 = vcmp.eq.f32.partialorder %v22153_v33, %v12673_v27  ;;  %vm12675_vm2 = vcmp.eq.f32.partialorder %v22161_v61, %v12673_v27  ;;  %vm19983_vm8 = vmpackc.low %vm12588_vm4, %vm12588_vm4 }
0x113f   :  { %18038 = vmatpush3.bf16.msra.mxu1 %v19721_v45  ;;  %v12695_v11 = vsel %vm12693_vm5, %v20774_v4, 256.0  ;;  %v12696_v0 = vsel %vm12694_vm6, %v20777_v5, 256.0  ;;  %v12676_v37 = vsel %vm12674_vm1, %v20774_v4, 256.0  ;;  %v12677_v33 = vsel %vm12675_vm2, %v20777_v5, 256.0  ;;  %vm19981_vm7 = vmpackc.low %vm12569_vm15, %vm12569_vm15  ;;  %19984 = vmatprep.mubr.msk.bf16.mxu1 %vm19983_vm8, %v20446_v35 }
0x1140   :  { %18018 = vmatpush3.bf16.msra.mxu0 %v19722_v50  ;;  %18039 = vmatprep.subr.bf16.mxu1 %v19723_v44  ;;  %v12697_v61 = vmin.f32 %v12695_v11, %v12696_v0  ;;  %v12678_v49 = vmin.f32 %v12676_v37, %v12677_v33  ;;  %vm19985_vm9 = vmpackc.low %vm12568_vm14, %vm12568_vm14  ;;  %v19758_v11 = vld [vmem:[#allocation7 + $0x400] sm:$0xff]  }
0x1141   :  { %18047 = vmatprep.subr.bf16.mxu0 %v19725_v31  ;;  %19982 = vmatprep.mubr.msk.bf16.mxu0 %vm19981_vm7, %v20446_v35  ;;  %vm19987_vm10 = vmpackc.low %vm12587_vm3, %vm12587_vm3 }
0x1142   :  { %12698 = vmin.xlane.f32.xlu1 %v12697_v61  ;;  %12679 = vmin.xlane.f32.xlu0 %v12678_v49  ;;  %v19762_v61 = vld [vmem:[#allocation7 + $0x408] sm:$0xff]   ;;  %v19764_v49 = vld [vmem:[#allocation7 + $0x450] sm:$0xff]  }
0x1143   :  { %19986 = vmatmul.mubr.msk.bf16.vlgmr.msra.gmra.mrb[40].mxu0 %vm19985_vm9, %v20446_v35  ;;  %18040 = vmatpush3.bf16.msra.mxu1 %v19724_v42  ;;  %v19765_v42 = vld [vmem:[#allocation7 + $0x488] sm:$0xff]  }
0x1144   :  { %18048 = vmatpush3.bf16.msra.mxu0 %v19726_v47  ;;  %18069 = vmatprep.subr.bf16.mxu1 %v19727_v24  ;;  %v19766_v47 = vld [vmem:[#allocation7 + $0x410] sm:$0xff]  }
0x1145   :  { %18049 = vmatprep.subr.bf16.mxu0 %v19728_v60  ;;  %v19767_v24 = vld [vmem:[#allocation7 + $0x4d0] sm:$0xff]   ;;  %v19768_v60 = vld [vmem:[#allocation7 + $0x458] sm:$0xff]  }
0x1146   :  { %19988 = vmatmul.mubr.msk.bf16.vlgmr.msra.gmra.mrb[40].mxu1 %vm19987_vm10, %v20446_v35 }
0x1147   :  { %18070 = vmatpush3.bf16.msra.mxu1 %v19729_v43  ;;  %v19769_v43 = vld [vmem:[#allocation7 + $0x490] sm:$0xff]  }
0x1148   :  { %18050 = vmatpush3.bf16.msra.mxu0 %v19730_v26  ;;  %18071 = vmatprep.subr.bf16.mxu1 %v19731_v59  ;;  %v19770_v26 = vld [vmem:[#allocation7 + $0x418] sm:$0xff]  }
0x1149   :  { %18051 = vmatprep.subr.bf16.mxu0 %v19732_v19  ;;  %v19771_v59 = vld [vmem:[#allocation7 + $0x4d8] sm:$0xff]   ;;  %v19772_v19 = vld [vmem:[#allocation7 + $0x460] sm:$0xff]  }
0x114b   :  { %18072 = vmatpush3.bf16.msra.mxu1 %v19733_v21  ;;  %v19773_v21 = vld [vmem:[#allocation7 + $0x498] sm:$0xff]  }
0x114c   :  { %18052 = vmatpush3.bf16.msra.mxu0 %v19734_v32  ;;  %18073 = vmatprep.subr.bf16.mxu1 %v19735_v22  ;;  %v19774_v32 = vld [vmem:[#allocation7 + $0x420] sm:$0xff]  }
0x114d   :  { %18053 = vmatprep.subr.bf16.mxu0 %v19736_v34  ;;  %v19775_v22 = vld [vmem:[#allocation7 + $0x4e0] sm:$0xff]   ;;  %v19776_v34 = vld [vmem:[#allocation7 + $0x468] sm:$0xff]  }
0x114f   :  { %18074 = vmatpush3.bf16.msra.mxu1 %v19737_v46  ;;  %v19777_v46 = vld [vmem:[#allocation7 + $0x4a0] sm:$0xff]  }
0x1150   :  { %18054 = vmatpush3.bf16.msra.mxu0 %v19738_v10  ;;  %18075 = vmatprep.subr.bf16.mxu1 %v19739_v7  ;;  %v19778_v10 = vld [vmem:[#allocation7 + $0x428] sm:$0xff]  }
0x1151   :  { %18055 = vmatprep.subr.bf16.mxu0 %v19740_v29  ;;  %v19779_v7 = vld [vmem:[#allocation7 + $0x4e8] sm:$0xff]   ;;  %v19780_v29 = vld [vmem:[#allocation7 + $0x470] sm:$0xff]  }
0x1153   :  { %18076 = vmatpush3.bf16.msra.mxu1 %v19741_v20  ;;  %v19781_v20 = vld [vmem:[#allocation7 + $0x4a8] sm:$0xff]  }
0x1154   :  { %18056 = vmatpush3.bf16.msra.mxu0 %v19742_v40  ;;  %18077 = vmatprep.subr.bf16.mxu1 %v19743_v16  ;;  %v19782_v40 = vld [vmem:[#allocation7 + $0x430] sm:$0xff]  }
0x1155   :  { %18057 = vmatprep.subr.bf16.mxu0 %v19744_v52  ;;  %v19783_v52 = vld [vmem:[#allocation7 + $0x4f0] sm:$0xff]  }
0x1157   :  { %18078 = vmatpush3.bf16.msra.mxu1 %v19745_v57  ;;  %v19784_v57 = vld [vmem:[#allocation7 + $0x478] sm:$0xff]  }
0x1158   :  { %18058 = vmatpush3.bf16.msra.mxu0 %v19746_v63  ;;  %18079 = vmatprep.subr.bf16.mxu1 %v19747_v51 }
0x1159   :  { %18059 = vmatprep.subr.bf16.mxu0 %v19748_v28 }
0x115b   :  { %18080 = vmatpush3.bf16.msra.mxu1 %v19749_v38  ;;  %v19785_v38 = vld [vmem:[#allocation7 + $0x4b0] sm:$0xff]  }
0x115c   :  { %18060 = vmatpush3.bf16.msra.mxu0 %v19750_v18  ;;  %18081 = vmatprep.subr.bf16.mxu1 %v19751_v53  ;;  %v19786_v18 = vld [vmem:[#allocation7 + $0x438] sm:$0xff]  }
0x115d   :  { %18061 = vmatprep.subr.bf16.mxu0 %v19752_v54 }
0x115f   :  { %18082 = vmatpush3.bf16.msra.mxu1 %v19753_v30  ;;  %v19787_v30 = vld [vmem:[#allocation7 + $0x4f8] sm:$0xff]  }
0x1160   :  { %18062 = vmatpush3.bf16.msra.mxu0 %v19754_v41  ;;  %18083 = vmatprep.subr.bf16.mxu1 %v19755_v17  ;;  %v19789_v41 = vld [vmem:[#allocation7 + $0x540] sm:$0xff]  }
0x1161   :  { %18091 = vmatprep.subr.bf16.mxu0 %v19757_v36 }
0x1163   :  { %18084 = vmatpush3.bf16.msra.mxu1 %v19756_v62 }
0x1164   :  { %18113 = vmatprep.subr.bf16.mxu1 %v19759_v48 }
0x1190   :  { %v12604_v6 = vpop.xlane.xlu0 %12603 }
0x1191   :  { %v18511_v12 = vtrunc.f32 %v12604_v6  ;;  %v19788_v6 = vld [vmem:[#allocation7 + $0x4b8] sm:$0xff]  }
0x1193   :  { %v18512_v25 = vcvt.f32.s32 %v18511_v12  ;;  %v12623_v45 = vpop.xlane.xlu1 %12622  ;;  %v19790_v12 = vld [vmem:[#allocation7 + $0x500] sm:$0xff]  }
0x1194   :  { %v18513_v50 = vtrunc.f32 %v12623_v45  ;;  %v12711_v15 = vpop.xlane.xlu0 %12710 }
0x1195   :  { %vm12606_vm11 = vcmp.eq.s32.totalorder %v20768_v2, %v18512_v25  ;;  %vm12607_vm12 = vcmp.eq.s32.totalorder %v20771_v3, %v18512_v25  ;;  %vm12712_vm13 = vcmp.eq.f32.partialorder %v22190_v8, %v12711_v15  ;;  %vm12713_vm14 = vcmp.eq.f32.partialorder %v22192_v9, %v12711_v15  ;;  %v19760_v9 = vld [vmem:[#allocation7 + $0x448] sm:$0xff]   ;;  %v19791_v25 = vld [vmem:[#allocation7 + $0x5c0] sm:$0xff]   ;;  %v19796_v15 = vld [vmem:[#allocation7 + $0x550] sm:$0xff]  }
0x1196   :  { %v18514_v27 = vcvt.f32.s32 %v18513_v50  ;;  %v12714_v44 = vsel %vm12712_vm13, %v20774_v4, 256.0  ;;  %v12715_v31 = vsel %vm12713_vm14, %v20777_v5, 256.0  ;;  %vm19989_vm4 = vmpackc.low %vm12607_vm12, %vm12607_vm12 }
0x1197   :  { %v12730_v39 = vpop.xlane.xlu1 %12729  ;;  %19990 = vmatprep.mubr.msk.bf16.mxu0 %vm19989_vm4, %v20446_v35  ;;  %v12716_v37 = vmin.f32 %v12714_v44, %v12715_v31  ;;  %vm19991_vm5 = vmpackc.low %vm12606_vm11, %vm12606_vm11  ;;  %v19798_v44 = vld [vmem:[#allocation7 + $0x510] sm:$0xff]  }
0x1198   :  { %vm12625_vm15 = vcmp.eq.s32.totalorder %v20768_v2, %v18514_v27  ;;  %vm12626_vm1 = vcmp.eq.s32.totalorder %v20771_v3, %v18514_v27  ;;  %vm12731_vm2 = vcmp.eq.f32.partialorder %v22204_v55, %v12730_v39  ;;  %vm12732_vm3 = vcmp.eq.f32.partialorder %v22206_v58, %v12730_v39  ;;  %19992 = vmatmul.mubr.msk.bf16.vlgmr.msra.gmra.mrb[44].mxu0 %vm19991_vm5, %v20446_v35  ;;  %v19761_v55 = vld [vmem:[#allocation7 + $0x480] sm:$0xff]   ;;  %v19763_v58 = vld [vmem:[#allocation7 + $0x4c8] sm:$0xff]   ;;  %v19799_v31 = vld [vmem:[#allocation7 + $0x5d0] sm:$0xff]  }
0x1199   :  { %v12733_v0 = vsel %vm12731_vm2, %v20774_v4, 256.0  ;;  %v12734_v8 = vsel %vm12732_vm3, %v20777_v5, 256.0  ;;  %18092 = vmatpush3.bf16.msra.mxu0 %v19758_v11  ;;  %12717 = vmin.xlane.f32.xlu0 %v12716_v37  ;;  %vm19993_vm6 = vmpackc.low %vm12626_vm1, %vm12626_vm1  ;;  %v19797_v27 = vld [vmem:[#allocation7 + $0x588] sm:$0xff]   ;;  %v19800_v39 = vld [vmem:[#allocation7 + $0x558] sm:$0xff]  }
0x119a   :  { %v12735_v33 = vmin.f32 %v12733_v0, %v12734_v8  ;;  %19994 = vmatprep.mubr.msk.bf16.mxu1 %vm19993_vm6, %v20446_v35  ;;  %18093 = vmatprep.subr.bf16.mxu0 %v19760_v9  ;;  %vm19995_vm7 = vmpackc.low %vm12625_vm15, %vm12625_vm15  ;;  %v19801_v11 = vld [vmem:[#allocation7 + $0x590] sm:$0xff]   ;;  %v19802_v0 = vld [vmem:[#allocation7 + $0x518] sm:$0xff]  }
0x119b   :  { %19996 = vmatmul.mubr.msk.bf16.vlgmr.msra.gmra.mrb[44].mxu1 %vm19995_vm7, %v20446_v35  ;;  %v19803_v8 = vld [vmem:[#allocation7 + $0x5d8] sm:$0xff]   ;;  %v19804_v9 = vld [vmem:[#allocation7 + $0x560] sm:$0xff]  }
0x119c   :  { %12736 = vmin.xlane.f32.xlu1 %v12735_v33  ;;  %18114 = vmatpush3.bf16.msra.mxu1 %v19761_v55  ;;  %v19805_v37 = vld [vmem:[#allocation7 + $0x598] sm:$0xff]   ;;  %v19806_v33 = vld [vmem:[#allocation7 + $0x520] sm:$0xff]  }
0x119d   :  { %18094 = vmatpush3.bf16.msra.mxu0 %v19762_v61  ;;  %18115 = vmatprep.subr.bf16.mxu1 %v19763_v58  ;;  %v19807_v55 = vld [vmem:[#allocation7 + $0x5e0] sm:$0xff]   ;;  %v19808_v61 = vld [vmem:[#allocation7 + $0x568] sm:$0xff]  }
0x119e   :  { %18095 = vmatprep.subr.bf16.mxu0 %v19764_v49  ;;  %v19809_v58 = vld [vmem:[#allocation7 + $0x5a0] sm:$0xff]   ;;  %v19810_v49 = vld [vmem:[#allocation7 + $0x528] sm:$0xff]  }
0x11a0   :  { %18116 = vmatpush3.bf16.msra.mxu1 %v19765_v42  ;;  %v19811_v42 = vld [vmem:[#allocation7 + $0x5e8] sm:$0xff]  }
0x11a1   :  { %18096 = vmatpush3.bf16.msra.mxu0 %v19766_v47  ;;  %18117 = vmatprep.subr.bf16.mxu1 %v19767_v24  ;;  %v19812_v47 = vld [vmem:[#allocation7 + $0x570] sm:$0xff]   ;;  %v19813_v24 = vld [vmem:[#allocation7 + $0x5a8] sm:$0xff]  }
0x11a2   :  { %18097 = vmatprep.subr.bf16.mxu0 %v19768_v60  ;;  %v19814_v60 = vld [vmem:[#allocation7 + $0x530] sm:$0xff]  }
0x11a4   :  { %18118 = vmatpush3.bf16.msra.mxu1 %v19769_v43  ;;  %v19815_v43 = vld [vmem:[#allocation7 + $0x5f0] sm:$0xff]  }
0x11a5   :  { %18098 = vmatpush3.bf16.msra.mxu0 %v19770_v26  ;;  %18119 = vmatprep.subr.bf16.mxu1 %v19771_v59  ;;  %v19816_v26 = vld [vmem:[#allocation7 + $0x578] sm:$0xff]  }
0x11a6   :  { %18099 = vmatprep.subr.bf16.mxu0 %v19772_v19 }
0x11a8   :  { %18120 = vmatpush3.bf16.msra.mxu1 %v19773_v21 }
0x11a9   :  { %18100 = vmatpush3.bf16.msra.mxu0 %v19774_v32  ;;  %18121 = vmatprep.subr.bf16.mxu1 %v19775_v22  ;;  %v19817_v22 = vld [vmem:[#allocation7 + $0x5b0] sm:$0xff]  }
0x11aa   :  { %18101 = vmatprep.subr.bf16.mxu0 %v19776_v34  ;;  %v19818_v34 = vld [vmem:[#allocation7 + $0x538] sm:$0xff]  }
0x11ac   :  { %18122 = vmatpush3.bf16.msra.mxu1 %v19777_v46 }
0x11ad   :  { %18102 = vmatpush3.bf16.msra.mxu0 %v19778_v10  ;;  %18123 = vmatprep.subr.bf16.mxu1 %v19779_v7  ;;  %v19819_v7 = vld [vmem:[#allocation7 + $0x5f8] sm:$0xff]  }
0x11ae   :  { %18103 = vmatprep.subr.bf16.mxu0 %v19780_v29  ;;  %v19821_v29 = vld [vmem:[#allocation7 + $0x640] sm:$0xff]  }
0x11b0   :  { %v12642_v16 = vpop.xlane.xlu0 %12641  ;;  %18124 = vmatpush3.bf16.msra.mxu1 %v19781_v20 }
0x11b1   :  { %v18515_v63 = vtrunc.f32 %v12642_v16  ;;  %18104 = vmatpush3.bf16.msra.mxu0 %v19782_v40  ;;  %18125 = vmatprep.subr.bf16.mxu1 %v19783_v52  ;;  %v19820_v16 = vld [vmem:[#allocation7 + $0x5b8] sm:$0xff]  }
0x11b2   :  { %18105 = vmatprep.subr.bf16.mxu0 %v19784_v57 }
0x11b3   :  { %v18516_v51 = vcvt.f32.s32 %v18515_v63  ;;  %v12661_v28 = vpop.xlane.xlu1 %12660  ;;  %v19822_v63 = vld [vmem:[#allocation7 + $0x600] sm:$0xff]  }
0x11b4   :  { %v18517_v53 = vtrunc.f32 %v12661_v28  ;;  %v12749_v54 = vpop.xlane.xlu0 %12748  ;;  %18126 = vmatpush3.bf16.msra.mxu1 %v19785_v38  ;;  %v17159_v28 = vld [vmem:[#allocation8] ss:$0 sm:$0xff] }
0x11b5   :  { %vm12644_vm8 = vcmp.eq.s32.totalorder %v20768_v2, %v18516_v51  ;;  %vm12645_vm9 = vcmp.eq.s32.totalorder %v20771_v3, %v18516_v51  ;;  %vm12750_vm10 = vcmp.eq.f32.partialorder %v22243_v13, %v12749_v54  ;;  %vm12751_vm11 = vcmp.eq.f32.partialorder %v22246_v14, %v12749_v54  ;;  %18106 = vmatpush3.bf16.msra.mxu0 %v19786_v18  ;;  %v19824_v51 = vld [vmem:[#allocation7 + $0x6c0] sm:$0xff]   ;;  %v19823_v18 = vld [vmem:[#allocation7 + $0x648] sm:$0xff]  }
0x11b6   :  { %v18518_v17 = vcvt.f32.s32 %v18517_v53  ;;  %v12752_v36 = vsel %vm12750_vm10, %v20774_v4, 256.0  ;;  %v12753_v62 = vsel %vm12751_vm11, %v20777_v5, 256.0  ;;  %18127 = vmatprep.subr.bf16.mxu1 %v19787_v30  ;;  %vm19997_vm1 = vmpackc.low %vm12645_vm9, %vm12645_vm9  ;;  %18135 = vmatprep.subr.bf16.mxu0 %v19789_v41  ;;  %v19826_v30 = vld [vmem:[#allocation7 + $0x680] sm:$0xff]  }
0x11b7   :  { %v12768_v48 = vpop.xlane.xlu1 %12767  ;;  %19998 = vmatprep.mubr.msk.bf16.mxu0 %vm19997_vm1, %v20446_v35  ;;  %v12754_v45 = vmin.f32 %v12752_v36, %v12753_v62  ;;  %vm19999_vm2 = vmpackc.low %vm12644_vm8, %vm12644_vm8  ;;  %v19825_v62 = vld [vmem:[#allocation7 + $0x608] sm:$0xff]  }
0x11b8   :  { %vm12663_vm12 = vcmp.eq.s32.totalorder %v20768_v2, %v18518_v17  ;;  %vm12664_vm13 = vcmp.eq.s32.totalorder %v20771_v3, %v18518_v17  ;;  %vm12769_vm14 = vcmp.eq.f32.partialorder %v22249_v56, %v12768_v48  ;;  %vm12770_vm15 = vcmp.eq.f32.partialorder %v22258_v23, %v12768_v48  ;;  %20000 = vmatmul.mubr.msk.bf16.vlgmr.msra.gmra.mrb[48].mxu0 %vm19999_vm2, %v20446_v35  ;;  %v19792_v56 = vld [vmem:[#allocation7 + $0x548] sm:$0xff]  }
0x11b9   :  { %v12771_v13 = vsel %vm12769_vm14, %v20774_v4, 256.0  ;;  %v12772_v14 = vsel %vm12770_vm15, %v20777_v5, 256.0  ;;  %18128 = vmatpush3.bf16.msra.mxu1 %v19788_v6  ;;  %18136 = vmatpush3.bf16.msra.mxu0 %v19790_v12  ;;  %v19793_v4 = vld [vmem:[#allocation7 + $0x580] sm:$0xff]   ;;  %v19794_v5 = vld [vmem:[#allocation7 + $0x508] sm:$0xff]   ;;  %vm20001_vm3 = vmpackc.low %vm12664_vm13, %vm12664_vm13 }
0x11ba   :  { %v12773_v50 = vmin.f32 %v12771_v13, %v12772_v14  ;;  %12755 = vmin.xlane.f32.xlu0 %v12754_v45  ;;  %v19795_v23 = vld [vmem:[#allocation7 + $0x5c8] sm:$0xff]   ;;  %20002 = vmatprep.mubr.msk.bf16.mxu1 %vm20001_vm3, %v20446_v35  ;;  %vm20003_vm4 = vmpackc.low %vm12663_vm12, %vm12663_vm12  ;;  %v19827_v12 = vld [vmem:[#allocation7 + $0x650] sm:$0xff]  }
0x11bb   :  { %18157 = vmatprep.subr.bf16.mxu1 %v19791_v25  ;;  %18137 = vmatprep.subr.bf16.mxu0 %v19792_v56  ;;  %v19828_v48 = vld [vmem:[#allocation7 + $0x6c8] sm:$0xff]   ;;  %v19829_v25 = vld [vmem:[#allocation7 + $0x610] sm:$0xff]  }
0x11bc   :  { %12774 = vmin.xlane.f32.xlu1 %v12773_v50  ;;  %20004 = vmatmul.mubr.msk.bf16.vlgmr.msra.gmra.mrb[48].mxu1 %vm20003_vm4, %v20446_v35  ;;  %v19830_v14 = vld [vmem:[#allocation7 + $0x688] sm:$0xff]   ;;  %v19832_v45 = vld [vmem:[#allocation7 + $0x6d0] sm:$0xff]   ;;  %v19831_v50 = vld [vmem:[#allocation7 + $0x658] sm:$0xff]  }
0x11bd   :  { %18158 = vmatpush3.bf16.msra.mxu1 %v19793_v4  ;;  %18138 = vmatpush3.bf16.msra.mxu0 %v19794_v5  ;;  %v19834_v56 = vld [vmem:[#allocation7 + $0x690] sm:$0xff]   ;;  %v19833_v4 = vld [vmem:[#allocation7 + $0x618] sm:$0xff]  }
0x11be   :  { %18159 = vmatprep.subr.bf16.mxu1 %v19795_v23  ;;  %18139 = vmatprep.subr.bf16.mxu0 %v19796_v15  ;;  %v19836_v5 = vld [vmem:[#allocation7 + $0x6d8] sm:$0xff]   ;;  %v19835_v23 = vld [vmem:[#allocation7 + $0x660] sm:$0xff]  }
0x11bf   :  { %v19838_v15 = vld [vmem:[#allocation7 + $0x698] sm:$0xff]  }
0x11c1   :  { %18160 = vmatpush3.bf16.msra.mxu1 %v19797_v27  ;;  %18140 = vmatpush3.bf16.msra.mxu0 %v19798_v44  ;;  %v19837_v27 = vld [vmem:[#allocation7 + $0x620] sm:$0xff]  }
0x11c2   :  { %18161 = vmatprep.subr.bf16.mxu1 %v19799_v31  ;;  %18141 = vmatprep.subr.bf16.mxu0 %v19800_v39  ;;  %v19840_v44 = vld [vmem:[#allocation7 + $0x6e0] sm:$0xff]   ;;  %v19839_v31 = vld [vmem:[#allocation7 + $0x668] sm:$0xff]  }
0x11c3   :  { %v19842_v39 = vld [vmem:[#allocation7 + $0x6a0] sm:$0xff]  }
0x11c5   :  { %18162 = vmatpush3.bf16.msra.mxu1 %v19801_v11  ;;  %18142 = vmatpush3.bf16.msra.mxu0 %v19802_v0  ;;  %v19841_v11 = vld [vmem:[#allocation7 + $0x628] sm:$0xff]  }
0x11c6   :  { %18163 = vmatprep.subr.bf16.mxu1 %v19803_v8  ;;  %18143 = vmatprep.subr.bf16.mxu0 %v19804_v9  ;;  %v19844_v0 = vld [vmem:[#allocation7 + $0x6e8] sm:$0xff]   ;;  %v19843_v8 = vld [vmem:[#allocation7 + $0x670] sm:$0xff]  }
0x11c7   :  { %v19846_v9 = vld [vmem:[#allocation7 + $0x6a8] sm:$0xff]  }
0x11c9   :  { %18164 = vmatpush3.bf16.msra.mxu1 %v19805_v37  ;;  %18144 = vmatpush3.bf16.msra.mxu0 %v19806_v33  ;;  %v19845_v37 = vld [vmem:[#allocation7 + $0x630] sm:$0xff]  }
0x11ca   :  { %18165 = vmatprep.subr.bf16.mxu1 %v19807_v55  ;;  %18145 = vmatprep.subr.bf16.mxu0 %v19808_v61  ;;  %v19848_v33 = vld [vmem:[#allocation7 + $0x6f0] sm:$0xff]   ;;  %v19847_v55 = vld [vmem:[#allocation7 + $0x678] sm:$0xff]  }
0x11cb   :  { %v19850_v61 = vld [vmem:[#allocation7 + $0x6b0] sm:$0xff]  }
0x11cd   :  { %18166 = vmatpush3.bf16.msra.mxu1 %v19809_v58  ;;  %18146 = vmatpush3.bf16.msra.mxu0 %v19810_v49  ;;  %v19849_v58 = vld [vmem:[#allocation7 + $0x638] sm:$0xff]  }
0x11ce   :  { %18167 = vmatprep.subr.bf16.mxu1 %v19811_v42  ;;  %18147 = vmatprep.subr.bf16.mxu0 %v19812_v47  ;;  %v19851_v49 = vld [vmem:[#allocation7 + $0x6f8] sm:$0xff]   ;;  %v19852_v42 = vld [vmem:[#allocation7 + $0x740] sm:$0xff]  }
0x11cf   :  { %v12699_v59 = vpop.xlane.xlu1 %12698  ;;  %v12680_v19 = vpop.xlane.xlu0 %12679 }
0x11d0   :  { %v18521_v21 = vtrunc.f32 %v12699_v59  ;;  %v18519_v32 = vtrunc.f32 %v12680_v19  ;;  %v19856_v59 = vld [vmem:[#allocation7 + $0x7c0] sm:$0xff]  }
0x11d1   :  { %18168 = vmatpush3.bf16.msra.mxu1 %v19813_v24  ;;  %18148 = vmatpush3.bf16.msra.mxu0 %v19814_v60  ;;  %v19853_v60 = vld [vmem:[#allocation7 + $0x6b8] sm:$0xff]  }
0x11d2   :  { %v18522_v46 = vcvt.f32.s32 %v18521_v21  ;;  %v18520_v10 = vcvt.f32.s32 %v18519_v32  ;;  %18169 = vmatprep.subr.bf16.mxu1 %v19815_v43  ;;  %18149 = vmatprep.subr.bf16.mxu0 %v19816_v26 }
0x11d4   :  { %vm12701_vm5 = vcmp.eq.s32.totalorder %v20768_v2, %v18522_v46  ;;  %vm12702_vm6 = vcmp.eq.s32.totalorder %v20771_v3, %v18522_v46  ;;  %vm12682_vm7 = vcmp.eq.s32.totalorder %v20768_v2, %v18520_v10  ;;  %vm12683_vm8 = vcmp.eq.s32.totalorder %v20771_v3, %v18520_v10  ;;  %v17931_v20 = vpop.f32.mrb[32].mxu0 }
0x11d5   :  { %18170 = vmatpush3.bf16.msra.mxu1 %v19817_v22  ;;  %18150 = vmatpush3.bf16.msra.mxu0 %v19818_v34  ;;  %v17932_v40 = vpop.f32.mrb[33].mxu0  ;;  %vm20005_vm9 = vmpackc.low %vm12683_vm8, %vm12683_vm8 }
0x11d6   :  { %v17933_v52 = vadd.f32 %v17932_v40, %v17931_v20  ;;  %v17934_v57 = vpop.f32.mrb[34].mxu0  ;;  %18171 = vmatprep.subr.bf16.mxu1 %v19819_v7  ;;  %18179 = vmatprep.subr.bf16.mxu0 %v19821_v29  ;;  %vm20007_vm10 = vmpackc.low %vm12702_vm6, %vm12702_vm6 }
0x11d7   :  { %v17935_v38 = vpop.f32.mrb[35].mxu0  ;;  %20006 = vmatprep.mubr.msk.bf16.mxu0 %vm20005_vm9, %v20446_v35  ;;  %20008 = vmatprep.mubr.msk.bf16.mxu1 %vm20007_vm10, %v20446_v35  ;;  %vm20009_vm11 = vmpackc.low %vm12682_vm7, %vm12682_vm7 }
0x11d8   :  { %v17953_v53 = vpop.f32.mrb[32].mxu1  ;;  %20010 = vmatmul.mubr.msk.bf16.vlgmr.msra.gmra.mrb[52].mxu0 %vm20009_vm11, %v20446_v35  ;;  %v14939_v41 = vadd.f32 %v17933_v52, %v17159_v28  ;;  %vm20011_vm12 = vmpackc.low %vm12701_vm5, %vm12701_vm5 }
0x11d9   :  { %18172 = vmatpush3.bf16.msra.mxu1 %v19820_v16  ;;  %v17954_v54 = vpop.f32.mrb[33].mxu1  ;;  %18180 = vmatpush3.bf16.msra.mxu0 %v19822_v63 }
0x11da   :  { %v17955_v17 = vadd.f32 %v17954_v54, %v17953_v53  ;;  %v17956_v36 = vpop.f32.mrb[34].mxu1  ;;  %18201 = vmatprep.subr.bf16.mxu1 %v19824_v51  ;;  %18181 = vmatprep.subr.bf16.mxu0 %v19823_v18 }
0x11db   :  { %v17957_v6 = vpop.f32.mrb[35].mxu1 }
0x11dc   :  { %v14979_v13 = vadd.f32 %v17955_v17, %v14939_v41  ;;  %20012 = vmatmul.mubr.msk.bf16.vlgmr.msra.gmra.mrb[52].mxu1 %vm20011_vm12, %v20446_v35  ;;  %v19858_v6 = vld [vmem:[#allocation7 + $0x780] sm:$0xff]  }
0x11dd   :  { %18202 = vmatpush3.bf16.msra.mxu1 %v19826_v30  ;;  %18182 = vmatpush3.bf16.msra.mxu0 %v19825_v62 }
0x11de   :  { %18203 = vmatprep.subr.bf16.mxu1 %v19828_v48  ;;  %18183 = vmatprep.subr.bf16.mxu0 %v19827_v12  ;;  %v19854_v48 = vld [vmem:[#allocation7 + $0x700] sm:$0xff]   ;;  %v19855_v12 = vld [vmem:[#allocation7 + $0x748] sm:$0xff]  }
0x11e1   :  { %18204 = vmatpush3.bf16.msra.mxu1 %v19830_v14  ;;  %18184 = vmatpush3.bf16.msra.mxu0 %v19829_v25  ;;  %v19857_v14 = vld [vmem:[#allocation7 + $0x708] sm:$0xff]  }
0x11e2   :  { %18205 = vmatprep.subr.bf16.mxu1 %v19832_v45  ;;  %18185 = vmatprep.subr.bf16.mxu0 %v19831_v50  ;;  %v19862_v25 = vld [vmem:[#allocation7 + $0x788] sm:$0xff]   ;;  %v19859_v45 = vld [vmem:[#allocation7 + $0x750] sm:$0xff]  }
0x11e3   :  { %v19864_v50 = vld [vmem:[#allocation7 + $0x7d0] sm:$0xff]  }
0x11e5   :  { %18206 = vmatpush3.bf16.msra.mxu1 %v19834_v56  ;;  %18186 = vmatpush3.bf16.msra.mxu0 %v19833_v4  ;;  %v19861_v56 = vld [vmem:[#allocation7 + $0x710] sm:$0xff]  }
0x11e6   :  { %18207 = vmatprep.subr.bf16.mxu1 %v19836_v5  ;;  %18187 = vmatprep.subr.bf16.mxu0 %v19835_v23  ;;  %v19866_v4 = vld [vmem:[#allocation7 + $0x790] sm:$0xff]   ;;  %v19863_v5 = vld [vmem:[#allocation7 + $0x758] sm:$0xff]  }
0x11e7   :  { %v19868_v23 = vld [vmem:[#allocation7 + $0x7d8] sm:$0xff]  }
0x11e9   :  { %18208 = vmatpush3.bf16.msra.mxu1 %v19838_v15  ;;  %18188 = vmatpush3.bf16.msra.mxu0 %v19837_v27  ;;  %v19865_v15 = vld [vmem:[#allocation7 + $0x718] sm:$0xff]  }
0x11ea   :  { %18209 = vmatprep.subr.bf16.mxu1 %v19840_v44  ;;  %18189 = vmatprep.subr.bf16.mxu0 %v19839_v31  ;;  %v19870_v27 = vld [vmem:[#allocation7 + $0x798] sm:$0xff]   ;;  %v19867_v44 = vld [vmem:[#allocation7 + $0x760] sm:$0xff]  }
0x11eb   :  { %v19872_v31 = vld [vmem:[#allocation7 + $0x7e0] sm:$0xff]  }
0x11ed   :  { %18210 = vmatpush3.bf16.msra.mxu1 %v19842_v39  ;;  %18190 = vmatpush3.bf16.msra.mxu0 %v19841_v11  ;;  %v19869_v39 = vld [vmem:[#allocation7 + $0x720] sm:$0xff]  }
0x11ee   :  { %18211 = vmatprep.subr.bf16.mxu1 %v19844_v0  ;;  %18191 = vmatprep.subr.bf16.mxu0 %v19843_v8  ;;  %v19874_v11 = vld [vmem:[#allocation7 + $0x7a0] sm:$0xff]   ;;  %v19871_v0 = vld [vmem:[#allocation7 + $0x768] sm:$0xff]  }
0x11ef   :  { %v19876_v8 = vld [vmem:[#allocation7 + $0x7e8] sm:$0xff]  }
0x11f1   :  { %18212 = vmatpush3.bf16.msra.mxu1 %v19846_v9  ;;  %18192 = vmatpush3.bf16.msra.mxu0 %v19845_v37  ;;  %v19873_v9 = vld [vmem:[#allocation7 + $0x728] sm:$0xff]  }
0x11f2   :  { %18213 = vmatprep.subr.bf16.mxu1 %v19848_v33  ;;  %18193 = vmatprep.subr.bf16.mxu0 %v19847_v55  ;;  %v19878_v37 = vld [vmem:[#allocation7 + $0x7a8] sm:$0xff]   ;;  %v19875_v33 = vld [vmem:[#allocation7 + $0x770] sm:$0xff]  }
0x11f3   :  { %v19880_v55 = vld [vmem:[#allocation7 + $0x7f0] sm:$0xff]  }
0x11f5   :  { %v17975_v47 = vpop.f32.mrb[36].mxu0  ;;  %18214 = vmatpush3.bf16.msra.mxu1 %v19850_v61  ;;  %18194 = vmatpush3.bf16.msra.mxu0 %v19849_v58  ;;  %v19877_v61 = vld [vmem:[#allocation7 + $0x730] sm:$0xff]  }
0x11f6   :  { %v17976_v24 = vpop.f32.mrb[37].mxu0  ;;  %18215 = vmatprep.subr.bf16.mxu1 %v19851_v49  ;;  %18223 = vmatprep.subr.bf16.mxu0 %v19852_v42  ;;  %v19882_v58 = vld [vmem:[#allocation7 + $0x7b0] sm:$0xff]  }
0x11f7   :  { %v17977_v43 = vadd.f32 %v17976_v24, %v17975_v47  ;;  %v17978_v26 = vpop.f32.mrb[38].mxu0  ;;  %v19879_v47 = vld [vmem:[#allocation7 + $0x778] sm:$0xff]  }
0x11f8   :  { %v17979_v19 = vpop.f32.mrb[39].mxu0  ;;  %v19883_v24 = vld [vmem:[#allocation7 + $0x7f8] sm:$0xff]  }
0x11f9   :  { %v15019_v21 = vadd.f32 %v17977_v43, %v14979_v13  ;;  %v17997_v32 = vpop.f32.mrb[36].mxu1  ;;  %18216 = vmatpush3.bf16.msra.mxu1 %v19853_v60  ;;  %v19860_v13 = vld [vmem:[#allocation7 + $0x7c8] sm:$0xff]   ;;  %v19881_v19 = vld [vmem:[#allocation7 + $0x738] sm:$0xff]  }
0x11fa   :  { %v17998_v22 = vpop.f32.mrb[37].mxu1  ;;  %18245 = vmatprep.subr.bf16.mxu1 %v19856_v59 }
0x11fb   :  { %v17999_v34 = vadd.f32 %v17998_v22, %v17997_v32  ;;  %v18000_v46 = vpop.f32.mrb[38].mxu1 }
0x11fc   :  { %v18001_v10 = vpop.f32.mrb[39].mxu1 }
0x11fd   :  { %v15059_v7 = vadd.f32 %v17999_v34, %v15019_v21  ;;  %v19884_v21 = vld [vmem:[#allocation7 + $0x7b8] sm:$0xff]  }
0x1216   :  { %v18019_v29 = vpop.f32.mrb[40].mxu0 }
0x1217   :  { %v18020_v20 = vpop.f32.mrb[41].mxu0 }
0x1218   :  { %v18021_v40 = vadd.f32 %v18020_v20, %v18019_v29  ;;  %v18022_v16 = vpop.f32.mrb[42].mxu0 }
0x1219   :  { %v18023_v52 = vpop.f32.mrb[43].mxu0  ;;  %v18041_v57 = vpop.f32.mrb[40].mxu1 }
0x121a   :  { %v15099_v63 = vadd.f32 %v18021_v40, %v15059_v7  ;;  %v18042_v51 = vpop.f32.mrb[41].mxu1 }
0x121b   :  { %v18043_v28 = vadd.f32 %v18042_v51, %v18041_v57  ;;  %v18044_v38 = vpop.f32.mrb[42].mxu1 }
0x121c   :  { %v18045_v18 = vpop.f32.mrb[43].mxu1 }
0x121d   :  { %v22384_v53 = vadd.f32 %v18043_v28, %v15099_v63  ;;  %v19886_v63 = vld [vmem:[#allocation10 + $0x8] sm:$0xff]  }
0x1226   :  { %v12718_v54 = vpop.xlane.xlu0 %12717 }
0x1227   :  { %v18523_v41 = vtrunc.f32 %v12718_v54 }
0x1229   :  { %v12737_v30 = vpop.xlane.xlu1 %12736  ;;  %v18524_v36 = vcvt.f32.s32 %v18523_v41 }
0x122a   :  { %v18525_v17 = vtrunc.f32 %v12737_v30 }
0x122b   :  { %vm12720_vm13 = vcmp.eq.s32.totalorder %v20768_v2, %v18524_v36  ;;  %vm12721_vm14 = vcmp.eq.s32.totalorder %v20771_v3, %v18524_v36 }
0x122c   :  { %v18526_v62 = vcvt.f32.s32 %v18525_v17  ;;  %vm20013_vm2 = vmpackc.low %vm12721_vm14, %vm12721_vm14 }
0x122d   :  { %20014 = vmatprep.mubr.msk.bf16.mxu0 %vm20013_vm2, %v20446_v35  ;;  %vm20017_vm4 = vmpackc.low %vm12720_vm13, %vm12720_vm13 }
0x122e   :  { %vm12739_vm15 = vcmp.eq.s32.totalorder %v20768_v2, %v18526_v62  ;;  %vm12740_vm1 = vcmp.eq.s32.totalorder %v20771_v3, %v18526_v62  ;;  %20018 = vmatmul.mubr.msk.bf16.vlgmr.msra.gmra.mrb[56].mxu0 %vm20017_vm4, %v20446_v35 }
0x122f   :  { %vm20015_vm3 = vmpackc.low %vm12740_vm1, %vm12740_vm1  ;;  %18224 = vmatpush3.bf16.msra.mxu0 %v19854_v48  ;;  %v19888_v48 = vld [vmem:[#allocation10 + $0x18] sm:$0xff]  }
0x1230   :  { %20016 = vmatprep.mubr.msk.bf16.mxu1 %vm20015_vm3, %v20446_v35  ;;  %vm20019_vm5 = vmpackc.low %vm12739_vm15, %vm12739_vm15  ;;  %18225 = vmatprep.subr.bf16.mxu0 %v19855_v12  ;;  %v19890_v12 = vld [vmem:[#allocation10 + $0x28] sm:$0xff]  }
0x1231   :  { %20020 = vmatmul.mubr.msk.bf16.vlgmr.msra.gmra.mrb[56].mxu1 %vm20019_vm5, %v20446_v35 }
0x1232   :  { %18246 = vmatpush3.bf16.msra.mxu1 %v19858_v6  ;;  %v19889_v6 = vld [vmem:[#allocation10 + $0x20] sm:$0xff]  }
0x1233   :  { %18247 = vmatprep.subr.bf16.mxu1 %v19860_v13  ;;  %18226 = vmatpush3.bf16.msra.mxu0 %v19857_v14  ;;  %v19891_v13 = vld [vmem:[#allocation10 + $0x30] sm:$0xff]   ;;  %v19892_v14 = vld [vmem:[#allocation10 + $0x38] sm:$0xff]  }
0x1234   :  { %18227 = vmatprep.subr.bf16.mxu0 %v19859_v45 }
0x1236   :  { %18248 = vmatpush3.bf16.msra.mxu1 %v19862_v25 }
0x1237   :  { %18249 = vmatprep.subr.bf16.mxu1 %v19864_v50  ;;  %18228 = vmatpush3.bf16.msra.mxu0 %v19861_v56 }
0x1238   :  { %18229 = vmatprep.subr.bf16.mxu0 %v19863_v5 }
0x123a   :  { %18250 = vmatpush3.bf16.msra.mxu1 %v19866_v4  ;;  %v19893_v4 = vld [vmem:[%s22460_s7 + $0x280] sm:$0xff]  }
0x123b   :  { %18251 = vmatprep.subr.bf16.mxu1 %v19868_v23  ;;  %18230 = vmatpush3.bf16.msra.mxu0 %v19865_v15 }
0x123c   :  { %18231 = vmatprep.subr.bf16.mxu0 %v19867_v44  ;;  %v19894_v44 = vld [vmem:[%s22460_s7 + $0x288] sm:$0xff]  }
0x123e   :  { %18252 = vmatpush3.bf16.msra.mxu1 %v19870_v27 }
0x123f   :  { %18253 = vmatprep.subr.bf16.mxu1 %v19872_v31  ;;  %18232 = vmatpush3.bf16.msra.mxu0 %v19869_v39 }
0x1240   :  { %18233 = vmatprep.subr.bf16.mxu0 %v19871_v0 }
0x1242   :  { %18254 = vmatpush3.bf16.msra.mxu1 %v19874_v11 }
0x1243   :  { %18255 = vmatprep.subr.bf16.mxu1 %v19876_v8  ;;  %18234 = vmatpush3.bf16.msra.mxu0 %v19873_v9  ;;  %v19895_v8 = vld [vmem:[%s22460_s7 + $0x290] sm:$0xff]   ;;  %v19896_v9 = vld [vmem:[%s22460_s7 + $0x298] sm:$0xff]  }
0x1244   :  { %18235 = vmatprep.subr.bf16.mxu0 %v19875_v33  ;;  %v19898_v33 = vld [vmem:[%s22460_s7 + $0x2a8] sm:$0xff]  }
0x1246   :  { %18256 = vmatpush3.bf16.msra.mxu1 %v19878_v37  ;;  %v19897_v37 = vld [vmem:[%s22460_s7 + $0x2a0] sm:$0xff]  }
0x1247   :  { %v12756_v49 = vpop.xlane.xlu0 %12755  ;;  %18257 = vmatprep.subr.bf16.mxu1 %v19880_v55  ;;  %18236 = vmatpush3.bf16.msra.mxu0 %v19877_v61  ;;  %v19899_v55 = vld [vmem:[%s22460_s7 + $0x2b0] sm:$0xff]  }
0x1248   :  { %v18527_v60 = vtrunc.f32 %v12756_v49  ;;  %18237 = vmatprep.subr.bf16.mxu0 %v19879_v47 }
0x1249   :  { %v12775_v42 = vpop.xlane.xlu1 %12774 }
0x124a   :  { %v18529_v43 = vtrunc.f32 %v12775_v42  ;;  %v18528_v26 = vcvt.f32.s32 %v18527_v60  ;;  %18258 = vmatpush3.bf16.msra.mxu1 %v19882_v58 }
0x124b   :  { %18259 = vmatprep.subr.bf16.mxu1 %v19883_v24  ;;  %18238 = vmatpush3.bf16.msra.mxu0 %v19881_v19 }
0x124c   :  { %v18530_v59 = vcvt.f32.s32 %v18529_v43  ;;  %vm12758_vm6 = vcmp.eq.s32.totalorder %v20768_v2, %v18528_v26  ;;  %vm12759_vm7 = vcmp.eq.s32.totalorder %v20771_v3, %v18528_v26  ;;  %18385 = vmatprep.subr.bf16.mxu0 %v20439_v1 }
0x124d   :  { %vm20021_vm10 = vmpackc.low %vm12759_vm7, %vm12759_vm7 }
0x124e   :  { %vm12777_vm8 = vcmp.eq.s32.totalorder %v20768_v2, %v18530_v59  ;;  %vm12778_vm9 = vcmp.eq.s32.totalorder %v20771_v3, %v18530_v59  ;;  %18260 = vmatpush3.bf16.msra.mxu1 %v19884_v21  ;;  %20022 = vmatprep.mubr.msk.bf16.mxu0 %vm20021_vm10, %v20446_v35  ;;  %vm20025_vm12 = vmpackc.low %vm12758_vm6, %vm12758_vm6 }
0x124f   :  { %18405 = vmatprep.subr.bf16.mxu1 %v20439_v1  ;;  %vm20023_vm11 = vmpackc.low %vm12778_vm9, %vm12778_vm9  ;;  %20026 = vmatmul.mubr.msk.bf16.vlgmr.msra.gmra.mrb[60].mxu0 %vm20025_vm12, %v20446_v35 }
0x1250   :  { %20024 = vmatprep.mubr.msk.bf16.mxu1 %vm20023_vm11, %v20446_v35  ;;  %vm20027_vm13 = vmpackc.low %vm12777_vm8, %vm12777_vm8  ;;  %18401 = vmatprep.mubr.msk.bf16.mxu0 %vm20440_vm0, %v20439_v1 }
0x1251   :  { %20028 = vmatmul.mubr.msk.bf16.vlgmr.msra.gmra.mrb[60].mxu1 %vm20027_vm13, %v20446_v35  ;;  %v19885_v35 = vld [vmem:[#allocation10] sm:$0xff]  }
0x1252   :  { %18421 = vmatprep.mubr.msk.bf16.mxu1 %vm20440_vm0, %v20439_v1  ;;  %18386 = vmatpush3.bf16.msra.mxu0 %v19885_v35  ;;  %v19900_v35 = vld [vmem:[%s22460_s7 + $0x2b8] sm:$0xff]  }
0x1253   :  { %18387 = vmatprep.subr.bf16.mxu0 %v20439_v1  ;;  %18406 = vmatpush3.bf16.msra.mxu1 %v19893_v4 }
0x1254   :  { %18407 = vmatprep.subr.bf16.mxu1 %v20439_v1 }
0x1256   :  { %18388 = vmatpush3.bf16.msra.mxu0 %v19886_v63 }
0x1257   :  { %18389 = vmatprep.subr.bf16.mxu0 %v20439_v1  ;;  %18408 = vmatpush3.bf16.msra.mxu1 %v19894_v44 }
0x1258   :  { %18409 = vmatprep.subr.bf16.mxu1 %v20439_v1 }
0x125b   :  { %18410 = vmatpush3.bf16.msra.mxu1 %v19895_v8 }
0x125c   :  { %18411 = vmatprep.subr.bf16.mxu1 %v20439_v1 }
0x125f   :  { %18412 = vmatpush3.bf16.msra.mxu1 %v19896_v9 }
0x1260   :  { %18413 = vmatprep.subr.bf16.mxu1 %v20439_v1 }
0x1263   :  { %18414 = vmatpush3.bf16.msra.mxu1 %v19897_v37 }
0x1264   :  { %18415 = vmatprep.subr.bf16.mxu1 %v20439_v1 }
0x1267   :  { %18416 = vmatpush3.bf16.msra.mxu1 %v19898_v33 }
0x1268   :  { %18417 = vmatprep.subr.bf16.mxu1 %v20439_v1 }
0x126b   :  { %v18063_v2 = vpop.f32.mrb[44].mxu0  ;;  %18418 = vmatpush3.bf16.msra.mxu1 %v19899_v55 }
0x126c   :  { %v18064_v3 = vpop.f32.mrb[45].mxu0  ;;  %18419 = vmatprep.subr.bf16.mxu1 %v20439_v1 }
0x126d   :  { %v18065_v32 = vadd.f32 %v18064_v3, %v18063_v2  ;;  %v18066_v22 = vpop.f32.mrb[46].mxu0 }
0x126e   :  { %v18067_v34 = vpop.f32.mrb[47].mxu0  ;;  %v18085_v10 = vpop.f32.mrb[44].mxu1 }
0x126f   :  { %v15179_v46 = vadd.f32 %v18065_v32, %v22384_v53  ;;  %v18086_v7 = vpop.f32.mrb[45].mxu1  ;;  %v19887_v53 = vld [vmem:[#allocation10 + $0x10] sm:$0xff]   ;;  %18420 = vmatpush3.bf16.msra.mxu1 %v19900_v35 }
0x1270   :  { %v18087_v29 = vadd.f32 %v18086_v7, %v18085_v10  ;;  %v18088_v20 = vpop.f32.mrb[46].mxu1  ;;  %18390 = vmatpush3.bf16.msra.mxu0 %v19887_v53 }
0x1271   :  { %v18089_v40 = vpop.f32.mrb[47].mxu1  ;;  %18391 = vmatprep.subr.bf16.mxu0 %v20439_v1 }
0x1272   :  { %v15219_v16 = vadd.f32 %v18087_v29, %v15179_v46 }
0x1274   :  { %18392 = vmatpush3.bf16.msra.mxu0 %v19888_v48 }
0x1275   :  { %18393 = vmatprep.subr.bf16.mxu0 %v20439_v1 }
0x1278   :  { %18394 = vmatpush3.bf16.msra.mxu0 %v19889_v6 }
0x1279   :  { %18395 = vmatprep.subr.bf16.mxu0 %v20439_v1 }
0x127c   :  { %18396 = vmatpush3.bf16.msra.mxu0 %v19890_v12 }
0x127d   :  { %18397 = vmatprep.subr.bf16.mxu0 %v20439_v1 }
0x1280   :  { %18398 = vmatpush3.bf16.msra.mxu0 %v19891_v13 }
0x1281   :  { %18399 = vmatprep.subr.bf16.mxu0 %v20439_v1 }
0x1284   :  { %18400 = vmatpush3.bf16.msra.mxu0 %v19892_v14 }
0x128b   :  { %v18107_v52 = vpop.f32.mrb[48].mxu0 }
0x128c   :  { %v18108_v57 = vpop.f32.mrb[49].mxu0 }
0x128d   :  { %v18109_v51 = vadd.f32 %v18108_v57, %v18107_v52  ;;  %v18110_v28 = vpop.f32.mrb[50].mxu0  ;;  %v17416_v52 = vld [vmem:[#allocation11] ss:$0 sm:$0xff] }
0x128e   :  { %v18111_v38 = vpop.f32.mrb[51].mxu0 }
0x128f   :  { %v15259_v18 = vadd.f32 %v18109_v51, %v15219_v16  ;;  %v18129_v54 = vpop.f32.mrb[48].mxu1 }
0x1290   :  { %v18130_v30 = vpop.f32.mrb[49].mxu1 }
0x1291   :  { %v18131_v41 = vadd.f32 %v18130_v30, %v18129_v54  ;;  %v18132_v17 = vpop.f32.mrb[50].mxu1  ;;  %v17442_v54 = vld [vmem:[%s22461_s8 + $0xa] ss:$0 sm:$0xff] }
0x1292   :  { %v18133_v36 = vpop.f32.mrb[51].mxu1 }
0x1293   :  { %v15299_v62 = vadd.f32 %v18131_v41, %v15259_v18 }
0x12ab   :  { %v18151_v25 = vpop.f32.mrb[52].mxu0 }
0x12ac   :  { %v18152_v45 = vpop.f32.mrb[53].mxu0 }
0x12ad   :  { %v18153_v50 = vadd.f32 %v18152_v45, %v18151_v25  ;;  %v18154_v56 = vpop.f32.mrb[54].mxu0 }
0x12ae   :  { %v18155_v5 = vpop.f32.mrb[55].mxu0 }
0x12af   :  { %v18173_v23 = vpop.f32.mrb[52].mxu1  ;;  %v15339_v15 = vadd.f32 %v18153_v50, %v15299_v62 }
0x12b0   :  { %v18174_v27 = vpop.f32.mrb[53].mxu1 }
0x12b1   :  { %v18175_v31 = vadd.f32 %v18174_v27, %v18173_v23  ;;  %v18176_v39 = vpop.f32.mrb[54].mxu1 }
0x12b2   :  { %v18177_v11 = vpop.f32.mrb[55].mxu1 }
0x12b3   :  { %v15379_v0 = vadd.f32 %v18175_v31, %v15339_v15 }
0x1301   :  { %v18195_v61 = vpop.f32.mrb[56].mxu0 }
0x1302   :  { %v18196_v49 = vpop.f32.mrb[57].mxu0 }
0x1303   :  { %v18197_v47 = vadd.f32 %v18196_v49, %v18195_v61  ;;  %v18198_v24 = vpop.f32.mrb[58].mxu0 }
0x1304   :  { %v18217_v58 = vpop.f32.mrb[56].mxu1  ;;  %v18199_v26 = vpop.f32.mrb[59].mxu0 }
0x1305   :  { %v18218_v42 = vpop.f32.mrb[57].mxu1  ;;  %v15419_v19 = vadd.f32 %v18197_v47, %v15379_v0 }
0x1306   :  { %v18219_v60 = vadd.f32 %v18218_v42, %v18217_v58  ;;  %v18220_v43 = vpop.f32.mrb[58].mxu1 }
0x1307   :  { %v18221_v59 = vpop.f32.mrb[59].mxu1 }
0x1308   :  { %v15459_v21 = vadd.f32 %v18219_v60, %v15419_v19 }
0x1322   :  { %v18239_v2 = vpop.f32.mrb[60].mxu0 }
0x1323   :  { %v18240_v32 = vpop.f32.mrb[61].mxu0 }
0x1324   :  { %v18261_v3 = vpop.f32.mrb[60].mxu1  ;;  %v18241_v34 = vadd.f32 %v18240_v32, %v18239_v2  ;;  %v18242_v46 = vpop.f32.mrb[62].mxu0 }
0x1325   :  { %v18262_v22 = vpop.f32.mrb[61].mxu1  ;;  %v18243_v7 = vpop.f32.mrb[63].mxu0 }
0x1326   :  { %v18263_v10 = vadd.f32 %v18262_v22, %v18261_v3  ;;  %v18264_v1 = vpop.f32.mrb[62].mxu1  ;;  %v15499_v20 = vadd.f32 %v18241_v34, %v15459_v21 }
0x1327   :  { %v18265_v29 = vpop.f32.mrb[63].mxu1 }
0x1328   :  { %v15539_v40 = vadd.f32 %v18263_v10, %v15499_v20 }
0x132a   :  { %v15561_v16 = vpack.c.bf16 %v15539_v40, %v15539_v40 }
0x132c   :  { %18402 = vmatmul.mubr.bf16.vlgmr.msra.gmra.mrb[64].mxu0 %v15561_v16 }
0x13ff   :  { %v15650_v57 = vpop.f32.mrb[64].mxu0 }
0x1400   :  { %v15651_v63 = vadd.f32 %v17416_v52, %v15650_v57  ;;  %v18403_v51 = vpop.f32.mrb[65].mxu0 }
0x1401   :  { %v15653_v28 = vpop.f32.mrb[66].mxu0 }
0x1402   :  { %v15675_v38 = vpack.c.bf16 %v15651_v63, %v15651_v63  ;;  %v18404_v18 = vpop.f32.mrb[67].mxu0 }
0x1404   :  { %18422 = vmatmul.mubr.bf16.vlgmr.msra.gmra.mrb[64].mxu1 %v15675_v38 }
0x14d7   :  { %v15764_v30 = vpop.f32.mrb[64].mxu1 }
0x14d8   :  { %v15765_v53 = vadd.f32 %v17442_v54, %v15764_v30  ;;  %v18423_v41 = vpop.f32.mrb[65].mxu1 }
0x14d9   :  { %v15767_v17 = vpop.f32.mrb[66].mxu1 }
0x14da   :  { %15770 = vst [vmem:[%s22474_s21] sm:$0xff] %v15765_v53  ;;  %v18424_v36 = vpop.f32.mrb[67].mxu1 }
0x14db   :  { %15775 = vsyncpa [#allocation4], 1 }
0x14dc   :  { %15776 = vsyncpa [#allocation6], 1 }
0x14dd   :  { %15777 = vsyncpa [#allocation9], 1 }
0x14de   :  { %15778 = vsyncpa [#allocation12], 1 }
0x14df   :  { %15779 = vsyncpa [#allocation15], 1 }
0x14e0   :  { %15780 = vsyncpa [#allocation18], 1 }
0x14e1   :  { %15781 = vsyncpa [#allocation21], 1 }
0x14e2   :  { %15782 = vsyncpa [#allocation24], 1 }
0x14e3   :  { %15783 = vsyncpa [#allocation27], 1 }

</bundles_post_ra>
